<compile_context>
chip_gen: v5e
topology: v5e:2x2
jax: 0.10.0
libtpu: 0.0.40
codegen_flags: <defaults>
</compile_context>

<pallas_src>
import jax
import jax.numpy as jnp
from jax import lax
from jax.experimental import pallas as pl
from jax.experimental.pallas import tpu as pltpu

# ----------------------------- configuration ------------------------------ #
B = 2            # batch
D = 32           # embed dim (visual & text)
NH = 4           # attention heads
DH = D // NH     # head dim
L = 8            # text tokens
Q = 16           # object queries
FFN = 64         # FFN hidden dim (== 2*D, lets FFN w1 share a stack with KV)
SPATIAL = [8, 4, 2, 2]            # per-level H (=W) of the 4 visual features
S = sum(h * h for h in SPATIAL)   # total visual tokens (= 88)
MAX_POS = 32
MASK_NEG = -1e9                   # additive attention mask (avoid NaN softmax)
ATTN_SCALE = 1.0 / float(DH) ** 0.5
OUT_LANES = 128                   # packed output width (cls | bbox | pad)

assert FFN == 2 * D, "FFN w1 shares the [*,D,2D] stack with the KV projections"

# -------- stacked-parameter index maps (kept in sync with make_params) ----- #
# [13, D, D] square matrices
(W_TXT_PROJ, W_TXT_WO, W_I2T_WQ, W_I2T_WO, W_IMG_WO, W_DS_WO,
 W_DT_WQ, W_DT_WO, W_DI_WQ, W_DI_WO, W_REG0, W_REG1, W_REG2) = range(13)
# [3, D, 3D] fused QKV (self-attention blocks)
(A_TXT, A_IMG, A_DEC) = range(3)
# [6, D, 2D]: fused KV (cross-attn) 0..2, FFN w1 3..5
(K_I2T, K_DT, K_DI, K_FFN_TXT, K_FFN_IMG, K_FFN_DEC) = range(6)
# [3, FFN, D] FFN w2
(F_TXT, F_IMG, F_DEC) = range(3)
# [9, 2, D] LayerNorm (gamma; beta)
(L_TXT1, L_TXT2, L_I2T, L_IMG, L_IMG_FFN, L_DS, L_DT, L_DI, L_DEC_FFN) = range(9)
# [16, D] 32-wide biases
(B_TXT_PROJ, B_TXT_WO, B_I2T_WQ, B_I2T_WO, B_IMG_WO, B_DS_WO,
 B_DT_WQ, B_DT_WO, B_DI_WQ, B_DI_WO, B_FFN_TXT_B2, B_FFN_IMG_B2,
 B_FFN_DEC_B2, B_REG0, B_REG1, B_REG2) = range(16)


# ------------------------- in-kernel building blocks ----------------------- #
def _sigmoid(x):
    return 1.0 / (1.0 + jnp.exp(-x))


def _ln(x, gb):
    """LayerNorm over the last dim. gb: [2, D] packed (gamma; beta)."""
    mu = jnp.mean(x, axis=-1, keepdims=True)
    xc = x - mu
    var = jnp.mean(xc * xc, axis=-1, keepdims=True)
    return xc * lax.rsqrt(var + 1e-5) * gb[0:1, :] + gb[1:2, :]


def _softmax(s):
    m = jnp.max(s, axis=-1, keepdims=True)
    e = jnp.exp(s - m)
    return e * pl.reciprocal(jnp.sum(e, axis=-1, keepdims=True), approx=True)


def _mm(a, b):
    """bf16-operand / f32-accumulate matmul on the MXU."""
    return jnp.dot(a.astype(jnp.bfloat16), b.astype(jnp.bfloat16),
                   preferred_element_type=jnp.float32)


def _mm_t(a, b):
    """a @ b^T (contract last dims), bf16 operands, f32 accumulate."""
    return lax.dot_general(a.astype(jnp.bfloat16), b.astype(jnp.bfloat16),
                           (((1,), (1,)), ((), ())),
                           preferred_element_type=jnp.float32)


def _attend(q, k, v, wo, bo, bias):
    """Multi-head attention core for one batch element.

    q: [Nq, D], k/v: [Nk, D], wo: [D, D], bo: [1, D],
    bias: None or broadcastable to [Nq, Nk].
    The scale is folded into q once and the bias is pre-broadcast once
    (hoisted out of the head loop); the four per-head outputs are lane-
    concatenated into one [Nq, D] value and projected with a single matmul.
    """
    nq, nk = q.shape[0], k.shape[0]
    qb = (q * ATTN_SCALE).astype(jnp.bfloat16)
    kb = k.astype(jnp.bfloat16)
    vb = v.astype(jnp.bfloat16)
    bias_full = None if bias is None else jnp.broadcast_to(bias, (nq, nk))
    heads = []
    for h in range(NH):
        sl = slice(h * DH, (h + 1) * DH)
        s = lax.dot_general(qb[:, sl], kb[:, sl], (((1,), (1,)), ((), ())),
                            preferred_element_type=jnp.float32)            # [Nq, Nk]
        if bias_full is not None:
            s = s + bias_full
        prob = _softmax(s)
        heads.append(jnp.dot(prob.astype(jnp.bfloat16), vb[:, sl],
                             preferred_element_type=jnp.float32))          # [Nq, DH]
    o = jnp.concatenate(heads, axis=-1)                                    # [Nq, D]
    return _mm(o, wo) + bo


def _mha_self(x, wqkv, bqkv, wo, bo, bias):
    qkv = _mm(x, wqkv) + bqkv                                              # [N, 3D]
    return _attend(qkv[:, :D], qkv[:, D:2 * D], qkv[:, 2 * D:], wo, bo, bias)


def _mha_cross(xq, xkv, wq, bq, wkv, bkv, wo, bo, bias):
    q = _mm(xq, wq) + bq                                                   # [Nq, D]
    kv = _mm(xkv, wkv) + bkv                                               # [Nk, 2D]
    return _attend(q, kv[:, :D], kv[:, D:], wo, bo, bias)


def _ffn(x, w1, b1, w2, b2):
    h = jnp.maximum(_mm(x, w1) + b1, 0.0)
    return _mm(h, w2) + b2


# ------------------------------ fused kernel ------------------------------- #
def _gdino_fused_kernel(emb_pos, feat, bias_tt, tmask,
                        wqkv, wkv1, wdd, w2, lns, b96, b64, b32, qref,
                        out):
    # small parameter stacks loaded once as values (everything stays in VMEM/vregs)
    lnv = lns[...]
    b96v = b96[...]
    b64v = b64[...]
    b32v = b32[...]

    tm = tmask[0]                                           # [1, L] float mask
    tbias = jnp.where(tm > 0.5, 0.0, MASK_NEG)              # [1, L] additive bias

    # ---------------- text enhancer ----------------
    ep = emb_pos[0]                                         # [2, L, D]
    x = _mm(ep[0], wdd[W_TXT_PROJ]) + b32v[B_TXT_PROJ:B_TXT_PROJ + 1] + ep[1]
    attn = _mha_self(x, wqkv[A_TXT], b96v[A_TXT:A_TXT + 1],
                     wdd[W_TXT_WO], b32v[B_TXT_WO:B_TXT_WO + 1], bias_tt[0])
    x = _ln(x + attn, lnv[L_TXT1])
    x = _ln(x + _ffn(x, wkv1[K_FFN_TXT], b64v[K_FFN_TXT:K_FFN_TXT + 1],
                     w2[F_TXT], b32v[B_FFN_TXT_B2:B_FFN_TXT_B2 + 1]),
            lnv[L_TXT2])
    memory_text = x                                         # [L, D]

    # ---------------- encoder layer ----------------
    y = feat[0]                                             # [S, D]
    attn = _mha_cross(y, memory_text,
                      wdd[W_I2T_WQ], b32v[B_I2T_WQ:B_I2T_WQ + 1],
                      wkv1[K_I2T], b64v[K_I2T:K_I2T + 1],
                      wdd[W_I2T_WO], b32v[B_I2T_WO:B_I2T_WO + 1], tbias)
    y = _ln(y + attn, lnv[L_I2T])
    attn = _mha_self(y, wqkv[A_IMG], b96v[A_IMG:A_IMG + 1],
                     wdd[W_IMG_WO], b32v[B_IMG_WO:B_IMG_WO + 1], None)
    y = _ln(y + attn, lnv[L_IMG])
    y = _ln(y + _ffn(y, wkv1[K_FFN_IMG], b64v[K_FFN_IMG:K_FFN_IMG + 1],
                     w2[F_IMG], b32v[B_FFN_IMG_B2:B_FFN_IMG_B2 + 1]),
            lnv[L_IMG_FFN])
    memory = y                                              # [S, D]

    # ---------------- decoder layer + bbox head ----------------
    q0 = qref[0]                                            # [Q, D] query embeds
    attn = _mha_self(q0, wqkv[A_DEC], b96v[A_DEC:A_DEC + 1],
                     wdd[W_DS_WO], b32v[B_DS_WO:B_DS_WO + 1], None)
    z = _ln(q0 + attn, lnv[L_DS])
    attn = _mha_cross(z, memory_text,
                      wdd[W_DT_WQ], b32v[B_DT_WQ:B_DT_WQ + 1],
                      wkv1[K_DT], b64v[K_DT:K_DT + 1],
                      wdd[W_DT_WO], b32v[B_DT_WO:B_DT_WO + 1], tbias)
    z = _ln(z + attn, lnv[L_DT])
    # TODO(synk): real GroundingDINO uses multi-scale deformable attention here;
    #             replaced with dense cross-attention over the flattened memory.
    attn = _mha_cross(z, memory,
                      wdd[W_DI_WQ], b32v[B_DI_WQ:B_DI_WQ + 1],
                      wkv1[K_DI], b64v[K_DI:K_DI + 1],
                      wdd[W_DI_WO], b32v[B_DI_WO:B_DI_WO + 1], None)
    z = _ln(z + attn, lnv[L_DI])
    hidden = _ln(z + _ffn(z, wkv1[K_FFN_DEC], b64v[K_FFN_DEC:K_FFN_DEC + 1],
                          w2[F_DEC], b32v[B_FFN_DEC_B2:B_FFN_DEC_B2 + 1]),
                 lnv[L_DEC_FFN])

    # contrastive cls logits vs memory_text (masked_fill -> -inf, as in PyTorch)
    logits = _mm_t(hidden, memory_text)                     # [Q, L]
    cls = jnp.where(tm > 0.5, logits, float("-inf"))

    # 3-layer reg MLP + reference refinement (reg2 weight padded D->D, cols>=4 zero)
    h1 = jnp.maximum(_mm(hidden, wdd[W_REG0]) + b32v[B_REG0:B_REG0 + 1], 0.0)
    h2 = jnp.maximum(_mm(h1, wdd[W_REG1]) + b32v[B_REG1:B_REG1 + 1], 0.0)
    delta = _mm(h2, wdd[W_REG2]) + b32v[B_REG2:B_REG2 + 1]  # [Q, D]
    bbox = _sigmoid(delta[:, :4] + qref[1][:, :4])          # [Q, 4]

    # lane-dense packed output row: [Q, 128] = cls(L) | bbox(4) | zero pad
    pad = jnp.zeros((Q, OUT_LANES - L - 4), jnp.float32)
    out[0] = jnp.concatenate([cls, bbox, pad], axis=-1)


# ---------------------------- pallas_call wrapper --------------------------- #
def run_transformer(batched, shared, out_shape):
    """Single fused launch; grid over batch, batch axis marked parallel.

    `batched` arrays have leading dim B and are blocked (1, ...) per grid step;
    `shared` stacked-weight slabs are passed whole (same block index every step,
    so they are DMA'd once and stay resident in VMEM).
    """
    bsz = batched[0].shape[0]

    def bspec(a):
        nd = a.ndim
        return pl.BlockSpec((1,) + a.shape[1:],
                            lambda b, nd=nd: (b,) + (0,) * (nd - 1))

    def sspec(a):
        nd = a.ndim
        return pl.BlockSpec(a.shape, lambda b, nd=nd: (0,) * nd)

    in_specs = [bspec(a) for a in batched] + [sspec(a) for a in shared]
    out_specs = pl.BlockSpec((1,) + tuple(out_shape[1:]), lambda b: (b, 0, 0))
    return pl.pallas_call(
        _gdino_fused_kernel,
        out_shape=jax.ShapeDtypeStruct(tuple(out_shape), jnp.float32),
        grid=(bsz,),
        in_specs=in_specs,
        out_specs=out_specs,
        compiler_params=pltpu.CompilerParams(dimension_semantics=("parallel",)),
    )(*batched, *shared)


# ------------------------------- parameters -------------------------------- #
def inverse_sigmoid(x, eps=1e-5):
    x = jnp.clip(x, eps, 1.0 - eps)
    return jnp.log(x / (1.0 - x))


def make_params():
    """Synthetic deterministic parameters, pre-stacked into a few VMEM slabs."""
    pkey = jax.random.PRNGKey(1234)
    counter = [0]

    def p(shape, scale=0.02):
        counter[0] += 1
        return scale * jax.random.normal(jax.random.fold_in(pkey, counter[0]),
                                         shape, dtype=jnp.float32)

    def ln_pair():
        return jnp.concatenate([jnp.ones((1, D), jnp.float32),
                                jnp.zeros((1, D), jnp.float32)], axis=0)

    # fused QKV weights for the 3 self-attention blocks (txt, img, dec_self)
    wqkv = jnp.stack([p((D, 3 * D)) for _ in range(3)], axis=0)          # [3, D, 3D]
    b96 = jnp.zeros((3, 3 * D), jnp.float32)

    # fused KV (i2t, dec_text, dec_img) + FFN w1 (txt, img, dec)  -- same shape
    wkv1 = jnp.stack([p((D, 2 * D)) for _ in range(3)]
                     + [p((D, FFN)) for _ in range(3)], axis=0)          # [6, D, 2D]
    b64 = jnp.zeros((6, 2 * D), jnp.float32)

    # all square [D, D] matrices + reg2 [D,4] padded to [D,D]
    reg2_w = jnp.pad(p((D, 4)), ((0, 0), (0, D - 4)))
    wdd = jnp.stack([p((D, D)) for _ in range(12)] + [reg2_w], axis=0)   # [13, D, D]
    b32 = jnp.zeros((16, D), jnp.float32)

    w2 = jnp.stack([p((FFN, D)) for _ in range(3)], axis=0)              # [3, FFN, D]
    lns = jnp.stack([ln_pair() for _ in range(9)], axis=0)               # [9, 2, D]

    # per-token level embedding (precomputed), position table
    level_embed = p((4, D))
    lvl_tok = jnp.concatenate(
        [jnp.broadcast_to(level_embed[i], (h * h, D)) for i, h in enumerate(SPATIAL)],
        axis=0)                                                          # [S, D]
    pos_table = p((MAX_POS, D))

    # query embeddings + unsigmoided reference boxes (padded to D lanes)
    query_embed = p((Q, D))
    ref_logits = p((Q, 4), scale=1.0)
    ref_unsig = inverse_sigmoid(jax.nn.sigmoid(ref_logits))
    qref = jnp.stack([query_embed, jnp.pad(ref_unsig, ((0, 0), (0, D - 4)))],
                     axis=0)                                             # [2, Q, D]

    return dict(pos_table=pos_table, lvl_tok=lvl_tok,
                wqkv=wqkv, b96=b96, wkv1=wkv1, b64=b64,
                wdd=wdd, b32=b32, w2=w2, lns=lns, qref=qref)


# --------------------------------- forward --------------------------------- #
def forward(params, visual_feats, embedded, masks, position_ids, text_token_mask):
    p = params
    bsz = embedded.shape[0]

    # visual features: NCHW -> concat on spatial -> one transpose -> + level embed
    flat = jnp.concatenate([vf.reshape(bsz, D, -1) for vf in visual_feats], axis=2)
    feat = flat.transpose(0, 2, 1) + p["lvl_tok"][None]                  # [B, S, D]

    pos = jnp.take(p["pos_table"], position_ids, axis=0)                 # [B, L, D]
    emb_pos = jnp.stack([embedded, pos], axis=1)                         # [B, 2, L, D]
    bias_tt = jnp.where(masks, 0.0, MASK_NEG).astype(jnp.float32)        # [B, L, L]
    tmask_f = text_token_mask.astype(jnp.float32)[:, None, :]            # [B, 1, L]

    packed = run_transformer(
        batched=[emb_pos, feat, bias_tt, tmask_f],
        shared=[p["wqkv"], p["wkv1"], p["wdd"], p["w2"], p["lns"],
                p["b96"], p["b64"], p["b32"], p["qref"]],
        out_shape=(bsz, Q, OUT_LANES),
    )
    cls_last = packed[:, :, :L]                                          # [B, Q, L]
    bbox_last = packed[:, :, L:L + 4]                                    # [B, Q, 4]
    return cls_last, bbox_last


# ----------------------------------- main ----------------------------------- #
if __name__ == "__main__":
    key = jax.random.PRNGKey(0)
    ks = jax.random.split(key, 8)

    visual_feats = [
        jax.random.normal(ks[i], (B, D, s, s), dtype=jnp.float32)
        for i, s in enumerate(SPATIAL)
    ]
    embedded = jax.random.normal(ks[4], (B, L, D), dtype=jnp.float32)
    masks = (jax.random.uniform(ks[5], (B, L, L)) > 0.3) | jnp.eye(L, dtype=bool)[None]
    position_ids = jnp.broadcast_to(jnp.arange(L, dtype=jnp.int32)[None], (B, L))
    text_token_mask = jnp.arange(L)[None, :] < jnp.array([[L], [L - 2]])

    params = make_params()
    fwd = jax.jit(forward)
    cls_last, bbox_last = fwd(params, visual_feats, embedded, masks,
                              position_ids, text_token_mask)
    jax.block_until_ready((cls_last, bbox_last))

    assert cls_last.shape == (B, Q, L)
    assert bbox_last.shape == (B, Q, 4)
    # NOTE: cls_last intentionally contains -inf at masked text positions
    # (PyTorch masked_fill semantics); only the bbox path is asserted finite.
    # Invariant: text_token_mask always has >= 1 valid token per row.
    assert bool(jnp.all(jnp.isfinite(bbox_last)))
    print("KERNEL_OK")
</pallas_src>

<mosaic_0001>
module attributes {stable_mosaic.version = 11 : i64} {
  func.func @_gdino_fused_kernel(%arg0: i32, %arg1: memref<1x2x8x32xf32, #tpu.memory_space<vmem>>, %arg2: memref<1x88x32xf32, #tpu.memory_space<vmem>>, %arg3: memref<1x8x8xf32, #tpu.memory_space<vmem>>, %arg4: memref<1x1x8xf32, #tpu.memory_space<vmem>>, %arg5: memref<3x32x96xf32, #tpu.memory_space<vmem>>, %arg6: memref<6x32x64xf32, #tpu.memory_space<vmem>>, %arg7: memref<13x32x32xf32, #tpu.memory_space<vmem>>, %arg8: memref<3x64x32xf32, #tpu.memory_space<vmem>>, %arg9: memref<9x2x32xf32, #tpu.memory_space<vmem>>, %arg10: memref<3x96xf32, #tpu.memory_space<vmem>>, %arg11: memref<6x64xf32, #tpu.memory_space<vmem>>, %arg12: memref<16x32xf32, #tpu.memory_space<vmem>>, %arg13: memref<2x16x32xf32, #tpu.memory_space<vmem>>, %arg14: memref<1x16x128xf32, #tpu.memory_space<vmem>>) attributes {dimension_semantics = [#tpu.dimension_semantics<parallel>], iteration_bounds = array<i64: 2>, scalar_prefetch = 0 : i64, scratch_operands = 0 : i64, tpu.core_type = #tpu.core_type<tc>, window_params = [{transform_indices = @transform_0, window_bounds = array<i64: 1, 2, 8, 32>}, {transform_indices = @transform_1, window_bounds = array<i64: 1, 88, 32>}, {transform_indices = @transform_2, window_bounds = array<i64: 1, 8, 8>}, {transform_indices = @transform_3, window_bounds = array<i64: 1, 1, 8>}, {pipeline_mode = #tpu.pipeline_mode<synchronous>, transform_indices = @transform_4, window_bounds = array<i64: 3, 32, 96>}, {pipeline_mode = #tpu.pipeline_mode<synchronous>, transform_indices = @transform_5, window_bounds = array<i64: 6, 32, 64>}, {pipeline_mode = #tpu.pipeline_mode<synchronous>, transform_indices = @transform_6, window_bounds = array<i64: 13, 32, 32>}, {pipeline_mode = #tpu.pipeline_mode<synchronous>, transform_indices = @transform_7, window_bounds = array<i64: 3, 64, 32>}, {pipeline_mode = #tpu.pipeline_mode<synchronous>, transform_indices = @transform_8, window_bounds = array<i64: 9, 2, 32>}, {pipeline_mode = #tpu.pipeline_mode<synchronous>, transform_indices = @transform_9, window_bounds = array<i64: 3, 96>}, {pipeline_mode = #tpu.pipeline_mode<synchronous>, transform_indices = @transform_10, window_bounds = array<i64: 6, 64>}, {pipeline_mode = #tpu.pipeline_mode<synchronous>, transform_indices = @transform_11, window_bounds = array<i64: 16, 32>}, {pipeline_mode = #tpu.pipeline_mode<synchronous>, transform_indices = @transform_12, window_bounds = array<i64: 2, 16, 32>}, {transform_indices = @transform_13, window_bounds = array<i64: 1, 16, 128>}]} {
    %c0 = arith.constant 0 : index
    %c0_0 = arith.constant 0 : index
    %c0_1 = arith.constant 0 : index
    %0 = vector.load %arg9[%c0, %c0_0, %c0_1] : memref<9x2x32xf32, #tpu.memory_space<vmem>>, vector<9x2x32xf32>
    %c0_2 = arith.constant 0 : index
    %c0_3 = arith.constant 0 : index
    %1 = vector.load %arg10[%c0_2, %c0_3] : memref<3x96xf32, #tpu.memory_space<vmem>>, vector<3x96xf32>
    %c0_4 = arith.constant 0 : index
    %c0_5 = arith.constant 0 : index
    %2 = vector.load %arg11[%c0_4, %c0_5] : memref<6x64xf32, #tpu.memory_space<vmem>>, vector<6x64xf32>
    %c0_6 = arith.constant 0 : index
    %c0_7 = arith.constant 0 : index
    %3 = vector.load %arg12[%c0_6, %c0_7] : memref<16x32xf32, #tpu.memory_space<vmem>>, vector<16x32xf32>
    %c0_8 = arith.constant 0 : index
    %c0_9 = arith.constant 0 : index
    %c0_10 = arith.constant 0 : index
    %4 = vector.load %arg4[%c0_8, %c0_9, %c0_10] : memref<1x1x8xf32, #tpu.memory_space<vmem>>, vector<1x1x8xf32>
    %5 = vector.shape_cast %4 : vector<1x1x8xf32> to vector<1x8xf32>
    %cst = arith.constant 5.000000e-01 : f32
    %6 = vector.broadcast %cst : f32 to vector<1x8xf32>
    %7 = arith.cmpf ogt, %5, %6 : vector<1x8xf32>
    %cst_11 = arith.constant 0.000000e+00 : f32
    %cst_12 = arith.constant -1.000000e+09 : f32
    %8 = vector.broadcast %cst_11 : f32 to vector<1x8xf32>
    %9 = vector.broadcast %cst_12 : f32 to vector<1x8xf32>
    %10 = arith.select %7, %8, %9 : vector<1x8xi1>, vector<1x8xf32>
    %c0_13 = arith.constant 0 : index
    %c0_14 = arith.constant 0 : index
    %c0_15 = arith.constant 0 : index
    %c0_16 = arith.constant 0 : index
    %11 = vector.load %arg1[%c0_13, %c0_14, %c0_15, %c0_16] : memref<1x2x8x32xf32, #tpu.memory_space<vmem>>, vector<1x2x8x32xf32>
    %12 = vector.shape_cast %11 : vector<1x2x8x32xf32> to vector<2x8x32xf32>
    %13 = vector.extract_strided_slice %12 {offsets = [0, 0, 0], sizes = [1, 8, 32], strides = [1, 1, 1]} : vector<2x8x32xf32> to vector<1x8x32xf32>
    %14 = vector.shape_cast %13 : vector<1x8x32xf32> to vector<8x32xf32>
    %c0_17 = arith.constant 0 : index
    %c0_18 = arith.constant 0 : index
    %c0_19 = arith.constant 0 : index
    %15 = vector.load %arg7[%c0_17, %c0_18, %c0_19] : memref<13x32x32xf32, #tpu.memory_space<vmem>>, vector<1x32x32xf32>
    %16 = vector.shape_cast %15 : vector<1x32x32xf32> to vector<32x32xf32>
    %17 = arith.truncf %14 : vector<8x32xf32> to vector<8x32xbf16>
    %18 = arith.truncf %16 : vector<32x32xf32> to vector<32x32xbf16>
    %cst_20 = arith.constant dense<0.000000e+00> : vector<8x32xf32>
    %19 = tpu.matmul %17, %18, %cst_20 {dimension_numbers = #tpu.dot_dimension_numbers<[1], [0], [0], [1], [0, 0, 1, 1], [], []>} : vector<8x32xbf16>, vector<32x32xbf16>, vector<8x32xf32> -> vector<8x32xf32>
    %20 = vector.extract_strided_slice %3 {offsets = [0, 0], sizes = [1, 32], strides = [1, 1]} : vector<16x32xf32> to vector<1x32xf32>
    %21 = vector.broadcast %20 : vector<1x32xf32> to vector<8x32xf32>
    %22 = arith.addf %19, %21 : vector<8x32xf32>
    %23 = vector.extract_strided_slice %12 {offsets = [1, 0, 0], sizes = [1, 8, 32], strides = [1, 1, 1]} : vector<2x8x32xf32> to vector<1x8x32xf32>
    %24 = vector.shape_cast %23 : vector<1x8x32xf32> to vector<8x32xf32>
    %25 = arith.addf %22, %24 : vector<8x32xf32>
    %c0_21 = arith.constant 0 : index
    %c0_22 = arith.constant 0 : index
    %c0_23 = arith.constant 0 : index
    %26 = vector.load %arg5[%c0_21, %c0_22, %c0_23] : memref<3x32x96xf32, #tpu.memory_space<vmem>>, vector<1x32x96xf32>
    %27 = vector.shape_cast %26 : vector<1x32x96xf32> to vector<32x96xf32>
    %28 = vector.extract_strided_slice %1 {offsets = [0, 0], sizes = [1, 96], strides = [1, 1]} : vector<3x96xf32> to vector<1x96xf32>
    %c1 = arith.constant 1 : index
    %c0_24 = arith.constant 0 : index
    %c0_25 = arith.constant 0 : index
    %29 = vector.load %arg7[%c1, %c0_24, %c0_25] : memref<13x32x32xf32, #tpu.memory_space<vmem>>, vector<1x32x32xf32>
    %30 = vector.shape_cast %29 : vector<1x32x32xf32> to vector<32x32xf32>
    %31 = vector.extract_strided_slice %3 {offsets = [1, 0], sizes = [1, 32], strides = [1, 1]} : vector<16x32xf32> to vector<1x32xf32>
    %c0_26 = arith.constant 0 : index
    %c0_27 = arith.constant 0 : index
    %c0_28 = arith.constant 0 : index
    %32 = vector.load %arg3[%c0_26, %c0_27, %c0_28] : memref<1x8x8xf32, #tpu.memory_space<vmem>>, vector<1x8x8xf32>
    %33 = vector.shape_cast %32 : vector<1x8x8xf32> to vector<8x8xf32>
    %34 = arith.truncf %25 : vector<8x32xf32> to vector<8x32xbf16>
    %35 = arith.truncf %27 : vector<32x96xf32> to vector<32x96xbf16>
    %cst_29 = arith.constant dense<0.000000e+00> : vector<8x96xf32>
    %36 = tpu.matmul %34, %35, %cst_29 {dimension_numbers = #tpu.dot_dimension_numbers<[1], [0], [0], [1], [0, 0, 1, 1], [], []>} : vector<8x32xbf16>, vector<32x96xbf16>, vector<8x96xf32> -> vector<8x96xf32>
    %37 = vector.broadcast %28 : vector<1x96xf32> to vector<8x96xf32>
    %38 = arith.addf %36, %37 : vector<8x96xf32>
    %39 = vector.extract_strided_slice %38 {offsets = [0, 0], sizes = [8, 32], strides = [1, 1]} : vector<8x96xf32> to vector<8x32xf32>
    %40 = vector.extract_strided_slice %38 {offsets = [0, 32], sizes = [8, 32], strides = [1, 1]} : vector<8x96xf32> to vector<8x32xf32>
    %41 = vector.extract_strided_slice %38 {offsets = [0, 64], sizes = [8, 32], strides = [1, 1]} : vector<8x96xf32> to vector<8x32xf32>
    %cst_30 = arith.constant 0.353553385 : f32
    %42 = vector.broadcast %cst_30 : f32 to vector<8x32xf32>
    %43 = arith.mulf %39, %42 : vector<8x32xf32>
    %44 = arith.truncf %43 : vector<8x32xf32> to vector<8x32xbf16>
    %45 = arith.truncf %40 : vector<8x32xf32> to vector<8x32xbf16>
    %46 = arith.truncf %41 : vector<8x32xf32> to vector<8x32xbf16>
    %47 = vector.extract_strided_slice %44 {offsets = [0, 0], sizes = [8, 8], strides = [1, 1]} : vector<8x32xbf16> to vector<8x8xbf16>
    %48 = vector.extract_strided_slice %45 {offsets = [0, 0], sizes = [8, 8], strides = [1, 1]} : vector<8x32xbf16> to vector<8x8xbf16>
    %cst_31 = arith.constant dense<0.000000e+00> : vector<8x8xf32>
    %49 = tpu.matmul %47, %48, %cst_31 {dimension_numbers = #tpu.dot_dimension_numbers<[1], [1], [0], [0], [0, 0, 1, 0], [], []>} : vector<8x8xbf16>, vector<8x8xbf16>, vector<8x8xf32> -> vector<8x8xf32>
    %50 = arith.addf %49, %33 : vector<8x8xf32>
    %cst_32 = arith.constant dense<0xFF800000> : vector<8xf32>
    %51 = vector.multi_reduction <maximumf>, %50, %cst_32 [1] : vector<8x8xf32> to vector<8xf32>
    %52 = vector.shape_cast %51 : vector<8xf32> to vector<8x1xf32>
    %53 = vector.broadcast %52 : vector<8x1xf32> to vector<8x8xf32>
    %54 = arith.subf %50, %53 : vector<8x8xf32>
    %55 = math.exp %54 : vector<8x8xf32>
    %cst_33 = arith.constant dense<0.000000e+00> : vector<8xf32>
    %56 = vector.multi_reduction <add>, %55, %cst_33 [1] : vector<8x8xf32> to vector<8xf32>
    %57 = vector.shape_cast %56 : vector<8xf32> to vector<8x1xf32>
    %58 = tpu.reciprocal %57 {approx = true} : vector<8x1xf32> -> vector<8x1xf32>
    %59 = vector.broadcast %58 : vector<8x1xf32> to vector<8x8xf32>
    %60 = arith.mulf %55, %59 : vector<8x8xf32>
    %61 = arith.truncf %60 : vector<8x8xf32> to vector<8x8xbf16>
    %62 = vector.extract_strided_slice %46 {offsets = [0, 0], sizes = [8, 8], strides = [1, 1]} : vector<8x32xbf16> to vector<8x8xbf16>
    %cst_34 = arith.constant dense<0.000000e+00> : vector<8x8xf32>
    %63 = tpu.matmul %61, %62, %cst_34 {dimension_numbers = #tpu.dot_dimension_numbers<[1], [0], [0], [1], [0, 0, 1, 1], [], []>} : vector<8x8xbf16>, vector<8x8xbf16>, vector<8x8xf32> -> vector<8x8xf32>
    %64 = vector.extract_strided_slice %44 {offsets = [0, 8], sizes = [8, 8], strides = [1, 1]} : vector<8x32xbf16> to vector<8x8xbf16>
    %65 = vector.extract_strided_slice %45 {offsets = [0, 8], sizes = [8, 8], strides = [1, 1]} : vector<8x32xbf16> to vector<8x8xbf16>
    %cst_35 = arith.constant dense<0.000000e+00> : vector<8x8xf32>
    %66 = tpu.matmul %64, %65, %cst_35 {dimension_numbers = #tpu.dot_dimension_numbers<[1], [1], [0], [0], [0, 0, 1, 0], [], []>} : vector<8x8xbf16>, vector<8x8xbf16>, vector<8x8xf32> -> vector<8x8xf32>
    %67 = arith.addf %66, %33 : vector<8x8xf32>
    %cst_36 = arith.constant dense<0xFF800000> : vector<8xf32>
    %68 = vector.multi_reduction <maximumf>, %67, %cst_36 [1] : vector<8x8xf32> to vector<8xf32>
    %69 = vector.shape_cast %68 : vector<8xf32> to vector<8x1xf32>
    %70 = vector.broadcast %69 : vector<8x1xf32> to vector<8x8xf32>
    %71 = arith.subf %67, %70 : vector<8x8xf32>
    %72 = math.exp %71 : vector<8x8xf32>
    %cst_37 = arith.constant dense<0.000000e+00> : vector<8xf32>
    %73 = vector.multi_reduction <add>, %72, %cst_37 [1] : vector<8x8xf32> to vector<8xf32>
    %74 = vector.shape_cast %73 : vector<8xf32> to vector<8x1xf32>
    %75 = tpu.reciprocal %74 {approx = true} : vector<8x1xf32> -> vector<8x1xf32>
    %76 = vector.broadcast %75 : vector<8x1xf32> to vector<8x8xf32>
    %77 = arith.mulf %72, %76 : vector<8x8xf32>
    %78 = arith.truncf %77 : vector<8x8xf32> to vector<8x8xbf16>
    %79 = vector.extract_strided_slice %46 {offsets = [0, 8], sizes = [8, 8], strides = [1, 1]} : vector<8x32xbf16> to vector<8x8xbf16>
    %cst_38 = arith.constant dense<0.000000e+00> : vector<8x8xf32>
    %80 = tpu.matmul %78, %79, %cst_38 {dimension_numbers = #tpu.dot_dimension_numbers<[1], [0], [0], [1], [0, 0, 1, 1], [], []>} : vector<8x8xbf16>, vector<8x8xbf16>, vector<8x8xf32> -> vector<8x8xf32>
    %81 = vector.extract_strided_slice %44 {offsets = [0, 16], sizes = [8, 8], strides = [1, 1]} : vector<8x32xbf16> to vector<8x8xbf16>
    %82 = vector.extract_strided_slice %45 {offsets = [0, 16], sizes = [8, 8], strides = [1, 1]} : vector<8x32xbf16> to vector<8x8xbf16>
    %cst_39 = arith.constant dense<0.000000e+00> : vector<8x8xf32>
    %83 = tpu.matmul %81, %82, %cst_39 {dimension_numbers = #tpu.dot_dimension_numbers<[1], [1], [0], [0], [0, 0, 1, 0], [], []>} : vector<8x8xbf16>, vector<8x8xbf16>, vector<8x8xf32> -> vector<8x8xf32>
    %84 = arith.addf %83, %33 : vector<8x8xf32>
    %cst_40 = arith.constant dense<0xFF800000> : vector<8xf32>
    %85 = vector.multi_reduction <maximumf>, %84, %cst_40 [1] : vector<8x8xf32> to vector<8xf32>
    %86 = vector.shape_cast %85 : vector<8xf32> to vector<8x1xf32>
    %87 = vector.broadcast %86 : vector<8x1xf32> to vector<8x8xf32>
    %88 = arith.subf %84, %87 : vector<8x8xf32>
    %89 = math.exp %88 : vector<8x8xf32>
    %cst_41 = arith.constant dense<0.000000e+00> : vector<8xf32>
    %90 = vector.multi_reduction <add>, %89, %cst_41 [1] : vector<8x8xf32> to vector<8xf32>
    %91 = vector.shape_cast %90 : vector<8xf32> to vector<8x1xf32>
    %92 = tpu.reciprocal %91 {approx = true} : vector<8x1xf32> -> vector<8x1xf32>
    %93 = vector.broadcast %92 : vector<8x1xf32> to vector<8x8xf32>
    %94 = arith.mulf %89, %93 : vector<8x8xf32>
    %95 = arith.truncf %94 : vector<8x8xf32> to vector<8x8xbf16>
    %96 = vector.extract_strided_slice %46 {offsets = [0, 16], sizes = [8, 8], strides = [1, 1]} : vector<8x32xbf16> to vector<8x8xbf16>
    %cst_42 = arith.constant dense<0.000000e+00> : vector<8x8xf32>
    %97 = tpu.matmul %95, %96, %cst_42 {dimension_numbers = #tpu.dot_dimension_numbers<[1], [0], [0], [1], [0, 0, 1, 1], [], []>} : vector<8x8xbf16>, vector<8x8xbf16>, vector<8x8xf32> -> vector<8x8xf32>
    %98 = vector.extract_strided_slice %44 {offsets = [0, 24], sizes = [8, 8], strides = [1, 1]} : vector<8x32xbf16> to vector<8x8xbf16>
    %99 = vector.extract_strided_slice %45 {offsets = [0, 24], sizes = [8, 8], strides = [1, 1]} : vector<8x32xbf16> to vector<8x8xbf16>
    %cst_43 = arith.constant dense<0.000000e+00> : vector<8x8xf32>
    %100 = tpu.matmul %98, %99, %cst_43 {dimension_numbers = #tpu.dot_dimension_numbers<[1], [1], [0], [0], [0, 0, 1, 0], [], []>} : vector<8x8xbf16>, vector<8x8xbf16>, vector<8x8xf32> -> vector<8x8xf32>
    %101 = arith.addf %100, %33 : vector<8x8xf32>
    %cst_44 = arith.constant dense<0xFF800000> : vector<8xf32>
    %102 = vector.multi_reduction <maximumf>, %101, %cst_44 [1] : vector<8x8xf32> to vector<8xf32>
    %103 = vector.shape_cast %102 : vector<8xf32> to vector<8x1xf32>
    %104 = vector.broadcast %103 : vector<8x1xf32> to vector<8x8xf32>
    %105 = arith.subf %101, %104 : vector<8x8xf32>
    %106 = math.exp %105 : vector<8x8xf32>
    %cst_45 = arith.constant dense<0.000000e+00> : vector<8xf32>
    %107 = vector.multi_reduction <add>, %106, %cst_45 [1] : vector<8x8xf32> to vector<8xf32>
    %108 = vector.shape_cast %107 : vector<8xf32> to vector<8x1xf32>
    %109 = tpu.reciprocal %108 {approx = true} : vector<8x1xf32> -> vector<8x1xf32>
    %110 = vector.broadcast %109 : vector<8x1xf32> to vector<8x8xf32>
    %111 = arith.mulf %106, %110 : vector<8x8xf32>
    %112 = arith.truncf %111 : vector<8x8xf32> to vector<8x8xbf16>
    %113 = vector.extract_strided_slice %46 {offsets = [0, 24], sizes = [8, 8], strides = [1, 1]} : vector<8x32xbf16> to vector<8x8xbf16>
    %cst_46 = arith.constant dense<0.000000e+00> : vector<8x8xf32>
    %114 = tpu.matmul %112, %113, %cst_46 {dimension_numbers = #tpu.dot_dimension_numbers<[1], [0], [0], [1], [0, 0, 1, 1], [], []>} : vector<8x8xbf16>, vector<8x8xbf16>, vector<8x8xf32> -> vector<8x8xf32>
    %115 = tpu.concatenate %63, %80, %97, %114 in 1 : vector<8x8xf32>, vector<8x8xf32>, vector<8x8xf32>, vector<8x8xf32> -> vector<8x32xf32>
    %116 = arith.truncf %115 : vector<8x32xf32> to vector<8x32xbf16>
    %117 = arith.truncf %30 : vector<32x32xf32> to vector<32x32xbf16>
    %cst_47 = arith.constant dense<0.000000e+00> : vector<8x32xf32>
    %118 = tpu.matmul %116, %117, %cst_47 {dimension_numbers = #tpu.dot_dimension_numbers<[1], [0], [0], [1], [0, 0, 1, 1], [], []>} : vector<8x32xbf16>, vector<32x32xbf16>, vector<8x32xf32> -> vector<8x32xf32>
    %119 = vector.broadcast %31 : vector<1x32xf32> to vector<8x32xf32>
    %120 = arith.addf %118, %119 : vector<8x32xf32>
    %121 = arith.addf %25, %120 : vector<8x32xf32>
    %122 = vector.extract_strided_slice %0 {offsets = [0, 0, 0], sizes = [1, 2, 32], strides = [1, 1, 1]} : vector<9x2x32xf32> to vector<1x2x32xf32>
    %123 = vector.shape_cast %122 : vector<1x2x32xf32> to vector<2x32xf32>
    %cst_48 = arith.constant dense<0.000000e+00> : vector<8xf32>
    %124 = vector.multi_reduction <add>, %121, %cst_48 [1] : vector<8x32xf32> to vector<8xf32>
    %125 = vector.shape_cast %124 : vector<8xf32> to vector<8x1xf32>
    %cst_49 = arith.constant 3.200000e+01 : f32
    %126 = vector.broadcast %cst_49 : f32 to vector<8x1xf32>
    %127 = arith.divf %125, %126 : vector<8x1xf32>
    %128 = vector.broadcast %127 : vector<8x1xf32> to vector<8x32xf32>
    %129 = arith.subf %121, %128 : vector<8x32xf32>
    %130 = arith.mulf %129, %129 : vector<8x32xf32>
    %cst_50 = arith.constant dense<0.000000e+00> : vector<8xf32>
    %131 = vector.multi_reduction <add>, %130, %cst_50 [1] : vector<8x32xf32> to vector<8xf32>
    %132 = vector.shape_cast %131 : vector<8xf32> to vector<8x1xf32>
    %cst_51 = arith.constant 3.200000e+01 : f32
    %133 = vector.broadcast %cst_51 : f32 to vector<8x1xf32>
    %134 = arith.divf %132, %133 : vector<8x1xf32>
    %cst_52 = arith.constant 9.99999974E-6 : f32
    %135 = vector.broadcast %cst_52 : f32 to vector<8x1xf32>
    %136 = arith.addf %134, %135 : vector<8x1xf32>
    %137 = math.rsqrt %136 : vector<8x1xf32>
    %138 = vector.broadcast %137 : vector<8x1xf32> to vector<8x32xf32>
    %139 = arith.mulf %129, %138 : vector<8x32xf32>
    %140 = vector.extract_strided_slice %123 {offsets = [0, 0], sizes = [1, 32], strides = [1, 1]} : vector<2x32xf32> to vector<1x32xf32>
    %141 = vector.broadcast %140 : vector<1x32xf32> to vector<8x32xf32>
    %142 = arith.mulf %139, %141 : vector<8x32xf32>
    %143 = vector.extract_strided_slice %123 {offsets = [1, 0], sizes = [1, 32], strides = [1, 1]} : vector<2x32xf32> to vector<1x32xf32>
    %144 = vector.broadcast %143 : vector<1x32xf32> to vector<8x32xf32>
    %145 = arith.addf %142, %144 : vector<8x32xf32>
    %c3 = arith.constant 3 : index
    %c0_53 = arith.constant 0 : index
    %c0_54 = arith.constant 0 : index
    %146 = vector.load %arg6[%c3, %c0_53, %c0_54] : memref<6x32x64xf32, #tpu.memory_space<vmem>>, vector<1x32x64xf32>
    %147 = vector.shape_cast %146 : vector<1x32x64xf32> to vector<32x64xf32>
    %148 = vector.extract_strided_slice %2 {offsets = [3, 0], sizes = [1, 64], strides = [1, 1]} : vector<6x64xf32> to vector<1x64xf32>
    %c0_55 = arith.constant 0 : index
    %c0_56 = arith.constant 0 : index
    %c0_57 = arith.constant 0 : index
    %149 = vector.load %arg8[%c0_55, %c0_56, %c0_57] : memref<3x64x32xf32, #tpu.memory_space<vmem>>, vector<1x64x32xf32>
    %150 = vector.shape_cast %149 : vector<1x64x32xf32> to vector<64x32xf32>
    %151 = vector.extract_strided_slice %3 {offsets = [10, 0], sizes = [1, 32], strides = [1, 1]} : vector<16x32xf32> to vector<1x32xf32>
    %152 = arith.truncf %145 : vector<8x32xf32> to vector<8x32xbf16>
    %153 = arith.truncf %147 : vector<32x64xf32> to vector<32x64xbf16>
    %cst_58 = arith.constant dense<0.000000e+00> : vector<8x64xf32>
    %154 = tpu.matmul %152, %153, %cst_58 {dimension_numbers = #tpu.dot_dimension_numbers<[1], [0], [0], [1], [0, 0, 1, 1], [], []>} : vector<8x32xbf16>, vector<32x64xbf16>, vector<8x64xf32> -> vector<8x64xf32>
    %155 = vector.broadcast %148 : vector<1x64xf32> to vector<8x64xf32>
    %156 = arith.addf %154, %155 : vector<8x64xf32>
    %cst_59 = arith.constant 0.000000e+00 : f32
    %157 = vector.broadcast %cst_59 : f32 to vector<8x64xf32>
    %158 = arith.maximumf %156, %157 : vector<8x64xf32>
    %159 = arith.truncf %158 : vector<8x64xf32> to vector<8x64xbf16>
    %160 = arith.truncf %150 : vector<64x32xf32> to vector<64x32xbf16>
    %cst_60 = arith.constant dense<0.000000e+00> : vector<8x32xf32>
    %161 = tpu.matmul %159, %160, %cst_60 {dimension_numbers = #tpu.dot_dimension_numbers<[1], [0], [0], [1], [0, 0, 1, 1], [], []>} : vector<8x64xbf16>, vector<64x32xbf16>, vector<8x32xf32> -> vector<8x32xf32>
    %162 = vector.broadcast %151 : vector<1x32xf32> to vector<8x32xf32>
    %163 = arith.addf %161, %162 : vector<8x32xf32>
    %164 = arith.addf %145, %163 : vector<8x32xf32>
    %165 = vector.extract_strided_slice %0 {offsets = [1, 0, 0], sizes = [1, 2, 32], strides = [1, 1, 1]} : vector<9x2x32xf32> to vector<1x2x32xf32>
    %166 = vector.shape_cast %165 : vector<1x2x32xf32> to vector<2x32xf32>
    %cst_61 = arith.constant dense<0.000000e+00> : vector<8xf32>
    %167 = vector.multi_reduction <add>, %164, %cst_61 [1] : vector<8x32xf32> to vector<8xf32>
    %168 = vector.shape_cast %167 : vector<8xf32> to vector<8x1xf32>
    %cst_62 = arith.constant 3.200000e+01 : f32
    %169 = vector.broadcast %cst_62 : f32 to vector<8x1xf32>
    %170 = arith.divf %168, %169 : vector<8x1xf32>
    %171 = vector.broadcast %170 : vector<8x1xf32> to vector<8x32xf32>
    %172 = arith.subf %164, %171 : vector<8x32xf32>
    %173 = arith.mulf %172, %172 : vector<8x32xf32>
    %cst_63 = arith.constant dense<0.000000e+00> : vector<8xf32>
    %174 = vector.multi_reduction <add>, %173, %cst_63 [1] : vector<8x32xf32> to vector<8xf32>
    %175 = vector.shape_cast %174 : vector<8xf32> to vector<8x1xf32>
    %cst_64 = arith.constant 3.200000e+01 : f32
    %176 = vector.broadcast %cst_64 : f32 to vector<8x1xf32>
    %177 = arith.divf %175, %176 : vector<8x1xf32>
    %cst_65 = arith.constant 9.99999974E-6 : f32
    %178 = vector.broadcast %cst_65 : f32 to vector<8x1xf32>
    %179 = arith.addf %177, %178 : vector<8x1xf32>
    %180 = math.rsqrt %179 : vector<8x1xf32>
    %181 = vector.broadcast %180 : vector<8x1xf32> to vector<8x32xf32>
    %182 = arith.mulf %172, %181 : vector<8x32xf32>
    %183 = vector.extract_strided_slice %166 {offsets = [0, 0], sizes = [1, 32], strides = [1, 1]} : vector<2x32xf32> to vector<1x32xf32>
    %184 = vector.broadcast %183 : vector<1x32xf32> to vector<8x32xf32>
    %185 = arith.mulf %182, %184 : vector<8x32xf32>
    %186 = vector.extract_strided_slice %166 {offsets = [1, 0], sizes = [1, 32], strides = [1, 1]} : vector<2x32xf32> to vector<1x32xf32>
    %187 = vector.broadcast %186 : vector<1x32xf32> to vector<8x32xf32>
    %188 = arith.addf %185, %187 : vector<8x32xf32>
    %c0_66 = arith.constant 0 : index
    %c0_67 = arith.constant 0 : index
    %c0_68 = arith.constant 0 : index
    %189 = vector.load %arg2[%c0_66, %c0_67, %c0_68] : memref<1x88x32xf32, #tpu.memory_space<vmem>>, vector<1x88x32xf32>
    %190 = vector.shape_cast %189 : vector<1x88x32xf32> to vector<88x32xf32>
    %c2 = arith.constant 2 : index
    %c0_69 = arith.constant 0 : index
    %c0_70 = arith.constant 0 : index
    %191 = vector.load %arg7[%c2, %c0_69, %c0_70] : memref<13x32x32xf32, #tpu.memory_space<vmem>>, vector<1x32x32xf32>
    %192 = vector.shape_cast %191 : vector<1x32x32xf32> to vector<32x32xf32>
    %193 = vector.extract_strided_slice %3 {offsets = [2, 0], sizes = [1, 32], strides = [1, 1]} : vector<16x32xf32> to vector<1x32xf32>
    %c0_71 = arith.constant 0 : index
    %c0_72 = arith.constant 0 : index
    %c0_73 = arith.constant 0 : index
    %194 = vector.load %arg6[%c0_71, %c0_72, %c0_73] : memref<6x32x64xf32, #tpu.memory_space<vmem>>, vector<1x32x64xf32>
    %195 = vector.shape_cast %194 : vector<1x32x64xf32> to vector<32x64xf32>
    %196 = vector.extract_strided_slice %2 {offsets = [0, 0], sizes = [1, 64], strides = [1, 1]} : vector<6x64xf32> to vector<1x64xf32>
    %c3_74 = arith.constant 3 : index
    %c0_75 = arith.constant 0 : index
    %c0_76 = arith.constant 0 : index
    %197 = vector.load %arg7[%c3_74, %c0_75, %c0_76] : memref<13x32x32xf32, #tpu.memory_space<vmem>>, vector<1x32x32xf32>
    %198 = vector.shape_cast %197 : vector<1x32x32xf32> to vector<32x32xf32>
    %199 = vector.extract_strided_slice %3 {offsets = [3, 0], sizes = [1, 32], strides = [1, 1]} : vector<16x32xf32> to vector<1x32xf32>
    %200 = arith.truncf %190 : vector<88x32xf32> to vector<88x32xbf16>
    %201 = arith.truncf %192 : vector<32x32xf32> to vector<32x32xbf16>
    %cst_77 = arith.constant dense<0.000000e+00> : vector<88x32xf32>
    %202 = tpu.matmul %200, %201, %cst_77 {dimension_numbers = #tpu.dot_dimension_numbers<[1], [0], [0], [1], [0, 0, 1, 1], [], []>} : vector<88x32xbf16>, vector<32x32xbf16>, vector<88x32xf32> -> vector<88x32xf32>
    %203 = vector.broadcast %193 : vector<1x32xf32> to vector<88x32xf32>
    %204 = arith.addf %202, %203 : vector<88x32xf32>
    %205 = arith.truncf %188 : vector<8x32xf32> to vector<8x32xbf16>
    %206 = arith.truncf %195 : vector<32x64xf32> to vector<32x64xbf16>
    %cst_78 = arith.constant dense<0.000000e+00> : vector<8x64xf32>
    %207 = tpu.matmul %205, %206, %cst_78 {dimension_numbers = #tpu.dot_dimension_numbers<[1], [0], [0], [1], [0, 0, 1, 1], [], []>} : vector<8x32xbf16>, vector<32x64xbf16>, vector<8x64xf32> -> vector<8x64xf32>
    %208 = vector.broadcast %196 : vector<1x64xf32> to vector<8x64xf32>
    %209 = arith.addf %207, %208 : vector<8x64xf32>
    %210 = vector.extract_strided_slice %209 {offsets = [0, 0], sizes = [8, 32], strides = [1, 1]} : vector<8x64xf32> to vector<8x32xf32>
    %211 = vector.extract_strided_slice %209 {offsets = [0, 32], sizes = [8, 32], strides = [1, 1]} : vector<8x64xf32> to vector<8x32xf32>
    %cst_79 = arith.constant 0.353553385 : f32
    %212 = vector.broadcast %cst_79 : f32 to vector<88x32xf32>
    %213 = arith.mulf %204, %212 : vector<88x32xf32>
    %214 = arith.truncf %213 : vector<88x32xf32> to vector<88x32xbf16>
    %215 = arith.truncf %210 : vector<8x32xf32> to vector<8x32xbf16>
    %216 = arith.truncf %211 : vector<8x32xf32> to vector<8x32xbf16>
    %217 = vector.shape_cast %10 : vector<1x8xf32> to vector<1x8xf32>
    %218 = vector.broadcast %217 : vector<1x8xf32> to vector<88x8xf32>
    %219 = vector.extract_strided_slice %214 {offsets = [0, 0], sizes = [88, 8], strides = [1, 1]} : vector<88x32xbf16> to vector<88x8xbf16>
    %220 = vector.extract_strided_slice %215 {offsets = [0, 0], sizes = [8, 8], strides = [1, 1]} : vector<8x32xbf16> to vector<8x8xbf16>
    %cst_80 = arith.constant dense<0.000000e+00> : vector<88x8xf32>
    %221 = tpu.matmul %219, %220, %cst_80 {dimension_numbers = #tpu.dot_dimension_numbers<[1], [1], [0], [0], [0, 0, 1, 0], [], []>} : vector<88x8xbf16>, vector<8x8xbf16>, vector<88x8xf32> -> vector<88x8xf32>
    %222 = arith.addf %221, %218 : vector<88x8xf32>
    %cst_81 = arith.constant dense<0xFF800000> : vector<88xf32>
    %223 = vector.multi_reduction <maximumf>, %222, %cst_81 [1] : vector<88x8xf32> to vector<88xf32>
    %224 = vector.shape_cast %223 : vector<88xf32> to vector<88x1xf32>
    %225 = vector.broadcast %224 : vector<88x1xf32> to vector<88x8xf32>
    %226 = arith.subf %222, %225 : vector<88x8xf32>
    %227 = math.exp %226 : vector<88x8xf32>
    %cst_82 = arith.constant dense<0.000000e+00> : vector<88xf32>
    %228 = vector.multi_reduction <add>, %227, %cst_82 [1] : vector<88x8xf32> to vector<88xf32>
    %229 = vector.shape_cast %228 : vector<88xf32> to vector<88x1xf32>
    %230 = tpu.reciprocal %229 {approx = true} : vector<88x1xf32> -> vector<88x1xf32>
    %231 = vector.broadcast %230 : vector<88x1xf32> to vector<88x8xf32>
    %232 = arith.mulf %227, %231 : vector<88x8xf32>
    %233 = arith.truncf %232 : vector<88x8xf32> to vector<88x8xbf16>
    %234 = vector.extract_strided_slice %216 {offsets = [0, 0], sizes = [8, 8], strides = [1, 1]} : vector<8x32xbf16> to vector<8x8xbf16>
    %cst_83 = arith.constant dense<0.000000e+00> : vector<88x8xf32>
    %235 = tpu.matmul %233, %234, %cst_83 {dimension_numbers = #tpu.dot_dimension_numbers<[1], [0], [0], [1], [0, 0, 1, 1], [], []>} : vector<88x8xbf16>, vector<8x8xbf16>, vector<88x8xf32> -> vector<88x8xf32>
    %236 = vector.extract_strided_slice %214 {offsets = [0, 8], sizes = [88, 8], strides = [1, 1]} : vector<88x32xbf16> to vector<88x8xbf16>
    %237 = vector.extract_strided_slice %215 {offsets = [0, 8], sizes = [8, 8], strides = [1, 1]} : vector<8x32xbf16> to vector<8x8xbf16>
    %cst_84 = arith.constant dense<0.000000e+00> : vector<88x8xf32>
    %238 = tpu.matmul %236, %237, %cst_84 {dimension_numbers = #tpu.dot_dimension_numbers<[1], [1], [0], [0], [0, 0, 1, 0], [], []>} : vector<88x8xbf16>, vector<8x8xbf16>, vector<88x8xf32> -> vector<88x8xf32>
    %239 = arith.addf %238, %218 : vector<88x8xf32>
    %cst_85 = arith.constant dense<0xFF800000> : vector<88xf32>
    %240 = vector.multi_reduction <maximumf>, %239, %cst_85 [1] : vector<88x8xf32> to vector<88xf32>
    %241 = vector.shape_cast %240 : vector<88xf32> to vector<88x1xf32>
    %242 = vector.broadcast %241 : vector<88x1xf32> to vector<88x8xf32>
    %243 = arith.subf %239, %242 : vector<88x8xf32>
    %244 = math.exp %243 : vector<88x8xf32>
    %cst_86 = arith.constant dense<0.000000e+00> : vector<88xf32>
    %245 = vector.multi_reduction <add>, %244, %cst_86 [1] : vector<88x8xf32> to vector<88xf32>
    %246 = vector.shape_cast %245 : vector<88xf32> to vector<88x1xf32>
    %247 = tpu.reciprocal %246 {approx = true} : vector<88x1xf32> -> vector<88x1xf32>
    %248 = vector.broadcast %247 : vector<88x1xf32> to vector<88x8xf32>
    %249 = arith.mulf %244, %248 : vector<88x8xf32>
    %250 = arith.truncf %249 : vector<88x8xf32> to vector<88x8xbf16>
    %251 = vector.extract_strided_slice %216 {offsets = [0, 8], sizes = [8, 8], strides = [1, 1]} : vector<8x32xbf16> to vector<8x8xbf16>
    %cst_87 = arith.constant dense<0.000000e+00> : vector<88x8xf32>
    %252 = tpu.matmul %250, %251, %cst_87 {dimension_numbers = #tpu.dot_dimension_numbers<[1], [0], [0], [1], [0, 0, 1, 1], [], []>} : vector<88x8xbf16>, vector<8x8xbf16>, vector<88x8xf32> -> vector<88x8xf32>
    %253 = vector.extract_strided_slice %214 {offsets = [0, 16], sizes = [88, 8], strides = [1, 1]} : vector<88x32xbf16> to vector<88x8xbf16>
    %254 = vector.extract_strided_slice %215 {offsets = [0, 16], sizes = [8, 8], strides = [1, 1]} : vector<8x32xbf16> to vector<8x8xbf16>
    %cst_88 = arith.constant dense<0.000000e+00> : vector<88x8xf32>
    %255 = tpu.matmul %253, %254, %cst_88 {dimension_numbers = #tpu.dot_dimension_numbers<[1], [1], [0], [0], [0, 0, 1, 0], [], []>} : vector<88x8xbf16>, vector<8x8xbf16>, vector<88x8xf32> -> vector<88x8xf32>
    %256 = arith.addf %255, %218 : vector<88x8xf32>
    %cst_89 = arith.constant dense<0xFF800000> : vector<88xf32>
    %257 = vector.multi_reduction <maximumf>, %256, %cst_89 [1] : vector<88x8xf32> to vector<88xf32>
    %258 = vector.shape_cast %257 : vector<88xf32> to vector<88x1xf32>
    %259 = vector.broadcast %258 : vector<88x1xf32> to vector<88x8xf32>
    %260 = arith.subf %256, %259 : vector<88x8xf32>
    %261 = math.exp %260 : vector<88x8xf32>
    %cst_90 = arith.constant dense<0.000000e+00> : vector<88xf32>
    %262 = vector.multi_reduction <add>, %261, %cst_90 [1] : vector<88x8xf32> to vector<88xf32>
    %263 = vector.shape_cast %262 : vector<88xf32> to vector<88x1xf32>
    %264 = tpu.reciprocal %263 {approx = true} : vector<88x1xf32> -> vector<88x1xf32>
    %265 = vector.broadcast %264 : vector<88x1xf32> to vector<88x8xf32>
    %266 = arith.mulf %261, %265 : vector<88x8xf32>
    %267 = arith.truncf %266 : vector<88x8xf32> to vector<88x8xbf16>
    %268 = vector.extract_strided_slice %216 {offsets = [0, 16], sizes = [8, 8], strides = [1, 1]} : vector<8x32xbf16> to vector<8x8xbf16>
    %cst_91 = arith.constant dense<0.000000e+00> : vector<88x8xf32>
    %269 = tpu.matmul %267, %268, %cst_91 {dimension_numbers = #tpu.dot_dimension_numbers<[1], [0], [0], [1], [0, 0, 1, 1], [], []>} : vector<88x8xbf16>, vector<8x8xbf16>, vector<88x8xf32> -> vector<88x8xf32>
    %270 = vector.extract_strided_slice %214 {offsets = [0, 24], sizes = [88, 8], strides = [1, 1]} : vector<88x32xbf16> to vector<88x8xbf16>
    %271 = vector.extract_strided_slice %215 {offsets = [0, 24], sizes = [8, 8], strides = [1, 1]} : vector<8x32xbf16> to vector<8x8xbf16>
    %cst_92 = arith.constant dense<0.000000e+00> : vector<88x8xf32>
    %272 = tpu.matmul %270, %271, %cst_92 {dimension_numbers = #tpu.dot_dimension_numbers<[1], [1], [0], [0], [0, 0, 1, 0], [], []>} : vector<88x8xbf16>, vector<8x8xbf16>, vector<88x8xf32> -> vector<88x8xf32>
    %273 = arith.addf %272, %218 : vector<88x8xf32>
    %cst_93 = arith.constant dense<0xFF800000> : vector<88xf32>
    %274 = vector.multi_reduction <maximumf>, %273, %cst_93 [1] : vector<88x8xf32> to vector<88xf32>
    %275 = vector.shape_cast %274 : vector<88xf32> to vector<88x1xf32>
    %276 = vector.broadcast %275 : vector<88x1xf32> to vector<88x8xf32>
    %277 = arith.subf %273, %276 : vector<88x8xf32>
    %278 = math.exp %277 : vector<88x8xf32>
    %cst_94 = arith.constant dense<0.000000e+00> : vector<88xf32>
    %279 = vector.multi_reduction <add>, %278, %cst_94 [1] : vector<88x8xf32> to vector<88xf32>
    %280 = vector.shape_cast %279 : vector<88xf32> to vector<88x1xf32>
    %281 = tpu.reciprocal %280 {approx = true} : vector<88x1xf32> -> vector<88x1xf32>
    %282 = vector.broadcast %281 : vector<88x1xf32> to vector<88x8xf32>
    %283 = arith.mulf %278, %282 : vector<88x8xf32>
    %284 = arith.truncf %283 : vector<88x8xf32> to vector<88x8xbf16>
    %285 = vector.extract_strided_slice %216 {offsets = [0, 24], sizes = [8, 8], strides = [1, 1]} : vector<8x32xbf16> to vector<8x8xbf16>
    %cst_95 = arith.constant dense<0.000000e+00> : vector<88x8xf32>
    %286 = tpu.matmul %284, %285, %cst_95 {dimension_numbers = #tpu.dot_dimension_numbers<[1], [0], [0], [1], [0, 0, 1, 1], [], []>} : vector<88x8xbf16>, vector<8x8xbf16>, vector<88x8xf32> -> vector<88x8xf32>
    %287 = tpu.concatenate %235, %252, %269, %286 in 1 : vector<88x8xf32>, vector<88x8xf32>, vector<88x8xf32>, vector<88x8xf32> -> vector<88x32xf32>
    %288 = arith.truncf %287 : vector<88x32xf32> to vector<88x32xbf16>
    %289 = arith.truncf %198 : vector<32x32xf32> to vector<32x32xbf16>
    %cst_96 = arith.constant dense<0.000000e+00> : vector<88x32xf32>
    %290 = tpu.matmul %288, %289, %cst_96 {dimension_numbers = #tpu.dot_dimension_numbers<[1], [0], [0], [1], [0, 0, 1, 1], [], []>} : vector<88x32xbf16>, vector<32x32xbf16>, vector<88x32xf32> -> vector<88x32xf32>
    %291 = vector.broadcast %199 : vector<1x32xf32> to vector<88x32xf32>
    %292 = arith.addf %290, %291 : vector<88x32xf32>
    %293 = arith.addf %190, %292 : vector<88x32xf32>
    %294 = vector.extract_strided_slice %0 {offsets = [2, 0, 0], sizes = [1, 2, 32], strides = [1, 1, 1]} : vector<9x2x32xf32> to vector<1x2x32xf32>
    %295 = vector.shape_cast %294 : vector<1x2x32xf32> to vector<2x32xf32>
    %cst_97 = arith.constant dense<0.000000e+00> : vector<88xf32>
    %296 = vector.multi_reduction <add>, %293, %cst_97 [1] : vector<88x32xf32> to vector<88xf32>
    %297 = vector.shape_cast %296 : vector<88xf32> to vector<88x1xf32>
    %cst_98 = arith.constant 3.200000e+01 : f32
    %298 = vector.broadcast %cst_98 : f32 to vector<88x1xf32>
    %299 = arith.divf %297, %298 : vector<88x1xf32>
    %300 = vector.broadcast %299 : vector<88x1xf32> to vector<88x32xf32>
    %301 = arith.subf %293, %300 : vector<88x32xf32>
    %302 = arith.mulf %301, %301 : vector<88x32xf32>
    %cst_99 = arith.constant dense<0.000000e+00> : vector<88xf32>
    %303 = vector.multi_reduction <add>, %302, %cst_99 [1] : vector<88x32xf32> to vector<88xf32>
    %304 = vector.shape_cast %303 : vector<88xf32> to vector<88x1xf32>
    %cst_100 = arith.constant 3.200000e+01 : f32
    %305 = vector.broadcast %cst_100 : f32 to vector<88x1xf32>
    %306 = arith.divf %304, %305 : vector<88x1xf32>
    %cst_101 = arith.constant 9.99999974E-6 : f32
    %307 = vector.broadcast %cst_101 : f32 to vector<88x1xf32>
    %308 = arith.addf %306, %307 : vector<88x1xf32>
    %309 = math.rsqrt %308 : vector<88x1xf32>
    %310 = vector.broadcast %309 : vector<88x1xf32> to vector<88x32xf32>
    %311 = arith.mulf %301, %310 : vector<88x32xf32>
    %312 = vector.extract_strided_slice %295 {offsets = [0, 0], sizes = [1, 32], strides = [1, 1]} : vector<2x32xf32> to vector<1x32xf32>
    %313 = vector.broadcast %312 : vector<1x32xf32> to vector<88x32xf32>
    %314 = arith.mulf %311, %313 : vector<88x32xf32>
    %315 = vector.extract_strided_slice %295 {offsets = [1, 0], sizes = [1, 32], strides = [1, 1]} : vector<2x32xf32> to vector<1x32xf32>
    %316 = vector.broadcast %315 : vector<1x32xf32> to vector<88x32xf32>
    %317 = arith.addf %314, %316 : vector<88x32xf32>
    %c1_102 = arith.constant 1 : index
    %c0_103 = arith.constant 0 : index
    %c0_104 = arith.constant 0 : index
    %318 = vector.load %arg5[%c1_102, %c0_103, %c0_104] : memref<3x32x96xf32, #tpu.memory_space<vmem>>, vector<1x32x96xf32>
    %319 = vector.shape_cast %318 : vector<1x32x96xf32> to vector<32x96xf32>
    %320 = vector.extract_strided_slice %1 {offsets = [1, 0], sizes = [1, 96], strides = [1, 1]} : vector<3x96xf32> to vector<1x96xf32>
    %c4 = arith.constant 4 : index
    %c0_105 = arith.constant 0 : index
    %c0_106 = arith.constant 0 : index
    %321 = vector.load %arg7[%c4, %c0_105, %c0_106] : memref<13x32x32xf32, #tpu.memory_space<vmem>>, vector<1x32x32xf32>
    %322 = vector.shape_cast %321 : vector<1x32x32xf32> to vector<32x32xf32>
    %323 = vector.extract_strided_slice %3 {offsets = [4, 0], sizes = [1, 32], strides = [1, 1]} : vector<16x32xf32> to vector<1x32xf32>
    %324 = arith.truncf %317 : vector<88x32xf32> to vector<88x32xbf16>
    %325 = arith.truncf %319 : vector<32x96xf32> to vector<32x96xbf16>
    %cst_107 = arith.constant dense<0.000000e+00> : vector<88x96xf32>
    %326 = tpu.matmul %324, %325, %cst_107 {dimension_numbers = #tpu.dot_dimension_numbers<[1], [0], [0], [1], [0, 0, 1, 1], [], []>} : vector<88x32xbf16>, vector<32x96xbf16>, vector<88x96xf32> -> vector<88x96xf32>
    %327 = vector.broadcast %320 : vector<1x96xf32> to vector<88x96xf32>
    %328 = arith.addf %326, %327 : vector<88x96xf32>
    %329 = vector.extract_strided_slice %328 {offsets = [0, 0], sizes = [88, 32], strides = [1, 1]} : vector<88x96xf32> to vector<88x32xf32>
    %330 = vector.extract_strided_slice %328 {offsets = [0, 32], sizes = [88, 32], strides = [1, 1]} : vector<88x96xf32> to vector<88x32xf32>
    %331 = vector.extract_strided_slice %328 {offsets = [0, 64], sizes = [88, 32], strides = [1, 1]} : vector<88x96xf32> to vector<88x32xf32>
    %cst_108 = arith.constant 0.353553385 : f32
    %332 = vector.broadcast %cst_108 : f32 to vector<88x32xf32>
    %333 = arith.mulf %329, %332 : vector<88x32xf32>
    %334 = arith.truncf %333 : vector<88x32xf32> to vector<88x32xbf16>
    %335 = arith.truncf %330 : vector<88x32xf32> to vector<88x32xbf16>
    %336 = arith.truncf %331 : vector<88x32xf32> to vector<88x32xbf16>
    %337 = vector.extract_strided_slice %334 {offsets = [0, 0], sizes = [88, 8], strides = [1, 1]} : vector<88x32xbf16> to vector<88x8xbf16>
    %338 = vector.extract_strided_slice %335 {offsets = [0, 0], sizes = [88, 8], strides = [1, 1]} : vector<88x32xbf16> to vector<88x8xbf16>
    %cst_109 = arith.constant dense<0.000000e+00> : vector<88x88xf32>
    %339 = tpu.matmul %337, %338, %cst_109 {dimension_numbers = #tpu.dot_dimension_numbers<[1], [1], [0], [0], [0, 0, 1, 0], [], []>} : vector<88x8xbf16>, vector<88x8xbf16>, vector<88x88xf32> -> vector<88x88xf32>
    %cst_110 = arith.constant dense<0xFF800000> : vector<88xf32>
    %340 = vector.multi_reduction <maximumf>, %339, %cst_110 [1] : vector<88x88xf32> to vector<88xf32>
    %341 = vector.shape_cast %340 : vector<88xf32> to vector<88x1xf32>
    %342 = vector.broadcast %341 : vector<88x1xf32> to vector<88x88xf32>
    %343 = arith.subf %339, %342 : vector<88x88xf32>
    %344 = math.exp %343 : vector<88x88xf32>
    %cst_111 = arith.constant dense<0.000000e+00> : vector<88xf32>
    %345 = vector.multi_reduction <add>, %344, %cst_111 [1] : vector<88x88xf32> to vector<88xf32>
    %346 = vector.shape_cast %345 : vector<88xf32> to vector<88x1xf32>
    %347 = tpu.reciprocal %346 {approx = true} : vector<88x1xf32> -> vector<88x1xf32>
    %348 = vector.broadcast %347 : vector<88x1xf32> to vector<88x88xf32>
    %349 = arith.mulf %344, %348 : vector<88x88xf32>
    %350 = arith.truncf %349 : vector<88x88xf32> to vector<88x88xbf16>
    %351 = vector.extract_strided_slice %336 {offsets = [0, 0], sizes = [88, 8], strides = [1, 1]} : vector<88x32xbf16> to vector<88x8xbf16>
    %cst_112 = arith.constant dense<0.000000e+00> : vector<88x8xf32>
    %352 = tpu.matmul %350, %351, %cst_112 {dimension_numbers = #tpu.dot_dimension_numbers<[1], [0], [0], [1], [0, 0, 1, 1], [], []>} : vector<88x88xbf16>, vector<88x8xbf16>, vector<88x8xf32> -> vector<88x8xf32>
    %353 = vector.extract_strided_slice %334 {offsets = [0, 8], sizes = [88, 8], strides = [1, 1]} : vector<88x32xbf16> to vector<88x8xbf16>
    %354 = vector.extract_strided_slice %335 {offsets = [0, 8], sizes = [88, 8], strides = [1, 1]} : vector<88x32xbf16> to vector<88x8xbf16>
    %cst_113 = arith.constant dense<0.000000e+00> : vector<88x88xf32>
    %355 = tpu.matmul %353, %354, %cst_113 {dimension_numbers = #tpu.dot_dimension_numbers<[1], [1], [0], [0], [0, 0, 1, 0], [], []>} : vector<88x8xbf16>, vector<88x8xbf16>, vector<88x88xf32> -> vector<88x88xf32>
    %cst_114 = arith.constant dense<0xFF800000> : vector<88xf32>
    %356 = vector.multi_reduction <maximumf>, %355, %cst_114 [1] : vector<88x88xf32> to vector<88xf32>
    %357 = vector.shape_cast %356 : vector<88xf32> to vector<88x1xf32>
    %358 = vector.broadcast %357 : vector<88x1xf32> to vector<88x88xf32>
    %359 = arith.subf %355, %358 : vector<88x88xf32>
    %360 = math.exp %359 : vector<88x88xf32>
    %cst_115 = arith.constant dense<0.000000e+00> : vector<88xf32>
    %361 = vector.multi_reduction <add>, %360, %cst_115 [1] : vector<88x88xf32> to vector<88xf32>
    %362 = vector.shape_cast %361 : vector<88xf32> to vector<88x1xf32>
    %363 = tpu.reciprocal %362 {approx = true} : vector<88x1xf32> -> vector<88x1xf32>
    %364 = vector.broadcast %363 : vector<88x1xf32> to vector<88x88xf32>
    %365 = arith.mulf %360, %364 : vector<88x88xf32>
    %366 = arith.truncf %365 : vector<88x88xf32> to vector<88x88xbf16>
    %367 = vector.extract_strided_slice %336 {offsets = [0, 8], sizes = [88, 8], strides = [1, 1]} : vector<88x32xbf16> to vector<88x8xbf16>
    %cst_116 = arith.constant dense<0.000000e+00> : vector<88x8xf32>
    %368 = tpu.matmul %366, %367, %cst_116 {dimension_numbers = #tpu.dot_dimension_numbers<[1], [0], [0], [1], [0, 0, 1, 1], [], []>} : vector<88x88xbf16>, vector<88x8xbf16>, vector<88x8xf32> -> vector<88x8xf32>
    %369 = vector.extract_strided_slice %334 {offsets = [0, 16], sizes = [88, 8], strides = [1, 1]} : vector<88x32xbf16> to vector<88x8xbf16>
    %370 = vector.extract_strided_slice %335 {offsets = [0, 16], sizes = [88, 8], strides = [1, 1]} : vector<88x32xbf16> to vector<88x8xbf16>
    %cst_117 = arith.constant dense<0.000000e+00> : vector<88x88xf32>
    %371 = tpu.matmul %369, %370, %cst_117 {dimension_numbers = #tpu.dot_dimension_numbers<[1], [1], [0], [0], [0, 0, 1, 0], [], []>} : vector<88x8xbf16>, vector<88x8xbf16>, vector<88x88xf32> -> vector<88x88xf32>
    %cst_118 = arith.constant dense<0xFF800000> : vector<88xf32>
    %372 = vector.multi_reduction <maximumf>, %371, %cst_118 [1] : vector<88x88xf32> to vector<88xf32>
    %373 = vector.shape_cast %372 : vector<88xf32> to vector<88x1xf32>
    %374 = vector.broadcast %373 : vector<88x1xf32> to vector<88x88xf32>
    %375 = arith.subf %371, %374 : vector<88x88xf32>
    %376 = math.exp %375 : vector<88x88xf32>
    %cst_119 = arith.constant dense<0.000000e+00> : vector<88xf32>
    %377 = vector.multi_reduction <add>, %376, %cst_119 [1] : vector<88x88xf32> to vector<88xf32>
    %378 = vector.shape_cast %377 : vector<88xf32> to vector<88x1xf32>
    %379 = tpu.reciprocal %378 {approx = true} : vector<88x1xf32> -> vector<88x1xf32>
    %380 = vector.broadcast %379 : vector<88x1xf32> to vector<88x88xf32>
    %381 = arith.mulf %376, %380 : vector<88x88xf32>
    %382 = arith.truncf %381 : vector<88x88xf32> to vector<88x88xbf16>
    %383 = vector.extract_strided_slice %336 {offsets = [0, 16], sizes = [88, 8], strides = [1, 1]} : vector<88x32xbf16> to vector<88x8xbf16>
    %cst_120 = arith.constant dense<0.000000e+00> : vector<88x8xf32>
    %384 = tpu.matmul %382, %383, %cst_120 {dimension_numbers = #tpu.dot_dimension_numbers<[1], [0], [0], [1], [0, 0, 1, 1], [], []>} : vector<88x88xbf16>, vector<88x8xbf16>, vector<88x8xf32> -> vector<88x8xf32>
    %385 = vector.extract_strided_slice %334 {offsets = [0, 24], sizes = [88, 8], strides = [1, 1]} : vector<88x32xbf16> to vector<88x8xbf16>
    %386 = vector.extract_strided_slice %335 {offsets = [0, 24], sizes = [88, 8], strides = [1, 1]} : vector<88x32xbf16> to vector<88x8xbf16>
    %cst_121 = arith.constant dense<0.000000e+00> : vector<88x88xf32>
    %387 = tpu.matmul %385, %386, %cst_121 {dimension_numbers = #tpu.dot_dimension_numbers<[1], [1], [0], [0], [0, 0, 1, 0], [], []>} : vector<88x8xbf16>, vector<88x8xbf16>, vector<88x88xf32> -> vector<88x88xf32>
    %cst_122 = arith.constant dense<0xFF800000> : vector<88xf32>
    %388 = vector.multi_reduction <maximumf>, %387, %cst_122 [1] : vector<88x88xf32> to vector<88xf32>
    %389 = vector.shape_cast %388 : vector<88xf32> to vector<88x1xf32>
    %390 = vector.broadcast %389 : vector<88x1xf32> to vector<88x88xf32>
    %391 = arith.subf %387, %390 : vector<88x88xf32>
    %392 = math.exp %391 : vector<88x88xf32>
    %cst_123 = arith.constant dense<0.000000e+00> : vector<88xf32>
    %393 = vector.multi_reduction <add>, %392, %cst_123 [1] : vector<88x88xf32> to vector<88xf32>
    %394 = vector.shape_cast %393 : vector<88xf32> to vector<88x1xf32>
    %395 = tpu.reciprocal %394 {approx = true} : vector<88x1xf32> -> vector<88x1xf32>
    %396 = vector.broadcast %395 : vector<88x1xf32> to vector<88x88xf32>
    %397 = arith.mulf %392, %396 : vector<88x88xf32>
    %398 = arith.truncf %397 : vector<88x88xf32> to vector<88x88xbf16>
    %399 = vector.extract_strided_slice %336 {offsets = [0, 24], sizes = [88, 8], strides = [1, 1]} : vector<88x32xbf16> to vector<88x8xbf16>
    %cst_124 = arith.constant dense<0.000000e+00> : vector<88x8xf32>
    %400 = tpu.matmul %398, %399, %cst_124 {dimension_numbers = #tpu.dot_dimension_numbers<[1], [0], [0], [1], [0, 0, 1, 1], [], []>} : vector<88x88xbf16>, vector<88x8xbf16>, vector<88x8xf32> -> vector<88x8xf32>
    %401 = tpu.concatenate %352, %368, %384, %400 in 1 : vector<88x8xf32>, vector<88x8xf32>, vector<88x8xf32>, vector<88x8xf32> -> vector<88x32xf32>
    %402 = arith.truncf %401 : vector<88x32xf32> to vector<88x32xbf16>
    %403 = arith.truncf %322 : vector<32x32xf32> to vector<32x32xbf16>
    %cst_125 = arith.constant dense<0.000000e+00> : vector<88x32xf32>
    %404 = tpu.matmul %402, %403, %cst_125 {dimension_numbers = #tpu.dot_dimension_numbers<[1], [0], [0], [1], [0, 0, 1, 1], [], []>} : vector<88x32xbf16>, vector<32x32xbf16>, vector<88x32xf32> -> vector<88x32xf32>
    %405 = vector.broadcast %323 : vector<1x32xf32> to vector<88x32xf32>
    %406 = arith.addf %404, %405 : vector<88x32xf32>
    %407 = arith.addf %317, %406 : vector<88x32xf32>
    %408 = vector.extract_strided_slice %0 {offsets = [3, 0, 0], sizes = [1, 2, 32], strides = [1, 1, 1]} : vector<9x2x32xf32> to vector<1x2x32xf32>
    %409 = vector.shape_cast %408 : vector<1x2x32xf32> to vector<2x32xf32>
    %cst_126 = arith.constant dense<0.000000e+00> : vector<88xf32>
    %410 = vector.multi_reduction <add>, %407, %cst_126 [1] : vector<88x32xf32> to vector<88xf32>
    %411 = vector.shape_cast %410 : vector<88xf32> to vector<88x1xf32>
    %cst_127 = arith.constant 3.200000e+01 : f32
    %412 = vector.broadcast %cst_127 : f32 to vector<88x1xf32>
    %413 = arith.divf %411, %412 : vector<88x1xf32>
    %414 = vector.broadcast %413 : vector<88x1xf32> to vector<88x32xf32>
    %415 = arith.subf %407, %414 : vector<88x32xf32>
    %416 = arith.mulf %415, %415 : vector<88x32xf32>
    %cst_128 = arith.constant dense<0.000000e+00> : vector<88xf32>
    %417 = vector.multi_reduction <add>, %416, %cst_128 [1] : vector<88x32xf32> to vector<88xf32>
    %418 = vector.shape_cast %417 : vector<88xf32> to vector<88x1xf32>
    %cst_129 = arith.constant 3.200000e+01 : f32
    %419 = vector.broadcast %cst_129 : f32 to vector<88x1xf32>
    %420 = arith.divf %418, %419 : vector<88x1xf32>
    %cst_130 = arith.constant 9.99999974E-6 : f32
    %421 = vector.broadcast %cst_130 : f32 to vector<88x1xf32>
    %422 = arith.addf %420, %421 : vector<88x1xf32>
    %423 = math.rsqrt %422 : vector<88x1xf32>
    %424 = vector.broadcast %423 : vector<88x1xf32> to vector<88x32xf32>
    %425 = arith.mulf %415, %424 : vector<88x32xf32>
    %426 = vector.extract_strided_slice %409 {offsets = [0, 0], sizes = [1, 32], strides = [1, 1]} : vector<2x32xf32> to vector<1x32xf32>
    %427 = vector.broadcast %426 : vector<1x32xf32> to vector<88x32xf32>
    %428 = arith.mulf %425, %427 : vector<88x32xf32>
    %429 = vector.extract_strided_slice %409 {offsets = [1, 0], sizes = [1, 32], strides = [1, 1]} : vector<2x32xf32> to vector<1x32xf32>
    %430 = vector.broadcast %429 : vector<1x32xf32> to vector<88x32xf32>
    %431 = arith.addf %428, %430 : vector<88x32xf32>
    %c4_131 = arith.constant 4 : index
    %c0_132 = arith.constant 0 : index
    %c0_133 = arith.constant 0 : index
    %432 = vector.load %arg6[%c4_131, %c0_132, %c0_133] : memref<6x32x64xf32, #tpu.memory_space<vmem>>, vector<1x32x64xf32>
    %433 = vector.shape_cast %432 : vector<1x32x64xf32> to vector<32x64xf32>
    %434 = vector.extract_strided_slice %2 {offsets = [4, 0], sizes = [1, 64], strides = [1, 1]} : vector<6x64xf32> to vector<1x64xf32>
    %c1_134 = arith.constant 1 : index
    %c0_135 = arith.constant 0 : index
    %c0_136 = arith.constant 0 : index
    %435 = vector.load %arg8[%c1_134, %c0_135, %c0_136] : memref<3x64x32xf32, #tpu.memory_space<vmem>>, vector<1x64x32xf32>
    %436 = vector.shape_cast %435 : vector<1x64x32xf32> to vector<64x32xf32>
    %437 = vector.extract_strided_slice %3 {offsets = [11, 0], sizes = [1, 32], strides = [1, 1]} : vector<16x32xf32> to vector<1x32xf32>
    %438 = arith.truncf %431 : vector<88x32xf32> to vector<88x32xbf16>
    %439 = arith.truncf %433 : vector<32x64xf32> to vector<32x64xbf16>
    %cst_137 = arith.constant dense<0.000000e+00> : vector<88x64xf32>
    %440 = tpu.matmul %438, %439, %cst_137 {dimension_numbers = #tpu.dot_dimension_numbers<[1], [0], [0], [1], [0, 0, 1, 1], [], []>} : vector<88x32xbf16>, vector<32x64xbf16>, vector<88x64xf32> -> vector<88x64xf32>
    %441 = vector.broadcast %434 : vector<1x64xf32> to vector<88x64xf32>
    %442 = arith.addf %440, %441 : vector<88x64xf32>
    %cst_138 = arith.constant 0.000000e+00 : f32
    %443 = vector.broadcast %cst_138 : f32 to vector<88x64xf32>
    %444 = arith.maximumf %442, %443 : vector<88x64xf32>
    %445 = arith.truncf %444 : vector<88x64xf32> to vector<88x64xbf16>
    %446 = arith.truncf %436 : vector<64x32xf32> to vector<64x32xbf16>
    %cst_139 = arith.constant dense<0.000000e+00> : vector<88x32xf32>
    %447 = tpu.matmul %445, %446, %cst_139 {dimension_numbers = #tpu.dot_dimension_numbers<[1], [0], [0], [1], [0, 0, 1, 1], [], []>} : vector<88x64xbf16>, vector<64x32xbf16>, vector<88x32xf32> -> vector<88x32xf32>
    %448 = vector.broadcast %437 : vector<1x32xf32> to vector<88x32xf32>
    %449 = arith.addf %447, %448 : vector<88x32xf32>
    %450 = arith.addf %431, %449 : vector<88x32xf32>
    %451 = vector.extract_strided_slice %0 {offsets = [4, 0, 0], sizes = [1, 2, 32], strides = [1, 1, 1]} : vector<9x2x32xf32> to vector<1x2x32xf32>
    %452 = vector.shape_cast %451 : vector<1x2x32xf32> to vector<2x32xf32>
    %cst_140 = arith.constant dense<0.000000e+00> : vector<88xf32>
    %453 = vector.multi_reduction <add>, %450, %cst_140 [1] : vector<88x32xf32> to vector<88xf32>
    %454 = vector.shape_cast %453 : vector<88xf32> to vector<88x1xf32>
    %cst_141 = arith.constant 3.200000e+01 : f32
    %455 = vector.broadcast %cst_141 : f32 to vector<88x1xf32>
    %456 = arith.divf %454, %455 : vector<88x1xf32>
    %457 = vector.broadcast %456 : vector<88x1xf32> to vector<88x32xf32>
    %458 = arith.subf %450, %457 : vector<88x32xf32>
    %459 = arith.mulf %458, %458 : vector<88x32xf32>
    %cst_142 = arith.constant dense<0.000000e+00> : vector<88xf32>
    %460 = vector.multi_reduction <add>, %459, %cst_142 [1] : vector<88x32xf32> to vector<88xf32>
    %461 = vector.shape_cast %460 : vector<88xf32> to vector<88x1xf32>
    %cst_143 = arith.constant 3.200000e+01 : f32
    %462 = vector.broadcast %cst_143 : f32 to vector<88x1xf32>
    %463 = arith.divf %461, %462 : vector<88x1xf32>
    %cst_144 = arith.constant 9.99999974E-6 : f32
    %464 = vector.broadcast %cst_144 : f32 to vector<88x1xf32>
    %465 = arith.addf %463, %464 : vector<88x1xf32>
    %466 = math.rsqrt %465 : vector<88x1xf32>
    %467 = vector.broadcast %466 : vector<88x1xf32> to vector<88x32xf32>
    %468 = arith.mulf %458, %467 : vector<88x32xf32>
    %469 = vector.extract_strided_slice %452 {offsets = [0, 0], sizes = [1, 32], strides = [1, 1]} : vector<2x32xf32> to vector<1x32xf32>
    %470 = vector.broadcast %469 : vector<1x32xf32> to vector<88x32xf32>
    %471 = arith.mulf %468, %470 : vector<88x32xf32>
    %472 = vector.extract_strided_slice %452 {offsets = [1, 0], sizes = [1, 32], strides = [1, 1]} : vector<2x32xf32> to vector<1x32xf32>
    %473 = vector.broadcast %472 : vector<1x32xf32> to vector<88x32xf32>
    %474 = arith.addf %471, %473 : vector<88x32xf32>
    %c0_145 = arith.constant 0 : index
    %c0_146 = arith.constant 0 : index
    %c0_147 = arith.constant 0 : index
    %475 = vector.load %arg13[%c0_145, %c0_146, %c0_147] : memref<2x16x32xf32, #tpu.memory_space<vmem>>, vector<1x16x32xf32>
    %476 = vector.shape_cast %475 : vector<1x16x32xf32> to vector<16x32xf32>
    %c2_148 = arith.constant 2 : index
    %c0_149 = arith.constant 0 : index
    %c0_150 = arith.constant 0 : index
    %477 = vector.load %arg5[%c2_148, %c0_149, %c0_150] : memref<3x32x96xf32, #tpu.memory_space<vmem>>, vector<1x32x96xf32>
    %478 = vector.shape_cast %477 : vector<1x32x96xf32> to vector<32x96xf32>
    %479 = vector.extract_strided_slice %1 {offsets = [2, 0], sizes = [1, 96], strides = [1, 1]} : vector<3x96xf32> to vector<1x96xf32>
    %c5 = arith.constant 5 : index
    %c0_151 = arith.constant 0 : index
    %c0_152 = arith.constant 0 : index
    %480 = vector.load %arg7[%c5, %c0_151, %c0_152] : memref<13x32x32xf32, #tpu.memory_space<vmem>>, vector<1x32x32xf32>
    %481 = vector.shape_cast %480 : vector<1x32x32xf32> to vector<32x32xf32>
    %482 = vector.extract_strided_slice %3 {offsets = [5, 0], sizes = [1, 32], strides = [1, 1]} : vector<16x32xf32> to vector<1x32xf32>
    %483 = arith.truncf %476 : vector<16x32xf32> to vector<16x32xbf16>
    %484 = arith.truncf %478 : vector<32x96xf32> to vector<32x96xbf16>
    %cst_153 = arith.constant dense<0.000000e+00> : vector<16x96xf32>
    %485 = tpu.matmul %483, %484, %cst_153 {dimension_numbers = #tpu.dot_dimension_numbers<[1], [0], [0], [1], [0, 0, 1, 1], [], []>} : vector<16x32xbf16>, vector<32x96xbf16>, vector<16x96xf32> -> vector<16x96xf32>
    %486 = vector.broadcast %479 : vector<1x96xf32> to vector<16x96xf32>
    %487 = arith.addf %485, %486 : vector<16x96xf32>
    %488 = vector.extract_strided_slice %487 {offsets = [0, 0], sizes = [16, 32], strides = [1, 1]} : vector<16x96xf32> to vector<16x32xf32>
    %489 = vector.extract_strided_slice %487 {offsets = [0, 32], sizes = [16, 32], strides = [1, 1]} : vector<16x96xf32> to vector<16x32xf32>
    %490 = vector.extract_strided_slice %487 {offsets = [0, 64], sizes = [16, 32], strides = [1, 1]} : vector<16x96xf32> to vector<16x32xf32>
    %cst_154 = arith.constant 0.353553385 : f32
    %491 = vector.broadcast %cst_154 : f32 to vector<16x32xf32>
    %492 = arith.mulf %488, %491 : vector<16x32xf32>
    %493 = arith.truncf %492 : vector<16x32xf32> to vector<16x32xbf16>
    %494 = arith.truncf %489 : vector<16x32xf32> to vector<16x32xbf16>
    %495 = arith.truncf %490 : vector<16x32xf32> to vector<16x32xbf16>
    %496 = vector.extract_strided_slice %493 {offsets = [0, 0], sizes = [16, 8], strides = [1, 1]} : vector<16x32xbf16> to vector<16x8xbf16>
    %497 = vector.extract_strided_slice %494 {offsets = [0, 0], sizes = [16, 8], strides = [1, 1]} : vector<16x32xbf16> to vector<16x8xbf16>
    %cst_155 = arith.constant dense<0.000000e+00> : vector<16x16xf32>
    %498 = tpu.matmul %496, %497, %cst_155 {dimension_numbers = #tpu.dot_dimension_numbers<[1], [1], [0], [0], [0, 0, 1, 0], [], []>} : vector<16x8xbf16>, vector<16x8xbf16>, vector<16x16xf32> -> vector<16x16xf32>
    %cst_156 = arith.constant dense<0xFF800000> : vector<16xf32>
    %499 = vector.multi_reduction <maximumf>, %498, %cst_156 [1] : vector<16x16xf32> to vector<16xf32>
    %500 = vector.shape_cast %499 : vector<16xf32> to vector<16x1xf32>
    %501 = vector.broadcast %500 : vector<16x1xf32> to vector<16x16xf32>
    %502 = arith.subf %498, %501 : vector<16x16xf32>
    %503 = math.exp %502 : vector<16x16xf32>
    %cst_157 = arith.constant dense<0.000000e+00> : vector<16xf32>
    %504 = vector.multi_reduction <add>, %503, %cst_157 [1] : vector<16x16xf32> to vector<16xf32>
    %505 = vector.shape_cast %504 : vector<16xf32> to vector<16x1xf32>
    %506 = tpu.reciprocal %505 {approx = true} : vector<16x1xf32> -> vector<16x1xf32>
    %507 = vector.broadcast %506 : vector<16x1xf32> to vector<16x16xf32>
    %508 = arith.mulf %503, %507 : vector<16x16xf32>
    %509 = arith.truncf %508 : vector<16x16xf32> to vector<16x16xbf16>
    %510 = vector.extract_strided_slice %495 {offsets = [0, 0], sizes = [16, 8], strides = [1, 1]} : vector<16x32xbf16> to vector<16x8xbf16>
    %cst_158 = arith.constant dense<0.000000e+00> : vector<16x8xf32>
    %511 = tpu.matmul %509, %510, %cst_158 {dimension_numbers = #tpu.dot_dimension_numbers<[1], [0], [0], [1], [0, 0, 1, 1], [], []>} : vector<16x16xbf16>, vector<16x8xbf16>, vector<16x8xf32> -> vector<16x8xf32>
    %512 = vector.extract_strided_slice %493 {offsets = [0, 8], sizes = [16, 8], strides = [1, 1]} : vector<16x32xbf16> to vector<16x8xbf16>
    %513 = vector.extract_strided_slice %494 {offsets = [0, 8], sizes = [16, 8], strides = [1, 1]} : vector<16x32xbf16> to vector<16x8xbf16>
    %cst_159 = arith.constant dense<0.000000e+00> : vector<16x16xf32>
    %514 = tpu.matmul %512, %513, %cst_159 {dimension_numbers = #tpu.dot_dimension_numbers<[1], [1], [0], [0], [0, 0, 1, 0], [], []>} : vector<16x8xbf16>, vector<16x8xbf16>, vector<16x16xf32> -> vector<16x16xf32>
    %cst_160 = arith.constant dense<0xFF800000> : vector<16xf32>
    %515 = vector.multi_reduction <maximumf>, %514, %cst_160 [1] : vector<16x16xf32> to vector<16xf32>
    %516 = vector.shape_cast %515 : vector<16xf32> to vector<16x1xf32>
    %517 = vector.broadcast %516 : vector<16x1xf32> to vector<16x16xf32>
    %518 = arith.subf %514, %517 : vector<16x16xf32>
    %519 = math.exp %518 : vector<16x16xf32>
    %cst_161 = arith.constant dense<0.000000e+00> : vector<16xf32>
    %520 = vector.multi_reduction <add>, %519, %cst_161 [1] : vector<16x16xf32> to vector<16xf32>
    %521 = vector.shape_cast %520 : vector<16xf32> to vector<16x1xf32>
    %522 = tpu.reciprocal %521 {approx = true} : vector<16x1xf32> -> vector<16x1xf32>
    %523 = vector.broadcast %522 : vector<16x1xf32> to vector<16x16xf32>
    %524 = arith.mulf %519, %523 : vector<16x16xf32>
    %525 = arith.truncf %524 : vector<16x16xf32> to vector<16x16xbf16>
    %526 = vector.extract_strided_slice %495 {offsets = [0, 8], sizes = [16, 8], strides = [1, 1]} : vector<16x32xbf16> to vector<16x8xbf16>
    %cst_162 = arith.constant dense<0.000000e+00> : vector<16x8xf32>
    %527 = tpu.matmul %525, %526, %cst_162 {dimension_numbers = #tpu.dot_dimension_numbers<[1], [0], [0], [1], [0, 0, 1, 1], [], []>} : vector<16x16xbf16>, vector<16x8xbf16>, vector<16x8xf32> -> vector<16x8xf32>
    %528 = vector.extract_strided_slice %493 {offsets = [0, 16], sizes = [16, 8], strides = [1, 1]} : vector<16x32xbf16> to vector<16x8xbf16>
    %529 = vector.extract_strided_slice %494 {offsets = [0, 16], sizes = [16, 8], strides = [1, 1]} : vector<16x32xbf16> to vector<16x8xbf16>
    %cst_163 = arith.constant dense<0.000000e+00> : vector<16x16xf32>
    %530 = tpu.matmul %528, %529, %cst_163 {dimension_numbers = #tpu.dot_dimension_numbers<[1], [1], [0], [0], [0, 0, 1, 0], [], []>} : vector<16x8xbf16>, vector<16x8xbf16>, vector<16x16xf32> -> vector<16x16xf32>
    %cst_164 = arith.constant dense<0xFF800000> : vector<16xf32>
    %531 = vector.multi_reduction <maximumf>, %530, %cst_164 [1] : vector<16x16xf32> to vector<16xf32>
    %532 = vector.shape_cast %531 : vector<16xf32> to vector<16x1xf32>
    %533 = vector.broadcast %532 : vector<16x1xf32> to vector<16x16xf32>
    %534 = arith.subf %530, %533 : vector<16x16xf32>
    %535 = math.exp %534 : vector<16x16xf32>
    %cst_165 = arith.constant dense<0.000000e+00> : vector<16xf32>
    %536 = vector.multi_reduction <add>, %535, %cst_165 [1] : vector<16x16xf32> to vector<16xf32>
    %537 = vector.shape_cast %536 : vector<16xf32> to vector<16x1xf32>
    %538 = tpu.reciprocal %537 {approx = true} : vector<16x1xf32> -> vector<16x1xf32>
    %539 = vector.broadcast %538 : vector<16x1xf32> to vector<16x16xf32>
    %540 = arith.mulf %535, %539 : vector<16x16xf32>
    %541 = arith.truncf %540 : vector<16x16xf32> to vector<16x16xbf16>
    %542 = vector.extract_strided_slice %495 {offsets = [0, 16], sizes = [16, 8], strides = [1, 1]} : vector<16x32xbf16> to vector<16x8xbf16>
    %cst_166 = arith.constant dense<0.000000e+00> : vector<16x8xf32>
    %543 = tpu.matmul %541, %542, %cst_166 {dimension_numbers = #tpu.dot_dimension_numbers<[1], [0], [0], [1], [0, 0, 1, 1], [], []>} : vector<16x16xbf16>, vector<16x8xbf16>, vector<16x8xf32> -> vector<16x8xf32>
    %544 = vector.extract_strided_slice %493 {offsets = [0, 24], sizes = [16, 8], strides = [1, 1]} : vector<16x32xbf16> to vector<16x8xbf16>
    %545 = vector.extract_strided_slice %494 {offsets = [0, 24], sizes = [16, 8], strides = [1, 1]} : vector<16x32xbf16> to vector<16x8xbf16>
    %cst_167 = arith.constant dense<0.000000e+00> : vector<16x16xf32>
    %546 = tpu.matmul %544, %545, %cst_167 {dimension_numbers = #tpu.dot_dimension_numbers<[1], [1], [0], [0], [0, 0, 1, 0], [], []>} : vector<16x8xbf16>, vector<16x8xbf16>, vector<16x16xf32> -> vector<16x16xf32>
    %cst_168 = arith.constant dense<0xFF800000> : vector<16xf32>
    %547 = vector.multi_reduction <maximumf>, %546, %cst_168 [1] : vector<16x16xf32> to vector<16xf32>
    %548 = vector.shape_cast %547 : vector<16xf32> to vector<16x1xf32>
    %549 = vector.broadcast %548 : vector<16x1xf32> to vector<16x16xf32>
    %550 = arith.subf %546, %549 : vector<16x16xf32>
    %551 = math.exp %550 : vector<16x16xf32>
    %cst_169 = arith.constant dense<0.000000e+00> : vector<16xf32>
    %552 = vector.multi_reduction <add>, %551, %cst_169 [1] : vector<16x16xf32> to vector<16xf32>
    %553 = vector.shape_cast %552 : vector<16xf32> to vector<16x1xf32>
    %554 = tpu.reciprocal %553 {approx = true} : vector<16x1xf32> -> vector<16x1xf32>
    %555 = vector.broadcast %554 : vector<16x1xf32> to vector<16x16xf32>
    %556 = arith.mulf %551, %555 : vector<16x16xf32>
    %557 = arith.truncf %556 : vector<16x16xf32> to vector<16x16xbf16>
    %558 = vector.extract_strided_slice %495 {offsets = [0, 24], sizes = [16, 8], strides = [1, 1]} : vector<16x32xbf16> to vector<16x8xbf16>
    %cst_170 = arith.constant dense<0.000000e+00> : vector<16x8xf32>
    %559 = tpu.matmul %557, %558, %cst_170 {dimension_numbers = #tpu.dot_dimension_numbers<[1], [0], [0], [1], [0, 0, 1, 1], [], []>} : vector<16x16xbf16>, vector<16x8xbf16>, vector<16x8xf32> -> vector<16x8xf32>
    %560 = tpu.concatenate %511, %527, %543, %559 in 1 : vector<16x8xf32>, vector<16x8xf32>, vector<16x8xf32>, vector<16x8xf32> -> vector<16x32xf32>
    %561 = arith.truncf %560 : vector<16x32xf32> to vector<16x32xbf16>
    %562 = arith.truncf %481 : vector<32x32xf32> to vector<32x32xbf16>
    %cst_171 = arith.constant dense<0.000000e+00> : vector<16x32xf32>
    %563 = tpu.matmul %561, %562, %cst_171 {dimension_numbers = #tpu.dot_dimension_numbers<[1], [0], [0], [1], [0, 0, 1, 1], [], []>} : vector<16x32xbf16>, vector<32x32xbf16>, vector<16x32xf32> -> vector<16x32xf32>
    %564 = vector.broadcast %482 : vector<1x32xf32> to vector<16x32xf32>
    %565 = arith.addf %563, %564 : vector<16x32xf32>
    %566 = arith.addf %476, %565 : vector<16x32xf32>
    %567 = vector.extract_strided_slice %0 {offsets = [5, 0, 0], sizes = [1, 2, 32], strides = [1, 1, 1]} : vector<9x2x32xf32> to vector<1x2x32xf32>
    %568 = vector.shape_cast %567 : vector<1x2x32xf32> to vector<2x32xf32>
    %cst_172 = arith.constant dense<0.000000e+00> : vector<16xf32>
    %569 = vector.multi_reduction <add>, %566, %cst_172 [1] : vector<16x32xf32> to vector<16xf32>
    %570 = vector.shape_cast %569 : vector<16xf32> to vector<16x1xf32>
    %cst_173 = arith.constant 3.200000e+01 : f32
    %571 = vector.broadcast %cst_173 : f32 to vector<16x1xf32>
    %572 = arith.divf %570, %571 : vector<16x1xf32>
    %573 = vector.broadcast %572 : vector<16x1xf32> to vector<16x32xf32>
    %574 = arith.subf %566, %573 : vector<16x32xf32>
    %575 = arith.mulf %574, %574 : vector<16x32xf32>
    %cst_174 = arith.constant dense<0.000000e+00> : vector<16xf32>
    %576 = vector.multi_reduction <add>, %575, %cst_174 [1] : vector<16x32xf32> to vector<16xf32>
    %577 = vector.shape_cast %576 : vector<16xf32> to vector<16x1xf32>
    %cst_175 = arith.constant 3.200000e+01 : f32
    %578 = vector.broadcast %cst_175 : f32 to vector<16x1xf32>
    %579 = arith.divf %577, %578 : vector<16x1xf32>
    %cst_176 = arith.constant 9.99999974E-6 : f32
    %580 = vector.broadcast %cst_176 : f32 to vector<16x1xf32>
    %581 = arith.addf %579, %580 : vector<16x1xf32>
    %582 = math.rsqrt %581 : vector<16x1xf32>
    %583 = vector.broadcast %582 : vector<16x1xf32> to vector<16x32xf32>
    %584 = arith.mulf %574, %583 : vector<16x32xf32>
    %585 = vector.extract_strided_slice %568 {offsets = [0, 0], sizes = [1, 32], strides = [1, 1]} : vector<2x32xf32> to vector<1x32xf32>
    %586 = vector.broadcast %585 : vector<1x32xf32> to vector<16x32xf32>
    %587 = arith.mulf %584, %586 : vector<16x32xf32>
    %588 = vector.extract_strided_slice %568 {offsets = [1, 0], sizes = [1, 32], strides = [1, 1]} : vector<2x32xf32> to vector<1x32xf32>
    %589 = vector.broadcast %588 : vector<1x32xf32> to vector<16x32xf32>
    %590 = arith.addf %587, %589 : vector<16x32xf32>
    %c6 = arith.constant 6 : index
    %c0_177 = arith.constant 0 : index
    %c0_178 = arith.constant 0 : index
    %591 = vector.load %arg7[%c6, %c0_177, %c0_178] : memref<13x32x32xf32, #tpu.memory_space<vmem>>, vector<1x32x32xf32>
    %592 = vector.shape_cast %591 : vector<1x32x32xf32> to vector<32x32xf32>
    %593 = vector.extract_strided_slice %3 {offsets = [6, 0], sizes = [1, 32], strides = [1, 1]} : vector<16x32xf32> to vector<1x32xf32>
    %c1_179 = arith.constant 1 : index
    %c0_180 = arith.constant 0 : index
    %c0_181 = arith.constant 0 : index
    %594 = vector.load %arg6[%c1_179, %c0_180, %c0_181] : memref<6x32x64xf32, #tpu.memory_space<vmem>>, vector<1x32x64xf32>
    %595 = vector.shape_cast %594 : vector<1x32x64xf32> to vector<32x64xf32>
    %596 = vector.extract_strided_slice %2 {offsets = [1, 0], sizes = [1, 64], strides = [1, 1]} : vector<6x64xf32> to vector<1x64xf32>
    %c7 = arith.constant 7 : index
    %c0_182 = arith.constant 0 : index
    %c0_183 = arith.constant 0 : index
    %597 = vector.load %arg7[%c7, %c0_182, %c0_183] : memref<13x32x32xf32, #tpu.memory_space<vmem>>, vector<1x32x32xf32>
    %598 = vector.shape_cast %597 : vector<1x32x32xf32> to vector<32x32xf32>
    %599 = vector.extract_strided_slice %3 {offsets = [7, 0], sizes = [1, 32], strides = [1, 1]} : vector<16x32xf32> to vector<1x32xf32>
    %600 = arith.truncf %590 : vector<16x32xf32> to vector<16x32xbf16>
    %601 = arith.truncf %592 : vector<32x32xf32> to vector<32x32xbf16>
    %cst_184 = arith.constant dense<0.000000e+00> : vector<16x32xf32>
    %602 = tpu.matmul %600, %601, %cst_184 {dimension_numbers = #tpu.dot_dimension_numbers<[1], [0], [0], [1], [0, 0, 1, 1], [], []>} : vector<16x32xbf16>, vector<32x32xbf16>, vector<16x32xf32> -> vector<16x32xf32>
    %603 = vector.broadcast %593 : vector<1x32xf32> to vector<16x32xf32>
    %604 = arith.addf %602, %603 : vector<16x32xf32>
    %605 = arith.truncf %188 : vector<8x32xf32> to vector<8x32xbf16>
    %606 = arith.truncf %595 : vector<32x64xf32> to vector<32x64xbf16>
    %cst_185 = arith.constant dense<0.000000e+00> : vector<8x64xf32>
    %607 = tpu.matmul %605, %606, %cst_185 {dimension_numbers = #tpu.dot_dimension_numbers<[1], [0], [0], [1], [0, 0, 1, 1], [], []>} : vector<8x32xbf16>, vector<32x64xbf16>, vector<8x64xf32> -> vector<8x64xf32>
    %608 = vector.broadcast %596 : vector<1x64xf32> to vector<8x64xf32>
    %609 = arith.addf %607, %608 : vector<8x64xf32>
    %610 = vector.extract_strided_slice %609 {offsets = [0, 0], sizes = [8, 32], strides = [1, 1]} : vector<8x64xf32> to vector<8x32xf32>
    %611 = vector.extract_strided_slice %609 {offsets = [0, 32], sizes = [8, 32], strides = [1, 1]} : vector<8x64xf32> to vector<8x32xf32>
    %cst_186 = arith.constant 0.353553385 : f32
    %612 = vector.broadcast %cst_186 : f32 to vector<16x32xf32>
    %613 = arith.mulf %604, %612 : vector<16x32xf32>
    %614 = arith.truncf %613 : vector<16x32xf32> to vector<16x32xbf16>
    %615 = arith.truncf %610 : vector<8x32xf32> to vector<8x32xbf16>
    %616 = arith.truncf %611 : vector<8x32xf32> to vector<8x32xbf16>
    %617 = vector.shape_cast %10 : vector<1x8xf32> to vector<1x8xf32>
    %618 = vector.broadcast %617 : vector<1x8xf32> to vector<16x8xf32>
    %619 = vector.extract_strided_slice %614 {offsets = [0, 0], sizes = [16, 8], strides = [1, 1]} : vector<16x32xbf16> to vector<16x8xbf16>
    %620 = vector.extract_strided_slice %615 {offsets = [0, 0], sizes = [8, 8], strides = [1, 1]} : vector<8x32xbf16> to vector<8x8xbf16>
    %cst_187 = arith.constant dense<0.000000e+00> : vector<16x8xf32>
    %621 = tpu.matmul %619, %620, %cst_187 {dimension_numbers = #tpu.dot_dimension_numbers<[1], [1], [0], [0], [0, 0, 1, 0], [], []>} : vector<16x8xbf16>, vector<8x8xbf16>, vector<16x8xf32> -> vector<16x8xf32>
    %622 = arith.addf %621, %618 : vector<16x8xf32>
    %cst_188 = arith.constant dense<0xFF800000> : vector<16xf32>
    %623 = vector.multi_reduction <maximumf>, %622, %cst_188 [1] : vector<16x8xf32> to vector<16xf32>
    %624 = vector.shape_cast %623 : vector<16xf32> to vector<16x1xf32>
    %625 = vector.broadcast %624 : vector<16x1xf32> to vector<16x8xf32>
    %626 = arith.subf %622, %625 : vector<16x8xf32>
    %627 = math.exp %626 : vector<16x8xf32>
    %cst_189 = arith.constant dense<0.000000e+00> : vector<16xf32>
    %628 = vector.multi_reduction <add>, %627, %cst_189 [1] : vector<16x8xf32> to vector<16xf32>
    %629 = vector.shape_cast %628 : vector<16xf32> to vector<16x1xf32>
    %630 = tpu.reciprocal %629 {approx = true} : vector<16x1xf32> -> vector<16x1xf32>
    %631 = vector.broadcast %630 : vector<16x1xf32> to vector<16x8xf32>
    %632 = arith.mulf %627, %631 : vector<16x8xf32>
    %633 = arith.truncf %632 : vector<16x8xf32> to vector<16x8xbf16>
    %634 = vector.extract_strided_slice %616 {offsets = [0, 0], sizes = [8, 8], strides = [1, 1]} : vector<8x32xbf16> to vector<8x8xbf16>
    %cst_190 = arith.constant dense<0.000000e+00> : vector<16x8xf32>
    %635 = tpu.matmul %633, %634, %cst_190 {dimension_numbers = #tpu.dot_dimension_numbers<[1], [0], [0], [1], [0, 0, 1, 1], [], []>} : vector<16x8xbf16>, vector<8x8xbf16>, vector<16x8xf32> -> vector<16x8xf32>
    %636 = vector.extract_strided_slice %614 {offsets = [0, 8], sizes = [16, 8], strides = [1, 1]} : vector<16x32xbf16> to vector<16x8xbf16>
    %637 = vector.extract_strided_slice %615 {offsets = [0, 8], sizes = [8, 8], strides = [1, 1]} : vector<8x32xbf16> to vector<8x8xbf16>
    %cst_191 = arith.constant dense<0.000000e+00> : vector<16x8xf32>
    %638 = tpu.matmul %636, %637, %cst_191 {dimension_numbers = #tpu.dot_dimension_numbers<[1], [1], [0], [0], [0, 0, 1, 0], [], []>} : vector<16x8xbf16>, vector<8x8xbf16>, vector<16x8xf32> -> vector<16x8xf32>
    %639 = arith.addf %638, %618 : vector<16x8xf32>
    %cst_192 = arith.constant dense<0xFF800000> : vector<16xf32>
    %640 = vector.multi_reduction <maximumf>, %639, %cst_192 [1] : vector<16x8xf32> to vector<16xf32>
    %641 = vector.shape_cast %640 : vector<16xf32> to vector<16x1xf32>
    %642 = vector.broadcast %641 : vector<16x1xf32> to vector<16x8xf32>
    %643 = arith.subf %639, %642 : vector<16x8xf32>
    %644 = math.exp %643 : vector<16x8xf32>
    %cst_193 = arith.constant dense<0.000000e+00> : vector<16xf32>
    %645 = vector.multi_reduction <add>, %644, %cst_193 [1] : vector<16x8xf32> to vector<16xf32>
    %646 = vector.shape_cast %645 : vector<16xf32> to vector<16x1xf32>
    %647 = tpu.reciprocal %646 {approx = true} : vector<16x1xf32> -> vector<16x1xf32>
    %648 = vector.broadcast %647 : vector<16x1xf32> to vector<16x8xf32>
    %649 = arith.mulf %644, %648 : vector<16x8xf32>
    %650 = arith.truncf %649 : vector<16x8xf32> to vector<16x8xbf16>
    %651 = vector.extract_strided_slice %616 {offsets = [0, 8], sizes = [8, 8], strides = [1, 1]} : vector<8x32xbf16> to vector<8x8xbf16>
    %cst_194 = arith.constant dense<0.000000e+00> : vector<16x8xf32>
    %652 = tpu.matmul %650, %651, %cst_194 {dimension_numbers = #tpu.dot_dimension_numbers<[1], [0], [0], [1], [0, 0, 1, 1], [], []>} : vector<16x8xbf16>, vector<8x8xbf16>, vector<16x8xf32> -> vector<16x8xf32>
    %653 = vector.extract_strided_slice %614 {offsets = [0, 16], sizes = [16, 8], strides = [1, 1]} : vector<16x32xbf16> to vector<16x8xbf16>
    %654 = vector.extract_strided_slice %615 {offsets = [0, 16], sizes = [8, 8], strides = [1, 1]} : vector<8x32xbf16> to vector<8x8xbf16>
    %cst_195 = arith.constant dense<0.000000e+00> : vector<16x8xf32>
    %655 = tpu.matmul %653, %654, %cst_195 {dimension_numbers = #tpu.dot_dimension_numbers<[1], [1], [0], [0], [0, 0, 1, 0], [], []>} : vector<16x8xbf16>, vector<8x8xbf16>, vector<16x8xf32> -> vector<16x8xf32>
    %656 = arith.addf %655, %618 : vector<16x8xf32>
    %cst_196 = arith.constant dense<0xFF800000> : vector<16xf32>
    %657 = vector.multi_reduction <maximumf>, %656, %cst_196 [1] : vector<16x8xf32> to vector<16xf32>
    %658 = vector.shape_cast %657 : vector<16xf32> to vector<16x1xf32>
    %659 = vector.broadcast %658 : vector<16x1xf32> to vector<16x8xf32>
    %660 = arith.subf %656, %659 : vector<16x8xf32>
    %661 = math.exp %660 : vector<16x8xf32>
    %cst_197 = arith.constant dense<0.000000e+00> : vector<16xf32>
    %662 = vector.multi_reduction <add>, %661, %cst_197 [1] : vector<16x8xf32> to vector<16xf32>
    %663 = vector.shape_cast %662 : vector<16xf32> to vector<16x1xf32>
    %664 = tpu.reciprocal %663 {approx = true} : vector<16x1xf32> -> vector<16x1xf32>
    %665 = vector.broadcast %664 : vector<16x1xf32> to vector<16x8xf32>
    %666 = arith.mulf %661, %665 : vector<16x8xf32>
    %667 = arith.truncf %666 : vector<16x8xf32> to vector<16x8xbf16>
    %668 = vector.extract_strided_slice %616 {offsets = [0, 16], sizes = [8, 8], strides = [1, 1]} : vector<8x32xbf16> to vector<8x8xbf16>
    %cst_198 = arith.constant dense<0.000000e+00> : vector<16x8xf32>
    %669 = tpu.matmul %667, %668, %cst_198 {dimension_numbers = #tpu.dot_dimension_numbers<[1], [0], [0], [1], [0, 0, 1, 1], [], []>} : vector<16x8xbf16>, vector<8x8xbf16>, vector<16x8xf32> -> vector<16x8xf32>
    %670 = vector.extract_strided_slice %614 {offsets = [0, 24], sizes = [16, 8], strides = [1, 1]} : vector<16x32xbf16> to vector<16x8xbf16>
    %671 = vector.extract_strided_slice %615 {offsets = [0, 24], sizes = [8, 8], strides = [1, 1]} : vector<8x32xbf16> to vector<8x8xbf16>
    %cst_199 = arith.constant dense<0.000000e+00> : vector<16x8xf32>
    %672 = tpu.matmul %670, %671, %cst_199 {dimension_numbers = #tpu.dot_dimension_numbers<[1], [1], [0], [0], [0, 0, 1, 0], [], []>} : vector<16x8xbf16>, vector<8x8xbf16>, vector<16x8xf32> -> vector<16x8xf32>
    %673 = arith.addf %672, %618 : vector<16x8xf32>
    %cst_200 = arith.constant dense<0xFF800000> : vector<16xf32>
    %674 = vector.multi_reduction <maximumf>, %673, %cst_200 [1] : vector<16x8xf32> to vector<16xf32>
    %675 = vector.shape_cast %674 : vector<16xf32> to vector<16x1xf32>
    %676 = vector.broadcast %675 : vector<16x1xf32> to vector<16x8xf32>
    %677 = arith.subf %673, %676 : vector<16x8xf32>
    %678 = math.exp %677 : vector<16x8xf32>
    %cst_201 = arith.constant dense<0.000000e+00> : vector<16xf32>
    %679 = vector.multi_reduction <add>, %678, %cst_201 [1] : vector<16x8xf32> to vector<16xf32>
    %680 = vector.shape_cast %679 : vector<16xf32> to vector<16x1xf32>
    %681 = tpu.reciprocal %680 {approx = true} : vector<16x1xf32> -> vector<16x1xf32>
    %682 = vector.broadcast %681 : vector<16x1xf32> to vector<16x8xf32>
    %683 = arith.mulf %678, %682 : vector<16x8xf32>
    %684 = arith.truncf %683 : vector<16x8xf32> to vector<16x8xbf16>
    %685 = vector.extract_strided_slice %616 {offsets = [0, 24], sizes = [8, 8], strides = [1, 1]} : vector<8x32xbf16> to vector<8x8xbf16>
    %cst_202 = arith.constant dense<0.000000e+00> : vector<16x8xf32>
    %686 = tpu.matmul %684, %685, %cst_202 {dimension_numbers = #tpu.dot_dimension_numbers<[1], [0], [0], [1], [0, 0, 1, 1], [], []>} : vector<16x8xbf16>, vector<8x8xbf16>, vector<16x8xf32> -> vector<16x8xf32>
    %687 = tpu.concatenate %635, %652, %669, %686 in 1 : vector<16x8xf32>, vector<16x8xf32>, vector<16x8xf32>, vector<16x8xf32> -> vector<16x32xf32>
    %688 = arith.truncf %687 : vector<16x32xf32> to vector<16x32xbf16>
    %689 = arith.truncf %598 : vector<32x32xf32> to vector<32x32xbf16>
    %cst_203 = arith.constant dense<0.000000e+00> : vector<16x32xf32>
    %690 = tpu.matmul %688, %689, %cst_203 {dimension_numbers = #tpu.dot_dimension_numbers<[1], [0], [0], [1], [0, 0, 1, 1], [], []>} : vector<16x32xbf16>, vector<32x32xbf16>, vector<16x32xf32> -> vector<16x32xf32>
    %691 = vector.broadcast %599 : vector<1x32xf32> to vector<16x32xf32>
    %692 = arith.addf %690, %691 : vector<16x32xf32>
    %693 = arith.addf %590, %692 : vector<16x32xf32>
    %694 = vector.extract_strided_slice %0 {offsets = [6, 0, 0], sizes = [1, 2, 32], strides = [1, 1, 1]} : vector<9x2x32xf32> to vector<1x2x32xf32>
    %695 = vector.shape_cast %694 : vector<1x2x32xf32> to vector<2x32xf32>
    %cst_204 = arith.constant dense<0.000000e+00> : vector<16xf32>
    %696 = vector.multi_reduction <add>, %693, %cst_204 [1] : vector<16x32xf32> to vector<16xf32>
    %697 = vector.shape_cast %696 : vector<16xf32> to vector<16x1xf32>
    %cst_205 = arith.constant 3.200000e+01 : f32
    %698 = vector.broadcast %cst_205 : f32 to vector<16x1xf32>
    %699 = arith.divf %697, %698 : vector<16x1xf32>
    %700 = vector.broadcast %699 : vector<16x1xf32> to vector<16x32xf32>
    %701 = arith.subf %693, %700 : vector<16x32xf32>
    %702 = arith.mulf %701, %701 : vector<16x32xf32>
    %cst_206 = arith.constant dense<0.000000e+00> : vector<16xf32>
    %703 = vector.multi_reduction <add>, %702, %cst_206 [1] : vector<16x32xf32> to vector<16xf32>
    %704 = vector.shape_cast %703 : vector<16xf32> to vector<16x1xf32>
    %cst_207 = arith.constant 3.200000e+01 : f32
    %705 = vector.broadcast %cst_207 : f32 to vector<16x1xf32>
    %706 = arith.divf %704, %705 : vector<16x1xf32>
    %cst_208 = arith.constant 9.99999974E-6 : f32
    %707 = vector.broadcast %cst_208 : f32 to vector<16x1xf32>
    %708 = arith.addf %706, %707 : vector<16x1xf32>
    %709 = math.rsqrt %708 : vector<16x1xf32>
    %710 = vector.broadcast %709 : vector<16x1xf32> to vector<16x32xf32>
    %711 = arith.mulf %701, %710 : vector<16x32xf32>
    %712 = vector.extract_strided_slice %695 {offsets = [0, 0], sizes = [1, 32], strides = [1, 1]} : vector<2x32xf32> to vector<1x32xf32>
    %713 = vector.broadcast %712 : vector<1x32xf32> to vector<16x32xf32>
    %714 = arith.mulf %711, %713 : vector<16x32xf32>
    %715 = vector.extract_strided_slice %695 {offsets = [1, 0], sizes = [1, 32], strides = [1, 1]} : vector<2x32xf32> to vector<1x32xf32>
    %716 = vector.broadcast %715 : vector<1x32xf32> to vector<16x32xf32>
    %717 = arith.addf %714, %716 : vector<16x32xf32>
    %c8 = arith.constant 8 : index
    %c0_209 = arith.constant 0 : index
    %c0_210 = arith.constant 0 : index
    %718 = vector.load %arg7[%c8, %c0_209, %c0_210] : memref<13x32x32xf32, #tpu.memory_space<vmem>>, vector<1x32x32xf32>
    %719 = vector.shape_cast %718 : vector<1x32x32xf32> to vector<32x32xf32>
    %720 = vector.extract_strided_slice %3 {offsets = [8, 0], sizes = [1, 32], strides = [1, 1]} : vector<16x32xf32> to vector<1x32xf32>
    %c2_211 = arith.constant 2 : index
    %c0_212 = arith.constant 0 : index
    %c0_213 = arith.constant 0 : index
    %721 = vector.load %arg6[%c2_211, %c0_212, %c0_213] : memref<6x32x64xf32, #tpu.memory_space<vmem>>, vector<1x32x64xf32>
    %722 = vector.shape_cast %721 : vector<1x32x64xf32> to vector<32x64xf32>
    %723 = vector.extract_strided_slice %2 {offsets = [2, 0], sizes = [1, 64], strides = [1, 1]} : vector<6x64xf32> to vector<1x64xf32>
    %c9 = arith.constant 9 : index
    %c0_214 = arith.constant 0 : index
    %c0_215 = arith.constant 0 : index
    %724 = vector.load %arg7[%c9, %c0_214, %c0_215] : memref<13x32x32xf32, #tpu.memory_space<vmem>>, vector<1x32x32xf32>
    %725 = vector.shape_cast %724 : vector<1x32x32xf32> to vector<32x32xf32>
    %726 = vector.extract_strided_slice %3 {offsets = [9, 0], sizes = [1, 32], strides = [1, 1]} : vector<16x32xf32> to vector<1x32xf32>
    %727 = arith.truncf %717 : vector<16x32xf32> to vector<16x32xbf16>
    %728 = arith.truncf %719 : vector<32x32xf32> to vector<32x32xbf16>
    %cst_216 = arith.constant dense<0.000000e+00> : vector<16x32xf32>
    %729 = tpu.matmul %727, %728, %cst_216 {dimension_numbers = #tpu.dot_dimension_numbers<[1], [0], [0], [1], [0, 0, 1, 1], [], []>} : vector<16x32xbf16>, vector<32x32xbf16>, vector<16x32xf32> -> vector<16x32xf32>
    %730 = vector.broadcast %720 : vector<1x32xf32> to vector<16x32xf32>
    %731 = arith.addf %729, %730 : vector<16x32xf32>
    %732 = arith.truncf %474 : vector<88x32xf32> to vector<88x32xbf16>
    %733 = arith.truncf %722 : vector<32x64xf32> to vector<32x64xbf16>
    %cst_217 = arith.constant dense<0.000000e+00> : vector<88x64xf32>
    %734 = tpu.matmul %732, %733, %cst_217 {dimension_numbers = #tpu.dot_dimension_numbers<[1], [0], [0], [1], [0, 0, 1, 1], [], []>} : vector<88x32xbf16>, vector<32x64xbf16>, vector<88x64xf32> -> vector<88x64xf32>
    %735 = vector.broadcast %723 : vector<1x64xf32> to vector<88x64xf32>
    %736 = arith.addf %734, %735 : vector<88x64xf32>
    %737 = vector.extract_strided_slice %736 {offsets = [0, 0], sizes = [88, 32], strides = [1, 1]} : vector<88x64xf32> to vector<88x32xf32>
    %738 = vector.extract_strided_slice %736 {offsets = [0, 32], sizes = [88, 32], strides = [1, 1]} : vector<88x64xf32> to vector<88x32xf32>
    %cst_218 = arith.constant 0.353553385 : f32
    %739 = vector.broadcast %cst_218 : f32 to vector<16x32xf32>
    %740 = arith.mulf %731, %739 : vector<16x32xf32>
    %741 = arith.truncf %740 : vector<16x32xf32> to vector<16x32xbf16>
    %742 = arith.truncf %737 : vector<88x32xf32> to vector<88x32xbf16>
    %743 = arith.truncf %738 : vector<88x32xf32> to vector<88x32xbf16>
    %744 = vector.extract_strided_slice %741 {offsets = [0, 0], sizes = [16, 8], strides = [1, 1]} : vector<16x32xbf16> to vector<16x8xbf16>
    %745 = vector.extract_strided_slice %742 {offsets = [0, 0], sizes = [88, 8], strides = [1, 1]} : vector<88x32xbf16> to vector<88x8xbf16>
    %cst_219 = arith.constant dense<0.000000e+00> : vector<16x88xf32>
    %746 = tpu.matmul %744, %745, %cst_219 {dimension_numbers = #tpu.dot_dimension_numbers<[1], [1], [0], [0], [0, 0, 1, 0], [], []>} : vector<16x8xbf16>, vector<88x8xbf16>, vector<16x88xf32> -> vector<16x88xf32>
    %cst_220 = arith.constant dense<0xFF800000> : vector<16xf32>
    %747 = vector.multi_reduction <maximumf>, %746, %cst_220 [1] : vector<16x88xf32> to vector<16xf32>
    %748 = vector.shape_cast %747 : vector<16xf32> to vector<16x1xf32>
    %749 = vector.broadcast %748 : vector<16x1xf32> to vector<16x88xf32>
    %750 = arith.subf %746, %749 : vector<16x88xf32>
    %751 = math.exp %750 : vector<16x88xf32>
    %cst_221 = arith.constant dense<0.000000e+00> : vector<16xf32>
    %752 = vector.multi_reduction <add>, %751, %cst_221 [1] : vector<16x88xf32> to vector<16xf32>
    %753 = vector.shape_cast %752 : vector<16xf32> to vector<16x1xf32>
    %754 = tpu.reciprocal %753 {approx = true} : vector<16x1xf32> -> vector<16x1xf32>
    %755 = vector.broadcast %754 : vector<16x1xf32> to vector<16x88xf32>
    %756 = arith.mulf %751, %755 : vector<16x88xf32>
    %757 = arith.truncf %756 : vector<16x88xf32> to vector<16x88xbf16>
    %758 = vector.extract_strided_slice %743 {offsets = [0, 0], sizes = [88, 8], strides = [1, 1]} : vector<88x32xbf16> to vector<88x8xbf16>
    %cst_222 = arith.constant dense<0.000000e+00> : vector<16x8xf32>
    %759 = tpu.matmul %757, %758, %cst_222 {dimension_numbers = #tpu.dot_dimension_numbers<[1], [0], [0], [1], [0, 0, 1, 1], [], []>} : vector<16x88xbf16>, vector<88x8xbf16>, vector<16x8xf32> -> vector<16x8xf32>
    %760 = vector.extract_strided_slice %741 {offsets = [0, 8], sizes = [16, 8], strides = [1, 1]} : vector<16x32xbf16> to vector<16x8xbf16>
    %761 = vector.extract_strided_slice %742 {offsets = [0, 8], sizes = [88, 8], strides = [1, 1]} : vector<88x32xbf16> to vector<88x8xbf16>
    %cst_223 = arith.constant dense<0.000000e+00> : vector<16x88xf32>
    %762 = tpu.matmul %760, %761, %cst_223 {dimension_numbers = #tpu.dot_dimension_numbers<[1], [1], [0], [0], [0, 0, 1, 0], [], []>} : vector<16x8xbf16>, vector<88x8xbf16>, vector<16x88xf32> -> vector<16x88xf32>
    %cst_224 = arith.constant dense<0xFF800000> : vector<16xf32>
    %763 = vector.multi_reduction <maximumf>, %762, %cst_224 [1] : vector<16x88xf32> to vector<16xf32>
    %764 = vector.shape_cast %763 : vector<16xf32> to vector<16x1xf32>
    %765 = vector.broadcast %764 : vector<16x1xf32> to vector<16x88xf32>
    %766 = arith.subf %762, %765 : vector<16x88xf32>
    %767 = math.exp %766 : vector<16x88xf32>
    %cst_225 = arith.constant dense<0.000000e+00> : vector<16xf32>
    %768 = vector.multi_reduction <add>, %767, %cst_225 [1] : vector<16x88xf32> to vector<16xf32>
    %769 = vector.shape_cast %768 : vector<16xf32> to vector<16x1xf32>
    %770 = tpu.reciprocal %769 {approx = true} : vector<16x1xf32> -> vector<16x1xf32>
    %771 = vector.broadcast %770 : vector<16x1xf32> to vector<16x88xf32>
    %772 = arith.mulf %767, %771 : vector<16x88xf32>
    %773 = arith.truncf %772 : vector<16x88xf32> to vector<16x88xbf16>
    %774 = vector.extract_strided_slice %743 {offsets = [0, 8], sizes = [88, 8], strides = [1, 1]} : vector<88x32xbf16> to vector<88x8xbf16>
    %cst_226 = arith.constant dense<0.000000e+00> : vector<16x8xf32>
    %775 = tpu.matmul %773, %774, %cst_226 {dimension_numbers = #tpu.dot_dimension_numbers<[1], [0], [0], [1], [0, 0, 1, 1], [], []>} : vector<16x88xbf16>, vector<88x8xbf16>, vector<16x8xf32> -> vector<16x8xf32>
    %776 = vector.extract_strided_slice %741 {offsets = [0, 16], sizes = [16, 8], strides = [1, 1]} : vector<16x32xbf16> to vector<16x8xbf16>
    %777 = vector.extract_strided_slice %742 {offsets = [0, 16], sizes = [88, 8], strides = [1, 1]} : vector<88x32xbf16> to vector<88x8xbf16>
    %cst_227 = arith.constant dense<0.000000e+00> : vector<16x88xf32>
    %778 = tpu.matmul %776, %777, %cst_227 {dimension_numbers = #tpu.dot_dimension_numbers<[1], [1], [0], [0], [0, 0, 1, 0], [], []>} : vector<16x8xbf16>, vector<88x8xbf16>, vector<16x88xf32> -> vector<16x88xf32>
    %cst_228 = arith.constant dense<0xFF800000> : vector<16xf32>
    %779 = vector.multi_reduction <maximumf>, %778, %cst_228 [1] : vector<16x88xf32> to vector<16xf32>
    %780 = vector.shape_cast %779 : vector<16xf32> to vector<16x1xf32>
    %781 = vector.broadcast %780 : vector<16x1xf32> to vector<16x88xf32>
    %782 = arith.subf %778, %781 : vector<16x88xf32>
    %783 = math.exp %782 : vector<16x88xf32>
    %cst_229 = arith.constant dense<0.000000e+00> : vector<16xf32>
    %784 = vector.multi_reduction <add>, %783, %cst_229 [1] : vector<16x88xf32> to vector<16xf32>
    %785 = vector.shape_cast %784 : vector<16xf32> to vector<16x1xf32>
    %786 = tpu.reciprocal %785 {approx = true} : vector<16x1xf32> -> vector<16x1xf32>
    %787 = vector.broadcast %786 : vector<16x1xf32> to vector<16x88xf32>
    %788 = arith.mulf %783, %787 : vector<16x88xf32>
    %789 = arith.truncf %788 : vector<16x88xf32> to vector<16x88xbf16>
    %790 = vector.extract_strided_slice %743 {offsets = [0, 16], sizes = [88, 8], strides = [1, 1]} : vector<88x32xbf16> to vector<88x8xbf16>
    %cst_230 = arith.constant dense<0.000000e+00> : vector<16x8xf32>
    %791 = tpu.matmul %789, %790, %cst_230 {dimension_numbers = #tpu.dot_dimension_numbers<[1], [0], [0], [1], [0, 0, 1, 1], [], []>} : vector<16x88xbf16>, vector<88x8xbf16>, vector<16x8xf32> -> vector<16x8xf32>
    %792 = vector.extract_strided_slice %741 {offsets = [0, 24], sizes = [16, 8], strides = [1, 1]} : vector<16x32xbf16> to vector<16x8xbf16>
    %793 = vector.extract_strided_slice %742 {offsets = [0, 24], sizes = [88, 8], strides = [1, 1]} : vector<88x32xbf16> to vector<88x8xbf16>
    %cst_231 = arith.constant dense<0.000000e+00> : vector<16x88xf32>
    %794 = tpu.matmul %792, %793, %cst_231 {dimension_numbers = #tpu.dot_dimension_numbers<[1], [1], [0], [0], [0, 0, 1, 0], [], []>} : vector<16x8xbf16>, vector<88x8xbf16>, vector<16x88xf32> -> vector<16x88xf32>
    %cst_232 = arith.constant dense<0xFF800000> : vector<16xf32>
    %795 = vector.multi_reduction <maximumf>, %794, %cst_232 [1] : vector<16x88xf32> to vector<16xf32>
    %796 = vector.shape_cast %795 : vector<16xf32> to vector<16x1xf32>
    %797 = vector.broadcast %796 : vector<16x1xf32> to vector<16x88xf32>
    %798 = arith.subf %794, %797 : vector<16x88xf32>
    %799 = math.exp %798 : vector<16x88xf32>
    %cst_233 = arith.constant dense<0.000000e+00> : vector<16xf32>
    %800 = vector.multi_reduction <add>, %799, %cst_233 [1] : vector<16x88xf32> to vector<16xf32>
    %801 = vector.shape_cast %800 : vector<16xf32> to vector<16x1xf32>
    %802 = tpu.reciprocal %801 {approx = true} : vector<16x1xf32> -> vector<16x1xf32>
    %803 = vector.broadcast %802 : vector<16x1xf32> to vector<16x88xf32>
    %804 = arith.mulf %799, %803 : vector<16x88xf32>
    %805 = arith.truncf %804 : vector<16x88xf32> to vector<16x88xbf16>
    %806 = vector.extract_strided_slice %743 {offsets = [0, 24], sizes = [88, 8], strides = [1, 1]} : vector<88x32xbf16> to vector<88x8xbf16>
    %cst_234 = arith.constant dense<0.000000e+00> : vector<16x8xf32>
    %807 = tpu.matmul %805, %806, %cst_234 {dimension_numbers = #tpu.dot_dimension_numbers<[1], [0], [0], [1], [0, 0, 1, 1], [], []>} : vector<16x88xbf16>, vector<88x8xbf16>, vector<16x8xf32> -> vector<16x8xf32>
    %808 = tpu.concatenate %759, %775, %791, %807 in 1 : vector<16x8xf32>, vector<16x8xf32>, vector<16x8xf32>, vector<16x8xf32> -> vector<16x32xf32>
    %809 = arith.truncf %808 : vector<16x32xf32> to vector<16x32xbf16>
    %810 = arith.truncf %725 : vector<32x32xf32> to vector<32x32xbf16>
    %cst_235 = arith.constant dense<0.000000e+00> : vector<16x32xf32>
    %811 = tpu.matmul %809, %810, %cst_235 {dimension_numbers = #tpu.dot_dimension_numbers<[1], [0], [0], [1], [0, 0, 1, 1], [], []>} : vector<16x32xbf16>, vector<32x32xbf16>, vector<16x32xf32> -> vector<16x32xf32>
    %812 = vector.broadcast %726 : vector<1x32xf32> to vector<16x32xf32>
    %813 = arith.addf %811, %812 : vector<16x32xf32>
    %814 = arith.addf %717, %813 : vector<16x32xf32>
    %815 = vector.extract_strided_slice %0 {offsets = [7, 0, 0], sizes = [1, 2, 32], strides = [1, 1, 1]} : vector<9x2x32xf32> to vector<1x2x32xf32>
    %816 = vector.shape_cast %815 : vector<1x2x32xf32> to vector<2x32xf32>
    %cst_236 = arith.constant dense<0.000000e+00> : vector<16xf32>
    %817 = vector.multi_reduction <add>, %814, %cst_236 [1] : vector<16x32xf32> to vector<16xf32>
    %818 = vector.shape_cast %817 : vector<16xf32> to vector<16x1xf32>
    %cst_237 = arith.constant 3.200000e+01 : f32
    %819 = vector.broadcast %cst_237 : f32 to vector<16x1xf32>
    %820 = arith.divf %818, %819 : vector<16x1xf32>
    %821 = vector.broadcast %820 : vector<16x1xf32> to vector<16x32xf32>
    %822 = arith.subf %814, %821 : vector<16x32xf32>
    %823 = arith.mulf %822, %822 : vector<16x32xf32>
    %cst_238 = arith.constant dense<0.000000e+00> : vector<16xf32>
    %824 = vector.multi_reduction <add>, %823, %cst_238 [1] : vector<16x32xf32> to vector<16xf32>
    %825 = vector.shape_cast %824 : vector<16xf32> to vector<16x1xf32>
    %cst_239 = arith.constant 3.200000e+01 : f32
    %826 = vector.broadcast %cst_239 : f32 to vector<16x1xf32>
    %827 = arith.divf %825, %826 : vector<16x1xf32>
    %cst_240 = arith.constant 9.99999974E-6 : f32
    %828 = vector.broadcast %cst_240 : f32 to vector<16x1xf32>
    %829 = arith.addf %827, %828 : vector<16x1xf32>
    %830 = math.rsqrt %829 : vector<16x1xf32>
    %831 = vector.broadcast %830 : vector<16x1xf32> to vector<16x32xf32>
    %832 = arith.mulf %822, %831 : vector<16x32xf32>
    %833 = vector.extract_strided_slice %816 {offsets = [0, 0], sizes = [1, 32], strides = [1, 1]} : vector<2x32xf32> to vector<1x32xf32>
    %834 = vector.broadcast %833 : vector<1x32xf32> to vector<16x32xf32>
    %835 = arith.mulf %832, %834 : vector<16x32xf32>
    %836 = vector.extract_strided_slice %816 {offsets = [1, 0], sizes = [1, 32], strides = [1, 1]} : vector<2x32xf32> to vector<1x32xf32>
    %837 = vector.broadcast %836 : vector<1x32xf32> to vector<16x32xf32>
    %838 = arith.addf %835, %837 : vector<16x32xf32>
    %c5_241 = arith.constant 5 : index
    %c0_242 = arith.constant 0 : index
    %c0_243 = arith.constant 0 : index
    %839 = vector.load %arg6[%c5_241, %c0_242, %c0_243] : memref<6x32x64xf32, #tpu.memory_space<vmem>>, vector<1x32x64xf32>
    %840 = vector.shape_cast %839 : vector<1x32x64xf32> to vector<32x64xf32>
    %841 = vector.extract_strided_slice %2 {offsets = [5, 0], sizes = [1, 64], strides = [1, 1]} : vector<6x64xf32> to vector<1x64xf32>
    %c2_244 = arith.constant 2 : index
    %c0_245 = arith.constant 0 : index
    %c0_246 = arith.constant 0 : index
    %842 = vector.load %arg8[%c2_244, %c0_245, %c0_246] : memref<3x64x32xf32, #tpu.memory_space<vmem>>, vector<1x64x32xf32>
    %843 = vector.shape_cast %842 : vector<1x64x32xf32> to vector<64x32xf32>
    %844 = vector.extract_strided_slice %3 {offsets = [12, 0], sizes = [1, 32], strides = [1, 1]} : vector<16x32xf32> to vector<1x32xf32>
    %845 = arith.truncf %838 : vector<16x32xf32> to vector<16x32xbf16>
    %846 = arith.truncf %840 : vector<32x64xf32> to vector<32x64xbf16>
    %cst_247 = arith.constant dense<0.000000e+00> : vector<16x64xf32>
    %847 = tpu.matmul %845, %846, %cst_247 {dimension_numbers = #tpu.dot_dimension_numbers<[1], [0], [0], [1], [0, 0, 1, 1], [], []>} : vector<16x32xbf16>, vector<32x64xbf16>, vector<16x64xf32> -> vector<16x64xf32>
    %848 = vector.broadcast %841 : vector<1x64xf32> to vector<16x64xf32>
    %849 = arith.addf %847, %848 : vector<16x64xf32>
    %cst_248 = arith.constant 0.000000e+00 : f32
    %850 = vector.broadcast %cst_248 : f32 to vector<16x64xf32>
    %851 = arith.maximumf %849, %850 : vector<16x64xf32>
    %852 = arith.truncf %851 : vector<16x64xf32> to vector<16x64xbf16>
    %853 = arith.truncf %843 : vector<64x32xf32> to vector<64x32xbf16>
    %cst_249 = arith.constant dense<0.000000e+00> : vector<16x32xf32>
    %854 = tpu.matmul %852, %853, %cst_249 {dimension_numbers = #tpu.dot_dimension_numbers<[1], [0], [0], [1], [0, 0, 1, 1], [], []>} : vector<16x64xbf16>, vector<64x32xbf16>, vector<16x32xf32> -> vector<16x32xf32>
    %855 = vector.broadcast %844 : vector<1x32xf32> to vector<16x32xf32>
    %856 = arith.addf %854, %855 : vector<16x32xf32>
    %857 = arith.addf %838, %856 : vector<16x32xf32>
    %858 = vector.extract_strided_slice %0 {offsets = [8, 0, 0], sizes = [1, 2, 32], strides = [1, 1, 1]} : vector<9x2x32xf32> to vector<1x2x32xf32>
    %859 = vector.shape_cast %858 : vector<1x2x32xf32> to vector<2x32xf32>
    %cst_250 = arith.constant dense<0.000000e+00> : vector<16xf32>
    %860 = vector.multi_reduction <add>, %857, %cst_250 [1] : vector<16x32xf32> to vector<16xf32>
    %861 = vector.shape_cast %860 : vector<16xf32> to vector<16x1xf32>
    %cst_251 = arith.constant 3.200000e+01 : f32
    %862 = vector.broadcast %cst_251 : f32 to vector<16x1xf32>
    %863 = arith.divf %861, %862 : vector<16x1xf32>
    %864 = vector.broadcast %863 : vector<16x1xf32> to vector<16x32xf32>
    %865 = arith.subf %857, %864 : vector<16x32xf32>
    %866 = arith.mulf %865, %865 : vector<16x32xf32>
    %cst_252 = arith.constant dense<0.000000e+00> : vector<16xf32>
    %867 = vector.multi_reduction <add>, %866, %cst_252 [1] : vector<16x32xf32> to vector<16xf32>
    %868 = vector.shape_cast %867 : vector<16xf32> to vector<16x1xf32>
    %cst_253 = arith.constant 3.200000e+01 : f32
    %869 = vector.broadcast %cst_253 : f32 to vector<16x1xf32>
    %870 = arith.divf %868, %869 : vector<16x1xf32>
    %cst_254 = arith.constant 9.99999974E-6 : f32
    %871 = vector.broadcast %cst_254 : f32 to vector<16x1xf32>
    %872 = arith.addf %870, %871 : vector<16x1xf32>
    %873 = math.rsqrt %872 : vector<16x1xf32>
    %874 = vector.broadcast %873 : vector<16x1xf32> to vector<16x32xf32>
    %875 = arith.mulf %865, %874 : vector<16x32xf32>
    %876 = vector.extract_strided_slice %859 {offsets = [0, 0], sizes = [1, 32], strides = [1, 1]} : vector<2x32xf32> to vector<1x32xf32>
    %877 = vector.broadcast %876 : vector<1x32xf32> to vector<16x32xf32>
    %878 = arith.mulf %875, %877 : vector<16x32xf32>
    %879 = vector.extract_strided_slice %859 {offsets = [1, 0], sizes = [1, 32], strides = [1, 1]} : vector<2x32xf32> to vector<1x32xf32>
    %880 = vector.broadcast %879 : vector<1x32xf32> to vector<16x32xf32>
    %881 = arith.addf %878, %880 : vector<16x32xf32>
    %882 = arith.truncf %881 : vector<16x32xf32> to vector<16x32xbf16>
    %883 = arith.truncf %188 : vector<8x32xf32> to vector<8x32xbf16>
    %cst_255 = arith.constant dense<0.000000e+00> : vector<16x8xf32>
    %884 = tpu.matmul %882, %883, %cst_255 {dimension_numbers = #tpu.dot_dimension_numbers<[1], [1], [0], [0], [0, 0, 1, 0], [], []>} : vector<16x32xbf16>, vector<8x32xbf16>, vector<16x8xf32> -> vector<16x8xf32>
    %cst_256 = arith.constant 5.000000e-01 : f32
    %885 = vector.broadcast %cst_256 : f32 to vector<1x8xf32>
    %886 = arith.cmpf ogt, %5, %885 : vector<1x8xf32>
    %cst_257 = arith.constant 0xFF800000 : f32
    %887 = vector.shape_cast %886 : vector<1x8xi1> to vector<1x8xi1>
    %888 = vector.broadcast %887 : vector<1x8xi1> to vector<16x8xi1>
    %889 = vector.broadcast %cst_257 : f32 to vector<16x8xf32>
    %890 = arith.select %888, %884, %889 : vector<16x8xi1>, vector<16x8xf32>
    %c10 = arith.constant 10 : index
    %c0_258 = arith.constant 0 : index
    %c0_259 = arith.constant 0 : index
    %891 = vector.load %arg7[%c10, %c0_258, %c0_259] : memref<13x32x32xf32, #tpu.memory_space<vmem>>, vector<1x32x32xf32>
    %892 = vector.shape_cast %891 : vector<1x32x32xf32> to vector<32x32xf32>
    %893 = arith.truncf %881 : vector<16x32xf32> to vector<16x32xbf16>
    %894 = arith.truncf %892 : vector<32x32xf32> to vector<32x32xbf16>
    %cst_260 = arith.constant dense<0.000000e+00> : vector<16x32xf32>
    %895 = tpu.matmul %893, %894, %cst_260 {dimension_numbers = #tpu.dot_dimension_numbers<[1], [0], [0], [1], [0, 0, 1, 1], [], []>} : vector<16x32xbf16>, vector<32x32xbf16>, vector<16x32xf32> -> vector<16x32xf32>
    %896 = vector.extract_strided_slice %3 {offsets = [13, 0], sizes = [1, 32], strides = [1, 1]} : vector<16x32xf32> to vector<1x32xf32>
    %897 = vector.broadcast %896 : vector<1x32xf32> to vector<16x32xf32>
    %898 = arith.addf %895, %897 : vector<16x32xf32>
    %cst_261 = arith.constant 0.000000e+00 : f32
    %899 = vector.broadcast %cst_261 : f32 to vector<16x32xf32>
    %900 = arith.maximumf %898, %899 : vector<16x32xf32>
    %c11 = arith.constant 11 : index
    %c0_262 = arith.constant 0 : index
    %c0_263 = arith.constant 0 : index
    %901 = vector.load %arg7[%c11, %c0_262, %c0_263] : memref<13x32x32xf32, #tpu.memory_space<vmem>>, vector<1x32x32xf32>
    %902 = vector.shape_cast %901 : vector<1x32x32xf32> to vector<32x32xf32>
    %903 = arith.truncf %900 : vector<16x32xf32> to vector<16x32xbf16>
    %904 = arith.truncf %902 : vector<32x32xf32> to vector<32x32xbf16>
    %cst_264 = arith.constant dense<0.000000e+00> : vector<16x32xf32>
    %905 = tpu.matmul %903, %904, %cst_264 {dimension_numbers = #tpu.dot_dimension_numbers<[1], [0], [0], [1], [0, 0, 1, 1], [], []>} : vector<16x32xbf16>, vector<32x32xbf16>, vector<16x32xf32> -> vector<16x32xf32>
    %906 = vector.extract_strided_slice %3 {offsets = [14, 0], sizes = [1, 32], strides = [1, 1]} : vector<16x32xf32> to vector<1x32xf32>
    %907 = vector.broadcast %906 : vector<1x32xf32> to vector<16x32xf32>
    %908 = arith.addf %905, %907 : vector<16x32xf32>
    %cst_265 = arith.constant 0.000000e+00 : f32
    %909 = vector.broadcast %cst_265 : f32 to vector<16x32xf32>
    %910 = arith.maximumf %908, %909 : vector<16x32xf32>
    %c12 = arith.constant 12 : index
    %c0_266 = arith.constant 0 : index
    %c0_267 = arith.constant 0 : index
    %911 = vector.load %arg7[%c12, %c0_266, %c0_267] : memref<13x32x32xf32, #tpu.memory_space<vmem>>, vector<1x32x32xf32>
    %912 = vector.shape_cast %911 : vector<1x32x32xf32> to vector<32x32xf32>
    %913 = arith.truncf %910 : vector<16x32xf32> to vector<16x32xbf16>
    %914 = arith.truncf %912 : vector<32x32xf32> to vector<32x32xbf16>
    %cst_268 = arith.constant dense<0.000000e+00> : vector<16x32xf32>
    %915 = tpu.matmul %913, %914, %cst_268 {dimension_numbers = #tpu.dot_dimension_numbers<[1], [0], [0], [1], [0, 0, 1, 1], [], []>} : vector<16x32xbf16>, vector<32x32xbf16>, vector<16x32xf32> -> vector<16x32xf32>
    %916 = vector.extract_strided_slice %3 {offsets = [15, 0], sizes = [1, 32], strides = [1, 1]} : vector<16x32xf32> to vector<1x32xf32>
    %917 = vector.broadcast %916 : vector<1x32xf32> to vector<16x32xf32>
    %918 = arith.addf %915, %917 : vector<16x32xf32>
    %919 = vector.extract_strided_slice %918 {offsets = [0, 0], sizes = [16, 4], strides = [1, 1]} : vector<16x32xf32> to vector<16x4xf32>
    %c1_269 = arith.constant 1 : index
    %c0_270 = arith.constant 0 : index
    %c0_271 = arith.constant 0 : index
    %920 = vector.load %arg13[%c1_269, %c0_270, %c0_271] : memref<2x16x32xf32, #tpu.memory_space<vmem>>, vector<1x16x32xf32>
    %921 = vector.shape_cast %920 : vector<1x16x32xf32> to vector<16x32xf32>
    %922 = vector.extract_strided_slice %921 {offsets = [0, 0], sizes = [16, 4], strides = [1, 1]} : vector<16x32xf32> to vector<16x4xf32>
    %923 = arith.addf %919, %922 : vector<16x4xf32>
    %cst_272 = arith.constant 0.000000e+00 : f32
    %924 = vector.broadcast %cst_272 : f32 to vector<16x4xf32>
    %925 = arith.subf %924, %923 : vector<16x4xf32>
    %926 = math.exp %925 : vector<16x4xf32>
    %cst_273 = arith.constant 1.000000e+00 : f32
    %927 = vector.broadcast %cst_273 : f32 to vector<16x4xf32>
    %928 = arith.addf %927, %926 : vector<16x4xf32>
    %cst_274 = arith.constant 1.000000e+00 : f32
    %929 = vector.broadcast %cst_274 : f32 to vector<16x4xf32>
    %930 = arith.divf %929, %928 : vector<16x4xf32>
    %cst_275 = arith.constant 0.000000e+00 : f32
    %931 = vector.broadcast %cst_275 : f32 to vector<16x116xf32>
    %932 = tpu.concatenate %890, %930, %931 in 1 : vector<16x8xf32>, vector<16x4xf32>, vector<16x116xf32> -> vector<16x128xf32>
    %c0_276 = arith.constant 0 : index
    %c0_277 = arith.constant 0 : index
    %c0_278 = arith.constant 0 : index
    %933 = vector.load %arg14[%c0_276, %c0_277, %c0_278] : memref<1x16x128xf32, #tpu.memory_space<vmem>>, vector<1x16x128xf32>
    %934 = vector.shape_cast %933 : vector<1x16x128xf32> to vector<16x128xf32>
    %935 = vector.shape_cast %932 : vector<16x128xf32> to vector<1x16x128xf32>
    tpu.vector_store %arg14[%c0_276, %c0_277, %c0_278], %935 {strides = array<i32>} : memref<1x16x128xf32, #tpu.memory_space<vmem>>, vector<1x16x128xf32>,
    return
  }
  func.func @transform_0(%arg0: i32) -> (i32, i32, i32, i32) {
    %c0_i32 = arith.constant 0 : i32
    %c0_i32_0 = arith.constant 0 : i32
    %c0_i32_1 = arith.constant 0 : i32
    %c0_i32_2 = arith.constant 0 : i32
    return %arg0, %c0_i32, %c0_i32_0, %c0_i32_1 : i32, i32, i32, i32
  }
  func.func @transform_1(%arg0: i32) -> (i32, i32, i32) {
    %c0_i32 = arith.constant 0 : i32
    %c0_i32_0 = arith.constant 0 : i32
    %c0_i32_1 = arith.constant 0 : i32
    return %arg0, %c0_i32, %c0_i32_0 : i32, i32, i32
  }
  func.func @transform_2(%arg0: i32) -> (i32, i32, i32) {
    %c0_i32 = arith.constant 0 : i32
    %c0_i32_0 = arith.constant 0 : i32
    %c0_i32_1 = arith.constant 0 : i32
    return %arg0, %c0_i32, %c0_i32_0 : i32, i32, i32
  }
  func.func @transform_3(%arg0: i32) -> (i32, i32, i32) {
    %c0_i32 = arith.constant 0 : i32
    %c0_i32_0 = arith.constant 0 : i32
    %c0_i32_1 = arith.constant 0 : i32
    return %arg0, %c0_i32, %c0_i32_0 : i32, i32, i32
  }
  func.func @transform_4(%arg0: i32) -> (i32, i32, i32) {
    %c0_i32 = arith.constant 0 : i32
    %c0_i32_0 = arith.constant 0 : i32
    %c0_i32_1 = arith.constant 0 : i32
    %c0_i32_2 = arith.constant 0 : i32
    return %c0_i32, %c0_i32_0, %c0_i32_1 : i32, i32, i32
  }
  func.func @transform_5(%arg0: i32) -> (i32, i32, i32) {
    %c0_i32 = arith.constant 0 : i32
    %c0_i32_0 = arith.constant 0 : i32
    %c0_i32_1 = arith.constant 0 : i32
    %c0_i32_2 = arith.constant 0 : i32
    return %c0_i32, %c0_i32_0, %c0_i32_1 : i32, i32, i32
  }
  func.func @transform_6(%arg0: i32) -> (i32, i32, i32) {
    %c0_i32 = arith.constant 0 : i32
    %c0_i32_0 = arith.constant 0 : i32
    %c0_i32_1 = arith.constant 0 : i32
    %c0_i32_2 = arith.constant 0 : i32
    return %c0_i32, %c0_i32_0, %c0_i32_1 : i32, i32, i32
  }
  func.func @transform_7(%arg0: i32) -> (i32, i32, i32) {
    %c0_i32 = arith.constant 0 : i32
    %c0_i32_0 = arith.constant 0 : i32
    %c0_i32_1 = arith.constant 0 : i32
    %c0_i32_2 = arith.constant 0 : i32
    return %c0_i32, %c0_i32_0, %c0_i32_1 : i32, i32, i32
  }
  func.func @transform_8(%arg0: i32) -> (i32, i32, i32) {
    %c0_i32 = arith.constant 0 : i32
    %c0_i32_0 = arith.constant 0 : i32
    %c0_i32_1 = arith.constant 0 : i32
    %c0_i32_2 = arith.constant 0 : i32
    return %c0_i32, %c0_i32_0, %c0_i32_1 : i32, i32, i32
  }
  func.func @transform_9(%arg0: i32) -> (i32, i32) {
    %c0_i32 = arith.constant 0 : i32
    %c0_i32_0 = arith.constant 0 : i32
    %c0_i32_1 = arith.constant 0 : i32
    return %c0_i32, %c0_i32_0 : i32, i32
  }
  func.func @transform_10(%arg0: i32) -> (i32, i32) {
    %c0_i32 = arith.constant 0 : i32
    %c0_i32_0 = arith.constant 0 : i32
    %c0_i32_1 = arith.constant 0 : i32
    return %c0_i32, %c0_i32_0 : i32, i32
  }
  func.func @transform_11(%arg0: i32) -> (i32, i32) {
    %c0_i32 = arith.constant 0 : i32
    %c0_i32_0 = arith.constant 0 : i32
    %c0_i32_1 = arith.constant 0 : i32
    return %c0_i32, %c0_i32_0 : i32, i32
  }
  func.func @transform_12(%arg0: i32) -> (i32, i32, i32) {
    %c0_i32 = arith.constant 0 : i32
    %c0_i32_0 = arith.constant 0 : i32
    %c0_i32_1 = arith.constant 0 : i32
    %c0_i32_2 = arith.constant 0 : i32
    return %c0_i32, %c0_i32_0, %c0_i32_1 : i32, i32, i32
  }
  func.func @transform_13(%arg0: i32) -> (i32, i32, i32) {
    %c0_i32 = arith.constant 0 : i32
    %c0_i32_0 = arith.constant 0 : i32
    %c0_i32_1 = arith.constant 0 : i32
    return %arg0, %c0_i32, %c0_i32_0 : i32, i32, i32
  }
}

</mosaic_0001>

<bundles_post_ra>
// kernel: forward.1
= control target key start
LH: loop header
LB: loop body
LE: loop exit
PB: predicated region body
PF: predicated region fallthrough
CT: control target
= control target key end

     0   :  { %s8043_s25 = smov 0   ;;  %s11563_s0 = inlined_call_operand.vmem [shape: f32[2,2,8,32], index: 0, kind: input, shape index: {}]   ;;  %s11564_s1 = inlined_call_operand.vmem [shape: f32[2,88,32], index: 1, kind: input, shape index: {}]   ;;  %s11565_s2 = inlined_call_operand.vmem [shape: f32[2,8,8], index: 2, kind: input, shape index: {}]   ;;  %s11566_s3 = inlined_call_operand.vmem [shape: f32[2,1,8], index: 3, kind: input, shape index: {}]   ;;  %s11567_s4 = inlined_call_operand.vmem [shape: f32[3,32,96], index: 4, kind: input, shape index: {}]   ;;  %s11568_s5 = inlined_call_operand.vmem [shape: f32[6,32,64], index: 5, kind: input, shape index: {}]   ;;  %s11569_s6 = inlined_call_operand.vmem [shape: f32[13,32,32], index: 6, kind: input, shape index: {}]   ;;  %s11570_s7 = inlined_call_operand.vmem [shape: f32[3,64,32], index: 7, kind: input, shape index: {}]   ;;  %s11571_s8 = inlined_call_operand.vmem [shape: f32[9,2,32], index: 8, kind: input, shape index: {}]   ;;  %s11572_s9 = inlined_call_operand.vmem [shape: f32[3,96], index: 9, kind: input, shape index: {}]   ;;  %s11573_s10 = inlined_call_operand.vmem [shape: f32[6,64], index: 10, kind: input, shape index: {}]   ;;  %s11574_s11 = inlined_call_operand.vmem [shape: f32[16,32], index: 11, kind: input, shape index: {}]   ;;  %s11575_s12 = inlined_call_operand.vmem [shape: f32[2,16,32], index: 12, kind: input, shape index: {}]   ;;  %s11576_s13 = inlined_call_operand.vmem [shape: f32[2,16,128], index: 13, kind: output, shape index: {}]  }
   0x1   :  { %11626 = sst [smem:[#allocation19_spill]] %s11563_s0 }
   0x2   :  { %11627 = sst [smem:[#allocation20_spill]] %s11564_s1 }
   0x3   :  { %11628 = sst [smem:[#allocation21_spill]] %s11565_s2 }
   0x4   :  { %11629 = sst [smem:[#allocation22_spill]] %s11566_s3 }
   0x5 LB: > { %11630 = sst [smem:[#allocation2_spill]] %s7954_s25  ;;  %s6848_s26 = sadd.s32 4294967295, %s7954_s25   ;;  %s7954_s25 = sphi %s8043_s25, %s23_s25  }
   0x6   : > { %p6852_p0 = scmp.ge.s32.totalorder %s7954_s25, 1  ;;  %p414_p1 = scmp.lt.s32.totalorder %s7954_s25, 3 }
   0x8   : > { %p415_p2 = pnand %p6852_p0, %p414_p1 }
   0xa   : > { %418 = sbr.rel (%p415_p2) target bundleno = 10507 (0x290b), region = 72 }
   0xf   : > { %v513_v0 = vld [vmem:[%s11569_s6 + $0x10] sm:$0xff]  ;;  %v514_v1 = vld [vmem:[%s11569_s6 + $0x18] sm:$0xff]  ;;  %v511_v2 = vld [vmem:[%s11569_s6] sm:$0xff]  ;;  %p470_p3 = scmp.lt.s32.totalorder %s6848_s26, 1  ;;  %s11631_s0 = sld [smem:[#allocation19_spill]]  ;;  %vm519_vm0 = vcmask 261120  }
  0x10   : > { %v517_v3 = vpack.c.bf16 %v514_v1, %v513_v0  ;;  %v512_v4 = vld [vmem:[%s11569_s6 + $0x8] sm:$0xff]  ;;  %v539_v8 = vld [vmem:[%s11567_s4 + $0x10] sm:$0xff]  ;;  %v540_v9 = vld [vmem:[%s11567_s4 + $0x18] sm:$0xff]  ;;  %s11621_s20 = smov 88   ;;  %s11603_s22 = smov 120   ;;  %vm575_vm1 = vcmask 64512  }
  0x11   : > { %s11684_s26 = smov (!%p470_p3, %s6848_s26), 1  ;;  %v516_v5 = vpack.c.bf16 %v512_v4, %v511_v2  ;;  %v549_v10 = vpack.c.bf16 %v540_v9, %v539_v8  ;;  %v537_v11 = vld [vmem:[%s11567_s4] sm:$0xff]  ;;  %v538_v12 = vld [vmem:[%s11567_s4 + $0x8] sm:$0xff]  ;;  %s11594_s23 = smov 80   ;;  %vm612_vm2 = vcmask 1043456   ;;  %vm813_vm3 = vcmask 130048  }
  0x12   : > { %529 = vmatpush.bf16.msra.mxu0 %v517_v3  ;;  %s11577_s18 = sshll.u32 %s11684_s26, 4  ;;  %v548_v13 = vpack.c.bf16 %v538_v12, %v537_v11  ;;  %v8087_v14 = vld [vmem:[%s11574_s11] sm:$0xff]  ;;  %s11590_s24 = smov 72   ;;  %vm815_vm4 = vcmask 195584   ;;  %vm911_vm9 = vcmask 523264  }
  0x13   : > { %560 = vmatpush.bf16.msra.mxu1 %v549_v10  ;;  %v518_v15 = vperm.slane %v8087_v14, 0  ;;  %v502_v22 = vld [vmem:[%s11572_s9] sm:$0x7]  ;;  %s11599_s27 = smov 112   ;;  %s6856_s28 = sshll.u32 %s11684_s26, 3 }
  0x14   : > { %v550_v23 = vperm.slane %v502_v22, 0  ;;  %s11632_s2 = sld [smem:[#allocation21_spill]]  ;;  %s11582_s15 = smov 64  }
  0x15   : > { %s474_s21 = scalar_lea.vmem %s11631_s0, %s11577_s18  ;;  %s11601_s16 = smov 104  }
  0x16   : > { %v509_v6 = vld [vmem:[%s474_s21] sm:$0xff]  ;;  %530 = vmatpush.bf16.msra.mxu0 %v516_v5  ;;  %v510_v16 = vld [vmem:[%s474_s21 + $0x8] sm:$0xff]  ;;  %s11623_s21 = smov 96   ;;  %s11580_s17 = smov 40  }
  0x17   : > { %v515_v7 = vpack.c.bf16 %v509_v6, %v509_v6  ;;  %561 = vmatpush.bf16.msra.mxu1 %v548_v13  ;;  %s11584_s19 = smov 56   ;;  %s11586_s29 = smov 8  }
  0x18   : > { %s11588_s30 = smov 16   ;;  %s7146_s18 = smul.u32 88, %s11684_s26 }
  0x19   : > { %6859 = vmatmul.msk.bf16.vlgmr.msra.gmra.mxu0 %vm519_vm0, %v515_v7  ;;  %s11634_s1 = sld [smem:[#allocation20_spill]] }
  0x1a   : > { %s483_s14 = scalar_lea.vmem %s11632_s2, %s6856_s28  ;;  %s11578_s28 = smov 48  }
  0x1b   : > { %v546_v43 = vld [vmem:[%s483_s14] sm:$0xff]  ;;  %s11592_s14 = smov 24   ;;  %s11636_s3 = sld [smem:[#allocation22_spill]] }
  0x96   : > { %v532_v17 = vpop.f32.mrf.mxu0 }
  0x97   : > { %v533_v18 = vadd.f32 %v532_v17, %v518_v15 }
  0x99   : > { %v8090_v19 = vadd.f32 %v533_v18, %v510_v16 }
  0x9b   : > { %v547_v20 = vpack.c.bf16 %v8090_v19, %v8090_v19 }
  0x9d   : > { %6864 = vmatmul.msk.bf16.vlgmr.msra.gmra.mxu1 %vm519_vm0, %v547_v20 }
  0x9e   : > { %v534_v21 = vpop.f32.mrf.mxu0 }
 0x11a   : > { %v563_v24 = vpop.f32.mrf.mxu1 }
 0x11b   : > { %v564_v25 = vadd.f32 %v563_v24, %v550_v23 }
 0x11d   : > { %v567_v26 = vmul.f32 0.35355338, %v564_v25  ;;  %v569_v27 = vpack.c.bf16 %v564_v25, %v564_v25 }
 0x11f   : > { %v571_v28 = vunpack.c.l.b16 %v569_v27  ;;  %v568_v29 = vpack.c.bf16 %v567_v26, %v567_v26 }
 0x121   : > { %v8098_v30 = vpack.c.b16 %v571_v28, %v571_v28  ;;  %v630_v32 = vunpack.c.l.b16 %v568_v29 }
 0x122   : > { %v565_v31 = vpop.f32.mrf.mxu1 }
 0x123   : > { %634 = vrot.lane.b32.xlu2 %v8098_v30, %s11621_s20  ;;  %573 = vrot.lane.b32.xlu0 %v8098_v30, %s11623_s21  ;;  %v631_v33 = vpack.c.b16 %v630_v32, %v630_v32 }
 0x12b   : > { %632 = vrot.lane.b32.xlu2 %v631_v33, %s11603_s22 }
 0x133   : > { %690 = vrot.lane.b32.xlu2 %v8098_v30, %s11594_s23  ;;  %s11639_s23 = smov 80  }
 0x13b   : > { %746 = vrot.lane.b32.xlu2 %v8098_v30, %s11590_s24  ;;  %s11642_s24 = smov 16  }
 0x143   : > { %688 = vrot.lane.b32.xlu2 %v631_v33, %s11599_s27 }
 0x17d   : > { %v635_v34 = vpop.permute.xlu2 %634 }
 0x17e   : > { %v640_v61 = vsel %vm575_vm1, %v635_v34, 0 }
 0x185   : > { %v633_v35 = vpop.permute.xlu2 %632 }
 0x18d   : > { %v691_v36 = vpop.permute.xlu2 %690 }
 0x18e   : > { %v696_v37 = vsel %vm575_vm1, %v691_v36, 0 }
 0x18f   : > { %705 = vmatpush.bf16.xpose.msrb.mxu1 %v696_v37 }
 0x195   : > { %v574_v38 = vpop.permute.xlu0 %573  ;;  %v747_v39 = vpop.permute.xlu2 %746 }
 0x196   : > { %v580_v40 = vsel %vm575_vm1, %v574_v38, 0  ;;  %v752_v63 = vsel %vm575_vm1, %v747_v39, 0 }
 0x197   : > { %589 = vmatpush.bf16.xpose.msra.mxu2 %v580_v40 }
 0x19d   : > { %v689_v41 = vpop.permute.xlu2 %688 }
 0x19e   : > { %6865 = vmatmul.msk.bf16.vlgmr.msra.gmra.mxu2 %vm575_vm1, %v568_v29  ;;  %6869 = vmatmul.msk.bf16.vlgmr.msrb.gmra.mxu1 %vm575_vm1, %v689_v41 }
 0x21b   : > { %v707_v42 = vpop.f32.mrf.mxu1 }
 0x21c   : > { %v708_v54 = vadd.f32 %v707_v42, %v546_v43 }
 0x21e   : > { %v711_v55 = vsel %vm575_vm1, %v708_v54, -inf }
 0x221   : > { %v591_v44 = vpop.f32.mrf.mxu2 }
 0x222   : > { %v592_v45 = vadd.f32 %v591_v44, %v546_v43 }
 0x223   : > { %v709_v46 = vpop.f32.mrf.mxu1 }
 0x224   : > { %v595_v47 = vsel %vm575_vm1, %v592_v45, -inf }
 0x225   : > { %596 = vmax.xlane.f32.xlu0 %v595_v47 }
 0x229   : > { %v593_v48 = vpop.f32.mrf.mxu2 }
 0x298   : > { %v597_v49 = vpop.xlane.xlu0 %596 }
 0x299   : > { %v598_v50 = vsub.f32 %v592_v45, %v597_v49 }
 0x29b   : > { %v599_v51 = vmul.f32 1.442695, %v598_v50 }
 0x29d   : > { %7367 = vpow2.f32 %v599_v51 }
 0x2a3   : > { %v7368_v52 = vpop.eup %7367 }
 0x2a4   : > { %v601_v53 = vsel %vm575_vm1, %v7368_v52, 0.0 }
 0x2a5   : > { %602 = vadd.xlane.f32.xlu1 %v601_v53  ;;  %v6863_v53 = vld [vmem:[%s11569_s6 + $0x38] sm:$0xff] }
 0x2be   : > { %607 = vrot.lane.b32.xlu1 %v8098_v30, %s11582_s15  ;;  %s11643_s15 = smov 24  }
 0x2c6   : > { %744 = vrot.lane.b32.xlu1 %v631_v33, %s11601_s16 }
 0x2f0   : > { %712 = vmax.xlane.f32.xlu1 %v711_v55  ;;  %v6860_v55 = vld [vmem:[%s11569_s6 + $0x20] sm:$0xff] }
 0x318   : > { %v603_v56 = vpop.xlane.xlu1 %602 }
 0x319   : > { %7369 = vrcp.f32 %v603_v56  ;;  %v6861_v56 = vld [vmem:[%s11569_s6 + $0x28] sm:$0xff] }
 0x31f   : > { %v7370_v57 = vpop.eup %7369 }
 0x320   : > { %v605_v58 = vmul.f32 %v7370_v57, %v7368_v52  ;;  %v6862_v52 = vld [vmem:[%s11569_s6 + $0x30] sm:$0xff]  ;;  %v818_v57 = vpack.c.bf16 %v6861_v56, %v6860_v55  ;;  %v8220_v55 = vld [vmem:[%s11573_s10] sm:$0x3f] }
 0x321   : > { %v887_v56 = vperm.slane %v8220_v55, 3 }
 0x322   : > { %v606_v62 = vpack.c.bf16 %v605_v58, %v605_v58 }
 0x330   : > { %v608_v59 = vpop.permute.xlu1 %607 }
 0x331   : > { %v614_v60 = vsel %vm612_vm2, %v608_v59, 0 }
 0x332   : > { %623 = vmatpush.bf16.msra.mxu3 %v614_v60 }
 0x335   : > { %6866 = vmatmul.msk.bf16.vlgmr.msra.gmra.mxu3 %vm575_vm1, %v606_v62 }
 0x336   : > { %649 = vmatpush.bf16.xpose.msrb.mxu3 %v640_v61 }
 0x338   : > { %v745_v0 = vpop.permute.xlu1 %744 }
 0x33e   : > { %761 = vmatpush.bf16.xpose.msra.mxu3 %v752_v63 }
 0x345   : > { %6867 = vmatmul.msk.bf16.vlgmr.msrb.gmra.mxu3 %vm575_vm1, %v633_v35 }
 0x355   : > { %6871 = vmatmul.msk.bf16.vlgmr.msra.gmra.mxu3 %vm575_vm1, %v745_v0 }
 0x363   : > { %v713_v2 = vpop.xlane.xlu1 %712 }
 0x364   : > { %v714_v4 = vsub.f32 %v708_v54, %v713_v2  ;;  %v819_v54 = vpack.c.bf16 %v6863_v53, %v6862_v52  ;;  %v820_v2 = vperm.slane %v8087_v14, 1  ;;  %v876_v52 = vld [vmem:[%s11570_s7] sm:$0xff]  ;;  %v877_v53 = vld [vmem:[%s11570_s7 + $0x8] sm:$0xff] }
 0x366   : > { %v715_v5 = vmul.f32 1.442695, %v714_v4  ;;  %830 = vmatpush.bf16.msra.mxu1 %v819_v54  ;;  %v906_v54 = vpack.c.bf16 %v877_v53, %v876_v52 }
 0x368   : > { %7371 = vpow2.f32 %v715_v5 }
 0x36a   : > { %831 = vmatpush.bf16.msra.mxu1 %v818_v57 }
 0x36e   : > { %v7372_v9 = vpop.eup %7371 }
 0x36f   : > { %v717_v11 = vsel %vm575_vm1, %v7372_v9, 0.0 }
 0x3b8   : > { %v8130_v1 = vpop.f32.mrf.mxu3 }
 0x3c0   : > { %v627_v3 = vpop.f32.mrf.mxu3 }
 0x3c8   : > { %v651_v6 = vpop.f32.mrf.mxu3 }
 0x3c9   : > { %v652_v7 = vadd.f32 %v651_v6, %v546_v43 }
 0x3cb   : > { %v655_v8 = vsel %vm575_vm1, %v652_v7, -inf }
 0x3cc   : > { %656 = vmax.xlane.f32.xlu2 %v655_v8  ;;  %v7970_v8 = vmov 32.0  }
 0x3d0   : > { %v653_v10 = vpop.f32.mrf.mxu3 }
 0x3d4   : > { %718 = vadd.xlane.f32.xlu2 %v717_v11 }
 0x3d8   : > { %v763_v12 = vpop.f32.mrf.mxu3 }
 0x3d9   : > { %v764_v13 = vadd.f32 %v763_v12, %v546_v43 }
 0x3db   : > { %v767_v15 = vsel %vm575_vm1, %v764_v13, -inf }
 0x3dc   : > { %768 = vmax.xlane.f32.xlu0 %v767_v15 }
 0x3e0   : > { %v765_v16 = vpop.f32.mrf.mxu3 }
 0x3ec   : > { %779 = vrot.lane.b32.xlu2 %v8098_v30, %s11580_s17  ;;  %s11656_s17 = smov 104  }
 0x3f0   : > { %667 = vrot.lane.b32.xlu0 %v8098_v30, %s11584_s19  ;;  %s11661_s19 = smov 48  }
 0x43f   : > { %v657_v17 = vpop.xlane.xlu2 %656 }
 0x440   : > { %v658_v18 = vsub.f32 %v652_v7, %v657_v17 }
 0x442   : > { %v659_v20 = vmul.f32 1.442695, %v658_v18 }
 0x444   : > { %7373 = vpow2.f32 %v659_v20  ;;  %v6876_v20 = vld [vmem:[%s11568_s5 + $0x70] sm:$0xff] }
 0x447   : > { %v719_v26 = vpop.xlane.xlu2 %718 }
 0x44a   : > { %v7374_v21 = vpop.eup %7373 }
 0x44b   : > { %v661_v22 = vsel %vm575_vm1, %v7374_v21, 0.0 }
 0x44c   : > { %662 = vadd.xlane.f32.xlu0 %v661_v22 }
 0x44f   : > { %v769_v23 = vpop.xlane.xlu0 %768  ;;  %v780_v29 = vpop.permute.xlu2 %779 }
 0x450   : > { %v770_v24 = vsub.f32 %v764_v13, %v769_v23  ;;  %v785_v33 = vsel %vm612_vm2, %v780_v29, 0  ;;  %v6874_v23 = vld [vmem:[%s11568_s5 + $0x60] sm:$0xff] }
 0x452   : > { %v771_v25 = vmul.f32 1.442695, %v770_v24  ;;  %v6875_v24 = vld [vmem:[%s11568_s5 + $0x68] sm:$0xff] }
 0x454   : > { %7375 = vpow2.f32 %v771_v25  ;;  %v885_v25 = vpack.c.bf16 %v6875_v24, %v6874_v23 }
 0x45a   : > { %v7376_v27 = vpop.eup %7375 }
 0x45b   : > { %v773_v28 = vsel %vm575_vm1, %v7376_v27, 0.0 }
 0x45c   : > { %774 = vadd.xlane.f32.xlu1 %v773_v28  ;;  %v880_v28 = vld [vmem:[%s11570_s7 + $0x20] sm:$0xff] }
 0x460   : > { %723 = vrot.lane.b32.xlu0 %v8098_v30, %s11578_s28  ;;  %s486_s28 = scalar_lea.vmem %s11636_s3, %s11684_s26 }
 0x462   : > { %v668_v31 = vpop.permute.xlu0 %667 }
 0x463   : > { %v673_v32 = vsel %vm612_vm2, %v668_v31, 0 }
 0x464   : > { %682 = vmatpush.bf16.msrb.mxu0 %v673_v32  ;;  %v881_v32 = vld [vmem:[%s11570_s7 + $0x28] sm:$0xff] }
 0x468   : > { %794 = vmatpush.bf16.msra.mxu0 %v785_v33 }
 0x4bf   : > { %v663_v34 = vpop.xlane.xlu0 %662 }
 0x4c0   : > { %7377 = vrcp.f32 %v663_v34  ;;  %v908_v34 = vpack.c.bf16 %v881_v32, %v880_v28 }
 0x4c1   : > { %7379 = vrcp.f32 %v719_v26  ;;  %v882_v26 = vld [vmem:[%s11570_s7 + $0x30] sm:$0xff] }
 0x4c6   : > { %v7378_v35 = vpop.eup %7377 }
 0x4c7   : > { %v665_v36 = vmul.f32 %v7378_v35, %v7374_v21  ;;  %v7380_v38 = vpop.eup %7379  ;;  %v6877_v21 = vld [vmem:[%s11568_s5 + $0x78] sm:$0xff] }
 0x4c8   : > { %v721_v30 = vmul.f32 %v7380_v38, %v7372_v9  ;;  %v886_v22 = vpack.c.bf16 %v6877_v21, %v6876_v20 }
 0x4c9   : > { %v666_v37 = vpack.c.bf16 %v665_v36, %v665_v36 }
 0x4ca   : > { %v722_v42 = vpack.c.bf16 %v721_v30, %v721_v30  ;;  %v493_v30 = vld [vmem:[%s11571_s8] sm:$0x3] }
 0x4cb   : > { %6868 = vmatmul.msk.bf16.vlgmr.msrb.gmra.mxu0 %vm575_vm1, %v666_v37 }
 0x4cf   : > { %v775_v39 = vpop.xlane.xlu1 %774 }
 0x4d0   : > { %7381 = vrcp.f32 %v775_v39 }
 0x4d1   : > { %7383 = vrcp.f32 %v7970_v8 }
 0x4d2   : > { %v724_v40 = vpop.permute.xlu0 %723 }
 0x4d3   : > { %v729_v41 = vsel %vm612_vm2, %v724_v40, 0 }
 0x4d4   : > { %738 = vmatpush.bf16.msrb.mxu2 %v729_v41 }
 0x4d6   : > { %v7382_v43 = vpop.eup %7381 }
 0x4d7   : > { %v777_v44 = vmul.f32 %v7382_v43, %v7376_v27  ;;  %6870 = vmatmul.msk.bf16.vlgmr.msrb.gmra.mxu2 %vm575_vm1, %v722_v42  ;;  %v883_v27 = vld [vmem:[%s11570_s7 + $0x38] sm:$0xff]  ;;  %v867_v42 = vperm.slane %v493_v30, 0 }
 0x4d8   : > { %897 = vmatpush.bf16.msra.mxu2 %v886_v22  ;;  %v909_v31 = vpack.c.bf16 %v883_v27, %v882_v26 }
 0x4d9   : > { %v778_v45 = vpack.c.bf16 %v777_v44, %v777_v44 }
 0x4da   : > { %919 = vmatpush.bf16.msrb.mxu3 %v909_v31 }
 0x4db   : > { %6872 = vmatmul.msk.bf16.vlgmr.msra.gmra.mxu0 %vm575_vm1, %v778_v45  ;;  %v869_v45 = vperm.slane %v493_v30, 1 }
 0x4dc   : > { %898 = vmatpush.bf16.msra.mxu2 %v885_v25 }
 0x4de   : > { %920 = vmatpush.bf16.msrb.mxu3 %v908_v34 }
 0x548   : > { %v684_v46 = vpop.f32.mrf.mxu0 }
 0x549   : > { %801 = vrot.lane.b32.xlu1 %v684_v46, %s11586_s29  ;;  %s11640_s29 = smov 72  }
 0x550   : > { %v686_v47 = vpop.f32.mrf.mxu0 }
 0x558   : > { %v796_v48 = vpop.f32.mrf.mxu0 }
 0x55a   : > { %v740_v49 = vpop.f32.mrf.mxu2 }
 0x55b   : > { %805 = vrot.lane.b32.xlu0 %v740_v49, %s11588_s30  ;;  %v878_v49 = vld [vmem:[%s11570_s7 + $0x10] sm:$0xff]  ;;  %s11641_s30 = smov 8  }
 0x560   : > { %v798_v50 = vpop.f32.mrf.mxu0 }
 0x561   : > { %v879_v50 = vld [vmem:[%s11570_s7 + $0x18] sm:$0xff] }
 0x562   : > { %v742_v51 = vpop.f32.mrf.mxu2 }
 0x563   : > { %809 = vrot.lane.b32.xlu0 %v796_v48, %s11592_s14  ;;  %v907_v51 = vpack.c.bf16 %v879_v50, %v878_v49  ;;  %s8238_s14 = scalar_lea.vmem %s11634_s1, %s7146_s18  ;;  %s11655_s18 = smov 120  }
 0x564   : > { %v959_v21 = vld [vmem:[%s8238_s14 + $0x20] sm:$0xff]  ;;  %v960_v22 = vld [vmem:[%s8238_s14 + $0x28] sm:$0xff]  ;;  %v961_v27 = vld [vmem:[%s8238_s14 + $0x30] sm:$0xff] }
 0x565   : > { %921 = vmatpush.bf16.msrb.mxu3 %v907_v51  ;;  %v982_v24 = vpack.c.bf16 %v960_v22, %v959_v21  ;;  %v962_v28 = vld [vmem:[%s8238_s14 + $0x38] sm:$0xff]  ;;  %v963_v31 = vld [vmem:[%s8238_s14 + $0x40] sm:$0xff]  ;;  %v964_v32 = vld [vmem:[%s8238_s14 + $0x48] sm:$0xff] }
 0x566   : > { %v965_v34 = vld [vmem:[%s8238_s14 + $0x50] sm:$0xff] }
 0x569   : > { %922 = vmatpush.bf16.msrb.mxu3 %v906_v54 }
 0x5bb   : > { %v802_v59 = vpop.permute.xlu1 %801 }
 0x5bc   : > { %v812_v60 = vsel %vm575_vm1, %v8130_v1, %v802_v59  ;;  %v7384_v1 = vpop.eup %7383 }
 0x5bd   : > { %v842_v9 = vmul.f32 32.0, %v7384_v1  ;;  %vm846_vm5 = vweird.f32 %v7384_v1 }
 0x5bf   : > { %v843_v10 = vsub.f32 1.0, %v842_v9  ;;  %v6881_v9 = vld [vmem:[%s11569_s6 + $0x48] sm:$0xff] }
 0x5c1   : > { %v844_v11 = vmul.f32 %v7384_v1, %v843_v10 }
 0x5c3   : > { %v845_v12 = vadd.f32 %v7384_v1, %v844_v11  ;;  %v955_v11 = vld [vmem:[%s8238_s14] sm:$0xff] }
 0x5c5   : > { %v8172_v13 = vsel %vm846_vm5, %v7384_v1, %v845_v12  ;;  %v6880_v1 = vld [vmem:[%s11569_s6 + $0x40] sm:$0xff]  ;;  %v956_v12 = vld [vmem:[%s8238_s14 + $0x8] sm:$0xff] }
 0x5c6   : > { %11633 = vst [vmem:[#allocation3_spill] sm:$0xff] %v8172_v13  ;;  %v986_v10 = vpack.c.bf16 %v6881_v9, %v6880_v1  ;;  %v494_v1 = vld [vmem:[%s11571_s8 + $0x2] sm:$0x3] }
 0x5cd   : > { %v806_v58 = vpop.permute.xlu0 %805 }
 0x5ce   : > { %v814_v61 = vsel %vm813_vm3, %v812_v60, %v806_v58 }
 0x5d5   : > { %v810_v62 = vpop.permute.xlu0 %809 }
 0x5d6   : > { %v816_v63 = vsel %vm815_vm4, %v814_v61, %v810_v62  ;;  %v505_v62 = vld [vmem:[%s11574_s11 + $0x8] sm:$0xff] }
 0x5d7   : > { %v817_v0 = vpack.c.bf16 %v816_v63, %v816_v63  ;;  %v910_v63 = vperm.slane %v505_v62, 2 }
 0x5d9   : > { %6873 = vmatmul.msk.bf16.vlgmr.msra.gmra.mxu1 %vm519_vm0, %v817_v0 }
 0x656   : > { %v833_v3 = vpop.f32.mrf.mxu1 }
 0x657   : > { %v834_v4 = vadd.f32 %v833_v3, %v820_v2 }
 0x659   : > { %v837_v5 = vadd.f32 %v834_v4, %v8090_v19 }
 0x65b   : > { %v838_v6 = vsel %vm519_vm0, %v837_v5, 0.0 }
 0x65c   : > { %839 = vadd.xlane.f32.xlu0 %v838_v6  ;;  %v6882_v6 = vld [vmem:[%s11569_s6 + $0x50] sm:$0xff] }
 0x65e   : > { %v835_v7 = vpop.f32.mrf.mxu1 }
 0x65f   : > { %v6883_v7 = vld [vmem:[%s11569_s6 + $0x58] sm:$0xff] }
 0x660   : > { %v987_v8 = vpack.c.bf16 %v6883_v7, %v6882_v6 }
 0x662   : > { %1013 = vmatpush.bf16.msrb.mxu0 %v987_v8 }
 0x666   : > { %1014 = vmatpush.bf16.msrb.mxu0 %v986_v10 }
 0x6cf   : > { %v840_v15 = vpop.xlane.xlu0 %839 }
 0x6d0   : > { %v848_v16 = vmul.f32 %v8172_v13, %v840_v15  ;;  %v980_v15 = vpack.c.bf16 %v956_v12, %v955_v11  ;;  %v951_v12 = vperm.slane %v494_v1, 0 }
 0x6d2   : > { %v849_v17 = vsub.f32 %v837_v5, %v848_v16  ;;  %6888 = vmatmul.msk.bf16.vlgmr.msrb.gmra.mxu0 %vm519_vm0, %v980_v15  ;;  %v957_v16 = vld [vmem:[%s8238_s14 + $0x10] sm:$0xff] }
 0x6d4   : > { %v850_v18 = vmul.f32 %v849_v17, %v849_v17 }
 0x6d6   : > { %v851_v19 = vsel %vm519_vm0, %v850_v18, 0.0 }
 0x6d7   : > { %852 = vadd.xlane.f32.xlu2 %v851_v19 }
 0x74a   : > { %v853_v29 = vpop.xlane.xlu2 %852 }
 0x74b   : > { %v854_v33 = vmul.f32 %v853_v29, %v8172_v13  ;;  %v983_v29 = vpack.c.bf16 %v962_v28, %v961_v27 }
 0x74d   : > { %v855_v35 = vadd.f32 1e-05, %v854_v33  ;;  %v984_v33 = vpack.c.bf16 %v964_v32, %v963_v31 }
 0x74f   : > { %7385 = vrsqrt.f32 %v855_v35  ;;  %vm862_vm7 = vweird.f32 %v855_v35 }
 0x755   : > { %v7386_v36 = vpop.eup %7385 }
 0x756   : > { %v857_v37 = vmul.f32 %v7386_v36, %v855_v35  ;;  %vm863_vm6 = vweird.f32 %v7386_v36  ;;  %v985_v35 = vpack.c.bf16 %v965_v34, %v965_v34 }
 0x757   : > { %vm864_vm8 = vmor %vm862_vm7, %vm863_vm6 }
 0x758   : > { %v858_v38 = vmul.f32 %v7386_v36, %v857_v37 }
 0x75a   : > { %v859_v39 = vmul.f32 0.5, %v858_v38  ;;  %v973_v38 = vld [vmem:[%s11568_s5 + $0x10] sm:$0xff] }
 0x75c   : > { %v860_v40 = vsub.f32 1.5, %v859_v39  ;;  %v974_v39 = vld [vmem:[%s11568_s5 + $0x18] sm:$0xff] }
 0x75d   : > { %v1047_v30 = vpack.c.bf16 %v974_v39, %v973_v38 }
 0x75e   : > { %v861_v41 = vmul.f32 %v7386_v36, %v860_v40  ;;  %v8276_v40 = vperm.slane %v8087_v14, 2 }
 0x75f   : > { %1058 = vmatpush.bf16.msrb.mxu1 %v1047_v30 }
 0x760   : > { %v865_v43 = vsel %vm864_vm8, %v7386_v36, %v861_v41  ;;  %v1016_v36 = vpop.f32.mrf.mxu0 }
 0x761   : > { %v866_v44 = vmul.f32 %v865_v43, %v849_v17  ;;  %v958_v17 = vld [vmem:[%s8238_s14 + $0x18] sm:$0xff]  ;;  %v1017_v41 = vadd.f32 %v1016_v36, %v8276_v40  ;;  %v972_v43 = vld [vmem:[%s11568_s5 + $0x8] sm:$0xff] }
 0x762   : > { %v981_v18 = vpack.c.bf16 %v958_v17, %v957_v16  ;;  %v953_v17 = vperm.slane %v494_v1, 1 }
 0x763   : > { %v868_v46 = vmul.f32 %v867_v42, %v866_v44  ;;  %v971_v42 = vld [vmem:[%s11568_s5] sm:$0xff] }
 0x764   : > { %6889 = vmatmul.msk.bf16.gmra.mxu0 %vm519_vm0, %v981_v18  ;;  %v1046_v44 = vpack.c.bf16 %v972_v43, %v971_v42 }
 0x765   : > { %v870_v47 = vadd.f32 %v869_v45, %v868_v46  ;;  %v1065_v46 = vmul.f32 0.35355338, %v1017_v41 }
 0x766   : > { %1059 = vmatpush.bf16.msrb.mxu1 %v1046_v44 }
 0x767   : > { %v884_v48 = vpack.c.bf16 %v870_v47, %v870_v47 }
 0x768   : > { %v1018_v37 = vpop.f32.mrf.mxu0 }
 0x769   : > { %6878 = vmatmul.msk.bf16.vlgmr.msra.gmra.mxu2 %vm519_vm0, %v884_v48  ;;  %v1019_v48 = vadd.f32 %v1018_v37, %v8276_v40 }
 0x76b   : > { %v1066_v51 = vmul.f32 0.35355338, %v1019_v48 }
 0x774   : > { %6890 = vmatmul.msk.bf16.gmra.mxu0 %vm519_vm0, %v982_v24 }
 0x784   : > { %6891 = vmatmul.msk.bf16.gmra.mxu0 %vm519_vm0, %v983_v29 }
 0x794   : > { %6892 = vmatmul.msk.bf16.gmra.mxu0 %vm519_vm0, %v984_v33 }
 0x7a4   : > { %6893 = vmatmul.msk.bf16.gmra.mxu0 %vm519_vm0, %v985_v35 }
 0x7e1   : > { %v1021_v45 = vpop.f32.mrf.mxu0 }
 0x7e2   : > { %v1022_v14 = vadd.f32 %v1021_v45, %v8276_v40 }
 0x7e4   : > { %v1067_v52 = vmul.f32 0.35355338, %v1022_v14 }
 0x7e9   : > { %v1023_v53 = vpop.f32.mrf.mxu0 }
 0x7ec   : > { %v900_v57 = vpop.f32.mrf.mxu2 }
 0x7ed   : > { %v901_v58 = vadd.f32 %v900_v57, %v887_v56  ;;  %v1077_v57 = vpack.c.bf16 %v1066_v51, %v1066_v51 }
 0x7ef   : > { %v904_v59 = vmax.f32 %v901_v58, 0.0  ;;  %v1024_v58 = vadd.f32 %v1023_v53, %v8276_v40 }
 0x7f1   : > { %v905_v60 = vpack.c.bf16 %v904_v59, %v904_v59  ;;  %v1078_v59 = vpack.c.bf16 %v1067_v52, %v1067_v52 }
 0x7f3   : > { %6879 = vmatmul.msk.bf16.vlgmr.msrb.gmra.mxu3 %vm911_vm9, %v905_v60  ;;  %v1103_v60 = vunpack.c.l.b16 %v1077_v57 }
 0x7f4   : > { %v902_v61 = vpop.f32.mrf.mxu2 }
 0x7f5   : > { %v1068_v61 = vmul.f32 0.35355338, %v1024_v58 }
 0x876   : > { %v924_v0 = vpop.f32.mrf.mxu3 }
 0x877   : > { %v925_v2 = vadd.f32 %v924_v0, %v910_v63  ;;  %v1104_v63 = vunpack.c.l.b16 %v1078_v59  ;;  %v1079_v0 = vpack.c.bf16 %v1068_v61, %v1068_v61  ;;  %v1048_v59 = vperm.slane %v8220_v55, 0 }
 0x879   : > { %v928_v3 = vadd.f32 %v925_v2, %v870_v47  ;;  %v1076_v47 = vpack.c.bf16 %v1065_v46, %v1065_v46  ;;  %v1105_v2 = vunpack.c.l.b16 %v1079_v0 }
 0x87b   : > { %v929_v4 = vsel %vm519_vm0, %v928_v3, 0.0  ;;  %v1102_v56 = vunpack.c.l.b16 %v1076_v47  ;;  %v8293_v6 = vpack.c.b16 %v1105_v2, %v1104_v63 }
 0x87c   : > { %930 = vadd.xlane.f32.xlu1 %v929_v4 }
 0x87d   : > { %v8289_v62 = vpack.c.b16 %v1103_v60, %v1102_v56 }
 0x87e   : > { %v926_v5 = vpop.f32.mrf.mxu3 }
 0x895   : > { %1369 = vrot.lane.b32.xlu1 %v8289_v62, %s11603_s22 }
 0x8ef   : > { %v931_v19 = vpop.xlane.xlu1 %930 }
 0x8f0   : > { %v932_v20 = vmul.f32 %v931_v19, %v8172_v13 }
 0x8f2   : > { %v8255_v23 = vsub.f32 %v928_v3, %v932_v20  ;;  %v1026_v3 = vpop.f32.mrf.mxu0 }
 0x8f3   : > { %v1027_v48 = vadd.f32 %v1026_v3, %v8276_v40 }
 0x8f4   : > { %v934_v25 = vmul.f32 %v8255_v23, %v8255_v23 }
 0x8f5   : > { %v1069_v52 = vmul.f32 0.35355338, %v1027_v48 }
 0x8f6   : > { %v935_v26 = vsel %vm519_vm0, %v934_v25, 0.0 }
 0x8f7   : > { %936 = vadd.xlane.f32.xlu0 %v935_v26 }
 0x8fa   : > { %v1028_v10 = vpop.f32.mrf.mxu0 }
 0x8fb   : > { %v1029_v14 = vadd.f32 %v1028_v10, %v8276_v40 }
 0x8fd   : > { %v1070_v53 = vmul.f32 0.35355338, %v1029_v14 }
 0x8ff   : > { %v1081_v56 = vpack.c.bf16 %v1070_v53, %v1070_v53 }
 0x901   : > { %v1107_v58 = vunpack.c.l.b16 %v1081_v56 }
 0x902   : > { %v1031_v19 = vpop.f32.mrf.mxu0 }
 0x903   : > { %v1032_v21 = vadd.f32 %v1031_v19, %v8276_v40 }
 0x905   : > { %v1071_v24 = vmul.f32 0.35355338, %v1032_v21 }
 0x907   : > { %v1082_v26 = vpack.c.bf16 %v1071_v24, %v1071_v24  ;;  %v1370_v10 = vpop.permute.xlu1 %1369  ;;  %v7971_v24 = vmov -1e+09  }
 0x909   : > { %v1108_v29 = vunpack.c.l.b16 %v1082_v26 }
 0x90a   : > { %v1033_v25 = vpop.f32.mrf.mxu0 }
 0x90b   : > { %1371 = vrot.lane.b32.xlu0 %v8293_v6, %s11603_s22  ;;  %v1034_v27 = vadd.f32 %v1033_v25, %v8276_v40 }
 0x90d   : > { %v1072_v28 = vmul.f32 0.35355338, %v1034_v27 }
 0x90f   : > { %v1083_v31 = vpack.c.bf16 %v1072_v28, %v1072_v28 }
 0x912   : > { %v1036_v32 = vpop.f32.mrf.mxu0 }
 0x913   : > { %v1037_v34 = vadd.f32 %v1036_v32, %v8276_v40 }
 0x915   : > { %v1073_v35 = vmul.f32 0.35355338, %v1037_v34 }
 0x917   : > { %v1084_v37 = vpack.c.bf16 %v1073_v35, %v1073_v35 }
 0x919   : > { %v1110_v30 = vunpack.c.l.b16 %v1084_v37 }
 0x91a   : > { %v1038_v36 = vpop.f32.mrf.mxu0 }
 0x91b   : > { %v1039_v38 = vadd.f32 %v1038_v36, %v8276_v40 }
 0x91d   : > { %v1074_v39 = vmul.f32 0.35355338, %v1039_v38 }
 0x91f   : > { %v1085_v41 = vpack.c.bf16 %v1074_v39, %v1074_v39 }
 0x921   : > { %v1111_v42 = vunpack.c.l.b16 %v1085_v41 }
 0x922   : > { %v1041_v43 = vpop.f32.mrf.mxu0 }
 0x923   : > { %v1117_v44 = vpack.c.b16 %v1111_v42, %v1110_v30  ;;  %v1042_v45 = vadd.f32 %v1041_v43, %v8276_v40 }
 0x925   : > { %v1075_v46 = vmul.f32 0.35355338, %v1042_v45  ;;  %1377 = vrot.lane.b32.xlu1 %v1117_v44, %s11603_s22 }
 0x927   : > { %v1086_v47 = vpack.c.bf16 %v1075_v46, %v1075_v46 }
 0x92d   : > { %1630 = vrot.lane.b32.xlu1 %v8289_v62, %s11599_s27 }
 0x935   : > { %1632 = vrot.lane.b32.xlu1 %v8293_v6, %s11599_s27 }
 0x96a   : > { %v937_v49 = vpop.xlane.xlu0 %936 }
 0x96b   : > { %v938_v50 = vmul.f32 %v937_v49, %v8172_v13  ;;  %v1112_v49 = vunpack.c.l.b16 %v1086_v47 }
 0x96d   : > { %v939_v54 = vadd.f32 1e-05, %v938_v50  ;;  %v1043_v50 = vpop.f32.mrf.mxu0  ;;  %v1118_v51 = vpack.c.b16 %v1112_v49, %v1112_v49 }
 0x96f   : > { %7387 = vrsqrt.f32 %v939_v54  ;;  %vm946_vm11 = vweird.f32 %v939_v54 }
 0x975   : > { %v7388_v4 = vpop.eup %7387 }
 0x976   : > { %v941_v5 = vmul.f32 %v7388_v4, %v939_v54  ;;  %vm947_vm10 = vweird.f32 %v7388_v4  ;;  %v1080_v54 = vpack.c.bf16 %v1069_v52, %v1069_v52 }
 0x977   : > { %vm948_vm12 = vmor %vm946_vm11, %vm947_vm10 }
 0x978   : > { %v942_v7 = vmul.f32 %v7388_v4, %v941_v5  ;;  %v1106_v57 = vunpack.c.l.b16 %v1080_v54 }
 0x97a   : > { %v943_v8 = vmul.f32 0.5, %v942_v7  ;;  %v1115_v40 = vpack.c.b16 %v1107_v58, %v1106_v57 }
 0x97c   : > { %v944_v9 = vsub.f32 1.5, %v943_v8  ;;  %1895 = vrot.lane.b32.xlu1 %v1115_v40, %s11601_s16 }
 0x97d   : > { %v1372_v55 = vpop.permute.xlu0 %1371 }
 0x97e   : > { %v945_v11 = vmul.f32 %v7388_v4, %v944_v9 }
 0x980   : > { %v949_v15 = vsel %vm948_vm12, %v7388_v4, %v945_v11 }
 0x981   : > { %v950_v16 = vmul.f32 %v949_v15, %v8255_v23  ;;  %v1109_v23 = vunpack.c.l.b16 %v1083_v31 }
 0x983   : > { %v952_v18 = vmul.f32 %v951_v12, %v950_v16  ;;  %v1116_v33 = vpack.c.b16 %v1109_v23, %v1108_v29 }
 0x984   : > { %1638 = vrot.lane.b32.xlu1 %v1117_v44, %s11599_s27 }
 0x985   : > { %v954_v20 = vadd.f32 %v953_v17, %v952_v18  ;;  %1375 = vrot.lane.b32.xlu0 %v1116_v33, %s11603_s22 }
 0x987   : > { %v8302_v22 = vpack.c.bf16 %v954_v20, %v954_v20  ;;  %v8374_v20 = vld [vmem:[%s486_s28] sm:$0x1]  ;;  %s11665_s28 = smov 88  }
 0x988   : > { %11637 = vst [vmem:[#allocation5_spill] sm:$0xff] %v8374_v20  ;;  %vm507_vm13 = vcmp.gt.f32.partialorder %v8374_v20, 0.5 }
 0x989   : > { %11635 = vst [vmem:[#allocation4_spill] sm:$0xff] %v8302_v22  ;;  %6894 = vmatmul.msk.bf16.vlgmr.msrb.gmra.mxu1 %vm519_vm0, %v8302_v22  ;;  %v508_v25 = vsel %vm507_vm13, 0.0, %v7971_v24 }
 0x98a   : > { %v8381_v28 = vperm.slane %v508_v25, 0 }
 0x98c   : > { %1901 = vrot.lane.b32.xlu1 %v1118_v51, %s11601_s16  ;;  %11638 = vst [vmem:[#allocation6_spill] sm:$0xff] %v8381_v28 }
 0x98d   : > { %1379 = vrot.lane.b32.xlu0 %v1118_v51, %s11603_s22 }
 0x995   : > { %1891 = vrot.lane.b32.xlu0 %v8289_v62, %s11601_s16 }
 0x997   : > { %v1378_v21 = vpop.permute.xlu1 %1377 }
 0x99d   : > { %1634 = vrot.lane.b32.xlu0 %v1115_v40, %s11599_s27 }
 0x99f   : > { %v1631_v23 = vpop.permute.xlu1 %1630 }
 0x9a5   : > { %1897 = vrot.lane.b32.xlu0 %v1116_v33, %s11601_s16 }
 0x9a7   : > { %v1633_v42 = vpop.permute.xlu1 %1632 }
 0x9ad   : > { %1640 = vrot.lane.b32.xlu0 %v1118_v51, %s11599_s27 }
 0x9ee   : > { %v1896_v58 = vpop.permute.xlu1 %1895 }
 0xa06   : > { %v1061_v60 = vpop.f32.mrf.mxu1 }
 0xa07   : > { %v1062_v61 = vadd.f32 %v1061_v60, %v1048_v59 }
 0xa09   : > { %v1087_v63 = vpack.c.bf16 %v1062_v61, %v1062_v61  ;;  %v1639_v61 = vpop.permute.xlu1 %1638 }
 0xa0b   : > { %v1138_v0 = vsel %vm575_vm1, %v1087_v63, 0  ;;  %v1306_v2 = vunpack.c.l.b16 %v1087_v63 }
 0xa0c   : > { %1147 = vmatpush.bf16.xpose.msrb.mxu2 %v1138_v0 }
 0xa0d   : > { %v8329_v3 = vpack.c.b16 %v1306_v2, %v1306_v2 }
 0xa0e   : > { %v1063_v4 = vpop.f32.mrf.mxu1 }
 0xa0f   : > { %1569 = vrot.lane.b32.xlu0 %v8329_v3, %s11621_s20  ;;  %1381 = vrot.lane.b32.xlu2 %v8329_v3, %s11603_s22 }
 0xa13   : > { %6895 = vmatmul.msk.bf16.vlgmr.msrb.gmra.mxu2 %vm575_vm1, %v8289_v62  ;;  %v1376_v62 = vpop.permute.xlu0 %1375 }
 0xa17   : > { %1373 = vrot.lane.b32.xlu2 %v1115_v40, %s11603_s22  ;;  %s11659_s22 = smov 64  }
 0xa1b   : > { %v8352_v5 = vpop.permute.xlu0 %1379 }
 0xa1f   : > { %1893 = vrot.lane.b32.xlu2 %v8293_v6, %s11601_s16 }
 0xa23   : > { %6896 = vmatmul.msk.bf16.gmra.mxu2 %vm575_vm1, %v8293_v6  ;;  %v8355_v6 = vpop.permute.xlu0 %1891 }
 0xa27   : > { %1636 = vrot.lane.b32.xlu2 %v1116_v33, %s11599_s27 }
 0xa2b   : > { %v1635_v7 = vpop.permute.xlu0 %1634 }
 0xa2f   : > { %1899 = vrot.lane.b32.xlu2 %v1117_v44, %s11601_s16 }
 0xa33   : > { %6897 = vmatmul.msk.bf16.gmra.mxu2 %vm575_vm1, %v1115_v40  ;;  %v8359_v9 = vpop.permute.xlu0 %1897 }
 0xa37   : > { %1642 = vrot.lane.b32.xlu2 %v8329_v3, %s11599_s27  ;;  %s11657_s27 = smov 112  }
 0xa3b   : > { %v8362_v12 = vpop.permute.xlu0 %1640 }
 0xa3f   : > { %1903 = vrot.lane.b32.xlu2 %v8329_v3, %s11601_s16  ;;  %s11658_s16 = smov 56  }
 0xa43   : > { %6898 = vmatmul.msk.bf16.gmra.mxu2 %vm575_vm1, %v1116_v33 }
 0xa47   : > { %1308 = vrot.lane.b32.xlu2 %v8329_v3, %s11623_s21 }
 0xa53   : > { %6899 = vmatmul.msk.bf16.gmra.mxu2 %vm575_vm1, %v1117_v44 }
 0xa63   : > { %6900 = vmatmul.msk.bf16.gmra.mxu2 %vm575_vm1, %v1118_v51 }
 0xa69   : > { %v1382_v8 = vpop.permute.xlu2 %1381 }
 0xa6a   : > { %v1402_v1 = vsel %vm575_vm1, %v1382_v8, 0 }
 0xa6b   : > { %1411 = vmatpush.bf16.xpose.msra.mxu1 %v1402_v1 }
 0xa71   : > { %v1374_v11 = vpop.permute.xlu2 %1373 }
 0xa72   : > { %6907 = vmatmul.msk.bf16.vlgmr.msra.gmra.mxu1 %vm575_vm1, %v1370_v10 }
 0xa79   : > { %v8364_v15 = vpop.permute.xlu2 %1893 }
 0xa81   : > { %v1637_v16 = vpop.permute.xlu2 %1636  ;;  %v1570_v17 = vpop.permute.xlu0 %1569 }
 0xa82   : > { %v1590_v18 = vsel %vm612_vm2, %v1570_v17, 0  ;;  %6908 = vmatmul.msk.bf16.gmra.mxu1 %vm575_vm1, %v1372_v55 }
 0xa83   : > { %1599 = vmatpush.bf16.msra.mxu0 %v1590_v18 }
 0xa89   : > { %v8372_v19 = vpop.permute.xlu2 %1899 }
 0xa91   : > { %v1643_v26 = vpop.permute.xlu2 %1642 }
 0xa92   : > { %v1663_v27 = vsel %vm575_vm1, %v1643_v26, 0  ;;  %6909 = vmatmul.msk.bf16.gmra.mxu1 %vm575_vm1, %v1374_v11 }
 0xa93   : > { %1672 = vmatpush.bf16.xpose.msra.mxu2 %v1663_v27 }
 0xa96   : > { %v1149_v29 = vpop.f32.mrf.mxu2 }
 0xa97   : > { %v8384_v31 = vadd.f32 %v1149_v29, %v8381_v28 }
 0xa99   : > { %v1904_v32 = vpop.permute.xlu2 %1903  ;;  %v1178_v33 = vsel %vm575_vm1, %v8384_v31, -inf }
 0xa9a   : > { %v1924_v34 = vsel %vm575_vm1, %v1904_v32, 0  ;;  %1179 = vmax.xlane.f32.xlu0 %v1178_v33  ;;  %6919 = vmatmul.msk.bf16.vlgmr.msra.gmra.mxu2 %vm575_vm1, %v1631_v23 }
 0xa9b   : > { %1933 = vmatpush.bf16.xpose.msrb.mxu1 %v1924_v34 }
 0xa9e   : > { %v1151_v35 = vpop.f32.mrf.mxu2 }
 0xa9f   : > { %v8391_v36 = vadd.f32 %v1151_v35, %v8381_v28 }
 0xaa1   : > { %v1309_v37 = vpop.permute.xlu2 %1308  ;;  %v1181_v38 = vsel %vm575_vm1, %v8391_v36, -inf }
 0xaa2   : > { %v1329_v39 = vsel %vm612_vm2, %v1309_v37, 0  ;;  %1182 = vmax.xlane.f32.xlu1 %v1181_v38  ;;  %6910 = vmatmul.msk.bf16.gmra.mxu1 %vm575_vm1, %v1376_v62 }
 0xaa3   : > { %1338 = vmatpush.bf16.msra.mxu3 %v1329_v39 }
 0xaa6   : > { %v1154_v30 = vpop.f32.mrf.mxu2 }
 0xaa7   : > { %v8398_v41 = vadd.f32 %v1154_v30, %v8381_v28 }
 0xaa9   : > { %v1184_v43 = vsel %vm575_vm1, %v8398_v41, -inf }
 0xaaa   : > { %1185 = vmax.xlane.f32.xlu1 %v1184_v43  ;;  %6920 = vmatmul.msk.bf16.gmra.mxu2 %vm575_vm1, %v1633_v42 }
 0xaae   : > { %v1156_v44 = vpop.f32.mrf.mxu2 }
 0xaaf   : > { %v8404_v45 = vadd.f32 %v1156_v44, %v8381_v28 }
 0xab1   : > { %v1187_v46 = vsel %vm575_vm1, %v8404_v45, -inf }
 0xab2   : > { %1188 = vmax.xlane.f32.xlu2 %v1187_v46  ;;  %6911 = vmatmul.msk.bf16.gmra.mxu1 %vm575_vm1, %v1378_v21  ;;  %v1902_v21 = vpop.permute.xlu1 %1901 }
 0xab6   : > { %v1159_v47 = vpop.f32.mrf.mxu2 }
 0xab7   : > { %v8410_v48 = vadd.f32 %v1159_v47, %v8381_v28 }
 0xab9   : > { %v1190_v14 = vsel %vm575_vm1, %v8410_v48, -inf }
 0xaba   : > { %1191 = vmax.xlane.f32.xlu2 %v1190_v14  ;;  %6921 = vmatmul.msk.bf16.gmra.mxu2 %vm575_vm1, %v1635_v7 }
 0xabe   : > { %v1161_v49 = vpop.f32.mrf.mxu2 }
 0xabf   : > { %v8416_v50 = vadd.f32 %v1161_v49, %v8381_v28 }
 0xac1   : > { %v1193_v51 = vsel %vm575_vm1, %v8416_v50, -inf }
 0xac2   : > { %1194 = vmax.xlane.f32.xlu0 %v1193_v51  ;;  %6912 = vmatmul.msk.bf16.gmra.mxu1 %vm575_vm1, %v8352_v5 }
 0xac6   : > { %v1164_v52 = vpop.f32.mrf.mxu2 }
 0xac7   : > { %v8423_v53 = vadd.f32 %v1164_v52, %v8381_v28 }
 0xac9   : > { %v1196_v54 = vsel %vm575_vm1, %v8423_v53, -inf }
 0xaca   : > { %1197 = vmax.xlane.f32.xlu1 %v1196_v54  ;;  %6922 = vmatmul.msk.bf16.gmra.mxu2 %vm575_vm1, %v1637_v16 }
 0xace   : > { %v1166_v56 = vpop.f32.mrf.mxu2 }
 0xacf   : > { %v8429_v57 = vadd.f32 %v1166_v56, %v8381_v28 }
 0xad1   : > { %v1199_v40 = vsel %vm575_vm1, %v8429_v57, -inf }
 0xad2   : > { %1200 = vmax.xlane.f32.xlu2 %v1199_v40  ;;  %6931 = vmatmul.msk.bf16.vlgmr.msrb.gmra.mxu1 %vm575_vm1, %v8355_v6 }
 0xad6   : > { %v1169_v59 = vpop.f32.mrf.mxu2 }
 0xad7   : > { %v8436_v60 = vadd.f32 %v1169_v59, %v8381_v28 }
 0xad9   : > { %v1202_v63 = vsel %vm575_vm1, %v8436_v60, -inf }
 0xada   : > { %1203 = vmax.xlane.f32.xlu0 %v1202_v63  ;;  %6923 = vmatmul.msk.bf16.gmra.mxu2 %vm575_vm1, %v1639_v61 }
 0xade   : > { %v1171_v0 = vpop.f32.mrf.mxu2 }
 0xadf   : > { %v8442_v2 = vadd.f32 %v1171_v0, %v8381_v28 }
 0xae1   : > { %v1205_v4 = vsel %vm575_vm1, %v8442_v2, -inf }
 0xae2   : > { %1206 = vmax.xlane.f32.xlu1 %v1205_v4  ;;  %6932 = vmatmul.msk.bf16.gmra.mxu1 %vm575_vm1, %v8364_v15 }
 0xae6   : > { %v1174_v55 = vpop.f32.mrf.mxu2 }
 0xae7   : > { %v8449_v62 = vadd.f32 %v1174_v55, %v8381_v28 }
 0xae9   : > { %v1208_v5 = vsel %vm575_vm1, %v8449_v62, -inf }
 0xaea   : > { %1209 = vmax.xlane.f32.xlu1 %v1208_v5  ;;  %6924 = vmatmul.msk.bf16.gmra.mxu2 %vm575_vm1, %v8362_v12 }
 0xaee   : > { %v1176_v6 = vpop.f32.mrf.mxu2 }
 0xaef   : > { %v1413_v7 = vpop.f32.mrf.mxu1 }
 0xaf0   : > { %v8456_v8 = vadd.f32 %v1413_v7, %v8381_v28 }
 0xaf2   : > { %6933 = vmatmul.msk.bf16.gmra.mxu1 %vm575_vm1, %v1896_v58  ;;  %v1442_v1 = vsel %vm575_vm1, %v8456_v8, -inf }
 0xaf3   : > { %1443 = vmax.xlane.f32.xlu2 %v1442_v1 }
 0xaf7   : > { %v1415_v10 = vpop.f32.mrf.mxu1 }
 0xaf8   : > { %v8462_v11 = vadd.f32 %v1415_v10, %v8381_v28 }
 0xafa   : > { %v1445_v15 = vsel %vm575_vm1, %v8462_v11, -inf }
 0xafb   : > { %1446 = vmax.xlane.f32.xlu0 %v1445_v15 }
 0xaff   : > { %v1418_v12 = vpop.f32.mrf.mxu1 }
 0xb00   : > { %v8484_v32 = vadd.f32 %v1418_v12, %v8381_v28 }
 0xb02   : > { %6934 = vmatmul.msk.bf16.gmra.mxu1 %vm575_vm1, %v8359_v9  ;;  %v1448_v38 = vsel %vm575_vm1, %v8484_v32, -inf }
 0xb07   : > { %v1420_v16 = vpop.f32.mrf.mxu1 }
 0xb0d   : > { %v1180_v24 = vpop.xlane.xlu0 %1179 }
 0xb0e   : > { %v1211_v27 = vsub.f32 %v8384_v31, %v1180_v24 }
 0xb0f   : > { %v8468_v17 = vpop.f32.mrf.mxu1 }
 0xb12   : > { %6935 = vmatmul.msk.bf16.gmra.mxu1 %vm575_vm1, %v8372_v19  ;;  %v1222_v19 = vmul.f32 1.442695, %v1211_v27 }
 0xb14   : > { %7389 = vpow2.f32 %v1222_v19 }
 0xb15   : > { %v1183_v23 = vpop.xlane.xlu1 %1182 }
 0xb16   : > { %v1212_v31 = vsub.f32 %v8391_v36, %v1183_v23 }
 0xb17   : > { %v8472_v18 = vpop.f32.mrf.mxu1 }
 0xb18   : > { %v1224_v39 = vmul.f32 1.442695, %v1212_v31 }
 0xb1a   : > { %v8494_v42 = vpop.eup %7389  ;;  %7391 = vpow2.f32 %v1224_v39 }
 0xb1b   : > { %v1244_v36 = vsel %vm575_vm1, %v8494_v42, 0.0 }
 0xb1d   : > { %v1674_v25 = vpop.f32.mrf.mxu2  ;;  %v1186_v30 = vpop.xlane.xlu1 %1185 }
 0xb1e   : > { %v8475_v26 = vadd.f32 %v1674_v25, %v8381_v28  ;;  %v1213_v46 = vsub.f32 %v8398_v41, %v1186_v30 }
 0xb1f   : > { %v8478_v29 = vpop.f32.mrf.mxu1 }
 0xb20   : > { %v1703_v9 = vsel %vm575_vm1, %v8475_v26, -inf  ;;  %v1226_v51 = vmul.f32 1.442695, %v1213_v46  ;;  %v8509_v56 = vpop.eup %7391 }
 0xb21   : > { %1704 = vmax.xlane.f32.xlu1 %v1703_v9  ;;  %v1247_v63 = vsel %vm575_vm1, %v8509_v56, 0.0 }
 0xb22   : > { %6936 = vmatmul.msk.bf16.gmra.mxu1 %vm575_vm1, %v1902_v21  ;;  %7393 = vpow2.f32 %v1226_v51 }
 0xb25   : > { %v1676_v33 = vpop.f32.mrf.mxu2  ;;  %v1189_v49 = vpop.xlane.xlu2 %1188 }
 0xb26   : > { %v8487_v34 = vadd.f32 %v1676_v33, %v8381_v28  ;;  %v1214_v58 = vsub.f32 %v8404_v45, %v1189_v49  ;;  %v8526_v45 = vadd.f32 %v1420_v16, %v8381_v28  ;;  %v8569_v49 = vadd.f32 %v8472_v18, %v8381_v28 }
 0xb27   : > { %v1430_v35 = vpop.f32.mrf.mxu1  ;;  %v8582_v18 = vadd.f32 %v8478_v29, %v8381_v28 }
 0xb28   : > { %v1706_v37 = vsel %vm575_vm1, %v8487_v34, -inf  ;;  %v8507_v52 = vadd.f32 %v1430_v35, %v8381_v28  ;;  %v1228_v0 = vmul.f32 1.442695, %v1214_v58  ;;  %v8523_v55 = vpop.eup %7393  ;;  %v1451_v21 = vsel %vm575_vm1, %v8526_v45, -inf }
 0xb29   : > { %1707 = vmax.xlane.f32.xlu2 %v1706_v37  ;;  %1449 = vmax.xlane.f32.xlu1 %v1448_v38  ;;  %v1250_v12 = vsel %vm575_vm1, %v8523_v55, 0.0 }
 0xb2a   : > { %v1463_v61 = vsel %vm575_vm1, %v8507_v52, -inf  ;;  %7395 = vpow2.f32 %v1228_v0 }
 0xb2d   : > { %v1679_v43 = vpop.f32.mrf.mxu2  ;;  %v1192_v4 = vpop.xlane.xlu2 %1191 }
 0xb2e   : > { %v8497_v44 = vadd.f32 %v1679_v43, %v8381_v28  ;;  %v1215_v1 = vsub.f32 %v8410_v48, %v1192_v4 }
 0xb2f   : > { %v8500_v47 = vpop.f32.mrf.mxu1 }
 0xb30   : > { %v1709_v14 = vsel %vm575_vm1, %v8497_v44, -inf  ;;  %v1230_v16 = vmul.f32 1.442695, %v1215_v1  ;;  %v8536_v25 = vpop.eup %7395 }
 0xb31   : > { %1245 = vadd.xlane.f32.xlu2 %v1244_v36  ;;  %1710 = vmax.xlane.f32.xlu0 %v1709_v14  ;;  %v1253_v19 = vsel %vm575_vm1, %v8536_v25, 0.0 }
 0xb35   : > { %v1681_v54 = vpop.f32.mrf.mxu2  ;;  %v1195_v24 = vpop.xlane.xlu0 %1194 }
 0xb36   : > { %v8512_v41 = vadd.f32 %v1681_v54, %v8381_v28  ;;  %v1216_v27 = vsub.f32 %v8416_v50, %v1195_v24 }
 0xb37   : > { %v8515_v40 = vpop.f32.mrf.mxu1 }
 0xb38   : > { %v1712_v59 = vsel %vm575_vm1, %v8512_v41, -inf  ;;  %v8597_v29 = vadd.f32 %v8515_v40, %v8381_v28 }
 0xb39   : > { %1713 = vmax.xlane.f32.xlu1 %v1712_v59  ;;  %1464 = vmax.xlane.f32.xlu0 %v1463_v61 }
 0xb3a   : > { %1248 = vadd.xlane.f32.xlu2 %v1247_v63  ;;  %v1457_v63 = vsel %vm575_vm1, %v8569_v49, -inf }
 0xb3d   : > { %v1684_v5 = vpop.f32.mrf.mxu2  ;;  %v1198_v6 = vpop.xlane.xlu1 %1197 }
 0xb3e   : > { %v1217_v7 = vsub.f32 %v8423_v53, %v1198_v6  ;;  %v8540_v53 = vadd.f32 %v8468_v17, %v8381_v28  ;;  %v1232_v17 = vmul.f32 1.442695, %v1216_v27  ;;  %v8556_v50 = vadd.f32 %v1684_v5, %v8381_v28 }
 0xb3f   : > { %v8530_v10 = vpop.f32.mrf.mxu1 }
 0xb40   : > { %v1234_v15 = vmul.f32 1.442695, %v1217_v7  ;;  %v1454_v33 = vsel %vm575_vm1, %v8540_v53, -inf  ;;  %v1715_v46 = vsel %vm575_vm1, %v8556_v50, -inf }
 0xb41   : > { %1251 = vadd.xlane.f32.xlu1 %v1250_v12 }
 0xb42   : > { %7397 = vpow2.f32 %v1234_v15  ;;  %1452 = vmax.xlane.f32.xlu2 %v1451_v21  ;;  %v1460_v15 = vsel %vm575_vm1, %v8582_v18, -inf }
 0xb43   : > { %7399 = vpow2.f32 %v1230_v16 }
 0xb44   : > { %7401 = vpow2.f32 %v1232_v17 }
 0xb45   : > { %v8542_v48 = vpop.f32.mrf.mxu2  ;;  %v1201_v31 = vpop.xlane.xlu2 %1200 }
 0xb46   : > { %v1218_v39 = vsub.f32 %v8429_v57, %v1201_v31 }
 0xb47   : > { %v1440_v9 = vpop.f32.mrf.mxu1 }
 0xb48   : > { %v8545_v23 = vpop.eup %7397  ;;  %v1236_v36 = vmul.f32 1.442695, %v1218_v39  ;;  %v1469_v9 = vsel %vm575_vm1, %v8597_v29, -inf }
 0xb49   : > { %1254 = vadd.xlane.f32.xlu1 %v1253_v19  ;;  %v1262_v35 = vsel %vm575_vm1, %v8545_v23, 0.0  ;;  %v8553_v37 = vpop.eup %7399 }
 0xb4a   : > { %1455 = vmax.xlane.f32.xlu2 %v1454_v33  ;;  %1263 = vadd.xlane.f32.xlu0 %v1262_v35  ;;  %v1256_v43 = vsel %vm575_vm1, %v8553_v37, 0.0  ;;  %v8565_v14 = vpop.eup %7401  ;;  %7403 = vpow2.f32 %v1236_v36 }
 0xb4b   : > { %v1259_v61 = vsel %vm575_vm1, %v8565_v14, 0.0 }
 0xb4d   : > { %v8558_v38 = vpop.f32.mrf.mxu2  ;;  %v1204_v4 = vpop.xlane.xlu0 %1203 }
 0xb4e   : > { %v1219_v7 = vsub.f32 %v8436_v60, %v1204_v4  ;;  %v8601_v60 = vadd.f32 %v8500_v47, %v8381_v28  ;;  %v8616_v47 = vadd.f32 %v8530_v10, %v8381_v28 }
 0xb4f   : > { %v1935_v30 = vpop.f32.mrf.mxu1 }
 0xb50   : > { %v8578_v0 = vpop.eup %7403  ;;  %v1238_v21 = vmul.f32 1.442695, %v1219_v7  ;;  %v1466_v19 = vsel %vm575_vm1, %v8601_v60, -inf  ;;  %v1472_v36 = vsel %vm575_vm1, %v8616_v47, -inf }
 0xb51   : > { %1257 = vadd.xlane.f32.xlu1 %v1256_v43  ;;  %v1265_v1 = vsel %vm575_vm1, %v8578_v0, 0.0 }
 0xb52   : > { %1716 = vmax.xlane.f32.xlu2 %v1715_v46 }
 0xb55   : > { %v8571_v51 = vpop.f32.mrf.mxu2  ;;  %v1207_v54 = vpop.xlane.xlu1 %1206 }
 0xb56   : > { %v1220_v57 = vsub.f32 %v8442_v2, %v1207_v54 }
 0xb57   : > { %v1937_v58 = vpop.f32.mrf.mxu1 }
 0xb58   : > { %v1240_v59 = vmul.f32 1.442695, %v1220_v57  ;;  %v8604_v16 = vadd.f32 %v1937_v58, %v8381_v28 }
 0xb59   : > { %1260 = vadd.xlane.f32.xlu1 %v1259_v61 }
 0xb5a   : > { %7405 = vpow2.f32 %v1240_v59  ;;  %1458 = vmax.xlane.f32.xlu2 %v1457_v63  ;;  %v1967_v40 = vsel %vm575_vm1, %v8604_v16, -inf  ;;  %v8632_v59 = vadd.f32 %v1935_v30, %v8381_v28 }
 0xb5b   : > { %7407 = vpow2.f32 %v1238_v21 }
 0xb5d   : > { %v8584_v2 = vpop.f32.mrf.mxu2  ;;  %v1210_v33 = vpop.xlane.xlu1 %1209 }
 0xb5e   : > { %v1221_v39 = vsub.f32 %v8449_v62, %v1210_v33 }
 0xb5f   : > { %v1940_v5 = vpop.f32.mrf.mxu1 }
 0xb60   : > { %v8586_v6 = vpop.eup %7405  ;;  %v1242_v10 = vmul.f32 1.442695, %v1221_v39  ;;  %v8629_v58 = vadd.f32 %v1940_v5, %v8381_v28 }
 0xb61   : > { %1266 = vadd.xlane.f32.xlu1 %v1265_v1  ;;  %v1271_v12 = vsel %vm575_vm1, %v8586_v6, 0.0  ;;  %v8620_v17 = vpop.eup %7407  ;;  %v1964_v1 = vsel %vm575_vm1, %v8632_v59, -inf }
 0xb62   : > { %1461 = vmax.xlane.f32.xlu2 %v1460_v15  ;;  %1272 = vadd.xlane.f32.xlu0 %v1271_v12  ;;  %v1268_v57 = vsel %vm575_vm1, %v8620_v17, 0.0  ;;  %v1970_v4 = vsel %vm575_vm1, %v8629_v58, -inf }
 0xb65   : > { %v8606_v24 = vpop.f32.mrf.mxu2 }
 0xb66   : > { %v1444_v62 = vpop.xlane.xlu2 %1443 }
 0xb67   : > { %v1942_v27 = vpop.f32.mrf.mxu1  ;;  %v1475_v63 = vsub.f32 %v8456_v8, %v1444_v62  ;;  %v8650_v8 = vadd.f32 %v8542_v48, %v8381_v28 }
 0xb68   : > { %v8646_v12 = vadd.f32 %v1942_v27, %v8381_v28 }
 0xb69   : > { %1470 = vmax.xlane.f32.xlu1 %v1469_v9  ;;  %v1486_v5 = vmul.f32 1.442695, %v1475_v63 }
 0xb6a   : > { %1467 = vmax.xlane.f32.xlu2 %v1466_v19  ;;  %1968 = vmax.xlane.f32.xlu0 %v1967_v40  ;;  %v1973_v19 = vsel %vm575_vm1, %v8646_v12, -inf  ;;  %v1718_v40 = vsel %vm575_vm1, %v8650_v8, -inf }
 0xb6d   : > { %v8618_v35 = vpop.f32.mrf.mxu2 }
 0xb6e   : > { %v1447_v31 = vpop.xlane.xlu0 %1446 }
 0xb6f   : > { %v1476_v43 = vsub.f32 %v8462_v11, %v1447_v31  ;;  %v1945_v46 = vpop.f32.mrf.mxu1 }
 0xb70   : > { %v8667_v31 = vadd.f32 %v1945_v46, %v8381_v28 }
 0xb71   : > { %v1488_v54 = vmul.f32 1.442695, %v1476_v43  ;;  %1473 = vmax.xlane.f32.xlu1 %v1472_v36 }
 0xb72   : > { %1269 = vadd.xlane.f32.xlu2 %v1268_v57  ;;  %v1976_v43 = vsel %vm575_vm1, %v8667_v31, -inf }
 0xb73   : > { %7409 = vpow2.f32 %v1488_v54  ;;  %v8675_v54 = vadd.f32 %v8558_v38, %v8381_v28 }
 0xb74   : > { %7411 = vpow2.f32 %v1242_v10 }
 0xb75   : > { %v1701_v11 = vpop.f32.mrf.mxu2  ;;  %7413 = vpow2.f32 %v1486_v5  ;;  %v1721_v10 = vsel %vm575_vm1, %v8675_v54, -inf }
 0xb77   : > { %v1947_v61 = vpop.f32.mrf.mxu1 }
 0xb79   : > { %v8637_v7 = vpop.eup %7409  ;;  %1971 = vmax.xlane.f32.xlu1 %v1970_v4 }
 0xb7a   : > { %1965 = vmax.xlane.f32.xlu2 %v1964_v1  ;;  %v1511_v30 = vsel %vm575_vm1, %v8637_v7, 0.0  ;;  %v8643_v15 = vpop.eup %7411 }
 0xb7b   : > { %1512 = vadd.xlane.f32.xlu0 %v1511_v30  ;;  %v1274_v9 = vsel %vm575_vm1, %v8643_v15, 0.0  ;;  %v8660_v27 = vpop.eup %7413 }
 0xb7c   : > { %v1508_v48 = vsel %vm575_vm1, %v8660_v27, 0.0 }
 0xb7f   : > { %v8652_v21 = vpop.f32.mrf.mxu1 }
 0xb81   : > { %1275 = vadd.xlane.f32.xlu1 %v1274_v9 }
 0xb82   : > { %1974 = vmax.xlane.f32.xlu2 %v1973_v19  ;;  %v8691_v19 = vadd.f32 %v1947_v61, %v8381_v28 }
 0xb83   : > { %1719 = vmax.xlane.f32.xlu0 %v1718_v40 }
 0xb87   : > { %v8662_v33 = vpop.f32.mrf.mxu1 }
 0xb8a   : > { %1509 = vadd.xlane.f32.xlu2 %v1508_v48 }
 0xb8f   : > { %v8669_v39 = vpop.f32.mrf.mxu1 }
 0xb92   : > { %1977 = vmax.xlane.f32.xlu2 %v1976_v43 }
 0xb94   : > { %v1705_v36 = vpop.xlane.xlu1 %1704 }
 0xb95   : > { %v1736_v61 = vsub.f32 %v8475_v26, %v1705_v36 }
 0xb97   : > { %v8677_v57 = vpop.f32.mrf.mxu1 }
 0xb9a   : > { %1722 = vmax.xlane.f32.xlu2 %v1721_v10 }
 0xb9c   : > { %v1708_v62 = vpop.xlane.xlu2 %1707  ;;  %v1450_v46 = vpop.xlane.xlu1 %1449 }
 0xb9d   : > { %v1477_v11 = vsub.f32 %v8484_v32, %v1450_v46  ;;  %v1979_v32 = vsel %vm575_vm1, %v8691_v19, -inf }
 0xb9f   : > { %v1490_v63 = vmul.f32 1.442695, %v1477_v11  ;;  %v8682_v4 = vpop.f32.mrf.mxu1 }
 0xba1   : > { %7415 = vpow2.f32 %v1490_v63 }
 0xba4   : > { %v1246_v1 = vpop.xlane.xlu2 %1245 }
 0xba5   : > { %7417 = vrcp.f32 %v1246_v1 }
 0xba7   : > { %v1962_v30 = vpop.f32.mrf.mxu1  ;;  %v8684_v5 = vpop.eup %7415 }
 0xba8   : > { %v1514_v38 = vsel %vm575_vm1, %v8684_v5, 0.0 }
 0xba9   : > { %1515 = vadd.xlane.f32.xlu0 %v1514_v38 }
 0xbab   : > { %v7418_v48 = vpop.eup %7417 }
 0xbac   : > { %v8688_v9 = vpop.xlane.xlu1 %1713  ;;  %v1288_v46 = vmul.f32 %v7418_v48, %v8494_v42 }
 0xbad   : > { %v1249_v40 = vpop.xlane.xlu2 %1248 }
 0xbae   : > { %7419 = vrcp.f32 %v1249_v40  ;;  %v8700_v40 = vpop.xlane.xlu0 %1710 }
 0xbb1   : > { %1980 = vmax.xlane.f32.xlu0 %v1979_v32  ;;  %v1747_v32 = vmul.f32 1.442695, %v1736_v61 }
 0xbb4   : > { %v7420_v43 = vpop.eup %7419  ;;  %v1252_v10 = vpop.xlane.xlu1 %1251 }
 0xbb5   : > { %v1289_v11 = vmul.f32 %v7420_v43, %v8509_v56  ;;  %v1453_v63 = vpop.xlane.xlu2 %1452 }
 0xbb6   : > { %v1478_v1 = vsub.f32 %v8526_v45, %v1453_v63  ;;  %v1737_v45 = vsub.f32 %v8487_v34, %v1708_v62 }
 0xbb7   : > { %v1299_v30 = vpack.c.bf16 %v1289_v11, %v1288_v46 }
 0xbb8   : > { %v1492_v38 = vmul.f32 1.442695, %v1478_v1 }
 0xbb9   : > { %6901 = vmatmul.msk.bf16.vlgmr.msra.gmra.mxu3 %vm575_vm1, %v1299_v30 }
 0xbba   : > { %7421 = vpow2.f32 %v1492_v38  ;;  %v8724_v38 = vadd.f32 %v8662_v33, %v8381_v28 }
 0xbbb   : > { %7423 = vrcp.f32 %v1252_v10  ;;  %v1749_v10 = vmul.f32 1.442695, %v1737_v45 }
 0xbbc   : > { %v1255_v20 = vpop.xlane.xlu1 %1254 }
 0xbbd   : > { %v1456_v22 = vpop.xlane.xlu2 %1455  ;;  %7425 = vrcp.f32 %v1255_v20 }
 0xbbe   : > { %v1479_v42 = vsub.f32 %v8540_v53, %v1456_v22  ;;  %7427 = vpow2.f32 %v1747_v32  ;;  %v1465_v22 = vpop.xlane.xlu0 %1464 }
 0xbbf   : > { %v1482_v1 = vsub.f32 %v8507_v52, %v1465_v22 }
 0xbc0   : > { %v8703_v56 = vpop.eup %7421  ;;  %v1494_v48 = vmul.f32 1.442695, %v1479_v42 }
 0xbc1   : > { %v7424_v26 = vpop.eup %7423  ;;  %v1517_v36 = vsel %vm575_vm1, %v8703_v56, 0.0 }
 0xbc2   : > { %7429 = vpow2.f32 %v1494_v48  ;;  %1518 = vadd.xlane.f32.xlu1 %v1517_v36  ;;  %v1290_v11 = vmul.f32 %v7424_v26, %v8523_v55  ;;  %v1985_v36 = vsel %vm575_vm1, %v8724_v38, -inf }
 0xbc3   : > { %v7426_v43 = vpop.eup %7425  ;;  %7431 = vpow2.f32 %v1749_v10 }
 0xbc4   : > { %v1258_v46 = vpop.xlane.xlu1 %1257  ;;  %v1291_v20 = vmul.f32 %v7426_v43, %v8536_v25  ;;  %v8712_v63 = vpop.eup %7427  ;;  %v1500_v25 = vmul.f32 1.442695, %v1482_v1 }
 0xbc5   : > { %v8710_v53 = vpop.xlane.xlu2 %1716  ;;  %v1769_v55 = vsel %vm575_vm1, %v8712_v63, 0.0  ;;  %7433 = vrcp.f32 %v1258_v46 }
 0xbc6   : > { %v1300_v34 = vpack.c.bf16 %v1291_v20, %v1290_v11 }
 0xbc8   : > { %v8714_v62 = vpop.eup %7429 }
 0xbc9   : > { %6902 = vmatmul.msk.bf16.gmra.mxu3 %vm575_vm1, %v1300_v34  ;;  %v1520_v30 = vsel %vm575_vm1, %v8714_v62, 0.0  ;;  %v8726_v52 = vpop.eup %7431 }
 0xbca   : > { %1521 = vadd.xlane.f32.xlu2 %v1520_v30  ;;  %1770 = vadd.xlane.f32.xlu1 %v1769_v55  ;;  %v1772_v26 = vsel %vm575_vm1, %v8726_v52, 0.0  ;;  %v1264_v30 = vpop.xlane.xlu0 %1263 }
 0xbcb   : > { %v7434_v48 = vpop.eup %7433 }
 0xbcc   : > { %v1261_v61 = vpop.xlane.xlu1 %1260  ;;  %v1292_v10 = vmul.f32 %v7434_v48, %v8553_v37 }
 0xbcd   : > { %v1459_v32 = vpop.xlane.xlu2 %1458  ;;  %7435 = vrcp.f32 %v1261_v61 }
 0xbce   : > { %v1480_v42 = vsub.f32 %v8569_v49, %v1459_v32  ;;  %7437 = vpow2.f32 %v1500_v25  ;;  %v8752_v32 = vadd.f32 %v8571_v51, %v8381_v28 }
 0xbd0   : > { %v1496_v45 = vmul.f32 1.442695, %v1480_v42  ;;  %v1724_v51 = vsel %vm575_vm1, %v8752_v32, -inf }
 0xbd2   : > { %7439 = vpow2.f32 %v1496_v45  ;;  %1773 = vadd.xlane.f32.xlu2 %v1772_v26  ;;  %1986 = vmax.xlane.f32.xlu1 %v1985_v36 }
 0xbd3   : > { %v7436_v33 = vpop.eup %7435 }
 0xbd4   : > { %v1267_v43 = vpop.xlane.xlu1 %1266  ;;  %v1293_v46 = vmul.f32 %v7436_v33, %v8565_v14  ;;  %v8735_v49 = vpop.eup %7437 }
 0xbd5   : > { %v1462_v11 = vpop.xlane.xlu2 %1461  ;;  %7441 = vrcp.f32 %v1267_v43  ;;  %v1529_v55 = vsel %vm575_vm1, %v8735_v49, 0.0 }
 0xbd6   : > { %v1481_v20 = vsub.f32 %v8582_v18, %v1462_v11  ;;  %v1301_v22 = vpack.c.bf16 %v1293_v46, %v1292_v10  ;;  %v8747_v18 = vadd.f32 %v8584_v2, %v8381_v28 }
 0xbd8   : > { %v8738_v34 = vpop.eup %7439  ;;  %v1498_v1 = vmul.f32 1.442695, %v1481_v20  ;;  %v1727_v36 = vsel %vm575_vm1, %v8747_v18, -inf  ;;  %v8768_v20 = vadd.f32 %v8652_v21, %v8381_v28 }
 0xbd9   : > { %6903 = vmatmul.msk.bf16.gmra.mxu3 %vm575_vm1, %v1301_v22  ;;  %v1523_v37 = vsel %vm575_vm1, %v8738_v34, 0.0 }
 0xbda   : > { %7443 = vpow2.f32 %v1498_v1  ;;  %1530 = vadd.xlane.f32.xlu2 %v1529_v55  ;;  %1524 = vadd.xlane.f32.xlu0 %v1523_v37  ;;  %v1273_v1 = vpop.xlane.xlu0 %1272 }
 0xbdb   : > { %7445 = vrcp.f32 %v1264_v30  ;;  %v7442_v42 = vpop.eup %7441 }
 0xbdc   : > { %v1471_v14 = vpop.xlane.xlu1 %1470 }
 0xbdd   : > { %v1468_v25 = vpop.xlane.xlu2 %1467  ;;  %v1484_v61 = vsub.f32 %v8597_v29, %v1471_v14  ;;  %v1295_v29 = vmul.f32 %v7442_v42, %v8578_v0 }
 0xbde   : > { %v1483_v26 = vsub.f32 %v8601_v60, %v1468_v25 }
 0xbdf   : > { %v1504_v45 = vmul.f32 1.442695, %v1484_v61 }
 0xbe0   : > { %v8754_v48 = vpop.eup %7443  ;;  %v1502_v43 = vmul.f32 1.442695, %v1483_v26  ;;  %v1738_v26 = vsub.f32 %v8497_v44, %v8700_v40 }
 0xbe1   : > { %7447 = vpow2.f32 %v1504_v45  ;;  %v1526_v2 = vsel %vm575_vm1, %v8754_v48, 0.0  ;;  %v7446_v33 = vpop.eup %7445 }
 0xbe2   : > { %1728 = vmax.xlane.f32.xlu2 %v1727_v36  ;;  %1527 = vadd.xlane.f32.xlu1 %v1526_v2  ;;  %v1294_v11 = vmul.f32 %v7446_v33, %v8545_v23  ;;  %7449 = vpow2.f32 %v1502_v43  ;;  %v1982_v23 = vsel %vm575_vm1, %v8768_v20, -inf  ;;  %v1969_v36 = vpop.xlane.xlu0 %1968 }
 0xbe3   : > { %1725 = vmax.xlane.f32.xlu0 %v1724_v51  ;;  %v1751_v51 = vmul.f32 1.442695, %v1738_v26  ;;  %v1998_v26 = vsub.f32 %v8604_v16, %v1969_v36 }
 0xbe4   : > { %v1474_v10 = vpop.xlane.xlu1 %1473  ;;  %v1302_v55 = vpack.c.bf16 %v1295_v29, %v1294_v11 }
 0xbe5   : > { %v1270_v46 = vpop.xlane.xlu2 %1269  ;;  %v1485_v60 = vsub.f32 %v8616_v47, %v1474_v10  ;;  %v8794_v10 = vadd.f32 %v8606_v24, %v8381_v28 }
 0xbe7   : > { %v8770_v22 = vpop.eup %7447  ;;  %v1506_v30 = vmul.f32 1.442695, %v1485_v60  ;;  %v1739_v60 = vsub.f32 %v8512_v41, %v8688_v9 }
 0xbe8   : > { %v1535_v0 = vsel %vm575_vm1, %v8770_v22, 0.0  ;;  %v8779_v37 = vpop.eup %7449 }
 0xbe9   : > { %7451 = vpow2.f32 %v1506_v30  ;;  %6904 = vmatmul.msk.bf16.gmra.mxu3 %vm575_vm1, %v1302_v55  ;;  %v1532_v33 = vsel %vm575_vm1, %v8779_v37, 0.0  ;;  %v1753_v24 = vmul.f32 1.442695, %v1739_v60 }
 0xbea   : > { %7453 = vrcp.f32 %v1270_v46  ;;  %1536 = vadd.xlane.f32.xlu1 %v1535_v0 }
 0xbeb   : > { %1983 = vmax.xlane.f32.xlu0 %v1982_v23  ;;  %7455 = vrcp.f32 %v1273_v1 }
 0xbec   : > { %v8777_v21 = vpop.xlane.xlu1 %1971 }
 0xbed   : > { %v1966_v47 = vpop.xlane.xlu2 %1965 }
 0xbee   : > { %v1997_v14 = vsub.f32 %v8632_v59, %v1966_v47  ;;  %v1513_v11 = vpop.xlane.xlu0 %1512 }
 0xbef   : > { %v8782_v25 = vpop.eup %7451 }
 0xbf0   : > { %v7454_v61 = vpop.eup %7453  ;;  %v2008_v42 = vmul.f32 1.442695, %v1997_v14  ;;  %v1538_v45 = vsel %vm575_vm1, %v8782_v25, 0.0 }
 0xbf1   : > { %v7456_v2 = vpop.eup %7455  ;;  %v1296_v59 = vmul.f32 %v7454_v61, %v8620_v17 }
 0xbf2   : > { %7457 = vpow2.f32 %v2008_v42  ;;  %1539 = vadd.xlane.f32.xlu1 %v1538_v45  ;;  %v1297_v43 = vmul.f32 %v7456_v2, %v8586_v6  ;;  %v1730_v6 = vsel %vm575_vm1, %v8794_v10, -inf }
 0xbf3   : > { %1533 = vadd.xlane.f32.xlu0 %v1532_v33  ;;  %7459 = vpow2.f32 %v1751_v51 }
 0xbf4   : > { %v1276_v46 = vpop.xlane.xlu1 %1275  ;;  %v1303_v44 = vpack.c.bf16 %v1297_v43, %v1296_v59 }
 0xbf5   : > { %v1975_v29 = vpop.xlane.xlu2 %1974  ;;  %7461 = vrcp.f32 %v1276_v46 }
 0xbf6   : > { %7463 = vrcp.f32 %v1513_v11  ;;  %v1720_v33 = vpop.xlane.xlu0 %1719  ;;  %v2000_v51 = vsub.f32 %v8646_v12, %v1975_v29  ;;  %v1999_v12 = vsub.f32 %v8629_v58, %v8777_v21 }
 0xbf8   : > { %v8796_v40 = vpop.eup %7457 }
 0xbf9   : > { %6905 = vmatmul.msk.bf16.gmra.mxu3 %vm575_vm1, %v1303_v44  ;;  %v2030_v17 = vsel %vm575_vm1, %v8796_v40, 0.0  ;;  %v8805_v30 = vpop.eup %7459 }
 0xbfa   : > { %2031 = vadd.xlane.f32.xlu2 %v2030_v17  ;;  %v1775_v9 = vsel %vm575_vm1, %v8805_v30, 0.0 }
 0xbfb   : > { %1731 = vmax.xlane.f32.xlu0 %v1730_v6  ;;  %v7462_v55 = vpop.eup %7461 }
 0xbfc   : > { %v7464_v41 = vpop.eup %7463  ;;  %v1298_v0 = vmul.f32 %v7462_v55, %v8643_v15  ;;  %v8823_v15 = vadd.f32 %v8677_v57, %v8381_v28 }
 0xbfd   : > { %v1510_v1 = vpop.xlane.xlu2 %1509  ;;  %v1553_v47 = vmul.f32 %v7464_v41, %v8637_v7  ;;  %v2010_v7 = vmul.f32 1.442695, %v1998_v26 }
 0xbfe   : > { %7465 = vrcp.f32 %v1510_v1  ;;  %v1304_v45 = vpack.c.bf16 %v1298_v0, %v1298_v0  ;;  %v1991_v16 = vsel %vm575_vm1, %v8823_v15, -inf  ;;  %v8853_v0 = vadd.f32 %v8669_v39, %v8381_v28 }
 0xbff   : > { %7467 = vpow2.f32 %v1753_v24  ;;  %v2012_v24 = vmul.f32 1.442695, %v1999_v12 }
 0xc00   : > { %7469 = vpow2.f32 %v2010_v7 }
 0xc03   : > { %1776 = vadd.xlane.f32.xlu0 %v1775_v9 }
 0xc04   : > { %v7466_v23 = vpop.eup %7465 }
 0xc05   : > { %v1552_v14 = vmul.f32 %v7466_v23, %v8660_v27  ;;  %v8812_v61 = vpop.eup %7467  ;;  %v1740_v27 = vsub.f32 %v8556_v50, %v8710_v53  ;;  %v2014_v50 = vmul.f32 1.442695, %v2000_v51  ;;  %v1978_v44 = vpop.xlane.xlu2 %1977 }
 0xc06   : > { %v1778_v2 = vsel %vm575_vm1, %v8812_v61, 0.0  ;;  %v8831_v59 = vpop.eup %7469  ;;  %v2001_v17 = vsub.f32 %v8667_v31, %v1978_v44 }
 0xc07   : > { %v1563_v42 = vpack.c.bf16 %v1553_v47, %v1552_v14  ;;  %v1755_v36 = vmul.f32 1.442695, %v1740_v27  ;;  %v2033_v57 = vsel %vm575_vm1, %v8831_v59, 0.0 }
 0xc08   : > { %v2016_v1 = vmul.f32 1.442695, %v2001_v17 }
 0xc09   : > { %6906 = vmatmul.msk.bf16.gmra.mxu3 %vm575_vm1, %v1304_v45  ;;  %6913 = vmatmul.msk.bf16.vlgmr.msra.gmra.mxu0 %vm575_vm1, %v1563_v42  ;;  %7471 = vpow2.f32 %v1755_v36 }
 0xc0a   : > { %7473 = vpow2.f32 %v2014_v50 }
 0xc0b   : > { %1779 = vadd.xlane.f32.xlu0 %v1778_v2  ;;  %1830 = vrot.lane.b32.xlu1 %v8329_v3, %s11639_s23 }
 0xc0d   : > { %v1723_v55 = vpop.xlane.xlu2 %1722 }
 0xc0e   : > { %v1742_v58 = vsub.f32 %v8675_v54, %v1723_v55 }
 0xc0f   : > { %v8836_v43 = vpop.eup %7471 }
 0xc10   : > { %v1781_v46 = vsel %vm575_vm1, %v8836_v43, 0.0  ;;  %v8841_v11 = vpop.eup %7473  ;;  %v1759_v21 = vmul.f32 1.442695, %v1742_v58 }
 0xc11   : > { %v2039_v6 = vsel %vm575_vm1, %v8841_v11, 0.0 }
 0xc12   : > { %2091 = vrot.lane.b32.xlu2 %v8329_v3, %s11640_s29  ;;  %v1741_v3 = vsub.f32 %v8650_v8, %v1720_v33  ;;  %v8878_v33 = vadd.f32 %v8618_v35, %v8381_v28  ;;  %v8895_v35 = vadd.f32 %v8682_v4, %v8381_v28 }
 0xc13   : > { %1992 = vmax.xlane.f32.xlu0 %v1991_v16 }
 0xc14   : > { %v1757_v60 = vmul.f32 1.442695, %v1741_v3  ;;  %v1733_v50 = vsel %vm575_vm1, %v8878_v33, -inf }
 0xc16   : > { %7475 = vpow2.f32 %v1757_v60 }
 0xc17   : > { %7477 = vpow2.f32 %v2012_v24 }
 0xc18   : > { %7479 = vpow2.f32 %v2016_v1 }
 0xc1b   : > { %2034 = vadd.xlane.f32.xlu0 %v2033_v57 }
 0xc1c   : > { %v1516_v53 = vpop.xlane.xlu0 %1515  ;;  %v8849_v41 = vpop.eup %7475 }
 0xc1d   : > { %v1784_v31 = vsel %vm575_vm1, %v8849_v41, 0.0  ;;  %v8860_v47 = vpop.eup %7477 }
 0xc1e   : > { %v8862_v39 = vpop.eup %7479  ;;  %v2036_v45 = vsel %vm575_vm1, %v8860_v47, 0.0 }
 0xc1f   : > { %v2042_v42 = vsel %vm575_vm1, %v8862_v39, 0.0 }
 0xc23   : > { %1782 = vadd.xlane.f32.xlu0 %v1781_v46  ;;  %v1994_v46 = vsel %vm575_vm1, %v8895_v35, -inf }
 0xc24   : > { %v1981_v29 = vpop.xlane.xlu0 %1980 }
 0xc25   : > { %v2002_v8 = vsub.f32 %v8691_v19, %v1981_v29  ;;  %v1988_v19 = vsel %vm575_vm1, %v8853_v0, -inf }
 0xc27   : > { %v2018_v9 = vmul.f32 1.442695, %v2002_v8 }
 0xc29   : > { %7481 = vpow2.f32 %v2018_v9 }
 0xc2a   : > { %7483 = vrcp.f32 %v1516_v53 }
 0xc2b   : > { %2040 = vadd.xlane.f32.xlu0 %v2039_v6 }
 0xc2f   : > { %v8864_v14 = vpop.eup %7481 }
 0xc30   : > { %v7484_v54 = vpop.eup %7483  ;;  %v2045_v7 = vsel %vm575_vm1, %v8864_v14, 0.0 }
 0xc31   : > { %v1554_v16 = vmul.f32 %v7484_v54, %v8684_v5 }
 0xc33   : > { %1785 = vadd.xlane.f32.xlu0 %v1784_v31 }
 0xc35   : > { %1989 = vmax.xlane.f32.xlu1 %v1988_v19  ;;  %v1519_v23 = vpop.xlane.xlu1 %1518 }
 0xc36   : > { %7485 = vrcp.f32 %v1519_v23 }
 0xc37   : > { %7487 = vpow2.f32 %v1759_v21 }
 0xc3b   : > { %2043 = vadd.xlane.f32.xlu0 %v2042_v42  ;;  %2037 = vadd.xlane.f32.xlu2 %v2036_v45 }
 0xc3c   : > { %v7486_v26 = vpop.eup %7485  ;;  %v8870_v2 = vpop.f32.mrf.mxu3 }
 0xc3d   : > { %v1522_v27 = vpop.xlane.xlu2 %1521  ;;  %2046 = vadd.xlane.f32.xlu1 %v2045_v7  ;;  %v1555_v36 = vmul.f32 %v7486_v26, %v8703_v56  ;;  %v8880_v51 = vpop.eup %7487 }
 0xc3e   : > { %v1787_v53 = vsel %vm575_vm1, %v8880_v51, 0.0  ;;  %v8887_v5 = vpop.xlane.xlu1 %1770  ;;  %7489 = vrcp.f32 %v1522_v27 }
 0xc3f   : > { %v1564_v57 = vpack.c.bf16 %v1555_v36, %v1554_v16 }
 0xc41   : > { %6914 = vmatmul.msk.bf16.gmra.mxu0 %vm575_vm1, %v1564_v57 }
 0xc43   : > { %1734 = vmax.xlane.f32.xlu0 %v1733_v50  ;;  %1788 = vadd.xlane.f32.xlu2 %v1787_v53 }
 0xc44   : > { %v8889_v56 = vpop.f32.mrf.mxu3  ;;  %v7490_v17 = vpop.eup %7489 }
 0xc45   : > { %v8891_v3 = vpop.xlane.xlu2 %1773  ;;  %v1556_v9 = vmul.f32 %v7490_v17, %v8714_v62 }
 0xc46   : > { %v1987_v29 = vpop.xlane.xlu1 %1986 }
 0xc47   : > { %v2004_v23 = vsub.f32 %v8724_v38, %v1987_v29 }
 0xc4b   : > { %1995 = vmax.xlane.f32.xlu0 %v1994_v46 }
 0xc4c   : > { %v8899_v44 = vpop.f32.mrf.mxu3 }
 0xc4d   : > { %v1531_v60 = vpop.xlane.xlu2 %1530  ;;  %v1525_v12 = vpop.xlane.xlu0 %1524 }
 0xc4e   : > { %7491 = vrcp.f32 %v1525_v12 }
 0xc54   : > { %v8901_v6 = vpop.f32.mrf.mxu3  ;;  %v7492_v8 = vpop.eup %7491 }
 0xc55   : > { %v1729_v24 = vpop.xlane.xlu2 %1728  ;;  %v1528_v55 = vpop.xlane.xlu1 %1527  ;;  %v1557_v58 = vmul.f32 %v7492_v8, %v8738_v34 }
 0xc56   : > { %v1744_v1 = vsub.f32 %v8747_v18, %v1729_v24  ;;  %v1726_v4 = vpop.xlane.xlu0 %1725  ;;  %7493 = vrcp.f32 %v1528_v55  ;;  %v2022_v18 = vmul.f32 1.442695, %v2004_v23 }
 0xc57   : > { %v1743_v31 = vsub.f32 %v8752_v32, %v1726_v4  ;;  %v1565_v21 = vpack.c.bf16 %v1557_v58, %v1556_v9 }
 0xc58   : > { %v1763_v19 = vmul.f32 1.442695, %v1744_v1 }
 0xc59   : > { %v1761_v54 = vmul.f32 1.442695, %v1743_v31  ;;  %6915 = vmatmul.msk.bf16.gmra.mxu0 %vm575_vm1, %v1565_v21 }
 0xc5a   : > { %7495 = vpow2.f32 %v1763_v19 }
 0xc5b   : > { %7497 = vpow2.f32 %v1761_v54 }
 0xc5c   : > { %v8909_v42 = vpop.f32.mrf.mxu3  ;;  %7499 = vrcp.f32 %v1531_v60  ;;  %v7494_v62 = vpop.eup %7493 }
 0xc5d   : > { %7501 = vpow2.f32 %v2022_v18  ;;  %v1558_v36 = vmul.f32 %v7494_v62, %v8754_v48  ;;  %v1537_v12 = vpop.xlane.xlu1 %1536 }
 0xc5e   : > { %v1984_v45 = vpop.xlane.xlu0 %1983 }
 0xc5f   : > { %v2003_v34 = vsub.f32 %v8768_v20, %v1984_v45 }
 0xc60   : > { %v8912_v26 = vpop.eup %7495 }
 0xc61   : > { %v8914_v32 = vpop.eup %7497  ;;  %v2020_v38 = vmul.f32 1.442695, %v2003_v34  ;;  %v1793_v7 = vsel %vm575_vm1, %v8912_v26, 0.0 }
 0xc62   : > { %1794 = vadd.xlane.f32.xlu0 %v1793_v7  ;;  %v1790_v27 = vsel %vm575_vm1, %v8914_v32, 0.0  ;;  %v7500_v16 = vpop.eup %7499 }
 0xc63   : > { %7503 = vpow2.f32 %v2020_v38  ;;  %1791 = vadd.xlane.f32.xlu1 %v1790_v27  ;;  %v1559_v20 = vmul.f32 %v7500_v16, %v8735_v49  ;;  %v8924_v53 = vpop.eup %7501 }
 0xc64   : > { %v8921_v57 = vpop.f32.mrf.mxu3  ;;  %v2051_v17 = vsel %vm575_vm1, %v8924_v53, 0.0 }
 0xc65   : > { %v1566_v46 = vpack.c.bf16 %v1559_v20, %v1558_v36  ;;  %v1540_v31 = vpop.xlane.xlu1 %1539 }
 0xc66   : > { %v1534_v50 = vpop.xlane.xlu0 %1533 }
 0xc67   : > { %7505 = vrcp.f32 %v1534_v50 }
 0xc68   : > { %7507 = vrcp.f32 %v1537_v12 }
 0xc69   : > { %v8926_v60 = vpop.eup %7503  ;;  %6916 = vmatmul.msk.bf16.gmra.mxu0 %vm575_vm1, %v1566_v46  ;;  %7509 = vrcp.f32 %v8891_v3 }
 0xc6a   : > { %v2048_v29 = vsel %vm575_vm1, %v8926_v60, 0.0 }
 0xc6b   : > { %2049 = vadd.xlane.f32.xlu2 %v2048_v29  ;;  %2052 = vadd.xlane.f32.xlu1 %v2051_v17 }
 0xc6c   : > { %v8933_v48 = vpop.f32.mrf.mxu3 }
 0xc6d   : > { %v2032_v49 = vpop.xlane.xlu2 %2031  ;;  %v7506_v1 = vpop.eup %7505 }
 0xc6e   : > { %v1732_v8 = vpop.xlane.xlu0 %1731  ;;  %v7508_v55 = vpop.eup %7507  ;;  %v1560_v9 = vmul.f32 %v7506_v1, %v8779_v37 }
 0xc6f   : > { %v1745_v24 = vsub.f32 %v8794_v10, %v1732_v8  ;;  %v1561_v21 = vmul.f32 %v7508_v55, %v8770_v22  ;;  %v7510_v10 = vpop.eup %7509 }
 0xc71   : > { %v1765_v4 = vmul.f32 1.442695, %v1745_v24  ;;  %v1567_v18 = vpack.c.bf16 %v1561_v21, %v1560_v9 }
 0xc73   : > { %7511 = vpow2.f32 %v1765_v4 }
 0xc74   : > { %v8938_v58 = vpop.f32.mrf.mxu3  ;;  %7513 = vrcp.f32 %v8887_v5  ;;  %v1814_v5 = vmul.f32 %v7510_v10, %v8726_v52 }
 0xc75   : > { %v2092_v19 = vpop.permute.xlu2 %2091  ;;  %7515 = vrcp.f32 %v1540_v31 }
 0xc76   : > { %v2112_v23 = vsel %vm612_vm2, %v2092_v19, 0  ;;  %v1777_v54 = vpop.xlane.xlu0 %1776 }
 0xc77   : > { %2121 = vmatpush.bf16.msrb.mxu0 %v2112_v23 }
 0xc79   : > { %v8943_v45 = vpop.eup %7511  ;;  %6917 = vmatmul.msk.bf16.gmra.mxu0 %vm575_vm1, %v1567_v18 }
 0xc7a   : > { %v1796_v37 = vsel %vm575_vm1, %v8943_v45, 0.0  ;;  %v7514_v3 = vpop.eup %7513 }
 0xc7b   : > { %1797 = vadd.xlane.f32.xlu2 %v1796_v37  ;;  %v1813_v34 = vmul.f32 %v7514_v3, %v8712_v63  ;;  %v7516_v16 = vpop.eup %7515 }
 0xc7c   : > { %v8949_v62 = vpop.f32.mrf.mxu3  ;;  %v1562_v20 = vmul.f32 %v7516_v16, %v8782_v25 }
 0xc7d   : > { %v1831_v22 = vpop.permute.xlu1 %1830  ;;  %v1824_v27 = vpack.c.bf16 %v1814_v5, %v1813_v34 }
 0xc7e   : > { %v1780_v38 = vpop.xlane.xlu0 %1779  ;;  %v1851_v7 = vsel %vm612_vm2, %v1831_v22, 0  ;;  %v1568_v46 = vpack.c.bf16 %v1562_v20, %v1562_v20 }
 0xc7f   : > { %1860 = vmatpush.bf16.msrb.mxu3 %v1851_v7  ;;  %7517 = vrcp.f32 %v1780_v38 }
 0xc80   : > { %7519 = vrcp.f32 %v1777_v54 }
 0xc82   : > { %6925 = vmatmul.msk.bf16.vlgmr.msrb.gmra.mxu3 %vm575_vm1, %v1824_v27 }
 0xc84   : > { %v8954_v36 = vpop.f32.mrf.mxu3 }
 0xc85   : > { %v7518_v12 = vpop.eup %7517 }
 0xc86   : > { %v1993_v52 = vpop.xlane.xlu0 %1992  ;;  %v7520_v29 = vpop.eup %7519  ;;  %v1816_v8 = vmul.f32 %v7518_v12, %v8812_v61 }
 0xc87   : > { %v2006_v50 = vsub.f32 %v8823_v15, %v1993_v52  ;;  %v1815_v1 = vmul.f32 %v7520_v29, %v8805_v30  ;;  %v1601_v21 = vpop.f32.mrf.mxu0 }
 0xc89   : > { %v2026_v63 = vmul.f32 1.442695, %v2006_v50  ;;  %6918 = vmatmul.msk.bf16.gmra.mxu0 %vm575_vm1, %v1568_v46  ;;  %v1825_v25 = vpack.c.bf16 %v1816_v8, %v1815_v1 }
 0xc8b   : > { %7521 = vpow2.f32 %v2026_v63 }
 0xc8c   : > { %v8959_v17 = vpop.f32.mrf.mxu3  ;;  %7523 = vrcp.f32 %v2032_v49 }
 0xc8e   : > { %v2035_v24 = vpop.xlane.xlu0 %2034 }
 0xc8f   : > { %7525 = vrcp.f32 %v2035_v24  ;;  %v1603_v54 = vpop.f32.mrf.mxu0 }
 0xc90   : > { %v7172_v10 = vpack.i.bf16 %v1603_v54, %v1601_v21 }
 0xc91   : > { %v8963_v4 = vpop.eup %7521 }
 0xc92   : > { %v2057_v15 = vsel %vm575_vm1, %v8963_v4, 0.0  ;;  %6926 = vmatmul.msk.bf16.gmra.mxu3 %vm575_vm1, %v1825_v25  ;;  %v7524_v55 = vpop.eup %7523 }
 0xc93   : > { %2058 = vadd.xlane.f32.xlu0 %v2057_v15  ;;  %v2074_v19 = vmul.f32 %v7524_v55, %v8796_v40 }
 0xc94   : > { %v1367_v9 = vpop.f32.mrf.mxu3 }
 0xc95   : > { %v7526_v31 = vpop.eup %7525 }
 0xc96   : > { %v2075_v61 = vmul.f32 %v7526_v31, %v8831_v59  ;;  %v1783_v49 = vpop.xlane.xlu0 %1782 }
 0xc97   : > { %7527 = vrcp.f32 %v1783_v49 }
 0xc98   : > { %v2085_v30 = vpack.c.bf16 %v2075_v61, %v2074_v19 }
 0xc9a   : > { %6937 = vmatmul.msk.bf16.vlgmr.msrb.gmra.mxu0 %vm575_vm1, %v2085_v30 }
 0xc9d   : > { %v7528_v5 = vpop.eup %7527 }
 0xc9e   : > { %v2041_v23 = vpop.xlane.xlu0 %2040  ;;  %v1817_v59 = vmul.f32 %v7528_v5, %v8836_v43 }
 0xca6   : > { %v1786_v18 = vpop.xlane.xlu0 %1785 }
 0xca7   : > { %7529 = vrcp.f32 %v1786_v18  ;;  %7173 = vrot.lane.b32.xlu0 %v7172_v10, %s11641_s30 }
 0xca8   : > { %v1990_v37 = vpop.xlane.xlu1 %1989 }
 0xca9   : > { %v2005_v3 = vsub.f32 %v8853_v0, %v1990_v37 }
 0xcab   : > { %v2024_v40 = vmul.f32 1.442695, %v2005_v3 }
 0xcad   : > { %v7530_v22 = vpop.eup %7529  ;;  %7531 = vpow2.f32 %v2024_v40 }
 0xcae   : > { %7533 = vrcp.f32 %v2041_v23  ;;  %v1818_v34 = vmul.f32 %v7530_v22, %v8849_v41  ;;  %v2044_v38 = vpop.xlane.xlu0 %2043  ;;  %v2038_v7 = vpop.xlane.xlu2 %2037 }
 0xcaf   : > { %7535 = vrcp.f32 %v2038_v7 }
 0xcb0   : > { %v1826_v27 = vpack.c.bf16 %v1818_v34, %v1817_v59  ;;  %v2047_v12 = vpop.xlane.xlu1 %2046 }
 0xcb2   : > { %6927 = vmatmul.msk.bf16.gmra.mxu3 %vm575_vm1, %v1826_v27 }
 0xcb3   : > { %v8976_v16 = vpop.eup %7531 }
 0xcb4   : > { %v7534_v20 = vpop.eup %7533  ;;  %v2054_v0 = vsel %vm575_vm1, %v8976_v16, 0.0 }
 0xcb5   : > { %2055 = vadd.xlane.f32.xlu1 %v2054_v0  ;;  %v7536_v52 = vpop.eup %7535  ;;  %v2077_v43 = vmul.f32 %v7534_v20, %v8841_v11 }
 0xcb6   : > { %v1735_v50 = vpop.xlane.xlu0 %1734  ;;  %v2076_v46 = vmul.f32 %v7536_v52, %v8860_v47  ;;  %v1789_v21 = vpop.xlane.xlu2 %1788 }
 0xcb7   : > { %v1746_v41 = vsub.f32 %v8878_v33, %v1735_v50 }
 0xcb8   : > { %v2086_v29 = vpack.c.bf16 %v2077_v43, %v2076_v46 }
 0xcb9   : > { %v1767_v63 = vmul.f32 1.442695, %v1746_v41 }
 0xcba   : > { %6938 = vmatmul.msk.bf16.gmra.mxu0 %vm575_vm1, %v2086_v29 }
 0xcbb   : > { %7537 = vpow2.f32 %v1767_v63 }
 0xcbc   : > { %7539 = vrcp.f32 %v2047_v12 }
 0xcbd   : > { %7541 = vrcp.f32 %v2044_v38 }
 0xcbe   : > { %v1996_v8 = vpop.xlane.xlu0 %1995  ;;  %v1606_v24 = vpop.f32.mrf.mxu0 }
 0xcbf   : > { %v2007_v1 = vsub.f32 %v8895_v35, %v1996_v8 }
 0xcc1   : > { %v8985_v25 = vpop.eup %7537  ;;  %v2028_v15 = vmul.f32 1.442695, %v2007_v1 }
 0xcc2   : > { %v7540_v11 = vpop.eup %7539  ;;  %v1799_v47 = vsel %vm575_vm1, %v8985_v25, 0.0 }
 0xcc3   : > { %7543 = vpow2.f32 %v2028_v15  ;;  %1800 = vadd.xlane.f32.xlu2 %v1799_v47  ;;  %v7542_v33 = vpop.eup %7541  ;;  %v2079_v55 = vmul.f32 %v7540_v11, %v8864_v14 }
 0xcc4   : > { %v2078_v31 = vmul.f32 %v7542_v33, %v8862_v39  ;;  %7545 = vrcp.f32 %v1789_v21 }
 0xcc6   : > { %v1608_v9 = vpop.f32.mrf.mxu0  ;;  %v2087_v35 = vpack.c.bf16 %v2079_v55, %v2078_v31 }
 0xcc7   : > { %v7187_v19 = vpack.i.bf16 %v1608_v9, %v1606_v24 }
 0xcc9   : > { %v8991_v61 = vpop.eup %7543  ;;  %7188 = vrot.lane.b32.xlu0 %v7187_v19, %s11641_s30 }
 0xcca   : > { %v2060_v49 = vsel %vm575_vm1, %v8991_v61, 0.0  ;;  %6939 = vmatmul.msk.bf16.gmra.mxu0 %vm575_vm1, %v2087_v35  ;;  %v7546_v23 = vpop.eup %7545 }
 0xccb   : > { %2061 = vadd.xlane.f32.xlu1 %v2060_v49  ;;  %v1819_v39 = vmul.f32 %v7546_v23, %v8880_v51 }
 0xcd5   : > { %v1795_v27 = vpop.xlane.xlu0 %1794 }
 0xcd6   : > { %v1792_v30 = vpop.xlane.xlu1 %1791  ;;  %v1611_v14 = vpop.f32.mrf.mxu0 }
 0xcd7   : > { %7547 = vrcp.f32 %v1792_v30 }
 0xcdd   : > { %v7548_v54 = vpop.eup %7547 }
 0xcde   : > { %v1820_v10 = vmul.f32 %v7548_v54, %v8914_v32  ;;  %v2050_v18 = vpop.xlane.xlu2 %2049  ;;  %v2053_v37 = vpop.xlane.xlu1 %2052 }
 0xcdf   : > { %7549 = vrcp.f32 %v2050_v18  ;;  %v1613_v3 = vpop.f32.mrf.mxu0 }
 0xce0   : > { %7551 = vrcp.f32 %v2053_v37  ;;  %v1827_v5 = vpack.c.bf16 %v1820_v10, %v1819_v39  ;;  %v7202_v47 = vpack.i.bf16 %v1613_v3, %v1611_v14 }
 0xce1   : > { %7553 = vrcp.f32 %v1795_v27  ;;  %v6886_v27 = vld [vmem:[%s11569_s6 + $0x70] sm:$0xff] }
 0xce2   : > { %6928 = vmatmul.msk.bf16.gmra.mxu3 %vm575_vm1, %v1827_v5 }
 0xce5   : > { %v7550_v40 = vpop.eup %7549 }
 0xce6   : > { %v7552_v22 = vpop.eup %7551  ;;  %v2080_v59 = vmul.f32 %v7550_v40, %v8926_v60 }
 0xce7   : > { %v2081_v34 = vmul.f32 %v7552_v22, %v8924_v53  ;;  %v1616_v38 = vpop.f32.mrf.mxu0  ;;  %v7554_v20 = vpop.eup %7553 }
 0xce8   : > { %v1821_v52 = vmul.f32 %v7554_v20, %v8912_v26 }
 0xce9   : > { %v2088_v7 = vpack.c.bf16 %v2081_v34, %v2080_v59 }
 0xceb   : > { %6940 = vmatmul.msk.bf16.gmra.mxu0 %vm575_vm1, %v2088_v7 }
 0xcee   : > { %v1798_v51 = vpop.xlane.xlu2 %1797 }
 0xcef   : > { %7555 = vrcp.f32 %v1798_v51  ;;  %v1618_v32 = vpop.f32.mrf.mxu0  ;;  %v6887_v51 = vld [vmem:[%s11569_s6 + $0x78] sm:$0xff] }
 0xcf0   : > { %v7217_v31 = vpack.i.bf16 %v1618_v32, %v1616_v38  ;;  %v2324_v32 = vpack.c.bf16 %v6887_v51, %v6886_v27 }
 0xcf2   : > { %2350 = vmatpush.bf16.msrb.mxu2 %v2324_v32 }
 0xcf5   : > { %v7556_v0 = vpop.eup %7555 }
 0xcf6   : > { %v1822_v50 = vmul.f32 %v7556_v0, %v8943_v45 }
 0xcf7   : > { %v1621_v43 = vpop.f32.mrf.mxu0 }
 0xcf8   : > { %v1828_v46 = vpack.c.bf16 %v1822_v50, %v1821_v52  ;;  %v6884_v50 = vld [vmem:[%s11569_s6 + $0x60] sm:$0xff] }
 0xcfa   : > { %6929 = vmatmul.msk.bf16.gmra.mxu3 %vm575_vm1, %v1828_v46 }
 0xcff   : > { %v1623_v53 = vpop.f32.mrf.mxu0 }
 0xd00   : > { %v7232_v14 = vpack.i.bf16 %v1623_v53, %v1621_v43  ;;  %v6885_v43 = vld [vmem:[%s11569_s6 + $0x68] sm:$0xff] }
 0xd01   : > { %v2323_v46 = vpack.c.bf16 %v6885_v43, %v6884_v50 }
 0xd03   : > { %2351 = vmatpush.bf16.msrb.mxu2 %v2323_v46 }
 0xd05   : > { %v1862_v60 = vpop.f32.mrf.mxu3 }
 0xd06   : > { %v2059_v45 = vpop.xlane.xlu0 %2058 }
 0xd07   : > { %v1626_v41 = vpop.f32.mrf.mxu0  ;;  %7557 = vrcp.f32 %v2059_v45 }
 0xd0d   : > { %v1864_v12 = vpop.f32.mrf.mxu3  ;;  %v7558_v55 = vpop.eup %7557 }
 0xd0e   : > { %v7177_v63 = vpack.i.bf16 %v1864_v12, %v1862_v60  ;;  %v2083_v19 = vmul.f32 %v7558_v55, %v8963_v4 }
 0xd0f   : > { %v1628_v29 = vpop.f32.mrf.mxu0 }
 0xd10   : > { %7178 = vrot.lane.b32.xlu2 %v7177_v63, %s11642_s24 }
 0xd15   : > { %v1867_v8 = vpop.f32.mrf.mxu3 }
 0xd17   : > { %v2123_v24 = vpop.f32.mrf.mxu0 }
 0xd19   : > { %v7174_v12 = vpop.permute.xlu0 %7173 }
 0xd1a   : > { %v7176_v29 = vunpack.i.h.bf16 %v7174_v12 }
 0xd1d   : > { %v1869_v1 = vpop.f32.mrf.mxu3 }
 0xd1e   : > { %v7192_v15 = vpack.i.bf16 %v1869_v1, %v1867_v8  ;;  %v7175_v8 = vunpack.i.l.bf16 %v7174_v12 }
 0xd1f   : > { %v2125_v11 = vpop.f32.mrf.mxu0 }
 0xd20   : > { %v7182_v26 = vpack.i.bf16 %v2125_v11, %v2123_v24  ;;  %7193 = vrot.lane.b32.xlu2 %v7192_v15, %s11642_s24  ;;  %v2285_v11 = vsel %vm575_vm1, %v8889_v56, %v7176_v29 }
 0xd22   : > { %7183 = vrot.lane.b32.xlu1 %v7182_v26, %s11643_s15  ;;  %v2284_v26 = vsel %vm575_vm1, %v8870_v2, %v7175_v8 }
 0xd28   : > { %v2056_v33 = vpop.xlane.xlu1 %2055 }
 0xd29   : > { %7559 = vrcp.f32 %v2056_v33 }
 0xd2a   : > { %7203 = vrot.lane.b32.xlu1 %v7202_v47, %s11641_s30 }
 0xd2f   : > { %v7560_v9 = vpop.eup %7559 }
 0xd30   : > { %v2082_v35 = vmul.f32 %v7560_v9, %v8976_v16 }
 0xd32   : > { %7218 = vrot.lane.b32.xlu1 %v7217_v31, %s11641_s30  ;;  %v2089_v49 = vpack.c.bf16 %v2083_v19, %v2082_v35 }
 0xd34   : > { %6941 = vmatmul.msk.bf16.gmra.mxu0 %vm575_vm1, %v2089_v49 }
 0xd35   : > { %v1872_v21 = vpop.f32.mrf.mxu3 }
 0xd36   : > { %v1801_v30 = vpop.xlane.xlu2 %1800 }
 0xd37   : > { %7561 = vrcp.f32 %v1801_v30  ;;  %v2128_v23 = vpop.f32.mrf.mxu0 }
 0xd3a   : > { %7233 = vrot.lane.b32.xlu1 %v7232_v14, %s11641_s30 }
 0xd3b   : > { %v7189_v35 = vpop.permute.xlu0 %7188 }
 0xd3c   : > { %v7191_v56 = vunpack.i.h.bf16 %v7189_v35  ;;  %v7190_v30 = vunpack.i.l.bf16 %v7189_v35  ;;  %v7928_v35 = vld [vmem:[%s8238_s14] sm:$0xff] }
 0xd3d   : > { %v7562_v54 = vpop.eup %7561  ;;  %v1874_v39 = vpop.f32.mrf.mxu3 }
 0xd3e   : > { %v7207_v10 = vpack.i.bf16 %v1874_v39, %v1872_v21  ;;  %v2062_v18 = vpop.xlane.xlu1 %2061  ;;  %v1823_v4 = vmul.f32 %v7562_v54, %v8985_v25  ;;  %v2287_v54 = vsel %vm575_vm1, %v8901_v6, %v7191_v56  ;;  %v2286_v39 = vsel %vm575_vm1, %v8899_v44, %v7190_v30 }
 0xd3f   : > { %7563 = vrcp.f32 %v2062_v18  ;;  %v2130_v16 = vpop.f32.mrf.mxu0 }
 0xd40   : > { %7208 = vrot.lane.b32.xlu2 %v7207_v10, %s11642_s24  ;;  %v1829_v37 = vpack.c.bf16 %v1823_v4, %v1823_v4  ;;  %v7197_v3 = vpack.i.bf16 %v2130_v16, %v2128_v23 }
 0xd42   : > { %2183 = vrot.lane.b32.xlu1 %v1626_v41, %s11641_s30  ;;  %6930 = vmatmul.msk.bf16.gmra.mxu3 %vm575_vm1, %v1829_v37 }
 0xd43   : > { %7198 = vrot.lane.b32.xlu0 %v7197_v3, %s11643_s15 }
 0xd45   : > { %v7564_v5 = vpop.eup %7563 }
 0xd46   : > { %v2084_v40 = vmul.f32 %v7564_v5, %v8991_v61 }
 0xd47   : > { %v2133_v22 = vpop.f32.mrf.mxu0 }
 0xd48   : > { %v2090_v59 = vpack.c.bf16 %v2084_v40, %v2084_v40 }
 0xd4a   : > { %6942 = vmatmul.msk.bf16.gmra.mxu0 %vm575_vm1, %v2090_v59 }
 0xd4f   : > { %v2135_v25 = vpop.f32.mrf.mxu0 }
 0xd50   : > { %v7212_v34 = vpack.i.bf16 %v2135_v25, %v2133_v22 }
 0xd52   : > { %7213 = vrot.lane.b32.xlu0 %v7212_v34, %s11643_s15 }
 0xd65   : > { %v1877_v38 = vpop.f32.mrf.mxu3 }
 0xd68   : > { %v2138_v7 = vpop.f32.mrf.mxu0 }
 0xd6a   : > { %v7179_v63 = vpop.permute.xlu2 %7178 }
 0xd6b   : > { %v7181_v24 = vunpack.i.h.bf16 %v7179_v63  ;;  %v7180_v1 = vunpack.i.l.bf16 %v7179_v63 }
 0xd6d   : > { %v1879_v61 = vpop.f32.mrf.mxu3  ;;  %v2296_v33 = vsel %vm813_vm3, %v2285_v11, %v7181_v24  ;;  %v2295_v55 = vsel %vm813_vm3, %v2284_v26, %v7180_v1 }
 0xd6e   : > { %v7222_v20 = vpack.i.bf16 %v1879_v61, %v1877_v38 }
 0xd70   : > { %v2140_v0 = vpop.f32.mrf.mxu0  ;;  %7223 = vrot.lane.b32.xlu2 %v7222_v20, %s11642_s24 }
 0xd71   : > { %v7227_v52 = vpack.i.bf16 %v2140_v0, %v2138_v7 }
 0xd73   : > { %7228 = vrot.lane.b32.xlu0 %v7227_v52, %s11643_s15 }
 0xd7a   : > { %v7194_v49 = vpop.permute.xlu2 %7193 }
 0xd7b   : > { %v7196_v14 = vunpack.i.h.bf16 %v7194_v49  ;;  %v7195_v2 = vunpack.i.l.bf16 %v7194_v49 }
 0xd7d   : > { %v1882_v53 = vpop.f32.mrf.mxu3  ;;  %v2298_v4 = vsel %vm813_vm3, %v2287_v54, %v7196_v14  ;;  %v2297_v16 = vsel %vm813_vm3, %v2286_v39, %v7195_v2  ;;  %v7929_v2 = vld [vmem:[%s8238_s14 + $0x8] sm:$0xff] }
 0xd85   : > { %v1884_v60 = vpop.f32.mrf.mxu3 }
 0xd86   : > { %v7237_v41 = vpack.i.bf16 %v1884_v60, %v1882_v53 }
 0xd88   : > { %7238 = vrot.lane.b32.xlu2 %v7237_v41, %s11642_s24 }
 0xd94   : > { %v7184_v15 = vpop.permute.xlu1 %7183 }
 0xd95   : > { %v7186_v45 = vunpack.i.h.bf16 %v7184_v15  ;;  %v7185_v47 = vunpack.i.l.bf16 %v7184_v15 }
 0xd97   : > { %v2307_v9 = vsel %vm815_vm4, %v2296_v33, %v7186_v45  ;;  %v2306_v31 = vsel %vm815_vm4, %v2295_v55, %v7185_v47 }
 0xd98   : > { %v2317_v19 = vpack.c.bf16 %v2307_v9, %v2306_v31 }
 0xd9a   : > { %6943 = vmatmul.msk.bf16.vlgmr.msrb.gmra.mxu2 %vm519_vm0, %v2317_v19  ;;  %v7209_v25 = vpop.permute.xlu2 %7208 }
 0xd9b   : > { %v7211_v7 = vunpack.i.h.bf16 %v7209_v25  ;;  %v7210_v27 = vunpack.i.l.bf16 %v7209_v25 }
 0xd9c   : > { %v7204_v6 = vpop.permute.xlu1 %7203 }
 0xd9d   : > { %v7206_v59 = vunpack.i.h.bf16 %v7204_v6  ;;  %v7205_v44 = vunpack.i.l.bf16 %v7204_v6 }
 0xd9f   : > { %v2289_v34 = vsel %vm575_vm1, %v8921_v57, %v7206_v59  ;;  %v2288_v38 = vsel %vm575_vm1, %v8909_v42, %v7205_v44 }
 0xda0   : > { %v2299_v0 = vsel %vm813_vm3, %v2288_v38, %v7210_v27  ;;  %v2300_v52 = vsel %vm813_vm3, %v2289_v34, %v7211_v7 }
 0xda4   : > { %v7219_v60 = vpop.permute.xlu1 %7218 }
 0xda5   : > { %v7221_v12 = vunpack.i.h.bf16 %v7219_v60  ;;  %v7220_v63 = vunpack.i.l.bf16 %v7219_v60 }
 0xda7   : > { %v2291_v1 = vsel %vm575_vm1, %v8938_v58, %v7221_v12  ;;  %v2290_v15 = vsel %vm575_vm1, %v8933_v48, %v7220_v63  ;;  %v7927_v58 = vld [vmem:[%s11574_s11] sm:$0xff] }
 0xda8   : > { %v9080_v31 = vperm.slane %v7927_v58, 3 }
 0xdac   : > { %v7234_v14 = vpop.permute.xlu1 %7233 }
 0xdb1   : > { %v2143_v21 = vpop.f32.mrf.mxu0 }
 0xdb4   : > { %v2184_v38 = vpop.permute.xlu1 %2183 }
 0xdb5   : > { %v7199_v23 = vpop.permute.xlu0 %7198 }
 0xdb6   : > { %v7201_v10 = vunpack.i.h.bf16 %v7199_v23  ;;  %v7200_v18 = vunpack.i.l.bf16 %v7199_v23 }
 0xdb8   : > { %v2308_v37 = vsel %vm815_vm4, %v2297_v16, %v7200_v18  ;;  %v2309_v3 = vsel %vm815_vm4, %v2298_v4, %v7201_v10  ;;  %v7236_v10 = vunpack.i.h.bf16 %v7234_v14  ;;  %v7235_v18 = vunpack.i.l.bf16 %v7234_v14 }
 0xdb9   : > { %v2145_v5 = vpop.f32.mrf.mxu0  ;;  %v2318_v40 = vpack.c.bf16 %v2309_v3, %v2308_v37 }
 0xdba   : > { %v7242_v22 = vpack.i.bf16 %v2145_v5, %v2143_v21  ;;  %v2293_v3 = vsel %vm575_vm1, %v8954_v36, %v7236_v10  ;;  %v2292_v5 = vsel %vm575_vm1, %v8949_v62, %v7235_v18  ;;  %v2294_v62 = vsel %vm575_vm1, %v8959_v17, %v2184_v38 }
 0xdbb   : > { %6944 = vmatmul.msk.bf16.gmra.mxu2 %vm519_vm0, %v2318_v40 }
 0xdbc   : > { %7243 = vrot.lane.b32.xlu0 %v7242_v22, %s11643_s15 }
 0xdc4   : > { %v7214_v51 = vpop.permute.xlu0 %7213 }
 0xdc5   : > { %v1887_v32 = vpop.f32.mrf.mxu3  ;;  %v7216_v61 = vunpack.i.h.bf16 %v7214_v51  ;;  %v7215_v20 = vunpack.i.l.bf16 %v7214_v51 }
 0xdc6   : > { %2227 = vrot.lane.b32.xlu2 %v1887_v32, %s11642_s24 }
 0xdc7   : > { %v2148_v50 = vpop.f32.mrf.mxu0  ;;  %v2310_v43 = vsel %vm815_vm4, %v2299_v0, %v7215_v20  ;;  %v2311_v57 = vsel %vm815_vm4, %v2300_v52, %v7216_v61  ;;  %v7930_v20 = vld [vmem:[%s8238_s14 + $0x10] sm:$0xff] }
 0xdc8   : > { %2271 = vrot.lane.b32.xlu0 %v2148_v50, %s11643_s15  ;;  %v2319_v42 = vpack.c.bf16 %v2311_v57, %v2310_v43  ;;  %v7931_v57 = vld [vmem:[%s8238_s14 + $0x18] sm:$0xff] }
 0xdca   : > { %v7224_v41 = vpop.permute.xlu2 %7223 }
 0xdcb   : > { %6945 = vmatmul.msk.bf16.gmra.mxu2 %vm519_vm0, %v2319_v42  ;;  %v7226_v29 = vunpack.i.h.bf16 %v7224_v41  ;;  %v7225_v8 = vunpack.i.l.bf16 %v7224_v41  ;;  %v7932_v41 = vld [vmem:[%s8238_s14 + $0x20] sm:$0xff] }
 0xdcd   : > { %v1889_v46 = vpop.f32.mrf.mxu3  ;;  %v2301_v45 = vsel %vm813_vm3, %v2290_v15, %v7225_v8  ;;  %v2302_v47 = vsel %vm813_vm3, %v2291_v1, %v7226_v29 }
 0xdcf   : > { %v2150_v53 = vpop.f32.mrf.mxu0 }
 0xde2   : > { %v7239_v54 = vpop.permute.xlu2 %7238 }
 0xde3   : > { %v7241_v4 = vunpack.i.h.bf16 %v7239_v54  ;;  %v7240_v16 = vunpack.i.l.bf16 %v7239_v54 }
 0xde5   : > { %v7229_v24 = vpop.permute.xlu0 %7228  ;;  %v2303_v6 = vsel %vm813_vm3, %v2292_v5, %v7240_v16  ;;  %v2304_v59 = vsel %vm813_vm3, %v2293_v3, %v7241_v4  ;;  %v7936_v3 = vld [vmem:[%s8238_s14 + $0x40] sm:$0xff] }
 0xde6   : > { %v7231_v11 = vunpack.i.h.bf16 %v7229_v24  ;;  %v7230_v26 = vunpack.i.l.bf16 %v7229_v24  ;;  %v7933_v24 = vld [vmem:[%s8238_s14 + $0x28] sm:$0xff] }
 0xde8   : > { %v2312_v33 = vsel %vm815_vm4, %v2301_v45, %v7230_v26  ;;  %v2313_v55 = vsel %vm815_vm4, %v2302_v47, %v7231_v11  ;;  %v7934_v45 = vld [vmem:[%s8238_s14 + $0x30] sm:$0xff] }
 0xde9   : > { %v2320_v9 = vpack.c.bf16 %v2313_v55, %v2312_v33 }
 0xdeb   : > { %6946 = vmatmul.msk.bf16.gmra.mxu2 %vm519_vm0, %v2320_v9 }
 0xe1d   : > { %v2353_v48 = vpop.f32.mrf.mxu2 }
 0xe1e   : > { %v2354_v19 = vadd.f32 %v2353_v48, %v9080_v31 }
 0xe20   : > { %v9084_v49 = vadd.f32 %v7928_v35, %v2354_v19  ;;  %v2228_v36 = vpop.permute.xlu2 %2227 }
 0xe21   : > { %v2305_v27 = vsel %vm813_vm3, %v2294_v62, %v2228_v36  ;;  %v7937_v36 = vld [vmem:[%s8238_s14 + $0x48] sm:$0xff] }
 0xe22   : > { %v2393_v21 = vsel %vm519_vm0, %v9084_v49, 0.0 }
 0xe23   : > { %2394 = vadd.xlane.f32.xlu1 %v2393_v21 }
 0xe25   : > { %v2355_v56 = vpop.f32.mrf.mxu2 }
 0xe26   : > { %v2356_v30 = vadd.f32 %v2355_v56, %v9080_v31 }
 0xe28   : > { %v9090_v23 = vadd.f32 %v7929_v2, %v2356_v30  ;;  %v7935_v2 = vld [vmem:[%s8238_s14 + $0x38] sm:$0xff] }
 0xe2a   : > { %v2396_v39 = vsel %vm519_vm0, %v9090_v23, 0.0 }
 0xe2b   : > { %2397 = vadd.xlane.f32.xlu2 %v2396_v39 }
 0xe2e   : > { %v7244_v37 = vpop.permute.xlu0 %7243 }
 0xe2f   : > { %v7246_v40 = vunpack.i.h.bf16 %v7244_v37  ;;  %v7245_v22 = vunpack.i.l.bf16 %v7244_v37 }
 0xe31   : > { %v2314_v44 = vsel %vm815_vm4, %v2303_v6, %v7245_v22  ;;  %v2315_v25 = vsel %vm815_vm4, %v2304_v59, %v7246_v40 }
 0xe32   : > { %v2321_v34 = vpack.c.bf16 %v2315_v25, %v2314_v44 }
 0xe34   : > { %6947 = vmatmul.msk.bf16.gmra.mxu2 %vm519_vm0, %v2321_v34 }
 0xe3a   : > { %v2272_v7 = vpop.permute.xlu0 %2271 }
 0xe3b   : > { %v2316_v32 = vsel %vm815_vm4, %v2305_v27, %v2272_v7 }
 0xe3c   : > { %v2322_v52 = vpack.c.bf16 %v2316_v32, %v2316_v32 }
 0xe3e   : > { %v2358_v51 = vpop.f32.mrf.mxu2 }
 0xe3f   : > { %v2359_v61 = vadd.f32 %v2358_v51, %v9080_v31 }
 0xe41   : > { %v2384_v0 = vadd.f32 %v7930_v20, %v2359_v61 }
 0xe43   : > { %v2399_v50 = vsel %vm519_vm0, %v2384_v0, 0.0 }
 0xe44   : > { %2400 = vadd.xlane.f32.xlu0 %v2399_v50  ;;  %6948 = vmatmul.msk.bf16.gmra.mxu2 %vm519_vm0, %v2322_v52  ;;  %v7938_v50 = vld [vmem:[%s8238_s14 + $0x50] sm:$0xff]  ;;  %s11660_s14 = smov 40  }
 0xe46   : > { %v2360_v43 = vpop.f32.mrf.mxu2 }
 0xe47   : > { %v2361_v17 = vadd.f32 %v2360_v43, %v9080_v31 }
 0xe49   : > { %v2385_v42 = vadd.f32 %v7931_v57, %v2361_v17 }
 0xe4b   : > { %v2402_v46 = vsel %vm519_vm0, %v2385_v42, 0.0 }
 0xe4c   : > { %2403 = vadd.xlane.f32.xlu1 %v2402_v46 }
 0xe4e   : > { %v2363_v53 = vpop.f32.mrf.mxu2 }
 0xe4f   : > { %v2364_v60 = vadd.f32 %v2363_v53, %v9080_v31 }
 0xe51   : > { %v2386_v12 = vadd.f32 %v7932_v41, %v2364_v60 }
 0xe53   : > { %v2405_v63 = vsel %vm519_vm0, %v2386_v12, 0.0 }
 0xe54   : > { %2406 = vadd.xlane.f32.xlu2 %v2405_v63 }
 0xe56   : > { %v2365_v29 = vpop.f32.mrf.mxu2 }
 0xe57   : > { %v2366_v8 = vadd.f32 %v2365_v29, %v9080_v31 }
 0xe59   : > { %v9119_v1 = vadd.f32 %v7933_v24, %v2366_v8 }
 0xe5b   : > { %v2408_v15 = vsel %vm519_vm0, %v9119_v1, 0.0 }
 0xe5c   : > { %2409 = vadd.xlane.f32.xlu0 %v2408_v15 }
 0xe6e   : > { %v2368_v11 = vpop.f32.mrf.mxu2 }
 0xe6f   : > { %v2369_v26 = vadd.f32 %v2368_v11, %v9080_v31  ;;  %v6952_v11 = vld [vmem:[%s11567_s4 + $0x38] sm:$0xff] }
 0xe71   : > { %v9125_v47 = vadd.f32 %v7934_v45, %v2369_v26 }
 0xe73   : > { %v2411_v33 = vsel %vm519_vm0, %v9125_v47, 0.0 }
 0xe74   : > { %2412 = vadd.xlane.f32.xlu0 %v2411_v33 }
 0xe76   : > { %v2370_v48 = vpop.f32.mrf.mxu2 }
 0xe77   : > { %v2371_v35 = vadd.f32 %v2370_v48, %v9080_v31 }
 0xe79   : > { %v9142_v54 = vadd.f32 %v7935_v2, %v2371_v35 }
 0xe7b   : > { %v2414_v10 = vsel %vm519_vm0, %v9142_v54, 0.0 }
 0xe96   : > { %v2395_v55 = vpop.xlane.xlu1 %2394 }
 0xe97   : > { %v2426_v9 = vmul.f32 %v2395_v55, %v8172_v13  ;;  %v6950_v55 = vld [vmem:[%s11567_s4 + $0x28] sm:$0xff] }
 0xe99   : > { %v9131_v58 = vsub.f32 %v9084_v49, %v2426_v9 }
 0xe9b   : > { %v2448_v19 = vmul.f32 %v9131_v58, %v9131_v58 }
 0xe9d   : > { %v2459_v21 = vsel %vm519_vm0, %v2448_v19, 0.0 }
 0xe9e   : > { %v2398_v56 = vpop.xlane.xlu2 %2397  ;;  %2460 = vadd.xlane.f32.xlu1 %v2459_v21 }
 0xe9f   : > { %v2427_v30 = vmul.f32 %v2398_v56, %v8172_v13 }
 0xea1   : > { %v9139_v14 = vsub.f32 %v9090_v23, %v2427_v30 }
 0xea3   : > { %v2449_v49 = vmul.f32 %v9139_v14, %v9139_v14 }
 0xea5   : > { %v2462_v39 = vsel %vm519_vm0, %v2449_v49, 0.0 }
 0xea6   : > { %2463 = vadd.xlane.f32.xlu2 %v2462_v39  ;;  %2415 = vadd.xlane.f32.xlu1 %v2414_v10 }
 0xeb7   : > { %v2401_v18 = vpop.xlane.xlu0 %2400  ;;  %v2373_v4 = vpop.f32.mrf.mxu2 }
 0xeb8   : > { %v2428_v16 = vmul.f32 %v2401_v18, %v8172_v13  ;;  %v2374_v23 = vadd.f32 %v2373_v4, %v9080_v31 }
 0xeba   : > { %v9151_v37 = vsub.f32 %v2384_v0, %v2428_v16  ;;  %v9154_v5 = vadd.f32 %v7936_v3, %v2374_v23 }
 0xebc   : > { %v2417_v40 = vsel %vm519_vm0, %v9154_v5, 0.0  ;;  %v2450_v22 = vmul.f32 %v9151_v37, %v9151_v37 }
 0xebd   : > { %2418 = vadd.xlane.f32.xlu1 %v2417_v40 }
 0xebe   : > { %v2465_v6 = vsel %vm519_vm0, %v2450_v22, 0.0 }
 0xebf   : > { %2466 = vadd.xlane.f32.xlu2 %v2465_v6  ;;  %v2404_v59 = vpop.xlane.xlu1 %2403  ;;  %v2375_v44 = vpop.f32.mrf.mxu2 }
 0xec0   : > { %v2429_v25 = vmul.f32 %v2404_v59, %v8172_v13  ;;  %v2376_v34 = vadd.f32 %v2375_v44, %v9080_v31 }
 0xec2   : > { %v9163_v38 = vsub.f32 %v2385_v42, %v2429_v25  ;;  %v9166_v7 = vadd.f32 %v7937_v36, %v2376_v34 }
 0xec4   : > { %v2420_v62 = vsel %vm519_vm0, %v9166_v7, 0.0  ;;  %v2451_v27 = vmul.f32 %v9163_v38, %v9163_v38 }
 0xec6   : > { %v2468_v51 = vsel %vm519_vm0, %v2451_v27, 0.0 }
 0xec7   : > { %2421 = vadd.xlane.f32.xlu2 %v2420_v62  ;;  %v2407_v32 = vpop.xlane.xlu2 %2406  ;;  %2469 = vadd.xlane.f32.xlu0 %v2468_v51  ;;  %v2378_v61 = vpop.f32.mrf.mxu2 }
 0xec8   : > { %v2430_v20 = vmul.f32 %v2407_v32, %v8172_v13  ;;  %v2379_v0 = vadd.f32 %v2378_v61, %v9080_v31 }
 0xeca   : > { %v9175_v52 = vsub.f32 %v2386_v12, %v2430_v20  ;;  %v9178_v43 = vadd.f32 %v7938_v50, %v2379_v0 }
 0xecc   : > { %v2423_v17 = vsel %vm519_vm0, %v9178_v43, 0.0  ;;  %v2452_v57 = vmul.f32 %v9175_v52, %v9175_v52 }
 0xece   : > { %v2471_v42 = vsel %vm519_vm0, %v2452_v57, 0.0 }
 0xecf   : > { %v2410_v46 = vpop.xlane.xlu0 %2409  ;;  %2424 = vadd.xlane.f32.xlu2 %v2423_v17  ;;  %2472 = vadd.xlane.f32.xlu0 %v2471_v42  ;;  %v2380_v53 = vpop.f32.mrf.mxu2 }
 0xed0   : > { %v2431_v60 = vmul.f32 %v2410_v46, %v8172_v13 }
 0xed2   : > { %v9187_v31 = vsub.f32 %v9119_v1, %v2431_v60  ;;  %v6951_v1 = vld [vmem:[%s11567_s4 + $0x30] sm:$0xff] }
 0xed3   : > { %v2676_v26 = vpack.c.bf16 %v6952_v11, %v6951_v1 }
 0xed4   : > { %v2453_v41 = vmul.f32 %v9187_v31, %v9187_v31 }
 0xed5   : > { %2702 = vmatpush.bf16.msra.mxu3 %v2676_v26 }
 0xed6   : > { %v2474_v12 = vsel %vm519_vm0, %v2453_v41, 0.0 }
 0xed7   : > { %2475 = vadd.xlane.f32.xlu1 %v2474_v12 }
 0xee7   : > { %v2413_v63 = vpop.xlane.xlu0 %2412 }
 0xee8   : > { %v2432_v29 = vmul.f32 %v2413_v63, %v8172_v13 }
 0xeea   : > { %v9194_v8 = vsub.f32 %v9125_v47, %v2432_v29  ;;  %v6949_v47 = vld [vmem:[%s11567_s4 + $0x20] sm:$0xff] }
 0xeeb   : > { %v2675_v48 = vpack.c.bf16 %v6950_v55, %v6949_v47 }
 0xeec   : > { %v2454_v24 = vmul.f32 %v9194_v8, %v9194_v8 }
 0xeed   : > { %2703 = vmatpush.bf16.msra.mxu3 %v2675_v48 }
 0xeee   : > { %v2477_v15 = vsel %vm519_vm0, %v2454_v24, 0.0 }
 0xeef   : > { %2478 = vadd.xlane.f32.xlu0 %v2477_v15 }
 0xf11   : > { %v2461_v45 = vpop.xlane.xlu1 %2460 }
 0xf12   : > { %v2492_v33 = vmul.f32 %v2461_v45, %v8172_v13 }
 0xf14   : > { %v2503_v9 = vadd.f32 1e-05, %v2492_v33 }
 0xf16   : > { %7565 = vrsqrt.f32 %v2503_v9  ;;  %vm2520_vm15 = vweird.f32 %v2503_v9 }
 0xf19   : > { %v2464_v19 = vpop.xlane.xlu2 %2463  ;;  %v2416_v35 = vpop.xlane.xlu1 %2415 }
 0xf1a   : > { %v2493_v21 = vmul.f32 %v2464_v19, %v8172_v13  ;;  %v2433_v56 = vmul.f32 %v2416_v35, %v8172_v13 }
 0xf1c   : > { %v7566_v30 = vpop.eup %7565  ;;  %v2504_v2 = vadd.f32 1e-05, %v2493_v21  ;;  %v9215_v49 = vsub.f32 %v9142_v54, %v2433_v56  ;;  %v495_v54 = vld [vmem:[%s11571_s8 + $0x4] sm:$0x3] }
 0xf1d   : > { %v2515_v39 = vmul.f32 %v7566_v30, %v2503_v9  ;;  %vm2521_vm14 = vweird.f32 %v7566_v30  ;;  %v9223_v34 = vperm.slane %v495_v54, 0  ;;  %v9226_v51 = vperm.slane %v495_v54, 1 }
 0xf1e   : > { %7567 = vrsqrt.f32 %v2504_v2  ;;  %v2455_v10 = vmul.f32 %v9215_v49, %v9215_v49  ;;  %vm2522_vm5 = vmor %vm2520_vm15, %vm2521_vm14  ;;  %vm2530_vm7 = vweird.f32 %v2504_v2 }
 0xf1f   : > { %v2516_v18 = vmul.f32 %v7566_v30, %v2515_v39 }
 0xf20   : > { %v2480_v4 = vsel %vm519_vm0, %v2455_v10, 0.0 }
 0xf21   : > { %v2517_v16 = vmul.f32 0.5, %v2516_v18  ;;  %2481 = vadd.xlane.f32.xlu1 %v2480_v4 }
 0xf23   : > { %v2518_v23 = vsub.f32 1.5, %v2517_v16 }
 0xf24   : > { %v7568_v3 = vpop.eup %7567 }
 0xf25   : > { %v2519_v40 = vmul.f32 %v7566_v30, %v2518_v23  ;;  %v2525_v22 = vmul.f32 %v7568_v3, %v2504_v2  ;;  %vm2531_vm6 = vweird.f32 %v7568_v3 }
 0xf26   : > { %vm2532_vm8 = vmor %vm2530_vm7, %vm2531_vm6 }
 0xf27   : > { %v2526_v6 = vmul.f32 %v7568_v3, %v2525_v22  ;;  %v2523_v59 = vsel %vm2522_vm5, %v7566_v30, %v2519_v40 }
 0xf28   : > { %v2624_v36 = vmul.f32 %v2523_v59, %v9131_v58 }
 0xf29   : > { %v2527_v44 = vmul.f32 0.5, %v2526_v6 }
 0xf2a   : > { %v2636_v32 = vmul.f32 %v9223_v34, %v2624_v36 }
 0xf2b   : > { %v2528_v25 = vsub.f32 1.5, %v2527_v44 }
 0xf2c   : > { %v9237_v42 = vadd.f32 %v9226_v51, %v2636_v32 }
 0xf2d   : > { %v2529_v62 = vmul.f32 %v7568_v3, %v2528_v25 }
 0xf2e   : > { %11644 = vst [vmem:[#allocation7_spill] sm:$0xff] %v9237_v42 }
 0xf2f   : > { %v2533_v27 = vsel %vm2532_vm8, %v7568_v3, %v2529_v62 }
 0xf30   : > { %v2625_v61 = vmul.f32 %v2533_v27, %v9139_v14  ;;  %v2419_v20 = vpop.xlane.xlu1 %2418 }
 0xf31   : > { %v2434_v0 = vmul.f32 %v2419_v20, %v8172_v13 }
 0xf32   : > { %v2637_v50 = vmul.f32 %v9223_v34, %v2625_v61  ;;  %v2467_v17 = vpop.xlane.xlu2 %2466 }
 0xf33   : > { %v9233_v57 = vsub.f32 %v9154_v5, %v2434_v0  ;;  %v2494_v58 = vmul.f32 %v2467_v17, %v8172_v13 }
 0xf34   : > { %v9240_v46 = vadd.f32 %v9226_v51, %v2637_v50 }
 0xf35   : > { %v2505_v53 = vadd.f32 1e-05, %v2494_v58  ;;  %v2456_v14 = vmul.f32 %v9233_v57, %v9233_v57 }
 0xf36   : > { %11645 = vst [vmem:[#allocation8_spill] sm:$0xff] %v9240_v46  ;;  %v2669_v60 = vpack.c.bf16 %v9240_v46, %v9237_v42 }
 0xf37   : > { %7569 = vrsqrt.f32 %v2505_v53  ;;  %v2483_v41 = vsel %vm519_vm0, %v2456_v14, 0.0  ;;  %vm2540_vm11 = vweird.f32 %v2505_v53 }
 0xf38   : > { %6957 = vmatmul.msk.bf16.vlgmr.msra.gmra.mxu3 %vm519_vm0, %v2669_v60  ;;  %2484 = vadd.xlane.f32.xlu2 %v2483_v41 }
 0xf3a   : > { %v2422_v5 = vpop.xlane.xlu2 %2421  ;;  %v2470_v12 = vpop.xlane.xlu0 %2469 }
 0xf3b   : > { %v2435_v63 = vmul.f32 %v2422_v5, %v8172_v13  ;;  %v2495_v29 = vmul.f32 %v2470_v12, %v8172_v13 }
 0xf3d   : > { %v7570_v24 = vpop.eup %7569  ;;  %v9251_v15 = vsub.f32 %v9166_v7, %v2435_v63  ;;  %v2506_v1 = vadd.f32 1e-05, %v2495_v29 }
 0xf3e   : > { %v2535_v11 = vmul.f32 %v7570_v24, %v2505_v53  ;;  %vm2541_vm10 = vweird.f32 %v7570_v24 }
 0xf3f   : > { %7571 = vrsqrt.f32 %v2506_v1  ;;  %v2457_v26 = vmul.f32 %v9251_v15, %v9251_v15  ;;  %vm2542_vm12 = vmor %vm2540_vm11, %vm2541_vm10  ;;  %vm2550_vm15 = vweird.f32 %v2506_v1 }
 0xf40   : > { %v2536_v45 = vmul.f32 %v7570_v24, %v2535_v11 }
 0xf41   : > { %v2486_v33 = vsel %vm519_vm0, %v2457_v26, 0.0 }
 0xf42   : > { %v2537_v47 = vmul.f32 0.5, %v2536_v45  ;;  %v2425_v55 = vpop.xlane.xlu2 %2424  ;;  %2487 = vadd.xlane.f32.xlu0 %v2486_v33  ;;  %v2473_v9 = vpop.xlane.xlu0 %2472 }
 0xf43   : > { %v2436_v48 = vmul.f32 %v2425_v55, %v8172_v13  ;;  %v2496_v19 = vmul.f32 %v2473_v9, %v8172_v13 }
 0xf44   : > { %v2538_v35 = vsub.f32 1.5, %v2537_v47 }
 0xf45   : > { %v7572_v7 = vpop.eup %7571  ;;  %v9259_v21 = vsub.f32 %v9178_v43, %v2436_v48  ;;  %v2507_v56 = vadd.f32 1e-05, %v2496_v19 }
 0xf46   : > { %v2539_v30 = vmul.f32 %v7570_v24, %v2538_v35  ;;  %v2545_v2 = vmul.f32 %v7572_v7, %v2506_v1  ;;  %vm2551_vm14 = vweird.f32 %v7572_v7 }
 0xf47   : > { %7573 = vrsqrt.f32 %v2507_v56  ;;  %v2458_v39 = vmul.f32 %v9259_v21, %v9259_v21  ;;  %vm2552_vm5 = vmor %vm2550_vm15, %vm2551_vm14  ;;  %vm2560_vm7 = vweird.f32 %v2507_v56 }
 0xf48   : > { %v2546_v10 = vmul.f32 %v7572_v7, %v2545_v2  ;;  %v2543_v4 = vsel %vm2542_vm12, %v7570_v24, %v2539_v30 }
 0xf49   : > { %v2489_v18 = vsel %vm519_vm0, %v2458_v39, 0.0  ;;  %v2626_v22 = vmul.f32 %v2543_v4, %v9151_v37 }
 0xf4a   : > { %v2547_v16 = vmul.f32 0.5, %v2546_v10  ;;  %2490 = vadd.xlane.f32.xlu1 %v2489_v18  ;;  %v2476_v23 = vpop.xlane.xlu1 %2475 }
 0xf4b   : > { %v2497_v43 = vmul.f32 %v2476_v23, %v8172_v13  ;;  %v2638_v62 = vmul.f32 %v9223_v34, %v2626_v22 }
 0xf4c   : > { %v2548_v3 = vsub.f32 1.5, %v2547_v16 }
 0xf4d   : > { %v7574_v40 = vpop.eup %7573  ;;  %v2508_v6 = vadd.f32 1e-05, %v2497_v43  ;;  %v9270_v0 = vadd.f32 %v9226_v51, %v2638_v62 }
 0xf4e   : > { %v2549_v54 = vmul.f32 %v7572_v7, %v2548_v3  ;;  %v2555_v59 = vmul.f32 %v7574_v40, %v2507_v56  ;;  %vm2561_vm6 = vweird.f32 %v7574_v40 }
 0xf4f   : > { %7575 = vrsqrt.f32 %v2508_v6  ;;  %11646 = vst [vmem:[#allocation9_spill] sm:$0xff] %v9270_v0  ;;  %vm2562_vm8 = vmor %vm2560_vm7, %vm2561_vm6  ;;  %vm2570_vm11 = vweird.f32 %v2508_v6 }
 0xf50   : > { %v2553_v44 = vsel %vm2552_vm5, %v7572_v7, %v2549_v54  ;;  %v2556_v25 = vmul.f32 %v7574_v40, %v2555_v59 }
 0xf51   : > { %v2627_v36 = vmul.f32 %v2553_v44, %v9163_v38 }
 0xf52   : > { %v2557_v27 = vmul.f32 0.5, %v2556_v25 }
 0xf53   : > { %v2639_v32 = vmul.f32 %v9223_v34, %v2627_v36 }
 0xf54   : > { %v2558_v61 = vsub.f32 1.5, %v2557_v27 }
 0xf55   : > { %v7576_v20 = vpop.eup %7575  ;;  %v9273_v37 = vadd.f32 %v9226_v51, %v2639_v32 }
 0xf56   : > { %v2559_v50 = vmul.f32 %v7574_v40, %v2558_v61  ;;  %v2565_v17 = vmul.f32 %v7576_v20, %v2508_v6  ;;  %vm2571_vm10 = vweird.f32 %v7576_v20 }
 0xf57   : > { %11647 = vst [vmem:[#allocation10_spill] sm:$0xff] %v9273_v37  ;;  %v2670_v58 = vpack.c.bf16 %v9273_v37, %v9270_v0  ;;  %vm2572_vm12 = vmor %vm2570_vm11, %vm2571_vm10 }
 0xf58   : > { %v2566_v38 = vmul.f32 %v7576_v20, %v2565_v17  ;;  %v2563_v53 = vsel %vm2562_vm8, %v7574_v40, %v2559_v50 }
 0xf59   : > { %6958 = vmatmul.msk.bf16.gmra.mxu3 %vm519_vm0, %v2670_v58  ;;  %v2628_v41 = vmul.f32 %v2563_v53, %v9175_v52 }
 0xf5a   : > { %v2567_v14 = vmul.f32 0.5, %v2566_v38 }
 0xf5b   : > { %v2640_v29 = vmul.f32 %v9223_v34, %v2628_v41 }
 0xf5c   : > { %v2568_v60 = vsub.f32 1.5, %v2567_v14 }
 0xf5d   : > { %v9283_v1 = vadd.f32 %v9226_v51, %v2640_v29 }
 0xf5e   : > { %v2569_v5 = vmul.f32 %v7576_v20, %v2568_v60 }
 0xf5f   : > { %11648 = vst [vmem:[#allocation11_spill] sm:$0xff] %v9283_v1 }
 0xf60   : > { %v2573_v12 = vsel %vm2572_vm12, %v7576_v20, %v2569_v5  ;;  %v7939_v20 = vld [vmem:[%s11572_s9] sm:$0x7] }
 0xf61   : > { %v2629_v63 = vmul.f32 %v2573_v12, %v9187_v31  ;;  %v9311_v50 = vperm.slane %v7939_v20, 1 }
 0xf62   : > { %v2479_v52 = vpop.xlane.xlu0 %2478 }
 0xf63   : > { %v2641_v24 = vmul.f32 %v9223_v34, %v2629_v63  ;;  %v2498_v45 = vmul.f32 %v2479_v52, %v8172_v13 }
 0xf65   : > { %v9286_v11 = vadd.f32 %v9226_v51, %v2641_v24  ;;  %v2509_v33 = vadd.f32 1e-05, %v2498_v45 }
 0xf67   : > { %11649 = vst [vmem:[#allocation12_spill] sm:$0xff] %v9286_v11  ;;  %v2671_v26 = vpack.c.bf16 %v9286_v11, %v9283_v1  ;;  %7577 = vrsqrt.f32 %v2509_v33  ;;  %vm2580_vm15 = vweird.f32 %v2509_v33 }
 0xf69   : > { %6959 = vmatmul.msk.bf16.gmra.mxu3 %vm519_vm0, %v2671_v26 }
 0xf6d   : > { %v7578_v31 = vpop.eup %7577 }
 0xf6e   : > { %v2575_v47 = vmul.f32 %v7578_v31, %v2509_v33  ;;  %vm2581_vm14 = vweird.f32 %v7578_v31 }
 0xf6f   : > { %vm2582_vm5 = vmor %vm2580_vm15, %vm2581_vm14 }
 0xf70   : > { %v2576_v55 = vmul.f32 %v7578_v31, %v2575_v47 }
 0xf72   : > { %v2577_v35 = vmul.f32 0.5, %v2576_v55 }
 0xf74   : > { %v2578_v7 = vsub.f32 1.5, %v2577_v35 }
 0xf76   : > { %v2579_v30 = vmul.f32 %v7578_v31, %v2578_v7 }
 0xf78   : > { %v2583_v10 = vsel %vm2582_vm5, %v7578_v31, %v2579_v30 }
 0xf79   : > { %v2630_v16 = vmul.f32 %v2583_v10, %v9194_v8 }
 0xf7b   : > { %v2642_v22 = vmul.f32 %v9223_v34, %v2630_v16 }
 0xf7d   : > { %v9299_v44 = vadd.f32 %v9226_v51, %v2642_v22 }
 0xf7f   : > { %11650 = vst [vmem:[#allocation13_spill] sm:$0xff] %v9299_v44 }
 0xf94   : > { %v2482_v9 = vpop.xlane.xlu1 %2481 }
 0xf95   : > { %v2499_v48 = vmul.f32 %v2482_v9, %v8172_v13 }
 0xf97   : > { %v2510_v19 = vadd.f32 1e-05, %v2499_v48 }
 0xf99   : > { %7579 = vrsqrt.f32 %v2510_v19  ;;  %vm2590_vm7 = vweird.f32 %v2510_v19 }
 0xf9f   : > { %v7580_v56 = vpop.eup %7579 }
 0xfa0   : > { %v2585_v2 = vmul.f32 %v7580_v56, %v2510_v19  ;;  %vm2591_vm6 = vweird.f32 %v7580_v56 }
 0xfa1   : > { %vm2592_vm8 = vmor %vm2590_vm7, %vm2591_vm6 }
 0xfa2   : > { %v2586_v39 = vmul.f32 %v7580_v56, %v2585_v2 }
 0xfa4   : > { %v2587_v18 = vmul.f32 0.5, %v2586_v39 }
 0xfa6   : > { %v2588_v4 = vsub.f32 1.5, %v2587_v18 }
 0xfa8   : > { %v2589_v23 = vmul.f32 %v7580_v56, %v2588_v4 }
 0xfaa   : > { %v2593_v43 = vsel %vm2592_vm8, %v7580_v56, %v2589_v23 }
 0xfab   : > { %v2631_v3 = vmul.f32 %v2593_v43, %v9215_v49  ;;  %v2485_v40 = vpop.xlane.xlu2 %2484 }
 0xfac   : > { %v2500_v6 = vmul.f32 %v2485_v40, %v8172_v13 }
 0xfad   : > { %v2643_v54 = vmul.f32 %v9223_v34, %v2631_v3 }
 0xfae   : > { %v2511_v59 = vadd.f32 1e-05, %v2500_v6 }
 0xfaf   : > { %v9302_v25 = vadd.f32 %v9226_v51, %v2643_v54 }
 0xfb0   : > { %7581 = vrsqrt.f32 %v2511_v59  ;;  %vm2600_vm11 = vweird.f32 %v2511_v59 }
 0xfb1   : > { %11651 = vst [vmem:[#allocation14_spill] sm:$0xff] %v9302_v25  ;;  %v2672_v8 = vpack.c.bf16 %v9302_v25, %v9299_v44 }
 0xfb3   : > { %6960 = vmatmul.msk.bf16.gmra.mxu3 %vm519_vm0, %v2672_v8 }
 0xfb5   : > { %v2488_v49 = vpop.xlane.xlu0 %2487 }
 0xfb6   : > { %v7582_v36 = vpop.eup %7581  ;;  %v2501_v62 = vmul.f32 %v2488_v49, %v8172_v13 }
 0xfb7   : > { %v2595_v27 = vmul.f32 %v7582_v36, %v2511_v59  ;;  %vm2601_vm10 = vweird.f32 %v7582_v36 }
 0xfb8   : > { %v2512_v32 = vadd.f32 1e-05, %v2501_v62  ;;  %vm2602_vm12 = vmor %vm2600_vm11, %vm2601_vm10  ;;  %vm2909_vm10 = vcmask 719872  }
 0xfb9   : > { %v2596_v61 = vmul.f32 %v7582_v36, %v2595_v27 }
 0xfba   : > { %7583 = vrsqrt.f32 %v2512_v32  ;;  %vm2610_vm15 = vweird.f32 %v2512_v32 }
 0xfbb   : > { %v2597_v17 = vmul.f32 0.5, %v2596_v61  ;;  %v2705_v58 = vpop.f32.mrf.mxu3 }
 0xfbc   : > { %v2706_v14 = vadd.f32 %v2705_v58, %v9311_v50 }
 0xfbd   : > { %v2598_v38 = vsub.f32 1.5, %v2597_v17  ;;  %v2491_v53 = vpop.xlane.xlu1 %2490 }
 0xfbe   : > { %v2502_v60 = vmul.f32 %v2491_v53, %v8172_v13  ;;  %v2734_v29 = vmul.f32 0.35355338, %v2706_v14  ;;  %v2756_v52 = vpack.c.bf16 %v2706_v14, %v2706_v14 }
 0xfbf   : > { %v2599_v12 = vmul.f32 %v7582_v36, %v2598_v38 }
 0xfc0   : > { %v7584_v41 = vpop.eup %7583  ;;  %v2513_v5 = vadd.f32 1e-05, %v2502_v60  ;;  %v2745_v47 = vpack.c.bf16 %v2734_v29, %v2734_v29  ;;  %v2806_v7 = vunpack.c.l.b16 %v2756_v52 }
 0xfc1   : > { %v2605_v63 = vmul.f32 %v7584_v41, %v2512_v32  ;;  %v2603_v33 = vsel %vm2602_vm12, %v7582_v36, %v2599_v12  ;;  %vm2611_vm14 = vweird.f32 %v7584_v41 }
 0xfc2   : > { %7585 = vrsqrt.f32 %v2513_v5  ;;  %v2632_v35 = vmul.f32 %v2603_v33, %v9233_v57  ;;  %vm2612_vm5 = vmor %vm2610_vm15, %vm2611_vm14  ;;  %v2778_v10 = vunpack.c.l.b16 %v2745_v47  ;;  %vm2620_vm7 = vweird.f32 %v2513_v5 }
 0xfc3   : > { %v2606_v24 = vmul.f32 %v7584_v41, %v2605_v63  ;;  %v2707_v26 = vpop.f32.mrf.mxu3 }
 0xfc4   : > { %v2708_v45 = vadd.f32 %v2707_v26, %v9311_v50  ;;  %v2644_v57 = vmul.f32 %v9223_v34, %v2632_v35 }
 0xfc5   : > { %v2607_v31 = vmul.f32 0.5, %v2606_v24 }
 0xfc6   : > { %v2735_v55 = vmul.f32 0.35355338, %v2708_v45  ;;  %v2757_v9 = vpack.c.bf16 %v2708_v45, %v2708_v45  ;;  %v9327_v54 = vadd.f32 %v9226_v51, %v2644_v57 }
 0xfc7   : > { %v2608_v48 = vsub.f32 1.5, %v2607_v31 }
 0xfc8   : > { %v7586_v19 = vpop.eup %7585  ;;  %v2746_v56 = vpack.c.bf16 %v2735_v55, %v2735_v55  ;;  %v2807_v30 = vunpack.c.l.b16 %v2757_v9  ;;  %11652 = vst [vmem:[#allocation15_spill] sm:$0xff] %v9327_v54 }
 0xfc9   : > { %v2609_v2 = vmul.f32 %v7584_v41, %v2608_v48  ;;  %v2615_v39 = vmul.f32 %v7586_v19, %v2513_v5  ;;  %vm2621_vm6 = vweird.f32 %v7586_v19 }
 0xfca   : > { %v2779_v18 = vunpack.c.l.b16 %v2746_v56  ;;  %v9317_v4 = vpack.c.b16 %v2807_v30, %v2806_v7  ;;  %vm2622_vm8 = vmor %vm2620_vm7, %vm2621_vm6 }
 0xfcb   : > { %v2613_v16 = vsel %vm2612_vm5, %v7584_v41, %v2609_v2  ;;  %v2616_v23 = vmul.f32 %v7586_v19, %v2615_v39 }
 0xfcc   : > { %v2633_v43 = vmul.f32 %v2613_v16, %v9251_v15  ;;  %v9320_v3 = vpack.c.b16 %v2779_v18, %v2778_v10  ;;  %3125 = vrot.lane.b32.xlu1 %v9317_v4, %s11621_s20 }
 0xfcd   : > { %v2617_v40 = vmul.f32 0.5, %v2616_v23 }
 0xfce   : > { %v2645_v22 = vmul.f32 %v9223_v34, %v2633_v43 }
 0xfcf   : > { %v2618_v6 = vsub.f32 1.5, %v2617_v40 }
 0xfd0   : > { %v9330_v59 = vadd.f32 %v9226_v51, %v2645_v22 }
 0xfd1   : > { %v2619_v8 = vmul.f32 %v7586_v19, %v2618_v6 }
 0xfd2   : > { %11653 = vst [vmem:[#allocation16_spill] sm:$0xff] %v9330_v59  ;;  %v2673_v15 = vpack.c.bf16 %v9330_v59, %v9327_v54 }
 0xfd3   : > { %v2623_v49 = vsel %vm2622_vm8, %v7586_v19, %v2619_v8 }
 0xfd4   : > { %6961 = vmatmul.msk.bf16.gmra.mxu3 %vm519_vm0, %v2673_v15  ;;  %v2634_v36 = vmul.f32 %v2623_v49, %v9259_v21 }
 0xfd6   : > { %v2646_v62 = vmul.f32 %v9223_v34, %v2634_v36 }
 0xfd8   : > { %v9338_v32 = vadd.f32 %v9226_v51, %v2646_v62 }
 0xfda   : > { %11654 = vst [vmem:[#allocation17_spill] sm:$0xff] %v9338_v32  ;;  %v2674_v20 = vpack.c.bf16 %v9338_v32, %v9338_v32 }
 0xfdc   : > { %v2710_v27 = vpop.f32.mrf.mxu3 }
 0xfdd   : > { %v2711_v61 = vadd.f32 %v2710_v27, %v9311_v50 }
 0xfdf   : > { %v2736_v17 = vmul.f32 0.35355338, %v2711_v61  ;;  %v2758_v38 = vpack.c.bf16 %v2711_v61, %v2711_v61 }
 0xfe1   : > { %v2747_v14 = vpack.c.bf16 %v2736_v17, %v2736_v17  ;;  %v2808_v34 = vunpack.c.l.b16 %v2758_v38 }
 0xfe3   : > { %v2780_v51 = vunpack.c.l.b16 %v2747_v14 }
 0xfe4   : > { %v2712_v58 = vpop.f32.mrf.mxu3  ;;  %6962 = vmatmul.msk.bf16.gmra.mxu3 %vm519_vm0, %v2674_v20 }
 0xfe5   : > { %v2713_v53 = vadd.f32 %v2712_v58, %v9311_v50 }
 0xfe7   : > { %v2737_v21 = vmul.f32 0.35355338, %v2713_v53  ;;  %v2759_v60 = vpack.c.bf16 %v2713_v53, %v2713_v53 }
 0xfe9   : > { %v2748_v41 = vpack.c.bf16 %v2737_v21, %v2737_v21  ;;  %v2809_v5 = vunpack.c.l.b16 %v2759_v60 }
 0xfeb   : > { %v2781_v12 = vunpack.c.l.b16 %v2748_v41  ;;  %v9345_v63 = vpack.c.b16 %v2809_v5, %v2808_v34 }
 0xfec   : > { %v2715_v29 = vpop.f32.mrf.mxu3 }
 0xfed   : > { %v9347_v24 = vpack.c.b16 %v2781_v12, %v2780_v51  ;;  %3127 = vrot.lane.b32.xlu0 %v9345_v63, %s11621_s20  ;;  %v2716_v26 = vadd.f32 %v2715_v29, %v9311_v50 }
 0xfef   : > { %v2738_v52 = vmul.f32 0.35355338, %v2716_v26  ;;  %v2760_v33 = vpack.c.bf16 %v2716_v26, %v2716_v26 }
 0xff1   : > { %v2749_v47 = vpack.c.bf16 %v2738_v52, %v2738_v52  ;;  %v2810_v48 = vunpack.c.l.b16 %v2760_v33 }
 0xff3   : > { %v2782_v7 = vunpack.c.l.b16 %v2749_v47 }
 0xff4   : > { %v2717_v45 = vpop.f32.mrf.mxu3 }
 0xff5   : > { %v2718_v31 = vadd.f32 %v2717_v45, %v9311_v50 }
 0xff7   : > { %v2739_v55 = vmul.f32 0.35355338, %v2718_v31  ;;  %v2761_v9 = vpack.c.bf16 %v2718_v31, %v2718_v31 }
 0xff9   : > { %v2750_v19 = vpack.c.bf16 %v2739_v55, %v2739_v55  ;;  %v2811_v35 = vunpack.c.l.b16 %v2761_v9 }
 0xffb   : > { %v2783_v56 = vunpack.c.l.b16 %v2750_v19  ;;  %v9353_v30 = vpack.c.b16 %v2811_v35, %v2810_v48 }
 0xffd   : > { %v9355_v2 = vpack.c.b16 %v2783_v56, %v2782_v7  ;;  %2827 = vrot.lane.b32.xlu0 %v9353_v30, %s11623_s21  ;;  %3129 = vrot.lane.b32.xlu2 %v9353_v30, %s11621_s20 }
0x1036   : > { %v2720_v39 = vpop.f32.mrf.mxu3 }
0x1037   : > { %v2721_v10 = vadd.f32 %v2720_v39, %v9311_v50 }
0x1039   : > { %v2762_v16 = vpack.c.bf16 %v2721_v10, %v2721_v10  ;;  %v2740_v14 = vmul.f32 0.35355338, %v2721_v10 }
0x103b   : > { %v2812_v57 = vunpack.c.l.b16 %v2762_v16  ;;  %v2751_v5 = vpack.c.bf16 %v2740_v14, %v2740_v14 }
0x103d   : > { %v2784_v12 = vunpack.c.l.b16 %v2751_v5 }
0x103e   : > { %v2722_v18 = vpop.f32.mrf.mxu3  ;;  %v3126_v48 = vpop.permute.xlu1 %3125 }
0x103f   : > { %v2723_v23 = vadd.f32 %v2722_v18, %v9311_v50  ;;  %v3156_v5 = vsel %vm575_vm1, %v3126_v48, 0 }
0x1041   : > { %v2763_v43 = vpack.c.bf16 %v2723_v23, %v2723_v23  ;;  %v2741_v38 = vmul.f32 0.35355338, %v2723_v23 }
0x1043   : > { %v2813_v40 = vunpack.c.l.b16 %v2763_v43  ;;  %v2752_v60 = vpack.c.bf16 %v2741_v38, %v2741_v38 }
0x1045   : > { %v9363_v22 = vpack.c.b16 %v2813_v40, %v2812_v57 }
0x1047   : > { %2829 = vrot.lane.b32.xlu2 %v9363_v22, %s11623_s21  ;;  %3131 = vrot.lane.b32.xlu1 %v9363_v22, %s11621_s20 }
0x1057   : > { %v2725_v6 = vpop.f32.mrf.mxu3  ;;  %v3130_v55 = vpop.permute.xlu2 %3129 }
0x1058   : > { %v2726_v8 = vadd.f32 %v2725_v6, %v9311_v50 }
0x105a   : > { %v2764_v49 = vpack.c.bf16 %v2726_v8, %v2726_v8  ;;  %v2742_v29 = vmul.f32 0.35355338, %v2726_v8 }
0x105c   : > { %v2814_v27 = vunpack.c.l.b16 %v2764_v49  ;;  %v2753_v45 = vpack.c.bf16 %v2742_v29, %v2742_v29 }
0x105e   : > { %v2786_v31 = vunpack.c.l.b16 %v2753_v45 }
0x105f   : > { %v2727_v15 = vpop.f32.mrf.mxu3  ;;  %v3128_v19 = vpop.permute.xlu0 %3127 }
0x1060   : > { %v2728_v36 = vadd.f32 %v2727_v15, %v9311_v50 }
0x1062   : > { %v2765_v62 = vpack.c.bf16 %v2728_v36, %v2728_v36  ;;  %v2743_v51 = vmul.f32 0.35355338, %v2728_v36 }
0x1064   : > { %v2815_v61 = vunpack.c.l.b16 %v2765_v62  ;;  %v2754_v52 = vpack.c.bf16 %v2743_v51, %v2743_v51 }
0x1066   : > { %v9371_v20 = vpack.c.b16 %v2815_v61, %v2814_v27  ;;  %v2787_v33 = vunpack.c.l.b16 %v2754_v52 }
0x1067   : > { %v2730_v17 = vpop.f32.mrf.mxu3 }
0x1068   : > { %v9374_v58 = vadd.f32 %v2730_v17, %v9311_v50  ;;  %3133 = vrot.lane.b32.xlu0 %v9371_v20, %s11621_s20  ;;  %2831 = vrot.lane.b32.xlu1 %v9371_v20, %s11623_s21  ;;  %v2785_v50 = vunpack.c.l.b16 %v2752_v60  ;;  %v9398_v47 = vpack.c.b16 %v2787_v33, %v2786_v31  ;;  %v3162_v17 = vsel %vm575_vm1, %v3130_v55, 0 }
0x106a   : > { %v2766_v53 = vpack.c.bf16 %v9374_v58, %v9374_v58  ;;  %v9390_v26 = vpack.c.b16 %v2785_v50, %v2784_v12  ;;  %v2744_v6 = vmul.f32 0.35355338, %v9374_v58 }
0x106c   : > { %v2816_v21 = vunpack.c.l.b16 %v2766_v53  ;;  %v2755_v49 = vpack.c.bf16 %v2744_v6, %v2744_v6 }
0x106e   : > { %v9382_v34 = vpack.c.b16 %v2816_v21, %v2816_v21  ;;  %v2788_v27 = vunpack.c.l.b16 %v2755_v49  ;;  %v3159_v21 = vsel %vm575_vm1, %v3128_v19, 0 }
0x106f   : > { %v2732_v41 = vpop.f32.mrf.mxu3  ;;  %v9469_v56 = vpop.permute.xlu0 %2827 }
0x1070   : > { %2823 = vrot.lane.b32.xlu0 %v9317_v4, %s11623_s21  ;;  %2825 = vrot.lane.b32.xlu1 %v9345_v63, %s11623_s21  ;;  %v9499_v58 = vpack.c.b16 %v2788_v27, %v2788_v27 }
0x1071   : > { %3135 = vrot.lane.b32.xlu2 %v9382_v34, %s11621_s20 }
0x1078   : > { %3117 = vrot.lane.b32.xlu1 %v9355_v2, %s11655_s18  ;;  %3119 = vrot.lane.b32.xlu0 %v9390_v26, %s11655_s18 }
0x1079   : > { %3113 = vrot.lane.b32.xlu2 %v9320_v3, %s11655_s18 }
0x1080   : > { %3735 = vrot.lane.b32.xlu1 %v9371_v20, %s11640_s29  ;;  %3121 = vrot.lane.b32.xlu0 %v9398_v47, %s11655_s18 }
0x1081   : > { %3115 = vrot.lane.b32.xlu2 %v9347_v24, %s11655_s18 }
0x1088   : > { %3434 = vrot.lane.b32.xlu1 %v9371_v20, %s11639_s23  ;;  %3731 = vrot.lane.b32.xlu0 %v9353_v30, %s11640_s29 }
0x1089   : > { %3733 = vrot.lane.b32.xlu2 %v9363_v22, %s11640_s29 }
0x1090   : > { %3727 = vrot.lane.b32.xlu1 %v9317_v4, %s11640_s29  ;;  %2833 = vrot.lane.b32.xlu0 %v9382_v34, %s11623_s21  ;;  %s11664_s21 = smov 96  }
0x1091   : > { %3432 = vrot.lane.b32.xlu2 %v9363_v22, %s11639_s23 }
0x1098   : > { %3428 = vrot.lane.b32.xlu1 %v9345_v63, %s11639_s23  ;;  %3729 = vrot.lane.b32.xlu0 %v9345_v63, %s11640_s29 }
0x1099   : > { %3715 = vrot.lane.b32.xlu2 %v9320_v3, %s11656_s17 }
0x10a0   : > { %3414 = vrot.lane.b32.xlu1 %v9320_v3, %s11657_s27  ;;  %3430 = vrot.lane.b32.xlu0 %v9353_v30, %s11639_s23 }
0x10a1   : > { %3717 = vrot.lane.b32.xlu2 %v9347_v24, %s11656_s17  ;;  %v9454_v9 = vpop.permute.xlu2 %2829 }
0x10a2   : > { %v2863_v48 = vsel %vm575_vm1, %v9454_v9, 0 }
0x10a8   : > { %3721 = vrot.lane.b32.xlu1 %v9390_v26, %s11656_s17  ;;  %3426 = vrot.lane.b32.xlu0 %v9317_v4, %s11639_s23 }
0x10a9   : > { %3416 = vrot.lane.b32.xlu2 %v9347_v24, %s11657_s27 }
0x10b0   : > { %3420 = vrot.lane.b32.xlu1 %v9390_v26, %s11657_s27  ;;  %3719 = vrot.lane.b32.xlu0 %v9355_v2, %s11656_s17 }
0x10b1   : > { %3723 = vrot.lane.b32.xlu2 %v9398_v47, %s11656_s17 }
0x10b8   : > { %3422 = vrot.lane.b32.xlu1 %v9398_v47, %s11657_s27  ;;  %3418 = vrot.lane.b32.xlu0 %v9355_v2, %s11657_s27 }
0x10b9   : > { %3342 = vrot.lane.b32.xlu2 %v9353_v30, %s11658_s16  ;;  %v3132_v39 = vpop.permute.xlu1 %3131 }
0x10ba   : > { %v3165_v15 = vsel %vm575_vm1, %v3132_v39, 0 }
0x10c0   : > { %3346 = vrot.lane.b32.xlu1 %v9371_v20, %s11658_s16  ;;  %3340 = vrot.lane.b32.xlu0 %v9345_v63, %s11658_s16 }
0x10c1   : > { %3045 = vrot.lane.b32.xlu2 %v9371_v20, %s11659_s22 }
0x10c8   : > { %3344 = vrot.lane.b32.xlu1 %v9363_v22, %s11658_s16  ;;  %3338 = vrot.lane.b32.xlu0 %v9317_v4, %s11658_s16 }
0x10c9   : > { %3037 = vrot.lane.b32.xlu2 %v9317_v4, %s11659_s22 }
0x10cb   : > { %v3136_v35 = vpop.permute.xlu2 %3135 }
0x10cc   : > { %v3171_v7 = vsel %vm575_vm1, %v3136_v35, 0 }
0x10cd   : > { %3175 = vmatpush.bf16.xpose.msra.mxu2 %v3171_v7  ;;  %v2860_v7 = vsel %vm575_vm1, %v9469_v56, 0 }
0x10d0   : > { %3041 = vrot.lane.b32.xlu1 %v9353_v30, %s11659_s22  ;;  %3043 = vrot.lane.b32.xlu0 %v9363_v22, %s11659_s22 }
0x10d1   : > { %3737 = vrot.lane.b32.xlu2 %v9382_v34, %s11640_s29 }
0x10d3   : > { %v3114_v10 = vpop.permute.xlu2 %3113 }
0x10d8   : > { %3436 = vrot.lane.b32.xlu1 %v9382_v34, %s11639_s23  ;;  %3039 = vrot.lane.b32.xlu0 %v9345_v63, %s11659_s22 }
0x10d9   : > { %3946 = vrot.lane.b32.xlu2 %v9363_v22, %s11660_s14 }
0x10da   : > { %v3134_v18 = vpop.permute.xlu0 %3133  ;;  %v2832_v16 = vpop.permute.xlu1 %2831 }
0x10db   : > { %v3116_v23 = vpop.permute.xlu2 %3115  ;;  %v3168_v43 = vsel %vm575_vm1, %v3134_v18, 0  ;;  %v2866_v45 = vsel %vm575_vm1, %v2832_v16, 0 }
0x10dc   : > { %3176 = vmatpush.bf16.xpose.msra.mxu2 %v3168_v43 }
0x10e0   : > { %3944 = vrot.lane.b32.xlu1 %v9353_v30, %s11660_s14  ;;  %3948 = vrot.lane.b32.xlu0 %v9371_v20, %s11660_s14 }
0x10e1   : > { %3348 = vrot.lane.b32.xlu2 %v9382_v34, %s11658_s16 }
0x10e2   : > { %v9484_v57 = vpop.permute.xlu0 %2823  ;;  %v2826_v40 = vpop.permute.xlu1 %2825 }
0x10e3   : > { %v9487_v8 = vpop.permute.xlu2 %3733  ;;  %v2857_v16 = vsel %vm575_vm1, %v2826_v40, 0  ;;  %v2854_v56 = vsel %vm575_vm1, %v9484_v57, 0 }
0x10e4   : > { %3177 = vmatpush.bf16.xpose.msra.mxu2 %v3165_v15 }
0x10e8   : > { %3940 = vrot.lane.b32.xlu1 %v9317_v4, %s11660_s14  ;;  %3942 = vrot.lane.b32.xlu0 %v9345_v63, %s11660_s14 }
0x10e9   : > { %3649 = vrot.lane.b32.xlu2 %v9382_v34, %s11661_s19 }
0x10ea   : > { %v3120_v36 = vpop.permute.xlu0 %3119  ;;  %v3118_v62 = vpop.permute.xlu1 %3117 }
0x10eb   : > { %v9496_v61 = vpop.permute.xlu2 %3432 }
0x10ec   : > { %3178 = vmatpush.bf16.xpose.msra.mxu2 %v3162_v17 }
0x10f0   : > { %3047 = vrot.lane.b32.xlu1 %v9382_v34, %s11659_s22  ;;  %3647 = vrot.lane.b32.xlu0 %v9371_v20, %s11661_s19 }
0x10f1   : > { %3123 = vrot.lane.b32.xlu2 %v9499_v58, %s11655_s18 }
0x10f2   : > { %v9507_v38 = vpop.permute.xlu0 %3121  ;;  %v3736_v53 = vpop.permute.xlu1 %3735 }
0x10f3   : > { %v9509_v14 = vpop.permute.xlu2 %3715  ;;  %v3770_v40 = vsel %vm575_vm1, %v3736_v53, 0 }
0x10f4   : > { %3179 = vmatpush.bf16.xpose.msra.mxu2 %v3159_v21 }
0x10f8   : > { %3950 = vrot.lane.b32.xlu1 %v9382_v34, %s11660_s14  ;;  %3645 = vrot.lane.b32.xlu0 %v9363_v22, %s11661_s19 }
0x10fa   : > { %v3732_v60 = vpop.permute.xlu0 %3731  ;;  %v9516_v41 = vpop.permute.xlu1 %3434 }
0x10fb   : > { %v9518_v20 = vpop.permute.xlu2 %3717 }
0x10fc   : > { %3180 = vmatpush.bf16.xpose.msra.mxu2 %v3156_v5  ;;  %v3767_v5 = vsel %vm575_vm1, %v9487_v8, 0 }
0x1100   : > { %3424 = vrot.lane.b32.xlu0 %v9499_v58, %s11657_s27  ;;  %3725 = vrot.lane.b32.xlu1 %v9499_v58, %s11656_s17 }
0x1102   : > { %v2834_v50 = vpop.permute.xlu0 %2833  ;;  %v9525_v51 = vpop.permute.xlu1 %3727 }
0x1103   : > { %v2869_v34 = vsel %vm575_vm1, %v2834_v50, 0  ;;  %v9528_v22 = vpop.permute.xlu2 %3416  ;;  %6975 = vmatmul.msk.bf16.vlgmr.msra.gmra.mxu2 %vm575_vm1, %v3114_v10 }
0x1104   : > { %2873 = vmatpush.bf16.xpose.msra.mxu1 %v2869_v34 }
0x110a   : > { %v3730_v12 = vpop.permute.xlu0 %3729  ;;  %v9531_v29 = vpop.permute.xlu1 %3428 }
0x110b   : > { %v9533_v52 = vpop.permute.xlu2 %3723 }
0x110c   : > { %2874 = vmatpush.bf16.xpose.msra.mxu1 %v2866_v45  ;;  %v3761_v45 = vsel %vm575_vm1, %v3730_v12, 0 }
0x1112   : > { %v9536_v33 = vpop.permute.xlu0 %3430  ;;  %v9538_v31 = vpop.permute.xlu1 %3414 }
0x1113   : > { %v3343_v55 = vpop.permute.xlu2 %3342  ;;  %6976 = vmatmul.msk.bf16.gmra.mxu2 %vm575_vm1, %v3116_v23 }
0x1114   : > { %2875 = vmatpush.bf16.xpose.msra.mxu1 %v2863_v48 }
0x111a   : > { %v9543_v19 = vpop.permute.xlu1 %3721  ;;  %v9549_v39 = vpop.permute.xlu0 %3426 }
0x111b   : > { %v9545_v35 = vpop.permute.xlu2 %3045 }
0x111c   : > { %2876 = vmatpush.bf16.xpose.msra.mxu1 %v2860_v7 }
0x1122   : > { %v9551_v10 = vpop.permute.xlu1 %3420  ;;  %v9557_v9 = vpop.permute.xlu0 %3719 }
0x1123   : > { %v9553_v18 = vpop.permute.xlu2 %3037  ;;  %6977 = vmatmul.msk.bf16.gmra.mxu2 %vm575_vm1, %v3118_v62 }
0x1124   : > { %2877 = vmatpush.bf16.xpose.msra.mxu1 %v2857_v16  ;;  %v3466_v16 = vsel %vm575_vm1, %v9496_v61, 0 }
0x112a   : > { %v9559_v23 = vpop.permute.xlu1 %3422  ;;  %v9564_v15 = vpop.permute.xlu0 %3418 }
0x112b   : > { %v3738_v43 = vpop.permute.xlu2 %3737 }
0x112c   : > { %v3773_v6 = vsel %vm575_vm1, %v3738_v43, 0  ;;  %2878 = vmatpush.bf16.xpose.msra.mxu1 %v2854_v56 }
0x112d   : > { %3777 = vmatpush.bf16.xpose.msrb.mxu2 %v3773_v6  ;;  %v3460_v6 = vsel %vm575_vm1, %v9531_v29, 0 }
0x1132   : > { %v3347_v49 = vpop.permute.xlu1 %3346  ;;  %v3341_v62 = vpop.permute.xlu0 %3340 }
0x1133   : > { %v9566_v27 = vpop.permute.xlu2 %3946  ;;  %6963 = vmatmul.msk.bf16.vlgmr.msra.gmra.mxu1 %vm575_vm1, %v9320_v3  ;;  %6978 = vmatmul.msk.bf16.gmra.mxu2 %vm575_vm1, %v3120_v36  ;;  %v3764_v36 = vsel %vm575_vm1, %v3732_v60, 0  ;;  %v3758_v60 = vsel %vm575_vm1, %v9525_v51, 0 }
0x1135   : > { %3778 = vmatpush.bf16.xpose.msrb.mxu2 %v3770_v40 }
0x113a   : > { %v3345_v17 = vpop.permute.xlu1 %3344  ;;  %v3339_v3 = vpop.permute.xlu0 %3338 }
0x113b   : > { %v3349_v57 = vpop.permute.xlu2 %3348 }
0x113c   : > { %v3374_v21 = vsel %vm612_vm2, %v3349_v57, 0 }
0x113d   : > { %3378 = vmatpush.bf16.msrb.mxu3 %v3374_v21  ;;  %3779 = vmatpush.bf16.xpose.msrb.mxu2 %v3767_v5 }
0x1141   : > { %3379 = vmatpush.bf16.msrb.mxu3 %v3347_v49 }
0x1142   : > { %v3042_v50 = vpop.permute.xlu1 %3041  ;;  %v3044_v48 = vpop.permute.xlu0 %3043 }
0x1143   : > { %6964 = vmatmul.msk.bf16.gmra.mxu1 %vm575_vm1, %v9347_v24  ;;  %6979 = vmatmul.msk.bf16.gmra.mxu2 %vm575_vm1, %v9507_v38  ;;  %v3650_v53 = vpop.permute.xlu2 %3649  ;;  %v3469_v38 = vsel %vm575_vm1, %v9516_v41, 0  ;;  %v3463_v41 = vsel %vm575_vm1, %v9536_v33, 0 }
0x1144   : > { %v3675_v29 = vsel %vm612_vm2, %v3650_v53, 0 }
0x1145   : > { %3380 = vmatpush.bf16.msrb.mxu3 %v3345_v17  ;;  %3780 = vmatpush.bf16.xpose.msrb.mxu2 %v3764_v36 }
0x1149   : > { %3381 = vmatpush.bf16.msrb.mxu3 %v3343_v55 }
0x114a   : > { %v3437_v34 = vpop.permute.xlu1 %3436  ;;  %v3040_v12 = vpop.permute.xlu0 %3039 }
0x114b   : > { %v3472_v8 = vsel %vm575_vm1, %v3437_v34, 0  ;;  %v3124_v24 = vpop.permute.xlu2 %3123 }
0x114c   : > { %3476 = vmatpush.bf16.xpose.msrb.mxu1 %v3472_v8 }
0x114d   : > { %3382 = vmatpush.bf16.msrb.mxu3 %v3341_v62  ;;  %3781 = vmatpush.bf16.xpose.msrb.mxu2 %v3761_v45 }
0x1151   : > { %3383 = vmatpush.bf16.msrb.mxu3 %v3339_v3 }
0x1152   : > { %v3945_v7 = vpop.permute.xlu1 %3944  ;;  %v3949_v43 = vpop.permute.xlu0 %3948 }
0x1153   : > { %6965 = vmatmul.msk.bf16.gmra.mxu1 %vm575_vm1, %v9355_v2  ;;  %6980 = vmatmul.msk.bf16.gmra.mxu2 %vm575_vm1, %v3124_v24 }
0x1154   : > { %3477 = vmatpush.bf16.xpose.msrb.mxu1 %v3469_v38 }
0x1155   : > { %3782 = vmatpush.bf16.xpose.msrb.mxu2 %v3758_v60 }
0x115a   : > { %v3941_v55 = vpop.permute.xlu1 %3940  ;;  %v3943_v49 = vpop.permute.xlu0 %3942 }
0x115c   : > { %3478 = vmatpush.bf16.xpose.msrb.mxu1 %v3466_v16 }
0x1162   : > { %v3048_v56 = vpop.permute.xlu1 %3047 }
0x1163   : > { %v3073_v2 = vsel %vm612_vm2, %v3048_v56, 0  ;;  %6966 = vmatmul.msk.bf16.gmra.mxu1 %vm575_vm1, %v9390_v26  ;;  %6999 = vmatmul.msk.bf16.vlgmr.msrb.gmra.mxu2 %vm575_vm1, %v9509_v14  ;;  %v3457_v26 = vsel %vm575_vm1, %v9549_v39, 0  ;;  %v3648_v14 = vpop.permute.xlu0 %3647 }
0x1164   : > { %3077 = vmatpush.bf16.msra.mxu0 %v3073_v2  ;;  %3479 = vmatpush.bf16.xpose.msrb.mxu1 %v3463_v41 }
0x1168   : > { %3078 = vmatpush.bf16.msra.mxu0 %v9545_v35 }
0x116a   : > { %v3951_v51 = vpop.permute.xlu1 %3950 }
0x116b   : > { %v3976_v61 = vsel %vm612_vm2, %v3951_v51, 0 }
0x116c   : > { %3079 = vmatpush.bf16.msra.mxu0 %v3044_v48  ;;  %3480 = vmatpush.bf16.xpose.msrb.mxu1 %v3460_v6 }
0x116d   : > { %3980 = vmatpush.bf16.msra.mxu3 %v3976_v61 }
0x1170   : > { %3080 = vmatpush.bf16.msra.mxu0 %v3042_v50 }
0x1171   : > { %3981 = vmatpush.bf16.msra.mxu3 %v3949_v43 }
0x1172   : > { %v3726_v40 = vpop.permute.xlu1 %3725 }
0x1173   : > { %6967 = vmatmul.msk.bf16.gmra.mxu1 %vm575_vm1, %v9398_v47  ;;  %7000 = vmatmul.msk.bf16.gmra.mxu2 %vm575_vm1, %v9518_v20  ;;  %v3646_v47 = vpop.permute.xlu0 %3645 }
0x1174   : > { %3081 = vmatpush.bf16.msra.mxu0 %v3040_v12  ;;  %3481 = vmatpush.bf16.xpose.msrb.mxu1 %v3457_v26 }
0x1175   : > { %3982 = vmatpush.bf16.msra.mxu3 %v9566_v27 }
0x1178   : > { %3082 = vmatpush.bf16.msra.mxu0 %v9553_v18 }
0x1179   : > { %3983 = vmatpush.bf16.msra.mxu3 %v3945_v7 }
0x117c   : > { %3679 = vmatpush.bf16.msrb.mxu0 %v3675_v29 }
0x117d   : > { %3984 = vmatpush.bf16.msra.mxu3 %v3943_v49 }
0x1180   : > { %3680 = vmatpush.bf16.msrb.mxu0 %v3648_v14 }
0x1181   : > { %3985 = vmatpush.bf16.msra.mxu3 %v3941_v55  ;;  %v3425_v55 = vpop.permute.xlu0 %3424 }
0x1183   : > { %6968 = vmatmul.msk.bf16.gmra.mxu1 %vm575_vm1, %v9499_v58  ;;  %7001 = vmatmul.msk.bf16.gmra.mxu2 %vm575_vm1, %v9557_v9 }
0x1184   : > { %3681 = vmatpush.bf16.msrb.mxu0 %v3646_v47 }
0x1186   : > { %v9615_v20 = vpop.f32.mrf.mxu2 }
0x1187   : > { %v3211_v33 = vsel %vm2909_vm10, %v9615_v20, -inf }
0x1188   : > { %3212 = vmax.xlane.f32.xlu0 %v3211_v33 }
0x118e   : > { %v9619_v35 = vpop.f32.mrf.mxu2 }
0x1193   : > { %6987 = vmatmul.msk.bf16.vlgmr.msrb.gmra.mxu1 %vm575_vm1, %v9538_v31  ;;  %7002 = vmatmul.msk.bf16.gmra.mxu2 %vm575_vm1, %v9543_v19 }
0x1196   : > { %v9625_v39 = vpop.f32.mrf.mxu2 }
0x1197   : > { %v3217_v58 = vsel %vm2909_vm10, %v9625_v39, -inf }
0x1198   : > { %3218 = vmax.xlane.f32.xlu1 %v3217_v58 }
0x119e   : > { %v9629_v18 = vpop.f32.mrf.mxu2 }
0x11a3   : > { %6988 = vmatmul.msk.bf16.gmra.mxu1 %vm575_vm1, %v9528_v22  ;;  %7003 = vmatmul.msk.bf16.gmra.mxu2 %vm575_vm1, %v9533_v52  ;;  %v3214_v52 = vsel %vm2909_vm10, %v9619_v35, -inf }
0x11a6   : > { %v9635_v9 = vpop.f32.mrf.mxu2 }
0x11a7   : > { %v3223_v53 = vsel %vm2909_vm10, %v9635_v9, -inf }
0x11ae   : > { %v9637_v31 = vpop.f32.mrf.mxu2 }
0x11af   : > { %v3226_v12 = vsel %vm2909_vm10, %v9637_v31, -inf }
0x11b0   : > { %v9639_v27 = vpop.f32.mrf.mxu1 }
0x11b1   : > { %v2910_v19 = vsel %vm2909_vm10, %v9639_v27, -inf }
0x11b2   : > { %2911 = vmax.xlane.f32.xlu2 %v2910_v19 }
0x11b3   : > { %6989 = vmatmul.msk.bf16.gmra.mxu1 %vm575_vm1, %v9564_v15  ;;  %7004 = vmatmul.msk.bf16.gmra.mxu2 %vm575_vm1, %v3726_v40  ;;  %v3220_v15 = vsel %vm2909_vm10, %v9629_v18, -inf }
0x11b6   : > { %v9646_v22 = vpop.f32.mrf.mxu2 }
0x11b7   : > { %v3229_v56 = vsel %vm2909_vm10, %v9646_v22, -inf }
0x11b8   : > { %v9648_v62 = vpop.f32.mrf.mxu1 }
0x11b9   : > { %v2913_v17 = vsel %vm2909_vm10, %v9648_v62, -inf }
0x11ba   : > { %3215 = vmax.xlane.f32.xlu2 %v3214_v52  ;;  %2914 = vmax.xlane.f32.xlu0 %v2913_v17 }
0x11be   : > { %v9654_v57 = vpop.f32.mrf.mxu2 }
0x11bf   : > { %v3232_v61 = vsel %vm2909_vm10, %v9654_v57, -inf }
0x11c0   : > { %v9656_v21 = vpop.f32.mrf.mxu1 }
0x11c1   : > { %v2916_v5 = vsel %vm2909_vm10, %v9656_v21, -inf }
0x11c2   : > { %3221 = vmax.xlane.f32.xlu0 %v3220_v15  ;;  %2917 = vmax.xlane.f32.xlu2 %v2916_v5 }
0x11c3   : > { %6990 = vmatmul.msk.bf16.gmra.mxu1 %vm575_vm1, %v9551_v10 }
0x11c6   : > { %v9664_v50 = vpop.f32.mrf.mxu2 }
0x11c7   : > { %v3235_v6 = vsel %vm2909_vm10, %v9664_v50, -inf }
0x11c8   : > { %v9666_v3 = vpop.f32.mrf.mxu1 }
0x11c9   : > { %v2919_v36 = vsel %vm2909_vm10, %v9666_v3, -inf }
0x11ca   : > { %2920 = vmax.xlane.f32.xlu1 %v2919_v36  ;;  %3224 = vmax.xlane.f32.xlu2 %v3223_v53 }
0x11ce   : > { %v9672_v34 = vpop.f32.mrf.mxu2 }
0x11cf   : > { %v3238_v58 = vsel %vm2909_vm10, %v9672_v34, -inf }
0x11d0   : > { %v9674_v8 = vpop.f32.mrf.mxu1 }
0x11d1   : > { %v2922_v45 = vsel %vm2909_vm10, %v9674_v8, -inf }
0x11d2   : > { %2923 = vmax.xlane.f32.xlu1 %v2922_v45 }
0x11d3   : > { %6991 = vmatmul.msk.bf16.gmra.mxu1 %vm575_vm1, %v9559_v23 }
0x11d6   : > { %v9680_v10 = vpop.f32.mrf.mxu2 }
0x11d7   : > { %v3241_v52 = vsel %vm2909_vm10, %v9680_v10, -inf }
0x11d8   : > { %v9682_v48 = vpop.f32.mrf.mxu1 }
0x11d9   : > { %v2925_v24 = vsel %vm2909_vm10, %v9682_v48, -inf }
0x11da   : > { %2926 = vmax.xlane.f32.xlu0 %v2925_v24 }
0x11de   : > { %v3209_v7 = vpop.f32.mrf.mxu2 }
0x11e0   : > { %v9686_v38 = vpop.f32.mrf.mxu1 }
0x11e1   : > { %v2928_v60 = vsel %vm2909_vm10, %v9686_v38, -inf }
0x11e2   : > { %2929 = vmax.xlane.f32.xlu1 %v2928_v60  ;;  %3227 = vmax.xlane.f32.xlu0 %v3226_v12 }
0x11e3   : > { %6992 = vmatmul.msk.bf16.gmra.mxu1 %vm575_vm1, %v3425_v55 }
0x11e6   : > { %v9693_v23 = vpop.f32.mrf.mxu2 }
0x11e7   : > { %v3813_v45 = vsel %vm2909_vm10, %v9693_v23, -inf }
0x11e8   : > { %v9695_v16 = vpop.f32.mrf.mxu1 }
0x11e9   : > { %v2931_v43 = vsel %vm2909_vm10, %v9695_v16, -inf }
0x11ea   : > { %2932 = vmax.xlane.f32.xlu2 %v2931_v43  ;;  %3230 = vmax.xlane.f32.xlu0 %v3229_v56 }
0x11ee   : > { %v9701_v2 = vpop.f32.mrf.mxu2 }
0x11ef   : > { %v3816_v43 = vsel %vm2909_vm10, %v9701_v2, -inf }
0x11f0   : > { %v9703_v41 = vpop.f32.mrf.mxu1 }
0x11f1   : > { %v2934_v51 = vsel %vm2909_vm10, %v9703_v41, -inf }
0x11f2   : > { %2935 = vmax.xlane.f32.xlu1 %v2934_v51  ;;  %3233 = vmax.xlane.f32.xlu2 %v3232_v61 }
0x11f3   : > { %3236 = vmax.xlane.f32.xlu0 %v3235_v6 }
0x11f6   : > { %v9711_v49 = vpop.f32.mrf.mxu2 }
0x11f8   : > { %v9713_v26 = vpop.f32.mrf.mxu1 }
0x11f9   : > { %v2937_v14 = vsel %vm2909_vm10, %v9713_v26, -inf }
0x11fa   : > { %2938 = vmax.xlane.f32.xlu2 %v2937_v14 }
0x11fb   : > { %v3213_v7 = vpop.xlane.xlu0 %3212 }
0x11fc   : > { %v3244_v55 = vsub.f32 %v9615_v20, %v3213_v7  ;;  %v3819_v20 = vsel %vm2909_vm10, %v9711_v49, -inf }
0x11fe   : > { %v9717_v29 = vpop.f32.mrf.mxu2  ;;  %v3255_v51 = vmul.f32 1.442695, %v3244_v55 }
0x1200   : > { %v9719_v47 = vpop.f32.mrf.mxu1  ;;  %7587 = vpow2.f32 %v3255_v51 }
0x1201   : > { %v2940_v33 = vsel %vm2909_vm10, %v9719_v47, -inf }
0x1202   : > { %2941 = vmax.xlane.f32.xlu0 %v2940_v33  ;;  %3239 = vmax.xlane.f32.xlu2 %v3238_v58 }
0x1206   : > { %v9725_v19 = vpop.f32.mrf.mxu2  ;;  %v9766_v7 = vpop.eup %7587 }
0x1208   : > { %v2907_v40 = vpop.f32.mrf.mxu1 }
0x1209   : > { %v3822_v40 = vsel %vm2909_vm10, %v9717_v29, -inf }
0x120a   : > { %3242 = vmax.xlane.f32.xlu0 %v3241_v52 }
0x120e   : > { %v9729_v17 = vpop.f32.mrf.mxu2 }
0x120f   : > { %v3828_v59 = vsel %vm2909_vm10, %v9729_v17, -inf }
0x1210   : > { %v9731_v15 = vpop.f32.mrf.mxu1 }
0x1211   : > { %v3512_v5 = vsel %vm2909_vm10, %v9731_v15, -inf }
0x1212   : > { %3513 = vmax.xlane.f32.xlu2 %v3512_v5 }
0x1216   : > { %v9735_v36 = vpop.f32.mrf.mxu2 }
0x1218   : > { %v9737_v53 = vpop.f32.mrf.mxu1 }
0x1219   : > { %v3515_v24 = vsel %vm2909_vm10, %v9737_v53, -inf }
0x121a   : > { %3814 = vmax.xlane.f32.xlu2 %v3813_v45  ;;  %3516 = vmax.xlane.f32.xlu1 %v3515_v24 }
0x121e   : > { %v9743_v60 = vpop.f32.mrf.mxu2 }
0x1220   : > { %v9745_v12 = vpop.f32.mrf.mxu1 }
0x1221   : > { %v3518_v56 = vsel %vm2909_vm10, %v9745_v12, -inf }
0x1222   : > { %3817 = vmax.xlane.f32.xlu1 %v3816_v43  ;;  %3519 = vmax.xlane.f32.xlu0 %v3518_v56 }
0x1225   : > { %v2912_v61 = vpop.xlane.xlu2 %2911 }
0x1226   : > { %v2943_v6 = vsub.f32 %v9639_v27, %v2912_v61  ;;  %v9753_v14 = vpop.f32.mrf.mxu2 }
0x1228   : > { %v2954_v33 = vmul.f32 1.442695, %v2943_v6  ;;  %v9755_v58 = vpop.f32.mrf.mxu1 }
0x1229   : > { %v3521_v52 = vsel %vm2909_vm10, %v9755_v58, -inf }
0x122a   : > { %7589 = vpow2.f32 %v2954_v33  ;;  %3820 = vmax.xlane.f32.xlu1 %v3819_v20  ;;  %3823 = vmax.xlane.f32.xlu0 %v3822_v40  ;;  %v3219_v33 = vpop.xlane.xlu1 %3218 }
0x122b   : > { %3522 = vmax.xlane.f32.xlu2 %v3521_v52 }
0x122d   : > { %v3216_v27 = vpop.xlane.xlu2 %3215  ;;  %v2915_v45 = vpop.xlane.xlu0 %2914 }
0x122e   : > { %v3245_v5 = vsub.f32 %v9619_v35, %v3216_v27  ;;  %v9764_v24 = vpop.f32.mrf.mxu2  ;;  %v2944_v51 = vsub.f32 %v9648_v62, %v2915_v45  ;;  %v3277_v35 = vsel %vm2909_vm10, %v9766_v7, 0.0 }
0x1230   : > { %v9768_v55 = vpop.eup %7589  ;;  %v3257_v43 = vmul.f32 1.442695, %v3245_v5  ;;  %v9770_v56 = vpop.f32.mrf.mxu1  ;;  %v2956_v20 = vmul.f32 1.442695, %v2944_v51 }
0x1231   : > { %v2976_v61 = vsel %vm2909_vm10, %v9768_v55, 0.0  ;;  %v3524_v6 = vsel %vm2909_vm10, %v9770_v56, -inf }
0x1232   : > { %7591 = vpow2.f32 %v3257_v43  ;;  %2977 = vadd.xlane.f32.xlu1 %v2976_v61  ;;  %3525 = vmax.xlane.f32.xlu0 %v3524_v6  ;;  %v3825_v61 = vsel %vm2909_vm10, %v9725_v19, -inf }
0x1233   : > { %3278 = vadd.xlane.f32.xlu2 %v3277_v35  ;;  %7593 = vpow2.f32 %v2956_v20  ;;  %v3246_v20 = vsub.f32 %v9625_v39, %v3219_v33 }
0x1235   : > { %v2918_v40 = vpop.xlane.xlu2 %2917 }
0x1236   : > { %v9779_v52 = vpop.f32.mrf.mxu2  ;;  %v2945_v62 = vsub.f32 %v9656_v21, %v2918_v40 }
0x1238   : > { %v9781_v27 = vpop.eup %7591  ;;  %v9784_v5 = vpop.f32.mrf.mxu1  ;;  %v2958_v51 = vmul.f32 1.442695, %v2945_v62  ;;  %v3259_v62 = vmul.f32 1.442695, %v3246_v20 }
0x1239   : > { %v3280_v45 = vsel %vm2909_vm10, %v9781_v27, 0.0  ;;  %v3527_v43 = vsel %vm2909_vm10, %v9784_v5, -inf  ;;  %v9793_v40 = vpop.eup %7593 }
0x123a   : > { %3281 = vadd.xlane.f32.xlu0 %v3280_v45  ;;  %3528 = vmax.xlane.f32.xlu1 %v3527_v43  ;;  %7595 = vpow2.f32 %v2958_v51  ;;  %v2979_v45 = vsel %vm2909_vm10, %v9793_v40, 0.0 }
0x123b   : > { %3826 = vmax.xlane.f32.xlu2 %v3825_v61 }
0x123d   : > { %v2921_v6 = vpop.xlane.xlu1 %2920 }
0x123e   : > { %v2946_v35 = vsub.f32 %v9666_v3, %v2921_v6  ;;  %v3811_v21 = vpop.f32.mrf.mxu2  ;;  %v3222_v3 = vpop.xlane.xlu0 %3221 }
0x123f   : > { %v3225_v6 = vpop.xlane.xlu2 %3224  ;;  %v3247_v33 = vsub.f32 %v9629_v18, %v3222_v3 }
0x1240   : > { %v2960_v28 = vmul.f32 1.442695, %v2946_v35  ;;  %v9796_v32 = vpop.f32.mrf.mxu1  ;;  %v9802_v61 = vpop.eup %7595 }
0x1241   : > { %v3530_v20 = vsel %vm2909_vm10, %v9796_v32, -inf  ;;  %v3261_v18 = vmul.f32 1.442695, %v3247_v33 }
0x1242   : > { %3829 = vmax.xlane.f32.xlu1 %v3828_v59  ;;  %7597 = vpow2.f32 %v2960_v28  ;;  %v3248_v59 = vsub.f32 %v9635_v9, %v3225_v6  ;;  %v2982_v28 = vsel %vm2909_vm10, %v9802_v61, 0.0 }
0x1243   : > { %2980 = vadd.xlane.f32.xlu2 %v2979_v45  ;;  %7599 = vpow2.f32 %v3259_v62 }
0x1244   : > { %v3263_v45 = vmul.f32 1.442695, %v3248_v59 }
0x1245   : > { %v2924_v43 = vpop.xlane.xlu1 %2923 }
0x1246   : > { %v2947_v39 = vsub.f32 %v9674_v8, %v2924_v43 }
0x1248   : > { %v2962_v51 = vmul.f32 1.442695, %v2947_v39  ;;  %v9806_v35 = vpop.f32.mrf.mxu1  ;;  %v9808_v21 = vpop.eup %7597 }
0x1249   : > { %v2985_v8 = vsel %vm2909_vm10, %v9808_v21, 0.0  ;;  %v9817_v3 = vpop.eup %7599 }
0x124a   : > { %7601 = vpow2.f32 %v2962_v51  ;;  %2983 = vadd.xlane.f32.xlu1 %v2982_v28  ;;  %2986 = vadd.xlane.f32.xlu0 %v2985_v8  ;;  %v3283_v6 = vsel %vm2909_vm10, %v9817_v3, 0.0  ;;  %v3831_v51 = vsel %vm2909_vm10, %v9735_v36, -inf }
0x124b   : > { %3531 = vmax.xlane.f32.xlu2 %v3530_v20  ;;  %7603 = vpow2.f32 %v3261_v18 }
0x124c   : > { %7605 = vpow2.f32 %v3263_v45 }
0x124d   : > { %v2927_v62 = vpop.xlane.xlu0 %2926 }
0x124e   : > { %v2948_v25 = vsub.f32 %v9682_v48, %v2927_v62 }
0x1250   : > { %v9819_v43 = vpop.eup %7601  ;;  %v9821_v9 = vpop.f32.mrf.mxu1 }
0x1251   : > { %v2988_v39 = vsel %vm2909_vm10, %v9819_v43, 0.0  ;;  %v9829_v28 = vpop.eup %7603 }
0x1252   : > { %3284 = vadd.xlane.f32.xlu1 %v3283_v6  ;;  %2989 = vadd.xlane.f32.xlu0 %v2988_v39  ;;  %v9832_v8 = vpop.eup %7605  ;;  %v3533_v6 = vsel %vm2909_vm10, %v9806_v35, -inf  ;;  %v3286_v39 = vsel %vm2909_vm10, %v9829_v28, 0.0 }
0x1253   : > { %3832 = vmax.xlane.f32.xlu2 %v3831_v51 }
0x1255   : > { %v3228_v33 = vpop.xlane.xlu0 %3227  ;;  %v2930_v59 = vpop.xlane.xlu1 %2929 }
0x1256   : > { %v3249_v20 = vsub.f32 %v9637_v31, %v3228_v33  ;;  %v2949_v45 = vsub.f32 %v9686_v38, %v2930_v59  ;;  %v3289_v31 = vsel %vm2909_vm10, %v9832_v8, 0.0  ;;  %v2964_v33 = vmul.f32 1.442695, %v2948_v25 }
0x1257   : > { %v3834_v25 = vsel %vm2909_vm10, %v9743_v60, -inf }
0x1258   : > { %v3265_v18 = vmul.f32 1.442695, %v3249_v20  ;;  %v9835_v54 = vpop.f32.mrf.mxu1  ;;  %v2966_v51 = vmul.f32 1.442695, %v2949_v45 }
0x125a   : > { %7607 = vpow2.f32 %v3265_v18  ;;  %3534 = vmax.xlane.f32.xlu1 %v3533_v6  ;;  %3290 = vadd.xlane.f32.xlu0 %v3289_v31  ;;  %v3837_v6 = vsel %vm2909_vm10, %v9753_v14, -inf }
0x125b   : > { %3287 = vadd.xlane.f32.xlu2 %v3286_v39  ;;  %7609 = vpow2.f32 %v2966_v51 }
0x125c   : > { %7611 = vpow2.f32 %v2964_v33 }
0x125d   : > { %v2933_v38 = vpop.xlane.xlu2 %2932  ;;  %v3231_v59 = vpop.xlane.xlu0 %3230 }
0x125e   : > { %v2950_v48 = vsub.f32 %v9695_v16, %v2933_v38  ;;  %v3250_v18 = vsub.f32 %v9646_v22, %v3231_v59 }
0x1260   : > { %v9844_v20 = vpop.eup %7607  ;;  %v9847_v62 = vpop.f32.mrf.mxu1  ;;  %v2968_v45 = vmul.f32 1.442695, %v2950_v48  ;;  %v3267_v31 = vmul.f32 1.442695, %v3250_v18  ;;  %v3840_v18 = vsel %vm2909_vm10, %v9764_v24, -inf }
0x1261   : > { %v3292_v39 = vsel %vm2909_vm10, %v9844_v20, 0.0  ;;  %v9856_v51 = vpop.eup %7609 }
0x1262   : > { %3838 = vmax.xlane.f32.xlu1 %v3837_v6  ;;  %3293 = vadd.xlane.f32.xlu0 %v3292_v39  ;;  %v9859_v38 = vpop.eup %7611  ;;  %7613 = vpow2.f32 %v2968_v45  ;;  %v2994_v6 = vsel %vm2909_vm10, %v9856_v51, 0.0 }
0x1263   : > { %3835 = vmax.xlane.f32.xlu2 %v3834_v25  ;;  %7615 = vpow2.f32 %v3267_v31  ;;  %v2991_v48 = vsel %vm2909_vm10, %v9859_v38, 0.0 }
0x1265   : > { %v3234_v16 = vpop.xlane.xlu2 %3233  ;;  %v2936_v22 = vpop.xlane.xlu1 %2935 }
0x1266   : > { %v3251_v33 = vsub.f32 %v9654_v57, %v3234_v16  ;;  %v2951_v42 = vsub.f32 %v9703_v41, %v2936_v22  ;;  %v3237_v57 = vpop.xlane.xlu0 %3236 }
0x1268   : > { %v3269_v59 = vmul.f32 1.442695, %v3251_v33  ;;  %v3510_v46 = vpop.f32.mrf.mxu1  ;;  %v2970_v39 = vmul.f32 1.442695, %v2951_v42  ;;  %v3252_v33 = vsub.f32 %v9664_v50, %v3237_v57 }
0x1269   : > { %v9868_v46 = vpop.eup %7613 }
0x126a   : > { %7617 = vpow2.f32 %v3269_v59  ;;  %2995 = vadd.xlane.f32.xlu1 %v2994_v6  ;;  %3841 = vmax.xlane.f32.xlu0 %v3840_v18  ;;  %v9871_v45 = vpop.eup %7615  ;;  %v2997_v59 = vsel %vm2909_vm10, %v9868_v46, 0.0 }
0x126b   : > { %2992 = vadd.xlane.f32.xlu2 %v2991_v48  ;;  %7619 = vpow2.f32 %v2970_v39  ;;  %v3295_v42 = vsel %vm2909_vm10, %v9871_v45, 0.0 }
0x126d   : > { %v2939_v25 = vpop.xlane.xlu2 %2938 }
0x126e   : > { %v2952_v41 = vsub.f32 %v9713_v26, %v2939_v25  ;;  %v3271_v26 = vmul.f32 1.442695, %v3252_v33 }
0x1270   : > { %v9873_v31 = vpop.eup %7617  ;;  %v2972_v16 = vmul.f32 1.442695, %v2952_v41 }
0x1271   : > { %v3298_v22 = vsel %vm2909_vm10, %v9873_v31, 0.0  ;;  %v9883_v50 = vpop.eup %7619 }
0x1272   : > { %7621 = vpow2.f32 %v2972_v16  ;;  %3299 = vadd.xlane.f32.xlu1 %v3298_v22  ;;  %2998 = vadd.xlane.f32.xlu0 %v2997_v59  ;;  %v3000_v16 = vsel %vm2909_vm10, %v9883_v50, 0.0 }
0x1273   : > { %3296 = vadd.xlane.f32.xlu2 %v3295_v42  ;;  %7623 = vpow2.f32 %v3271_v26 }
0x1275   : > { %v2942_v6 = vpop.xlane.xlu0 %2941  ;;  %v3240_v48 = vpop.xlane.xlu2 %3239 }
0x1276   : > { %v3253_v18 = vsub.f32 %v9672_v34, %v3240_v48  ;;  %v2953_v25 = vsub.f32 %v9719_v47, %v2942_v6 }
0x1278   : > { %v9885_v57 = vpop.eup %7621  ;;  %v3273_v39 = vmul.f32 1.442695, %v3253_v18  ;;  %v2974_v33 = vmul.f32 1.442695, %v2953_v25 }
0x1279   : > { %v3003_v41 = vsel %vm2909_vm10, %v9885_v57, 0.0  ;;  %v9893_v42 = vpop.eup %7623 }
0x127a   : > { %7625 = vpow2.f32 %v3273_v39  ;;  %3001 = vadd.xlane.f32.xlu0 %v3000_v16  ;;  %v3301_v26 = vsel %vm2909_vm10, %v9893_v42, 0.0 }
0x127b   : > { %3004 = vadd.xlane.f32.xlu2 %v3003_v41  ;;  %7627 = vpow2.f32 %v2974_v33 }
0x127d   : > { %v3243_v22 = vpop.xlane.xlu0 %3242 }
0x127e   : > { %v3254_v34 = vsub.f32 %v9680_v10, %v3243_v22 }
0x1280   : > { %v3275_v59 = vmul.f32 1.442695, %v3254_v34  ;;  %v9895_v48 = vpop.eup %7625 }
0x1281   : > { %v3304_v47 = vsel %vm2909_vm10, %v9895_v48, 0.0  ;;  %v9902_v39 = vpop.eup %7627 }
0x1282   : > { %7629 = vpow2.f32 %v3275_v59  ;;  %3302 = vadd.xlane.f32.xlu0 %v3301_v26  ;;  %v3006_v16 = vsel %vm2909_vm10, %v9902_v39, 0.0 }
0x1283   : > { %3305 = vadd.xlane.f32.xlu2 %v3304_v47 }
0x1285   : > { %v3514_v6 = vpop.xlane.xlu2 %3513 }
0x1286   : > { %v3545_v18 = vsub.f32 %v9731_v15, %v3514_v6 }
0x1288   : > { %v9904_v10 = vpop.eup %7629  ;;  %v3556_v25 = vmul.f32 1.442695, %v3545_v18 }
0x1289   : > { %v3307_v41 = vsel %vm2909_vm10, %v9904_v10, 0.0 }
0x128a   : > { %7631 = vpow2.f32 %v3556_v25  ;;  %3308 = vadd.xlane.f32.xlu1 %v3307_v41  ;;  %3007 = vadd.xlane.f32.xlu0 %v3006_v16 }
0x128d   : > { %v3815_v33 = vpop.xlane.xlu2 %3814  ;;  %v3517_v22 = vpop.xlane.xlu1 %3516 }
0x128e   : > { %v3846_v34 = vsub.f32 %v9693_v23, %v3815_v33  ;;  %v3546_v47 = vsub.f32 %v9737_v53, %v3517_v22 }
0x1290   : > { %v9911_v59 = vpop.eup %7631  ;;  %v3857_v15 = vmul.f32 1.442695, %v3846_v34  ;;  %v3558_v6 = vmul.f32 1.442695, %v3546_v47 }
0x1291   : > { %11662 = vst [vmem:[#allocation18_spill] sm:$0xff] %v9911_v59  ;;  %v3578_v26 = vsel %vm2909_vm10, %v9911_v59, 0.0 }
0x1292   : > { %7633 = vpow2.f32 %v3857_v15  ;;  %3579 = vadd.xlane.f32.xlu1 %v3578_v26 }
0x1293   : > { %7635 = vpow2.f32 %v3558_v6 }
0x1295   : > { %v9916_v18 = vpop.xlane.xlu0 %3519  ;;  %v3818_v25 = vpop.xlane.xlu1 %3817 }
0x1296   : > { %v3847_v41 = vsub.f32 %v9701_v2, %v3818_v25 }
0x1298   : > { %v9919_v16 = vpop.eup %7633  ;;  %v3859_v23 = vmul.f32 1.442695, %v3847_v41 }
0x1299   : > { %v3879_v33 = vsel %vm2909_vm10, %v9919_v16, 0.0  ;;  %v9923_v34 = vpop.eup %7635 }
0x129a   : > { %3880 = vadd.xlane.f32.xlu2 %v3879_v33  ;;  %7637 = vpow2.f32 %v3859_v23  ;;  %v3581_v6 = vsel %vm2909_vm10, %v9923_v34, 0.0 }
0x129d   : > { %v3824_v53 = vpop.xlane.xlu0 %3823  ;;  %v3821_v22 = vpop.xlane.xlu1 %3820 }
0x129e   : > { %v3849_v15 = vsub.f32 %v9717_v29, %v3824_v53  ;;  %v9926_v47 = vpop.xlane.xlu2 %3522  ;;  %v3848_v26 = vsub.f32 %v9711_v49, %v3821_v22 }
0x12a0   : > { %v3863_v2 = vmul.f32 1.442695, %v3849_v15  ;;  %v3861_v25 = vmul.f32 1.442695, %v3848_v26  ;;  %v9929_v13 = vpop.eup %7637 }
0x12a1   : > { %v3882_v41 = vsel %vm2909_vm10, %v9929_v13, 0.0 }
0x12a2   : > { %7639 = vpow2.f32 %v3863_v2  ;;  %3582 = vadd.xlane.f32.xlu2 %v3581_v6  ;;  %3883 = vadd.xlane.f32.xlu0 %v3882_v41 }
0x12a3   : > { %7641 = vpow2.f32 %v3861_v25 }
0x12a5   : > { %v9935_v23 = vpop.xlane.xlu0 %3525  ;;  %v2978_v29 = vpop.xlane.xlu1 %2977 }
0x12a6   : > { %v3279_v33 = vpop.xlane.xlu2 %3278 }
0x12a7   : > { %7643 = vrcp.f32 %v3279_v33 }
0x12a8   : > { %v9937_v53 = vpop.eup %7639 }
0x12a9   : > { %v3888_v49 = vsel %vm2909_vm10, %v9937_v53, 0.0  ;;  %v9941_v22 = vpop.eup %7641 }
0x12aa   : > { %3889 = vadd.xlane.f32.xlu2 %v3888_v49  ;;  %v3885_v15 = vsel %vm2909_vm10, %v9941_v22, 0.0 }
0x12ab   : > { %3886 = vadd.xlane.f32.xlu1 %v3885_v15 }
0x12ad   : > { %v3282_v26 = vpop.xlane.xlu0 %3281  ;;  %v9945_v2 = vpop.xlane.xlu1 %3528 }
0x12ae   : > { %v3827_v25 = vpop.xlane.xlu2 %3826  ;;  %7645 = vrcp.f32 %v3282_v26  ;;  %v7644_v6 = vpop.eup %7643 }
0x12af   : > { %v3321_v44 = vmul.f32 %v7644_v6, %v9766_v7  ;;  %7647 = vrcp.f32 %v2978_v29 }
0x12b4   : > { %v7646_v41 = vpop.eup %7645 }
0x12b5   : > { %v3322_v11 = vmul.f32 %v7646_v41, %v9781_v27  ;;  %v3830_v1 = vpop.xlane.xlu1 %3829  ;;  %v7648_v33 = vpop.eup %7647 }
0x12b6   : > { %v2981_v37 = vpop.xlane.xlu2 %2980  ;;  %3639 = vrot.lane.b32.xlu0 %v9317_v4, %s11661_s19  ;;  %v3020_v26 = vmul.f32 %v7648_v33, %v9768_v55 }
0x12b7   : > { %v3332_v49 = vpack.c.bf16 %v3322_v11, %v3321_v44  ;;  %7649 = vrcp.f32 %v2981_v37 }
0x12b9   : > { %6981 = vmatmul.msk.bf16.vlgmr.msrb.gmra.mxu3 %vm2909_vm10, %v3332_v49 }
0x12bd   : > { %v7650_v15 = vpop.eup %7649  ;;  %v2984_v0 = vpop.xlane.xlu1 %2983 }
0x12be   : > { %v3021_v59 = vmul.f32 %v7650_v15, %v9793_v40  ;;  %v9954_v7 = vpop.xlane.xlu2 %3531  ;;  %v2987_v29 = vpop.xlane.xlu0 %2986  ;;  %7651 = vrcp.f32 %v2984_v0  ;;  %v3850_v15 = vsub.f32 %v9725_v19, %v3827_v25 }
0x12bf   : > { %7653 = vrcp.f32 %v2987_v29 }
0x12c0   : > { %v3031_v27 = vpack.c.bf16 %v3021_v59, %v3020_v26 }
0x12c2   : > { %6969 = vmatmul.msk.bf16.vlgmr.msra.gmra.mxu0 %vm2909_vm10, %v3031_v27  ;;  %3641 = vrot.lane.b32.xlu2 %v9345_v63, %s11661_s19 }
0x12c4   : > { %3643 = vrot.lane.b32.xlu1 %v9353_v30, %s11661_s19  ;;  %v7652_v4 = vpop.eup %7651 }
0x12c5   : > { %v3285_v37 = vpop.xlane.xlu1 %3284  ;;  %v7654_v55 = vpop.eup %7653  ;;  %v3022_v59 = vmul.f32 %v7652_v4, %v9802_v61 }
0x12c6   : > { %v9961_v11 = vpop.xlane.xlu2 %3832  ;;  %v2990_v44 = vpop.xlane.xlu0 %2989  ;;  %v3023_v40 = vmul.f32 %v7654_v55, %v9808_v21  ;;  %7655 = vrcp.f32 %v3285_v37  ;;  %v3865_v37 = vmul.f32 1.442695, %v3850_v15  ;;  %v3547_v55 = vsub.f32 %v9745_v12, %v9916_v18 }
0x12c7   : > { %v3548_v12 = vsub.f32 %v9755_v58, %v9926_v47 }
0x12c8   : > { %v3032_v63 = vpack.c.bf16 %v3023_v40, %v3022_v59 }
0x12cc   : > { %v7656_v30 = vpop.eup %7655 }
0x12cd   : > { %v9965_v0 = vpop.xlane.xlu1 %3534  ;;  %v3323_v26 = vmul.f32 %v7656_v30, %v9817_v3  ;;  %v3851_v3 = vsub.f32 %v9729_v17, %v3830_v1 }
0x12ce   : > { %v3288_v6 = vpop.xlane.xlu2 %3287  ;;  %v3291_v41 = vpop.xlane.xlu0 %3290 }
0x12cf   : > { %7657 = vrcp.f32 %v3288_v6  ;;  %v3560_v6 = vmul.f32 1.442695, %v3547_v55 }
0x12d2   : > { %6970 = vmatmul.msk.bf16.gmra.mxu0 %vm2909_vm10, %v3032_v63 }
0x12d5   : > { %v7658_v49 = vpop.eup %7657  ;;  %v9968_v33 = vpop.xlane.xlu1 %3838 }
0x12d6   : > { %v3324_v21 = vmul.f32 %v7658_v49, %v9829_v28  ;;  %v3836_v61 = vpop.xlane.xlu2 %3835  ;;  %v3294_v29 = vpop.xlane.xlu0 %3293  ;;  %v3843_v28 = vsel %vm2909_vm10, %v9779_v52, -inf }
0x12d7   : > { %7659 = vrcp.f32 %v3294_v29  ;;  %v3852_v29 = vsub.f32 %v9735_v36, %v9961_v11 }
0x12d8   : > { %v3333_v27 = vpack.c.bf16 %v3324_v21, %v3323_v26  ;;  %7661 = vrcp.f32 %v2990_v44 }
0x12d9   : > { %7663 = vrcp.f32 %v3291_v41  ;;  %v3867_v41 = vmul.f32 1.442695, %v3851_v3 }
0x12da   : > { %6982 = vmatmul.msk.bf16.gmra.mxu3 %vm2909_vm10, %v3333_v27  ;;  %7665 = vpow2.f32 %v3865_v37  ;;  %v3562_v27 = vmul.f32 1.442695, %v3548_v12  ;;  %v3853_v37 = vsub.f32 %v9743_v60, %v3836_v61  ;;  %v3549_v60 = vsub.f32 %v9770_v56, %v9935_v23 }
0x12dc   : > { %v3871_v11 = vmul.f32 1.442695, %v3853_v37 }
0x12dd   : > { %v2996_v4 = vpop.xlane.xlu1 %2995  ;;  %v7660_v25 = vpop.eup %7659 }
0x12de   : > { %v2993_v40 = vpop.xlane.xlu2 %2992  ;;  %v9976_v19 = vpop.xlane.xlu0 %3841  ;;  %v3326_v18 = vmul.f32 %v7660_v25, %v9844_v20 }
0x12df   : > { %7667 = vrcp.f32 %v2993_v40  ;;  %v7662_v59 = vpop.eup %7661  ;;  %v3539_v40 = vsel %vm2909_vm10, %v9835_v54, -inf }
0x12e0   : > { %3844 = vmax.xlane.f32.xlu0 %v3843_v28  ;;  %v7664_v44 = vpop.eup %7663  ;;  %7669 = vpow2.f32 %v3560_v6  ;;  %v3024_v1 = vmul.f32 %v7662_v59, %v9819_v43  ;;  %v3536_v43 = vsel %vm2909_vm10, %v9821_v9, -inf  ;;  %v3550_v28 = vsub.f32 %v9784_v5, %v9945_v2 }
0x12e1   : > { %v9981_v63 = vpop.eup %7665  ;;  %v3325_v17 = vmul.f32 %v7664_v44, %v9832_v8  ;;  %7671 = vpow2.f32 %v3867_v41  ;;  %v3869_v8 = vmul.f32 1.442695, %v3852_v29  ;;  %v3564_v44 = vmul.f32 1.442695, %v3549_v60 }
0x12e2   : > { %v3891_v58 = vsel %vm2909_vm10, %v9981_v63, 0.0  ;;  %v3566_v41 = vmul.f32 1.442695, %v3550_v28  ;;  %v3542_v60 = vsel %vm2909_vm10, %v9847_v62, -inf }
0x12e3   : > { %v3334_v47 = vpack.c.bf16 %v3326_v18, %v3325_v17 }
0x12e5   : > { %v7668_v30 = vpop.eup %7667  ;;  %v3300_v49 = vpop.xlane.xlu1 %3299 }
0x12e6   : > { %v3025_v15 = vmul.f32 %v7668_v30, %v9859_v38  ;;  %v3297_v26 = vpop.xlane.xlu2 %3296  ;;  %v2999_v21 = vpop.xlane.xlu0 %2998  ;;  %7673 = vrcp.f32 %v3300_v49  ;;  %v3854_v30 = vsub.f32 %v9753_v14, %v9968_v33 }
0x12e7   : > { %7675 = vrcp.f32 %v3297_v26  ;;  %v9998_v36 = vpop.eup %7669 }
0x12e8   : > { %v3033_v20 = vpack.c.bf16 %v3025_v15, %v3024_v1  ;;  %3892 = vadd.xlane.f32.xlu0 %v3891_v58  ;;  %7677 = vrcp.f32 %v2999_v21  ;;  %v10000_v38 = vpop.eup %7671  ;;  %v3584_v23 = vsel %vm2909_vm10, %v9998_v36, 0.0  ;;  %v3873_v33 = vmul.f32 1.442695, %v3854_v30 }
0x12e9   : > { %7679 = vpow2.f32 %v3562_v27  ;;  %v3894_v59 = vsel %vm2909_vm10, %v10000_v38, 0.0 }
0x12ea   : > { %6971 = vmatmul.msk.bf16.gmra.mxu0 %vm2909_vm10, %v3033_v20  ;;  %6983 = vmatmul.msk.bf16.gmra.mxu3 %vm2909_vm10, %v3334_v47  ;;  %7681 = vrcp.f32 %v2996_v4 }
0x12eb   : > { %3537 = vmax.xlane.f32.xlu2 %v3536_v43  ;;  %7683 = vpow2.f32 %v3869_v8 }
0x12ec   : > { %v7674_v3 = vpop.eup %7673  ;;  %7685 = vpow2.f32 %v3871_v11 }
0x12ed   : > { %v7676_v25 = vpop.eup %7675  ;;  %v3328_v12 = vmul.f32 %v7674_v3, %v9873_v31  ;;  %7687 = vpow2.f32 %v3564_v44 }
0x12ee   : > { %v3005_v61 = vpop.xlane.xlu2 %3004  ;;  %v3002_v55 = vpop.xlane.xlu0 %3001  ;;  %3540 = vmax.xlane.f32.xlu1 %v3539_v40  ;;  %v3327_v5 = vmul.f32 %v7676_v25, %v9871_v45  ;;  %7689 = vpow2.f32 %v3566_v41  ;;  %v3855_v45 = vsub.f32 %v9764_v24, %v9976_v19 }
0x12ef   : > { %v7678_v6 = vpop.eup %7677  ;;  %7691 = vrcp.f32 %v3005_v61 }
0x12f0   : > { %3895 = vadd.xlane.f32.xlu0 %v3894_v59  ;;  %v10010_v56 = vpop.eup %7679  ;;  %v3027_v2 = vmul.f32 %v7678_v6, %v9868_v46  ;;  %v3335_v14 = vpack.c.bf16 %v3328_v12, %v3327_v5  ;;  %7693 = vrcp.f32 %v3002_v55  ;;  %v3875_v21 = vmul.f32 1.442695, %v3855_v45 }
0x12f1   : > { %v7682_v4 = vpop.eup %7681  ;;  %v3587_v1 = vsel %vm2909_vm10, %v10010_v56, 0.0 }
0x12f2   : > { %v10017_v18 = vpop.eup %7683  ;;  %v3026_v49 = vmul.f32 %v7682_v4, %v9856_v51  ;;  %v3551_v51 = vsub.f32 %v9796_v32, %v9954_v7  ;;  %v3552_v32 = vsub.f32 %v9806_v35, %v9965_v0 }
0x12f3   : > { %3585 = vadd.xlane.f32.xlu2 %v3584_v23  ;;  %v10024_v17 = vpop.eup %7685  ;;  %v3897_v15 = vsel %vm2909_vm10, %v10017_v18, 0.0 }
0x12f4   : > { %v3034_v26 = vpack.c.bf16 %v3027_v2, %v3026_v49  ;;  %v3900_v24 = vsel %vm2909_vm10, %v10024_v17, 0.0  ;;  %v10036_v19 = vpop.eup %7687  ;;  %v3568_v27 = vmul.f32 1.442695, %v3551_v51  ;;  %v3570_v8 = vmul.f32 1.442695, %v3552_v32 }
0x12f5   : > { %v10038_v29 = vpop.eup %7689  ;;  %v3590_v58 = vsel %vm2909_vm10, %v10036_v19, 0.0 }
0x12f6   : > { %v3306_v46 = vpop.xlane.xlu2 %3305  ;;  %3588 = vadd.xlane.f32.xlu1 %v3587_v1  ;;  %v3303_v31 = vpop.xlane.xlu0 %3302  ;;  %v3593_v37 = vsel %vm2909_vm10, %v10038_v29, 0.0 }
0x12f7   : > { %7695 = vrcp.f32 %v3306_v46  ;;  %v7692_v7 = vpop.eup %7691 }
0x12f8   : > { %3898 = vadd.xlane.f32.xlu0 %v3897_v15  ;;  %7697 = vrcp.f32 %v3303_v31  ;;  %v7694_v20 = vpop.eup %7693  ;;  %v3029_v0 = vmul.f32 %v7692_v7, %v9885_v57 }
0x12f9   : > { %7699 = vpow2.f32 %v3873_v33  ;;  %v3028_v11 = vmul.f32 %v7694_v20, %v9883_v50  ;;  %v11663_v20 = vld [vmem:[#allocation18_spill] sm:$0xff] }
0x12fa   : > { %6972 = vmatmul.msk.bf16.gmra.mxu0 %vm2909_vm10, %v3034_v26  ;;  %6984 = vmatmul.msk.bf16.gmra.mxu3 %vm2909_vm10, %v3335_v14  ;;  %7701 = vpow2.f32 %v3875_v21 }
0x12fb   : > { %3901 = vadd.xlane.f32.xlu2 %v3900_v24  ;;  %7703 = vpow2.f32 %v3568_v27  ;;  %v3035_v6 = vpack.c.bf16 %v3029_v0, %v3028_v11 }
0x12fc   : > { %7705 = vpow2.f32 %v3570_v8 }
0x12fd   : > { %v7696_v47 = vpop.eup %7695  ;;  %v3309_v25 = vpop.xlane.xlu1 %3308 }
0x12fe   : > { %3591 = vadd.xlane.f32.xlu1 %v3590_v58  ;;  %v7698_v43 = vpop.eup %7697  ;;  %v3330_v61 = vmul.f32 %v7696_v47, %v9895_v48  ;;  %v3008_v59 = vpop.xlane.xlu0 %3007  ;;  %7707 = vrcp.f32 %v3309_v25 }
0x12ff   : > { %v10048_v35 = vpop.eup %7699  ;;  %v3329_v55 = vmul.f32 %v7698_v43, %v9893_v42  ;;  %7709 = vrcp.f32 %v3008_v59 }
0x1300   : > { %3594 = vadd.xlane.f32.xlu0 %v3593_v37  ;;  %v10054_v40 = vpop.eup %7701  ;;  %v3903_v3 = vsel %vm2909_vm10, %v10048_v35, 0.0 }
0x1301   : > { %v10058_v28 = vpop.eup %7703  ;;  %v3906_v57 = vsel %vm2909_vm10, %v10054_v40, 0.0  ;;  %v3336_v50 = vpack.c.bf16 %v3330_v61, %v3329_v55 }
0x1302   : > { %v3596_v42 = vsel %vm2909_vm10, %v10058_v28, 0.0  ;;  %v10066_v48 = vpop.eup %7705 }
0x1303   : > { %3543 = vmax.xlane.f32.xlu2 %v3542_v60  ;;  %v3599_v44 = vsel %vm2909_vm10, %v10066_v48, 0.0 }
0x1304   : > { %v7708_v23 = vpop.eup %7707 }
0x1305   : > { %v7710_v4 = vpop.eup %7709  ;;  %v3331_v2 = vmul.f32 %v7708_v23, %v9904_v10  ;;  %v3580_v45 = vpop.xlane.xlu1 %3579 }
0x1306   : > { %3904 = vadd.xlane.f32.xlu1 %v3903_v3  ;;  %v3030_v5 = vmul.f32 %v7710_v4, %v9902_v39 }
0x1307   : > { %v3337_v49 = vpack.c.bf16 %v3331_v2, %v3331_v2 }
0x1308   : > { %3907 = vadd.xlane.f32.xlu0 %v3906_v57  ;;  %v3036_v30 = vpack.c.bf16 %v3030_v5, %v3030_v5 }
0x130a   : > { %6973 = vmatmul.msk.bf16.gmra.mxu0 %vm2909_vm10, %v3035_v6  ;;  %6985 = vmatmul.msk.bf16.gmra.mxu3 %vm2909_vm10, %v3336_v50 }
0x130b   : > { %3597 = vadd.xlane.f32.xlu2 %v3596_v42 }
0x130d   : > { %v3881_v41 = vpop.xlane.xlu2 %3880 }
0x130e   : > { %3600 = vadd.xlane.f32.xlu1 %v3599_v44 }
0x1315   : > { %v3884_v12 = vpop.xlane.xlu0 %3883  ;;  %v3583_v1 = vpop.xlane.xlu2 %3582 }
0x1316   : > { %7711 = vrcp.f32 %v3884_v12 }
0x1317   : > { %7713 = vrcp.f32 %v3881_v41 }
0x131a   : > { %6974 = vmatmul.msk.bf16.gmra.mxu0 %vm2909_vm10, %v3036_v30  ;;  %6986 = vmatmul.msk.bf16.gmra.mxu3 %vm2909_vm10, %v3337_v49 }
0x131c   : > { %v7712_v46 = vpop.eup %7711 }
0x131d   : > { %v7714_v31 = vpop.eup %7713  ;;  %v3924_v15 = vmul.f32 %v7712_v46, %v9929_v13  ;;  %v3890_v39 = vpop.xlane.xlu2 %3889 }
0x131e   : > { %v3923_v26 = vmul.f32 %v7714_v31, %v9919_v16  ;;  %v3887_v10 = vpop.xlane.xlu1 %3886  ;;  %7715 = vrcp.f32 %v3890_v39 }
0x131f   : > { %7717 = vrcp.f32 %v3887_v10 }
0x1320   : > { %v3934_v14 = vpack.c.bf16 %v3924_v15, %v3923_v26  ;;  %7719 = vrcp.f32 %v3583_v1 }
0x1321   : > { %7721 = vrcp.f32 %v3580_v45 }
0x1324   : > { %v7716_v51 = vpop.eup %7715 }
0x1325   : > { %v7718_v33 = vpop.eup %7717  ;;  %v3926_v24 = vmul.f32 %v7716_v51, %v9937_v53  ;;  %v3642_v16 = vpop.permute.xlu2 %3641 }
0x1326   : > { %v3925_v21 = vmul.f32 %v7718_v33, %v9941_v22  ;;  %v7720_v32 = vpop.eup %7719 }
0x1327   : > { %v7722_v7 = vpop.eup %7721  ;;  %v3623_v58 = vmul.f32 %v7720_v32, %v9923_v34 }
0x1328   : > { %v3935_v13 = vpack.c.bf16 %v3926_v24, %v3925_v21  ;;  %v3622_v47 = vmul.f32 %v7722_v7, %v11663_v20  ;;  %v3640_v37 = vpop.permute.xlu0 %3639 }
0x132a   : > { %7005 = vmatmul.msk.bf16.vlgmr.msra.gmra.mxu3 %vm2909_vm10, %v3934_v14  ;;  %v3633_v43 = vpack.c.bf16 %v3623_v58, %v3622_v47 }
0x1336   : > { %v3644_v27 = vpop.permute.xlu1 %3643 }
0x1337   : > { %3682 = vmatpush.bf16.msrb.mxu0 %v3644_v27 }
0x133a   : > { %7006 = vmatmul.msk.bf16.gmra.mxu3 %vm2909_vm10, %v3935_v13 }
0x133b   : > { %3683 = vmatpush.bf16.msrb.mxu0 %v3642_v16 }
0x133c   : > { %v10085_v22 = vpop.f32.mrf.mxu3 }
0x133f   : > { %3684 = vmatpush.bf16.msrb.mxu0 %v3640_v37  ;;  %v10082_v53 = vpop.f32.mrf.mxu0 }
0x1342   : > { %6993 = vmatmul.msk.bf16.vlgmr.msrb.gmra.mxu0 %vm2909_vm10, %v3633_v43 }
0x1344   : > { %v10089_v0 = vpop.f32.mrf.mxu3 }
0x1347   : > { %v10087_v8 = vpop.f32.mrf.mxu0 }
0x134f   : > { %v10091_v11 = vpop.f32.mrf.mxu0 }
0x1353   : > { %v3845_v60 = vpop.xlane.xlu0 %3844 }
0x1354   : > { %v3856_v34 = vsub.f32 %v9779_v52, %v3845_v60 }
0x1356   : > { %v3877_v61 = vmul.f32 1.442695, %v3856_v34 }
0x1357   : > { %v10098_v57 = vpop.f32.mrf.mxu0 }
0x1358   : > { %7723 = vpow2.f32 %v3877_v61 }
0x135b   : > { %v3893_v55 = vpop.xlane.xlu0 %3892 }
0x135c   : > { %7725 = vrcp.f32 %v3893_v55 }
0x135d   : > { %v10094_v3 = vpop.f32.mrf.mxu3 }
0x135e   : > { %v3538_v25 = vpop.xlane.xlu2 %3537  ;;  %v10096_v59 = vpop.eup %7723 }
0x135f   : > { %v3553_v6 = vsub.f32 %v9821_v9, %v3538_v25  ;;  %v3909_v50 = vsel %vm2909_vm10, %v10096_v59, 0.0 }
0x1360   : > { %3910 = vadd.xlane.f32.xlu0 %v3909_v50 }
0x1361   : > { %v3572_v42 = vmul.f32 1.442695, %v3553_v6  ;;  %v3541_v44 = vpop.xlane.xlu1 %3540 }
0x1362   : > { %v3554_v52 = vsub.f32 %v9835_v54, %v3541_v44  ;;  %v7726_v9 = vpop.eup %7725 }
0x1363   : > { %7727 = vpow2.f32 %v3572_v42  ;;  %v3896_v23 = vpop.xlane.xlu0 %3895  ;;  %v3927_v54 = vmul.f32 %v7726_v9, %v9981_v63 }
0x1364   : > { %v3574_v4 = vmul.f32 1.442695, %v3554_v52  ;;  %7729 = vrcp.f32 %v3896_v23 }
0x1365   : > { %v10104_v41 = vpop.f32.mrf.mxu3 }
0x1366   : > { %v3586_v5 = vpop.xlane.xlu2 %3585  ;;  %7731 = vpow2.f32 %v3574_v4 }
0x1367   : > { %v10106_v2 = vpop.f32.mrf.mxu0  ;;  %7733 = vrcp.f32 %v3586_v5 }
0x1369   : > { %v10108_v12 = vpop.eup %7727  ;;  %v3589_v30 = vpop.xlane.xlu1 %3588 }
0x136a   : > { %v3602_v49 = vsel %vm2909_vm10, %v10108_v12, 0.0  ;;  %v7730_v1 = vpop.eup %7729  ;;  %7735 = vrcp.f32 %v3589_v30 }
0x136b   : > { %3603 = vadd.xlane.f32.xlu2 %v3602_v49  ;;  %v3928_v45 = vmul.f32 %v7730_v1, %v10000_v38  ;;  %v3899_v46 = vpop.xlane.xlu0 %3898 }
0x136c   : > { %v10114_v31 = vpop.eup %7731 }
0x136d   : > { %v10116_v15 = vpop.f32.mrf.mxu3  ;;  %v3605_v26 = vsel %vm2909_vm10, %v10114_v31, 0.0  ;;  %v3936_v14 = vpack.c.bf16 %v3928_v45, %v3927_v54  ;;  %v7734_v10 = vpop.eup %7733 }
0x136e   : > { %v3902_v39 = vpop.xlane.xlu2 %3901  ;;  %3606 = vadd.xlane.f32.xlu1 %v3605_v26  ;;  %v3624_v63 = vmul.f32 %v7734_v10, %v9998_v36 }
0x136f   : > { %v10120_v51 = vpop.f32.mrf.mxu0  ;;  %7007 = vmatmul.msk.bf16.gmra.mxu3 %vm2909_vm10, %v3936_v14  ;;  %7737 = vrcp.f32 %v3902_v39 }
0x1370   : > { %v7736_v33 = vpop.eup %7735  ;;  %7739 = vrcp.f32 %v3899_v46 }
0x1371   : > { %v3625_v38 = vmul.f32 %v7736_v33, %v10010_v56  ;;  %v3592_v24 = vpop.xlane.xlu1 %3591 }
0x1373   : > { %v3595_v21 = vpop.xlane.xlu0 %3594  ;;  %v3634_v27 = vpack.c.bf16 %v3625_v38, %v3624_v63 }
0x1374   : > { %7741 = vrcp.f32 %v3595_v21 }
0x1375   : > { %v3397_v13 = vpop.f32.mrf.mxu3  ;;  %6994 = vmatmul.msk.bf16.gmra.mxu0 %vm2909_vm10, %v3634_v27  ;;  %v7738_v16 = vpop.eup %7737  ;;  %7743 = vrcp.f32 %v3592_v24 }
0x1376   : > { %v3544_v32 = vpop.xlane.xlu2 %3543  ;;  %v7740_v20 = vpop.eup %7739  ;;  %v3930_v36 = vmul.f32 %v7738_v16, %v10024_v17  ;;  %v7247_v17 = vpack.i.bf16 %v10089_v0, %v10085_v22  ;;  %v7277_v46 = vpack.i.bf16 %v3397_v13, %v10116_v15  ;;  %v7043_v16 = vld [vmem:[%s11567_s4 + $0x50] sm:$0xff] }
0x1377   : > { %v3555_v7 = vsub.f32 %v9847_v62, %v3544_v32  ;;  %v10127_v58 = vpop.f32.mrf.mxu0  ;;  %v3929_v37 = vmul.f32 %v7740_v20, %v10017_v18 }
0x1379   : > { %v3576_v47 = vmul.f32 1.442695, %v3555_v7  ;;  %v3905_v56 = vpop.xlane.xlu1 %3904  ;;  %v3937_v61 = vpack.c.bf16 %v3930_v36, %v3929_v37  ;;  %v7044_v7 = vld [vmem:[%s11567_s4 + $0x58] sm:$0xff]  ;;  %v7042_v37 = vld [vmem:[%s11567_s4 + $0x48] sm:$0xff] }
0x137a   : > { %v7742_v43 = vpop.eup %7741  ;;  %v4971_v20 = vpack.c.bf16 %v7044_v7, %v7043_v16 }
0x137b   : > { %7745 = vpow2.f32 %v3576_v47  ;;  %v3908_v34 = vpop.xlane.xlu0 %3907  ;;  %v7744_v55 = vpop.eup %7743  ;;  %v3627_v62 = vmul.f32 %v7742_v43, %v10038_v29 }
0x137c   : > { %7747 = vrcp.f32 %v3908_v34  ;;  %v3626_v50 = vmul.f32 %v7744_v55, %v10036_v19  ;;  %v7262_v19 = vpack.i.bf16 %v10104_v41, %v10094_v3  ;;  %4982 = vmatpush.bf16.msrb.mxu3 %v4971_v20 }
0x137d   : > { %v3400_v60 = vpop.f32.mrf.mxu3  ;;  %7749 = vrcp.f32 %v3905_v56  ;;  %v7041_v56 = vld [vmem:[%s11567_s4 + $0x40] sm:$0xff] }
0x137e   : > { %v3635_v44 = vpack.c.bf16 %v3627_v62, %v3626_v50  ;;  %v3598_v52 = vpop.xlane.xlu2 %3597  ;;  %v4970_v34 = vpack.c.bf16 %v7042_v37, %v7041_v56  ;;  %v10184_v62 = vld [vmem:[%s11575_s12] sm:$0xff] }
0x137f   : > { %v10131_v25 = vpop.f32.mrf.mxu0  ;;  %7008 = vmatmul.msk.bf16.gmra.mxu3 %vm2909_vm10, %v3937_v61 }
0x1380   : > { %4983 = vmatpush.bf16.msrb.mxu3 %v4970_v34 }
0x1381   : > { %v10135_v6 = vpop.eup %7745  ;;  %v3601_v42 = vpop.xlane.xlu1 %3600 }
0x1382   : > { %v3608_v18 = vsel %vm2909_vm10, %v10135_v6, 0.0  ;;  %v7748_v23 = vpop.eup %7747  ;;  %7751 = vrcp.f32 %v3601_v42 }
0x1383   : > { %7248 = vrot.lane.b32.xlu2 %v7247_v17, %s11641_s30  ;;  %3609 = vadd.xlane.f32.xlu0 %v3608_v18  ;;  %v7750_v22 = vpop.eup %7749  ;;  %7753 = vrcp.f32 %v3598_v52  ;;  %v3932_v0 = vmul.f32 %v7748_v23, %v10054_v40  ;;  %v10189_v17 = vld [vmem:[%s11575_s12 + $0x8] sm:$0xff] }
0x1384   : > { %v3931_v5 = vmul.f32 %v7750_v22, %v10048_v35 }
0x1385   : > { %v3402_v29 = vpop.f32.mrf.mxu3  ;;  %6995 = vmatmul.msk.bf16.gmra.mxu0 %vm2909_vm10, %v3635_v44  ;;  %v4969_v44 = vpack.c.bf16 %v10189_v17, %v10184_v62 }
0x1386   : > { %v3938_v49 = vpack.c.bf16 %v3932_v0, %v3931_v5  ;;  %v7292_v26 = vpack.i.bf16 %v3402_v29, %v3400_v60 }
0x1387   : > { %v10144_v4 = vpop.f32.mrf.mxu0 }
0x1388   : > { %v7752_v9 = vpop.eup %7751 }
0x1389   : > { %v7754_v1 = vpop.eup %7753  ;;  %v3629_v45 = vmul.f32 %v7752_v9, %v10066_v48 }
0x138a   : > { %v3628_v3 = vmul.f32 %v7754_v1, %v10058_v28 }
0x138b   : > { %7263 = vrot.lane.b32.xlu2 %v7262_v19, %s11641_s30 }
0x138c   : > { %v3636_v40 = vpack.c.bf16 %v3629_v45, %v3628_v3  ;;  %v6956_v3 = vld [vmem:[%s11569_s6 + $0x98] sm:$0xff] }
0x138d   : > { %v3405_v30 = vpop.f32.mrf.mxu3 }
0x138f   : > { %v10151_v54 = vpop.f32.mrf.mxu0  ;;  %7009 = vmatmul.msk.bf16.gmra.mxu3 %vm2909_vm10, %v3938_v49 }
0x1393   : > { %7278 = vrot.lane.b32.xlu2 %v7277_v46, %s11641_s30  ;;  %v6955_v46 = vld [vmem:[%s11569_s6 + $0x90] sm:$0xff] }
0x1395   : > { %v3407_v41 = vpop.f32.mrf.mxu3  ;;  %6996 = vmatmul.msk.bf16.gmra.mxu0 %vm2909_vm10, %v3636_v40 }
0x1396   : > { %v7307_v48 = vpack.i.bf16 %v3407_v41, %v3405_v30 }
0x1397   : > { %v10159_v35 = vpop.f32.mrf.mxu0 }
0x139b   : > { %7293 = vrot.lane.b32.xlu2 %v7292_v26, %s11641_s30  ;;  %v4188_v26 = vpack.c.bf16 %v6956_v3, %v6955_v46 }
0x139d   : > { %v3410_v39 = vpop.f32.mrf.mxu3  ;;  %4214 = vmatpush.bf16.msra.mxu1 %v4188_v26 }
0x139f   : > { %v3111_v14 = vpop.f32.mrf.mxu0 }
0x13a3   : > { %7308 = vrot.lane.b32.xlu2 %v7307_v48, %s11641_s30 }
0x13a5   : > { %v3412_v10 = vpop.f32.mrf.mxu3 }
0x13ab   : > { %4047 = vrot.lane.b32.xlu2 %v3410_v39, %s11641_s30 }
0x13ad   : > { %v3987_v28 = vpop.f32.mrf.mxu3 }
0x13b5   : > { %v3989_v15 = vpop.f32.mrf.mxu3 }
0x13b6   : > { %v7257_v33 = vpack.i.bf16 %v3989_v15, %v3987_v28  ;;  %v6953_v15 = vld [vmem:[%s11569_s6 + $0x80] sm:$0xff] }
0x13b8   : > { %7258 = vrot.lane.b32.xlu0 %v7257_v33, %s11643_s15  ;;  %v6954_v33 = vld [vmem:[%s11569_s6 + $0x88] sm:$0xff] }
0x13bd   : > { %v3992_v38 = vpop.f32.mrf.mxu3 }
0x13bf   : > { %v3686_v63 = vpop.f32.mrf.mxu0 }
0x13c5   : > { %v3994_v27 = vpop.f32.mrf.mxu3 }
0x13c6   : > { %v7272_v13 = vpack.i.bf16 %v3994_v27, %v3992_v38 }
0x13c7   : > { %v3688_v24 = vpop.f32.mrf.mxu0 }
0x13c8   : > { %v7252_v21 = vpack.i.bf16 %v3688_v24, %v3686_v63  ;;  %v4187_v63 = vpack.c.bf16 %v6954_v33, %v6953_v15 }
0x13ca   : > { %7253 = vrot.lane.b32.xlu1 %v7252_v21, %s11642_s24  ;;  %4215 = vmatpush.bf16.msra.mxu1 %v4187_v63 }
0x13d2   : > { %7273 = vrot.lane.b32.xlu1 %v7272_v13, %s11643_s15 }
0x13d3   : > { %v3911_v32 = vpop.xlane.xlu0 %3910 }
0x13d4   : > { %7755 = vrcp.f32 %v3911_v32 }
0x13da   : > { %v7756_v47 = vpop.eup %7755 }
0x13db   : > { %v3933_v36 = vmul.f32 %v7756_v47, %v10096_v59 }
0x13dd   : > { %v3939_v60 = vpack.c.bf16 %v3933_v36, %v3933_v36 }
0x13de   : > { %v3604_v43 = vpop.xlane.xlu2 %3603 }
0x13df   : > { %7010 = vmatmul.msk.bf16.gmra.mxu3 %vm2909_vm10, %v3939_v60  ;;  %7757 = vrcp.f32 %v3604_v43 }
0x13e1   : > { %v3607_v61 = vpop.xlane.xlu1 %3606 }
0x13e2   : > { %7759 = vrcp.f32 %v3607_v61 }
0x13e5   : > { %v7758_v55 = vpop.eup %7757 }
0x13e6   : > { %v3630_v50 = vmul.f32 %v7758_v55, %v10108_v12  ;;  %v7249_v38 = vpop.permute.xlu2 %7248 }
0x13e7   : > { %v7251_v24 = vunpack.i.h.bf16 %v7249_v38  ;;  %v7250_v21 = vunpack.i.l.bf16 %v7249_v38 }
0x13e8   : > { %v7760_v59 = vpop.eup %7759 }
0x13e9   : > { %v3631_v18 = vmul.f32 %v7760_v59, %v10114_v31  ;;  %v4148_v7 = vsel %vm575_vm1, %v10082_v53, %v7250_v21  ;;  %v4149_v20 = vsel %vm575_vm1, %v10087_v8, %v7251_v24 }
0x13eb   : > { %v3637_v42 = vpack.c.bf16 %v3631_v18, %v3630_v50 }
0x13ed   : > { %6997 = vmatmul.msk.bf16.gmra.mxu0 %vm2909_vm10, %v3637_v42 }
0x13ee   : > { %v7264_v53 = vpop.permute.xlu2 %7263 }
0x13ef   : > { %7049 = vmatmul.msk.bf16.vlgmr.msrb.gmra.mxu3 %vm519_vm0, %v4969_v44  ;;  %v7266_v8 = vunpack.i.h.bf16 %v7264_v53  ;;  %v7265_v50 = vunpack.i.l.bf16 %v7264_v53 }
0x13f1   : > { %v4151_v44 = vsel %vm575_vm1, %v10098_v57, %v7266_v8 }
0x13f2   : > { %v3691_v29 = vpop.f32.mrf.mxu0  ;;  %v3997_v52 = vpop.f32.mrf.mxu3 }
0x13f6   : > { %v3610_v23 = vpop.xlane.xlu0 %3609  ;;  %v7279_v3 = vpop.permute.xlu2 %7278 }
0x13f7   : > { %7761 = vrcp.f32 %v3610_v23  ;;  %v4150_v23 = vsel %vm575_vm1, %v10091_v11, %v7265_v50 }
0x13fa   : > { %v3693_v22 = vpop.f32.mrf.mxu0  ;;  %v3999_v19 = vpop.f32.mrf.mxu3 }
0x13fb   : > { %v7267_v0 = vpack.i.bf16 %v3693_v22, %v3691_v29  ;;  %v7287_v5 = vpack.i.bf16 %v3999_v19, %v3997_v52 }
0x13fd   : > { %v7762_v9 = vpop.eup %7761  ;;  %7268 = vrot.lane.b32.xlu0 %v7267_v0, %s11642_s24  ;;  %7288 = vrot.lane.b32.xlu1 %v7287_v5, %s11643_s15  ;;  %v7940_v0 = vld [vmem:[%s11572_s9] sm:$0x7] }
0x13fe   : > { %v3632_v12 = vmul.f32 %v7762_v9, %v10135_v6  ;;  %v4972_v5 = vperm.slane %v7940_v0, 2 }
0x1400   : > { %v3638_v31 = vpack.c.bf16 %v3632_v12, %v3632_v12 }
0x1402   : > { %6998 = vmatmul.msk.bf16.gmra.mxu0 %vm2909_vm10, %v3638_v31  ;;  %v3696_v30 = vpop.f32.mrf.mxu0  ;;  %v4002_v49 = vpop.f32.mrf.mxu3 }
0x140a   : > { %v3698_v1 = vpop.f32.mrf.mxu0  ;;  %v4004_v45 = vpop.f32.mrf.mxu3 }
0x140b   : > { %v7282_v40 = vpack.i.bf16 %v3698_v1, %v3696_v30  ;;  %v7302_v41 = vpack.i.bf16 %v4004_v45, %v4002_v49 }
0x140d   : > { %7283 = vrot.lane.b32.xlu0 %v7282_v40, %s11642_s24  ;;  %7303 = vrot.lane.b32.xlu1 %v7302_v41, %s11643_s15 }
0x1412   : > { %v3701_v6 = vpop.f32.mrf.mxu0  ;;  %v4007_v39 = vpop.f32.mrf.mxu3 }
0x141a   : > { %v3703_v14 = vpop.f32.mrf.mxu0  ;;  %v4009_v48 = vpop.f32.mrf.mxu3 }
0x141b   : > { %v7297_v10 = vpack.i.bf16 %v3703_v14, %v3701_v6  ;;  %v7317_v28 = vpack.i.bf16 %v4009_v48, %v4007_v39  ;;  %v7281_v39 = vunpack.i.h.bf16 %v7279_v3  ;;  %v7280_v14 = vunpack.i.l.bf16 %v7279_v3 }
0x141d   : > { %7298 = vrot.lane.b32.xlu0 %v7297_v10, %s11642_s24  ;;  %7318 = vrot.lane.b32.xlu1 %v7317_v28, %s11643_s15 }
0x142a   : > { %v7259_v27 = vpop.permute.xlu0 %7258 }
0x142b   : > { %v7261_v47 = vunpack.i.h.bf16 %v7259_v27  ;;  %v7260_v36 = vunpack.i.l.bf16 %v7259_v27  ;;  %v4153_v27 = vsel %vm575_vm1, %v10120_v51, %v7281_v39 }
0x143c   : > { %v7254_v13 = vpop.permute.xlu1 %7253 }
0x143d   : > { %v7256_v32 = vunpack.i.h.bf16 %v7254_v13  ;;  %v7255_v16 = vunpack.i.l.bf16 %v7254_v13  ;;  %v4152_v13 = vsel %vm575_vm1, %v10106_v2, %v7280_v14 }
0x143f   : > { %v4160_v56 = vsel %vm813_vm3, %v4149_v20, %v7256_v32  ;;  %v4159_v37 = vsel %vm813_vm3, %v4148_v7, %v7255_v16 }
0x1440   : > { %v4171_v43 = vsel %vm815_vm4, %v4160_v56, %v7261_v47  ;;  %v4170_v60 = vsel %vm815_vm4, %v4159_v37, %v7260_v36 }
0x1441   : > { %v4181_v34 = vpack.c.bf16 %v4171_v43, %v4170_v60 }
0x1443   : > { %7011 = vmatmul.msk.bf16.vlgmr.msra.gmra.mxu1 %vm519_vm0, %v4181_v34 }
0x1444   : > { %v7274_v18 = vpop.permute.xlu1 %7273 }
0x1445   : > { %v7276_v22 = vunpack.i.h.bf16 %v7274_v18  ;;  %v7275_v19 = vunpack.i.l.bf16 %v7274_v18 }
0x1462   : > { %v4012_v61 = vpop.f32.mrf.mxu3 }
0x1463   : > { %4135 = vrot.lane.b32.xlu1 %v4012_v61, %s11643_s15  ;;  %v7294_v61 = vpop.permute.xlu2 %7293 }
0x1464   : > { %v7296_v53 = vunpack.i.h.bf16 %v7294_v61 }
0x146a   : > { %v3706_v55 = vpop.f32.mrf.mxu0  ;;  %v4014_v59 = vpop.f32.mrf.mxu3 }
0x146f   : > { %v7269_v42 = vpop.permute.xlu0 %7268  ;;  %v7289_v15 = vpop.permute.xlu1 %7288 }
0x1470   : > { %v7271_v29 = vunpack.i.h.bf16 %v7269_v42  ;;  %v7270_v52 = vunpack.i.l.bf16 %v7269_v42  ;;  %v7291_v7 = vunpack.i.h.bf16 %v7289_v15  ;;  %v7290_v20 = vunpack.i.l.bf16 %v7289_v15 }
0x1471   : > { %v4155_v42 = vsel %vm575_vm1, %v10131_v25, %v7296_v53 }
0x1472   : > { %v4162_v9 = vsel %vm813_vm3, %v4151_v44, %v7271_v29  ;;  %v4161_v12 = vsel %vm813_vm3, %v4150_v23, %v7270_v52  ;;  %v3708_v31 = vpop.f32.mrf.mxu0  ;;  %v4985_v30 = vpop.f32.mrf.mxu3 }
0x1473   : > { %v7312_v49 = vpack.i.bf16 %v3708_v31, %v3706_v55  ;;  %v4172_v57 = vsel %vm815_vm4, %v4161_v12, %v7275_v19  ;;  %v4173_v1 = vsel %vm815_vm4, %v4162_v9, %v7276_v22  ;;  %v4986_v11 = vadd.f32 %v4985_v30, %v4972_v5  ;;  %v7309_v9 = vpop.permute.xlu2 %7308 }
0x1474   : > { %v4182_v45 = vpack.c.bf16 %v4173_v1, %v4172_v57  ;;  %v7295_v55 = vunpack.i.l.bf16 %v7294_v61  ;;  %v7311_v31 = vunpack.i.h.bf16 %v7309_v9  ;;  %v7310_v30 = vunpack.i.l.bf16 %v7309_v9 }
0x1475   : > { %7313 = vrot.lane.b32.xlu0 %v7312_v49, %s11642_s24  ;;  %v4990_v46 = vmul.f32 0.35355338, %v4986_v11  ;;  %v4994_v40 = vpack.c.bf16 %v4986_v11, %v4986_v11 }
0x1476   : > { %7012 = vmatmul.msk.bf16.gmra.mxu1 %vm519_vm0, %v4182_v45  ;;  %v4154_v44 = vsel %vm575_vm1, %v10127_v58, %v7295_v55  ;;  %v4157_v11 = vsel %vm575_vm1, %v10151_v54, %v7311_v31 }
0x1477   : > { %v4992_v26 = vpack.c.bf16 %v4990_v46, %v4990_v46  ;;  %v5003_v48 = vunpack.c.l.b16 %v4994_v40  ;;  %v4156_v46 = vsel %vm575_vm1, %v10144_v4, %v7310_v30 }
0x1479   : > { %v4998_v38 = vunpack.c.l.b16 %v4992_v26 }
0x147a   : > { %v4987_v41 = vpop.f32.mrf.mxu3 }
0x147b   : > { %v4988_v6 = vadd.f32 %v4987_v41, %v4972_v5  ;;  %v4048_v25 = vpop.permute.xlu2 %4047 }
0x147c   : > { %v4158_v54 = vsel %vm575_vm1, %v10159_v35, %v4048_v25 }
0x147d   : > { %v4991_v10 = vmul.f32 0.35355338, %v4988_v6  ;;  %v4995_v28 = vpack.c.bf16 %v4988_v6, %v4988_v6 }
0x147f   : > { %v3711_v33 = vpop.f32.mrf.mxu0  ;;  %v7284_v63 = vpop.permute.xlu0 %7283  ;;  %v4993_v24 = vpack.c.bf16 %v4991_v10, %v4991_v10  ;;  %v5004_v21 = vunpack.c.l.b16 %v4995_v28 }
0x1480   : > { %4091 = vrot.lane.b32.xlu0 %v3711_v33, %s11642_s24  ;;  %v7286_v32 = vunpack.i.h.bf16 %v7284_v63  ;;  %v7285_v16 = vunpack.i.l.bf16 %v7284_v63  ;;  %v7304_v59 = vpop.permute.xlu1 %7303 }
0x1481   : > { %v4999_v47 = vunpack.c.l.b16 %v4993_v24  ;;  %v10245_v36 = vpack.c.b16 %v5004_v21, %v5003_v48  ;;  %v7306_v29 = vunpack.i.h.bf16 %v7304_v59  ;;  %v7305_v52 = vunpack.i.l.bf16 %v7304_v59 }
0x1482   : > { %v4164_v56 = vsel %vm813_vm3, %v4153_v27, %v7286_v32  ;;  %v4163_v37 = vsel %vm813_vm3, %v4152_v13, %v7285_v16 }
0x1483   : > { %v4174_v43 = vsel %vm815_vm4, %v4163_v37, %v7290_v20  ;;  %v4175_v60 = vsel %vm815_vm4, %v4164_v56, %v7291_v7  ;;  %v5000_v34 = vpack.c.b16 %v4999_v47, %v4998_v38  ;;  %5006 = vrot.lane.b32.xlu2 %v10245_v36, %s11664_s21 }
0x1484   : > { %v4183_v2 = vpack.c.bf16 %v4175_v60, %v4174_v43 }
0x1485   : > { %5071 = vrot.lane.b32.xlu1 %v5000_v34, %s11655_s18 }
0x1486   : > { %7013 = vmatmul.msk.bf16.gmra.mxu1 %vm519_vm0, %v4183_v2 }
0x1487   : > { %v3713_v51 = vpop.f32.mrf.mxu0 }
0x1488   : > { %5073 = vrot.lane.b32.xlu0 %v10245_v36, %s11665_s28 }
0x148b   : > { %5140 = vrot.lane.b32.xlu2 %v10245_v36, %s11639_s23 }
0x148d   : > { %5207 = vrot.lane.b32.xlu1 %v10245_v36, %s11640_s29 }
0x148f   : > { %v7299_v8 = vpop.permute.xlu0 %7298  ;;  %v7319_v49 = vpop.permute.xlu1 %7318 }
0x1490   : > { %5138 = vrot.lane.b32.xlu0 %v5000_v34, %s11657_s27  ;;  %v7301_v50 = vunpack.i.h.bf16 %v7299_v8  ;;  %v7300_v18 = vunpack.i.l.bf16 %v7299_v8  ;;  %v7321_v3 = vunpack.i.h.bf16 %v7319_v49  ;;  %v7320_v40 = vunpack.i.l.bf16 %v7319_v49 }
0x1492   : > { %v4166_v23 = vsel %vm813_vm3, %v4155_v42, %v7301_v50  ;;  %v4165_v22 = vsel %vm813_vm3, %v4154_v44, %v7300_v18 }
0x1493   : > { %v4176_v19 = vsel %vm815_vm4, %v4165_v22, %v7305_v52  ;;  %v4177_v0 = vsel %vm815_vm4, %v4166_v23, %v7306_v29  ;;  %5205 = vrot.lane.b32.xlu2 %v5000_v34, %s11656_s17 }
0x1494   : > { %v4184_v5 = vpack.c.bf16 %v4177_v0, %v4176_v19 }
0x1496   : > { %7014 = vmatmul.msk.bf16.gmra.mxu1 %vm519_vm0, %v4184_v5 }
0x14c0   : > { %v10292_v13 = vpop.f32.mrf.mxu1 }
0x14c8   : > { %v10294_v32 = vpop.f32.mrf.mxu1 }
0x14d5   : > { %v4136_v4 = vpop.permute.xlu1 %4135 }
0x14dd   : > { %v5007_v12 = vpop.permute.xlu2 %5006 }
0x14de   : > { %v5012_v58 = vsel %vm575_vm1, %v5007_v12, 0 }
0x14df   : > { %5021 = vmatpush.bf16.xpose.msrb.mxu1 %v5012_v58 }
0x14e5   : > { %v5141_v38 = vpop.permute.xlu2 %5140 }
0x14e6   : > { %v5146_v24 = vsel %vm575_vm1, %v5141_v38, 0 }
0x14e7   : > { %v7314_v57 = vpop.permute.xlu0 %7313 }
0x14e8   : > { %v7316_v1 = vunpack.i.h.bf16 %v7314_v57  ;;  %v7315_v45 = vunpack.i.l.bf16 %v7314_v57 }
0x14ea   : > { %v4168_v41 = vsel %vm813_vm3, %v4157_v11, %v7316_v1  ;;  %v4167_v26 = vsel %vm813_vm3, %v4156_v46, %v7315_v45 }
0x14eb   : > { %v4178_v6 = vsel %vm815_vm4, %v4167_v26, %v7320_v40  ;;  %v4179_v39 = vsel %vm815_vm4, %v4168_v41, %v7321_v3 }
0x14ec   : > { %v4185_v14 = vpack.c.bf16 %v4179_v39, %v4178_v6 }
0x14ed   : > { %v5206_v47 = vpop.permute.xlu2 %5205 }
0x14ee   : > { %7015 = vmatmul.msk.bf16.gmra.mxu1 %vm519_vm0, %v4185_v14 }
0x14f2   : > { %v4092_v48 = vpop.permute.xlu0 %4091 }
0x14f3   : > { %v4169_v10 = vsel %vm813_vm3, %v4158_v54, %v4092_v48  ;;  %v10297_v7 = vpop.f32.mrf.mxu1 }
0x14f4   : > { %v4180_v28 = vsel %vm815_vm4, %v4169_v10, %v4136_v4 }
0x14f5   : > { %v4186_v63 = vpack.c.bf16 %v4180_v28, %v4180_v28 }
0x14f7   : > { %v5072_v21 = vpop.permute.xlu1 %5071 }
0x14fa   : > { %v5074_v15 = vpop.permute.xlu0 %5073 }
0x14fb   : > { %v5079_v33 = vsel %vm575_vm1, %v5074_v15, 0  ;;  %v10299_v20 = vpop.f32.mrf.mxu1 }
0x14fc   : > { %5088 = vmatpush.bf16.xpose.msra.mxu1 %v5079_v33 }
0x14fe   : > { %7016 = vmatmul.msk.bf16.gmra.mxu1 %vm519_vm0, %v4186_v63 }
0x14ff   : > { %v5208_v35 = vpop.permute.xlu1 %5207 }
0x1500   : > { %v5213_v27 = vsel %vm575_vm1, %v5208_v35, 0 }
0x1502   : > { %v5139_v16 = vpop.permute.xlu0 %5138 }
0x1503   : > { %v10302_v56 = vpop.f32.mrf.mxu1 }
0x150b   : > { %v10304_v37 = vpop.f32.mrf.mxu1 }
0x150e   : > { %7050 = vmatmul.msk.bf16.vlgmr.msrb.gmra.mxu1 %vm575_vm1, %v5000_v34 }
0x150f   : > { %5155 = vmatpush.bf16.xpose.msrb.mxu1 %v5146_v24 }
0x1513   : > { %v10306_v43 = vpop.f32.mrf.mxu1 }
0x151b   : > { %v10308_v60 = vpop.f32.mrf.mxu1 }
0x151e   : > { %7052 = vmatmul.msk.bf16.vlgmr.msra.gmra.mxu1 %vm575_vm1, %v5072_v21 }
0x151f   : > { %5222 = vmatpush.bf16.xpose.msra.mxu1 %v5213_v27 }
0x152e   : > { %7054 = vmatmul.msk.bf16.vlgmr.msrb.gmra.mxu1 %vm575_vm1, %v5139_v16 }
0x153e   : > { %7056 = vmatmul.msk.bf16.vlgmr.msra.gmra.mxu1 %vm575_vm1, %v5206_v47 }
0x156b   : > { %v10310_v34 = vpop.f32.mrf.mxu1 }
0x1573   : > { %v10312_v2 = vpop.f32.mrf.mxu1 }
0x157b   : > { %v10314_v51 = vpop.f32.mrf.mxu1 }
0x1583   : > { %v4244_v61 = vpop.f32.mrf.mxu1 }
0x158b   : > { %v5023_v53 = vpop.f32.mrf.mxu1 }
0x158c   : > { %v5028_v55 = vsel %vm813_vm3, %v5023_v53, -inf }
0x158d   : > { %5029 = vmax.xlane.f32.xlu0 %v5028_v55 }
0x1593   : > { %v5025_v59 = vpop.f32.mrf.mxu1 }
0x1594   : > { %v5031_v8 = vsel %vm813_vm3, %v5025_v59, -inf }
0x1595   : > { %5032 = vmax.xlane.f32.xlu1 %v5031_v8 }
0x159b   : > { %v10318_v50 = vpop.f32.mrf.mxu1 }
0x159c   : > { %v5095_v18 = vsel %vm813_vm3, %v10318_v50, -inf }
0x159d   : > { %5096 = vmax.xlane.f32.xlu2 %v5095_v18 }
0x15a3   : > { %v5092_v42 = vpop.f32.mrf.mxu1 }
0x15a4   : > { %v5098_v44 = vsel %vm813_vm3, %v5092_v42, -inf }
0x15a5   : > { %5099 = vmax.xlane.f32.xlu0 %v5098_v44  ;;  %v11666_v44 = vld [vmem:[#allocation9_spill] sm:$0xff] }
0x15ab   : > { %v5157_v29 = vpop.f32.mrf.mxu1 }
0x15ac   : > { %v5162_v52 = vsel %vm813_vm3, %v5157_v29, -inf }
0x15ad   : > { %5163 = vmax.xlane.f32.xlu1 %v5162_v52 }
0x15b3   : > { %v5159_v23 = vpop.f32.mrf.mxu1 }
0x15b4   : > { %v5165_v22 = vsel %vm813_vm3, %v5159_v23, -inf }
0x15b5   : > { %5166 = vmax.xlane.f32.xlu2 %v5165_v22 }
0x15bb   : > { %v5224_v19 = vpop.f32.mrf.mxu1 }
0x15bc   : > { %v5229_v0 = vsel %vm813_vm3, %v5224_v19, -inf }
0x15bd   : > { %5230 = vmax.xlane.f32.xlu0 %v5229_v0  ;;  %v11667_v0 = vld [vmem:[#allocation10_spill] sm:$0xff] }
0x15c3   : > { %v5226_v5 = vpop.f32.mrf.mxu1 }
0x15c4   : > { %v5232_v9 = vsel %vm813_vm3, %v5226_v5, -inf }
0x15c5   : > { %5233 = vmax.xlane.f32.xlu1 %v5232_v9 }
0x15de   : > { %5051 = vrot.lane.b32.xlu1 %v10245_v36, %s11659_s22 }
0x15e6   : > { %5185 = vrot.lane.b32.xlu1 %v10245_v36, %s11661_s19 }
0x1600   : > { %v5030_v25 = vpop.xlane.xlu0 %5029 }
0x1601   : > { %v5034_v12 = vsub.f32 %v5023_v53, %v5030_v25 }
0x1603   : > { %v5036_v58 = vmul.f32 1.442695, %v5034_v12  ;;  %v11668_v12 = vld [vmem:[#allocation11_spill] sm:$0xff] }
0x1605   : > { %7763 = vpow2.f32 %v5036_v58 }
0x1608   : > { %v5033_v31 = vpop.xlane.xlu1 %5032 }
0x1609   : > { %v5035_v30 = vsub.f32 %v5025_v59, %v5033_v31  ;;  %v10361_v59 = vld [vmem:[%s11574_s11] sm:$0xff] }
0x160a   : > { %v10364_v8 = vperm.slane %v10361_v59, 4 }
0x160b   : > { %v10331_v49 = vpop.eup %7763  ;;  %v5038_v57 = vmul.f32 1.442695, %v5035_v30  ;;  %v11669_v30 = vld [vmem:[#allocation12_spill] sm:$0xff] }
0x160c   : > { %v5040_v1 = vsel %vm813_vm3, %v10331_v49, 0.0  ;;  %v4228_v9 = vadd.f32 %v10302_v56, %v10364_v8 }
0x160d   : > { %7765 = vpow2.f32 %v5038_v57  ;;  %5041 = vadd.xlane.f32.xlu2 %v5040_v1  ;;  %v4233_v1 = vadd.f32 %v10306_v43, %v10364_v8 }
0x160e   : > { %v4250_v58 = vadd.f32 %v4228_v9, %v11668_v12 }
0x1610   : > { %v5097_v41 = vpop.xlane.xlu2 %5096  ;;  %v4269_v31 = vsel %vm519_vm0, %v4250_v58, 0.0 }
0x1611   : > { %v5101_v61 = vsub.f32 %v10318_v50, %v5097_v41 }
0x1613   : > { %v10335_v45 = vpop.eup %7765  ;;  %v5103_v55 = vmul.f32 1.442695, %v5101_v61 }
0x1614   : > { %v5043_v11 = vsel %vm813_vm3, %v10335_v45, 0.0 }
0x1615   : > { %5044 = vadd.xlane.f32.xlu0 %v5043_v11  ;;  %v11670_v11 = vld [vmem:[#allocation13_spill] sm:$0xff] }
0x1618   : > { %v5100_v46 = vpop.xlane.xlu0 %5099 }
0x1619   : > { %v5102_v3 = vsub.f32 %v5092_v42, %v5100_v46  ;;  %v4223_v42 = vadd.f32 %v10297_v7, %v10364_v8  ;;  %v10398_v46 = vadd.f32 %v4233_v1, %v11670_v11 }
0x161b   : > { %v5105_v40 = vmul.f32 1.442695, %v5102_v3 }
0x161d   : > { %7767 = vpow2.f32 %v5105_v40 }
0x1620   : > { %v5164_v26 = vpop.xlane.xlu1 %5163 }
0x1621   : > { %v5168_v6 = vsub.f32 %v5157_v29, %v5164_v26  ;;  %v10373_v29 = vadd.f32 %v4223_v42, %v11666_v44 }
0x1623   : > { %v10339_v39 = vpop.eup %7767  ;;  %v5170_v14 = vmul.f32 1.442695, %v5168_v6  ;;  %v4263_v22 = vsel %vm519_vm0, %v10373_v29, 0.0 }
0x1624   : > { %v5110_v48 = vsel %vm813_vm3, %v10339_v39, 0.0 }
0x1625   : > { %7769 = vpow2.f32 %v5170_v14  ;;  %5118 = vrot.lane.b32.xlu2 %v10245_v36, %s11658_s16  ;;  %5111 = vadd.xlane.f32.xlu0 %v5110_v48 }
0x1628   : > { %v5167_v54 = vpop.xlane.xlu2 %5166 }
0x1629   : > { %v5169_v10 = vsub.f32 %v5159_v23, %v5167_v54  ;;  %v4225_v23 = vadd.f32 %v10299_v20, %v10364_v8  ;;  %v4230_v20 = vadd.f32 %v10304_v37, %v10364_v8  ;;  %v4275_v37 = vsel %vm519_vm0, %v10398_v46, 0.0 }
0x162b   : > { %v10345_v4 = vpop.eup %7769  ;;  %v5172_v28 = vmul.f32 1.442695, %v5169_v10  ;;  %v10389_v57 = vadd.f32 %v4230_v20, %v11669_v30 }
0x162c   : > { %v5174_v15 = vsel %vm813_vm3, %v10345_v4, 0.0 }
0x162d   : > { %7771 = vpow2.f32 %v5172_v28  ;;  %5175 = vadd.xlane.f32.xlu0 %v5174_v15  ;;  %v4272_v56 = vsel %vm519_vm0, %v10389_v57, 0.0 }
0x1630   : > { %v5231_v33 = vpop.xlane.xlu0 %5230 }
0x1631   : > { %v5235_v63 = vsub.f32 %v5224_v19, %v5231_v33 }
0x1633   : > { %v10349_v38 = vpop.eup %7771  ;;  %v5237_v24 = vmul.f32 1.442695, %v5235_v63 }
0x1634   : > { %v5177_v21 = vsel %vm813_vm3, %v10349_v38, 0.0 }
0x1635   : > { %7773 = vpow2.f32 %v5237_v24  ;;  %5178 = vadd.xlane.f32.xlu0 %v5177_v21 }
0x1638   : > { %v5234_v35 = vpop.xlane.xlu1 %5233 }
0x1639   : > { %v5236_v27 = vsub.f32 %v5226_v5, %v5234_v35  ;;  %v4249_v5 = vadd.f32 %v4225_v23, %v11667_v0 }
0x163b   : > { %v10353_v16 = vpop.eup %7773  ;;  %v5239_v47 = vmul.f32 1.442695, %v5236_v27  ;;  %v4266_v25 = vsel %vm519_vm0, %v4249_v5, 0.0 }
0x163c   : > { %v5241_v53 = vsel %vm813_vm3, %v10353_v16, 0.0 }
0x163d   : > { %7775 = vpow2.f32 %v5239_v47  ;;  %5242 = vadd.xlane.f32.xlu0 %v5241_v53 }
0x163e   : > { %7777 = vpow2.f32 %v5103_v55 }
0x1643   : > { %v10366_v18 = vpop.eup %7775 }
0x1644   : > { %v5244_v50 = vsel %vm813_vm3, %v10366_v18, 0.0  ;;  %v7778_v52 = vpop.eup %7777 }
0x1645   : > { %5245 = vadd.xlane.f32.xlu1 %v5244_v50  ;;  %v5107_v19 = vsel %vm813_vm3, %v7778_v52, 0.0 }
0x164d   : > { %4264 = vadd.xlane.f32.xlu1 %v4263_v22 }
0x164e   : > { %5108 = vadd.xlane.f32.xlu2 %v5107_v19 }
0x1650   : > { %v5052_v7 = vpop.permute.xlu1 %5051 }
0x1651   : > { %5064 = vmatpush.bf16.msra.mxu3 %v5052_v7 }
0x1655   : > { %4267 = vadd.xlane.f32.xlu1 %v4266_v25 }
0x1658   : > { %v5186_v48 = vpop.permute.xlu1 %5185 }
0x165d   : > { %4270 = vadd.xlane.f32.xlu1 %v4269_v31 }
0x1665   : > { %4273 = vadd.xlane.f32.xlu1 %v4272_v56 }
0x1666   : > { %5252 = vrot.lane.b32.xlu2 %v10245_v36, %s11660_s14  ;;  %s11681_s14 = sshll.u32 %s11684_s26, 4 }
0x1667   : > { %s491_s20 = scalar_lea.vmem %s11576_s13, %s11681_s14 }
0x166d   : > { %4276 = vadd.xlane.f32.xlu1 %v4275_v37 }
0x1680   : > { %v5042_v3 = vpop.xlane.xlu2 %5041 }
0x1681   : > { %7779 = vrcp.f32 %v5042_v3 }
0x1687   : > { %v7780_v43 = vpop.eup %7779 }
0x1688   : > { %v5119_v40 = vpop.permute.xlu2 %5118  ;;  %v5045_v41 = vpop.xlane.xlu0 %5044  ;;  %v5048_v6 = vmul.f32 %v7780_v43, %v10331_v49 }
0x1689   : > { %7781 = vrcp.f32 %v5045_v41  ;;  %5131 = vmatpush.bf16.msrb.mxu3 %v5119_v40 }
0x168f   : > { %v7782_v26 = vpop.eup %7781 }
0x1690   : > { %v5049_v14 = vmul.f32 %v7782_v26, %v10335_v45  ;;  %v11671_v45 = vld [vmem:[#allocation3_spill] sm:$0xff] }
0x1691   : > { %v11672_v26 = vld [vmem:[#allocation7_spill] sm:$0xff] }
0x1692   : > { %v5050_v36 = vpack.c.bf16 %v5049_v14, %v5048_v6 }
0x1694   : > { %7051 = vmatmul.msk.bf16.vlgmr.msra.gmra.mxu3 %vm813_vm3, %v5050_v36  ;;  %v4220_v36 = vadd.f32 %v10294_v32, %v10364_v8  ;;  %v7046_v32 = vld [vmem:[%s11569_s6 + $0xa8] sm:$0xff] }
0x1695   : > { %5198 = vmatpush.bf16.msra.mxu3 %v5186_v48  ;;  %v11673_v48 = vld [vmem:[#allocation8_spill] sm:$0xff] }
0x1698   : > { %v5112_v54 = vpop.xlane.xlu0 %5111 }
0x1699   : > { %7783 = vrcp.f32 %v5112_v54  ;;  %v4247_v54 = vadd.f32 %v4220_v36, %v11673_v48  ;;  %v4240_v36 = vadd.f32 %v10312_v2, %v10364_v8 }
0x169f   : > { %v7784_v63 = vpop.eup %7783 }
0x16a0   : > { %v5176_v15 = vpop.xlane.xlu0 %5175  ;;  %v5116_v49 = vmul.f32 %v7784_v63, %v10339_v39  ;;  %v7045_v63 = vld [vmem:[%s11569_s6 + $0xa0] sm:$0xff] }
0x16a8   : > { %v5179_v47 = vpop.xlane.xlu0 %5178 }
0x16b0   : > { %v5243_v25 = vpop.xlane.xlu0 %5242 }
0x16b8   : > { %v5246_v10 = vpop.xlane.xlu1 %5245 }
0x16c0   : > { %v10405_v28 = vpop.xlane.xlu1 %4264 }
0x16c1   : > { %v5109_v33 = vpop.xlane.xlu2 %5108 }
0x16c2   : > { %7785 = vrcp.f32 %v5109_v33 }
0x16c3   : > { %7787 = vrcp.f32 %v5179_v47 }
0x16c4   : > { %7789 = vrcp.f32 %v5176_v15  ;;  %v7047_v15 = vld [vmem:[%s11569_s6 + $0xb0] sm:$0xff] }
0x16c5   : > { %7791 = vrcp.f32 %v5246_v10  ;;  %v4260_v10 = vsel %vm519_vm0, %v4247_v54, 0.0 }
0x16c6   : > { %7793 = vrcp.f32 %v5243_v25 }
0x16c8   : > { %v7786_v24 = vpop.eup %7785  ;;  %v4268_v21 = vpop.xlane.xlu1 %4267 }
0x16c9   : > { %v5115_v35 = vmul.f32 %v7786_v24, %v7778_v52  ;;  %v4293_v27 = vmul.f32 %v4268_v21, %v11671_v45  ;;  %v5253_v55 = vpop.permute.xlu2 %5252  ;;  %v7788_v23 = vpop.eup %7787  ;;  %v5303_v24 = vpack.c.bf16 %v7046_v32, %v7045_v63 }
0x16ca   : > { %v7790_v19 = vpop.eup %7789  ;;  %v5183_v7 = vmul.f32 %v7788_v23, %v10349_v38 }
0x16cb   : > { %v5117_v61 = vpack.c.bf16 %v5116_v49, %v5115_v35  ;;  %v10409_v53 = vsub.f32 %v4249_v5, %v4293_v27  ;;  %v5182_v5 = vmul.f32 %v7790_v19, %v10345_v4  ;;  %v7792_v12 = vpop.eup %7791 }
0x16cc   : > { %v5250_v20 = vmul.f32 %v7792_v12, %v10366_v18 }
0x16cd   : > { %7053 = vmatmul.msk.bf16.vlgmr.msrb.gmra.mxu3 %vm813_vm3, %v5117_v61  ;;  %v4315_v42 = vmul.f32 %v10409_v53, %v10409_v53  ;;  %v5184_v9 = vpack.c.bf16 %v5183_v7, %v5182_v5 }
0x16ce   : > { %5265 = vmatpush.bf16.msrb.mxu3 %v5253_v55 }
0x16cf   : > { %v4332_v50 = vsel %vm519_vm0, %v4315_v42, 0.0 }
0x16d0   : > { %4333 = vadd.xlane.f32.xlu1 %v4332_v50  ;;  %v4271_v39 = vpop.xlane.xlu1 %4270 }
0x16d1   : > { %v4294_v44 = vmul.f32 %v4271_v39, %v11671_v45 }
0x16d3   : > { %v10416_v52 = vsub.f32 %v4250_v58, %v4294_v44  ;;  %v7794_v58 = vpop.eup %7793 }
0x16d4   : > { %v5249_v31 = vmul.f32 %v7794_v58, %v10353_v16  ;;  %v4218_v16 = vadd.f32 %v10292_v13, %v10364_v8  ;;  %v7048_v13 = vld [vmem:[%s11569_s6 + $0xb8] sm:$0xff]  ;;  %v4235_v58 = vadd.f32 %v10308_v60, %v10364_v8 }
0x16d5   : > { %v4316_v22 = vmul.f32 %v10416_v52, %v10416_v52  ;;  %v5304_v33 = vpack.c.bf16 %v7048_v13, %v7047_v15  ;;  %v11677_v13 = vld [vmem:[#allocation17_spill] sm:$0xff] }
0x16d6   : > { %v5251_v30 = vpack.c.bf16 %v5250_v20, %v5249_v31  ;;  %v4246_v6 = vadd.f32 %v4218_v16, %v11672_v26  ;;  %v11674_v31 = vld [vmem:[#allocation14_spill] sm:$0xff] }
0x16d7   : > { %v4335_v0 = vsel %vm519_vm0, %v4316_v22, 0.0  ;;  %5315 = vmatpush.bf16.msrb.mxu1 %v5304_v33 }
0x16d8   : > { %4336 = vadd.xlane.f32.xlu1 %v4335_v0  ;;  %v4257_v14 = vsel %vm519_vm0, %v4246_v6, 0.0 }
0x16db   : > { %5316 = vmatpush.bf16.msrb.mxu1 %v5303_v24  ;;  %v5305_v24 = vperm.slane %v10361_v59, 5 }
0x16dd   : > { %7055 = vmatmul.msk.bf16.vlgmr.msra.gmra.mxu3 %vm813_vm3, %v5184_v9 }
0x16ed   : > { %7057 = vmatmul.msk.bf16.vlgmr.msrb.gmra.mxu3 %vm813_vm3, %v5251_v30  ;;  %v4253_v30 = vadd.f32 %v4235_v58, %v11674_v31 }
0x1717   : > { %v5066_v38 = vpop.f32.mrf.mxu3 }
0x171f   : > { %v5068_v1 = vpop.f32.mrf.mxu3 }
0x1750   : > { %v5133_v56 = vpop.f32.mrf.mxu3 }
0x1758   : > { %v5135_v11 = vpop.f32.mrf.mxu3 }
0x1759   : > { %v7322_v4 = vpack.i.bf16 %v5135_v11, %v5133_v56  ;;  %v4274_v56 = vpop.xlane.xlu1 %4273  ;;  %v11675_v11 = vld [vmem:[#allocation15_spill] sm:$0xff] }
0x175b   : > { %7323 = vrot.lane.b32.xlu0 %v7322_v4, %s11641_s30 }
0x1760   : > { %v5200_v37 = vpop.f32.mrf.mxu3 }
0x1761   : > { %v4277_v15 = vpop.xlane.xlu1 %4276 }
0x1762   : > { %v4296_v63 = vmul.f32 %v4277_v15, %v11671_v45 }
0x1764   : > { %v10506_v2 = vsub.f32 %v10398_v46, %v4296_v63 }
0x1768   : > { %v5202_v3 = vpop.f32.mrf.mxu3 }
0x1769   : > { %v7327_v40 = vpack.i.bf16 %v5202_v3, %v5200_v37  ;;  %v4295_v37 = vmul.f32 %v4274_v56, %v11671_v45  ;;  %v4334_v58 = vpop.xlane.xlu1 %4333 }
0x176b   : > { %7328 = vrot.lane.b32.xlu2 %v7327_v40, %s11642_s24  ;;  %v10472_v3 = vsub.f32 %v10389_v57, %v4295_v37 }
0x176d   : > { %v4317_v40 = vmul.f32 %v10472_v3, %v10472_v3 }
0x1770   : > { %v5267_v41 = vpop.f32.mrf.mxu3 }
0x1778   : > { %v5269_v43 = vpop.f32.mrf.mxu3 }
0x1779   : > { %v7332_v18 = vpack.i.bf16 %v5269_v43, %v5267_v41 }
0x177b   : > { %7333 = vrot.lane.b32.xlu2 %v7332_v18, %s11643_s15  ;;  %v4292_v18 = vmul.f32 %v10405_v28, %v11671_v45  ;;  %v11676_v28 = vld [vmem:[#allocation16_spill] sm:$0xff] }
0x177d   : > { %v10486_v26 = vsub.f32 %v10373_v29, %v4292_v18  ;;  %v4337_v18 = vpop.xlane.xlu1 %4336 }
0x1785   : > { %4258 = vadd.xlane.f32.xlu0 %v4257_v14  ;;  %v4314_v14 = vmul.f32 %v10486_v26, %v10486_v26 }
0x1787   : > { %v4329_v48 = vsel %vm519_vm0, %v4314_v14, 0.0 }
0x17a4   : > { %4261 = vadd.xlane.f32.xlu2 %v4260_v10  ;;  %v4243_v10 = vadd.f32 %v10314_v51, %v10364_v8  ;;  %v4318_v51 = vmul.f32 %v10506_v2, %v10506_v2 }
0x17a6   : > { %v10502_v33 = vadd.f32 %v4243_v10, %v11677_v13  ;;  %v4360_v10 = vmul.f32 %v4337_v18, %v11671_v45 }
0x17a8   : > { %v4287_v32 = vsel %vm519_vm0, %v10502_v33, 0.0 }
0x17c5   : > { %v7329_v21 = vpop.permute.xlu2 %7328 }
0x17c6   : > { %v7331_v55 = vunpack.i.h.bf16 %v7329_v21  ;;  %v7330_v42 = vunpack.i.l.bf16 %v7329_v21 }
0x17cd   : > { %v7324_v49 = vpop.permute.xlu0 %7323 }
0x17ce   : > { %v7326_v35 = vunpack.i.h.bf16 %v7324_v49  ;;  %v7325_v27 = vunpack.i.l.bf16 %v7324_v49 }
0x17d0   : > { %v5297_v47 = vsel %vm575_vm1, %v5068_v1, %v7326_v35  ;;  %v5296_v61 = vsel %vm575_vm1, %v5066_v38, %v7325_v27  ;;  %v4238_v38 = vadd.f32 %v10310_v34, %v10364_v8  ;;  %v4278_v1 = vsel %vm519_vm0, %v4253_v30, 0.0 }
0x17d1   : > { %v5298_v23 = vsel %vm813_vm3, %v5296_v61, %v7330_v42  ;;  %v5299_v22 = vsel %vm813_vm3, %v5297_v47, %v7331_v55  ;;  %v4338_v34 = vsel %vm519_vm0, %v4317_v40, 0.0  ;;  %v4341_v8 = vsel %vm519_vm0, %v4318_v51, 0.0 }
0x17d2   : > { %v4254_v4 = vadd.f32 %v4238_v38, %v11675_v11  ;;  %v7018_v38 = vld [vmem:[%s11568_s5 + $0x88] sm:$0xff] }
0x17d4   : > { %v4281_v60 = vsel %vm519_vm0, %v4254_v4, 0.0 }
0x17d5   : > { %v7334_v50 = vpop.permute.xlu2 %7333 }
0x17d6   : > { %v7336_v39 = vunpack.i.h.bf16 %v7334_v50  ;;  %v7335_v44 = vunpack.i.l.bf16 %v7334_v50 }
0x17d8   : > { %v5301_v19 = vsel %vm815_vm4, %v5299_v22, %v7336_v39  ;;  %v5300_v7 = vsel %vm815_vm4, %v5298_v23, %v7335_v44 }
0x17d9   : > { %v5302_v0 = vpack.c.bf16 %v5301_v19, %v5300_v7 }
0x17db   : > { %7058 = vmatmul.msk.bf16.vlgmr.msrb.gmra.mxu1 %vm519_vm0, %v5302_v0 }
0x17f8   : > { %v4259_v5 = vpop.xlane.xlu0 %4258 }
0x17f9   : > { %v4290_v9 = vmul.f32 %v4259_v5, %v11671_v45  ;;  %v7019_v5 = vld [vmem:[%s11568_s5 + $0x90] sm:$0xff] }
0x17fb   : > { %v10458_v25 = vsub.f32 %v4246_v6, %v4290_v9  ;;  %v7020_v9 = vld [vmem:[%s11568_s5 + $0x98] sm:$0xff] }
0x17fd   : > { %v4312_v12 = vmul.f32 %v10458_v25, %v10458_v25 }
0x17ff   : > { %v4323_v20 = vsel %vm519_vm0, %v4312_v12, 0.0  ;;  %v4544_v12 = vpack.c.bf16 %v7020_v9, %v7019_v5 }
0x1800   : > { %4324 = vadd.xlane.f32.xlu0 %v4323_v20 }
0x1801   : > { %4570 = vmatpush.bf16.msra.mxu0 %v4544_v12 }
0x1808   : > { %4279 = vadd.xlane.f32.xlu0 %v4278_v1  ;;  %v4359_v1 = vmul.f32 %v4334_v58, %v11671_v45 }
0x1810   : > { %4282 = vadd.xlane.f32.xlu0 %v4281_v60 }
0x1817   : > { %v4262_v41 = vpop.xlane.xlu2 %4261 }
0x1818   : > { %v4291_v43 = vmul.f32 %v4262_v41, %v11671_v45  ;;  %4339 = vadd.xlane.f32.xlu0 %v4338_v34 }
0x181a   : > { %v10481_v16 = vsub.f32 %v4247_v54, %v4291_v43  ;;  %v10495_v54 = vadd.f32 %v4240_v36, %v11676_v28 }
0x181c   : > { %v4313_v57 = vmul.f32 %v10481_v16, %v10481_v16  ;;  %v4284_v29 = vsel %vm519_vm0, %v10495_v54, 0.0 }
0x181e   : > { %v4326_v6 = vsel %vm519_vm0, %v4313_v57, 0.0 }
0x181f   : > { %4327 = vadd.xlane.f32.xlu2 %v4326_v6 }
0x1827   : > { %4330 = vadd.xlane.f32.xlu2 %v4329_v48 }
0x182f   : > { %4285 = vadd.xlane.f32.xlu2 %v4284_v29 }
0x1837   : > { %4288 = vadd.xlane.f32.xlu2 %v4287_v32 }
0x183f   : > { %4342 = vadd.xlane.f32.xlu2 %v4341_v8  ;;  %v10563_v8 = vadd.f32 1e-05, %v4360_v10 }
0x1858   : > { %v5318_v21 = vpop.f32.mrf.mxu1 }
0x1859   : > { %v5319_v49 = vadd.f32 %v5318_v21, %v5305_v24 }
0x185b   : > { %v10515_v35 = vadd.f32 %v5319_v49, %v10184_v62 }
0x185d   : > { %v5325_v46 = vsel %vm519_vm0, %v10515_v35, 0.0 }
0x185e   : > { %5326 = vadd.xlane.f32.xlu1 %v5325_v46 }
0x1860   : > { %v5320_v27 = vpop.f32.mrf.mxu1 }
0x1861   : > { %v5321_v47 = vadd.f32 %v5320_v27, %v5305_v24 }
0x1863   : > { %v10520_v61 = vadd.f32 %v5321_v47, %v10189_v17  ;;  %v496_v47 = vld [vmem:[%s11571_s8 + $0x6] sm:$0x3] }
0x1865   : > { %v5328_v55 = vsel %vm519_vm0, %v10520_v61, 0.0 }
0x1866   : > { %5329 = vadd.xlane.f32.xlu0 %v5328_v55 }
0x1873   : > { %v4325_v42 = vpop.xlane.xlu0 %4324 }
0x1874   : > { %v4356_v62 = vmul.f32 %v4325_v42, %v11671_v45 }
0x1876   : > { %v4367_v23 = vadd.f32 1e-05, %v4356_v62 }
0x1878   : > { %7795 = vrsqrt.f32 %v4367_v23  ;;  %vm4384_vm12 = vweird.f32 %v4367_v23 }
0x187b   : > { %v4280_v59 = vpop.xlane.xlu0 %4279 }
0x187c   : > { %v4297_v50 = vmul.f32 %v4280_v59, %v11671_v45 }
0x187e   : > { %v10526_v39 = vsub.f32 %v4253_v30, %v4297_v50  ;;  %v7796_v31 = vpop.eup %7795  ;;  %v7017_v30 = vld [vmem:[%s11568_s5 + $0x80] sm:$0xff] }
0x187f   : > { %v4543_v56 = vpack.c.bf16 %v7018_v38, %v7017_v30  ;;  %v4379_v11 = vmul.f32 %v7796_v31, %v4367_v23  ;;  %vm4385_vm11 = vweird.f32 %v7796_v31  ;;  %v10583_v30 = vperm.slane %v496_v47, 1 }
0x1880   : > { %v4319_v44 = vmul.f32 %v10526_v39, %v10526_v39  ;;  %vm4386_vm14 = vmor %vm4384_vm12, %vm4385_vm11 }
0x1881   : > { %4571 = vmatpush.bf16.msra.mxu0 %v4543_v56  ;;  %v4380_v37 = vmul.f32 %v7796_v31, %v4379_v11 }
0x1882   : > { %v4344_v22 = vsel %vm519_vm0, %v4319_v44, 0.0 }
0x1883   : > { %4345 = vadd.xlane.f32.xlu1 %v4344_v22  ;;  %v4283_v17 = vpop.xlane.xlu0 %4282  ;;  %v4381_v34 = vmul.f32 0.5, %v4380_v37  ;;  %v10576_v22 = vperm.slane %v496_v47, 0 }
0x1884   : > { %v4298_v19 = vmul.f32 %v4283_v17, %v11671_v45 }
0x1885   : > { %v4382_v57 = vsub.f32 1.5, %v4381_v34 }
0x1886   : > { %v10532_v7 = vsub.f32 %v4254_v4, %v4298_v19  ;;  %v10550_v4 = vadd.f32 1e-05, %v4359_v1 }
0x1887   : > { %v4383_v13 = vmul.f32 %v7796_v31, %v4382_v57 }
0x1888   : > { %v4320_v0 = vmul.f32 %v10532_v7, %v10532_v7  ;;  %7797 = vrsqrt.f32 %v10550_v4 }
0x1889   : > { %v4387_v21 = vsel %vm4386_vm14, %v7796_v31, %v4383_v13  ;;  %vm4414_vm14 = vweird.f32 %v10550_v4 }
0x188a   : > { %v4347_v20 = vsel %vm519_vm0, %v4320_v0, 0.0  ;;  %v4488_v59 = vmul.f32 %v4387_v21, %v10458_v25 }
0x188b   : > { %4348 = vadd.xlane.f32.xlu0 %v4347_v20  ;;  %v4340_v43 = vpop.xlane.xlu0 %4339 }
0x188c   : > { %v4361_v36 = vmul.f32 %v4340_v43, %v11671_v45  ;;  %v4500_v9 = vmul.f32 %v10576_v22, %v4488_v59 }
0x188e   : > { %v10554_v14 = vpop.eup %7797  ;;  %v10561_v32 = vadd.f32 1e-05, %v4361_v36 }
0x188f   : > { %v4409_v15 = vmul.f32 %v10554_v14, %v10550_v4  ;;  %vm4415_vm8 = vweird.f32 %v10554_v14 }
0x1891   : > { %v4410_v24 = vmul.f32 %v10554_v14, %v4409_v15 }
0x1892   : > { %v4328_v60 = vpop.xlane.xlu2 %4327 }
0x1893   : > { %v4357_v40 = vmul.f32 %v4328_v60, %v11671_v45  ;;  %v4411_v62 = vmul.f32 0.5, %v4410_v24 }
0x1895   : > { %v4368_v41 = vadd.f32 1e-05, %v4357_v40  ;;  %v4412_v12 = vsub.f32 1.5, %v4411_v62 }
0x1897   : > { %7799 = vrsqrt.f32 %v4368_v41  ;;  %vm4394_vm5 = vweird.f32 %v4368_v41  ;;  %v4413_v40 = vmul.f32 %v10554_v14, %v4412_v12 }
0x189a   : > { %v4331_v6 = vpop.xlane.xlu2 %4330 }
0x189b   : > { %v4358_v48 = vmul.f32 %v4331_v6, %v11671_v45 }
0x189d   : > { %v7800_v28 = vpop.eup %7799  ;;  %v4369_v29 = vadd.f32 1e-05, %v4358_v48 }
0x189e   : > { %v4389_v63 = vmul.f32 %v7800_v28, %v4368_v41  ;;  %vm4395_vm15 = vweird.f32 %v7800_v28 }
0x189f   : > { %7801 = vrsqrt.f32 %v4369_v29  ;;  %vm4396_vm6 = vmor %vm4394_vm5, %vm4395_vm15  ;;  %vm4404_vm11 = vweird.f32 %v4369_v29 }
0x18a0   : > { %v4390_v51 = vmul.f32 %v7800_v28, %v4389_v63  ;;  %7803 = vrsqrt.f32 %v10561_v32  ;;  %vm4416_vm15 = vmor %vm4414_vm14, %vm4415_vm8 }
0x18a1   : > { %7805 = vrsqrt.f32 %v10563_v8  ;;  %v4417_v36 = vsel %vm4416_vm15, %v10554_v14, %v4413_v40 }
0x18a2   : > { %v4391_v49 = vmul.f32 0.5, %v4390_v51  ;;  %v4286_v46 = vpop.xlane.xlu2 %4285 }
0x18a3   : > { %v4299_v27 = vmul.f32 %v4286_v46, %v11671_v45 }
0x18a4   : > { %v4392_v55 = vsub.f32 1.5, %v4391_v49 }
0x18a5   : > { %v7802_v42 = vpop.eup %7801  ;;  %v10574_v50 = vsub.f32 %v10495_v54, %v4299_v27 }
0x18a6   : > { %v4393_v44 = vmul.f32 %v7800_v28, %v4392_v55  ;;  %v4399_v23 = vmul.f32 %v7802_v42, %v4369_v29  ;;  %v7804_v5 = vpop.eup %7803  ;;  %vm4405_vm7 = vweird.f32 %v7802_v42  ;;  %v4491_v29 = vmul.f32 %v4417_v36, %v10409_v53 }
0x18a7   : > { %v4321_v17 = vmul.f32 %v10574_v50, %v10574_v50  ;;  %v7806_v31 = vpop.eup %7805  ;;  %v4429_v56 = vmul.f32 %v7804_v5, %v10561_v32  ;;  %vm4406_vm12 = vmor %vm4404_vm11, %vm4405_vm7  ;;  %vm4435_vm5 = vweird.f32 %v7804_v5  ;;  %vm4434_vm7 = vweird.f32 %v10561_v32 }
0x18a8   : > { %v4397_v19 = vsel %vm4396_vm6, %v7800_v28, %v4393_v44  ;;  %v4400_v0 = vmul.f32 %v7802_v42, %v4399_v23  ;;  %v4419_v41 = vmul.f32 %v7806_v31, %v10563_v8  ;;  %v4503_v63 = vmul.f32 %v10576_v22, %v4491_v29  ;;  %vm4436_vm8 = vmor %vm4434_vm7, %vm4435_vm5  ;;  %v7027_v29 = vld [vmem:[%s11570_s7 + $0x70] sm:$0xff] }
0x18a9   : > { %v4489_v25 = vmul.f32 %v4397_v19, %v10481_v16  ;;  %v4350_v54 = vsel %vm519_vm0, %v4321_v17, 0.0  ;;  %v10590_v16 = vadd.f32 %v10583_v30, %v4500_v9  ;;  %v4430_v57 = vmul.f32 %v7804_v5, %v4429_v56 }
0x18aa   : > { %v4401_v58 = vmul.f32 0.5, %v4400_v0  ;;  %4351 = vadd.xlane.f32.xlu2 %v4350_v54  ;;  %v4289_v20 = vpop.xlane.xlu2 %4288  ;;  %v4420_v48 = vmul.f32 %v7806_v31, %v4419_v41  ;;  %v10616_v14 = vadd.f32 %v10583_v30, %v4503_v63  ;;  %vm4425_vm6 = vweird.f32 %v7806_v31 }
0x18ab   : > { %v4501_v38 = vmul.f32 %v10576_v22, %v4489_v25  ;;  %v4300_v1 = vmul.f32 %v4289_v20, %v11671_v45  ;;  %v4431_v10 = vmul.f32 0.5, %v4430_v57  ;;  %vm4424_vm11 = vweird.f32 %v10563_v8 }
0x18ac   : > { %v4402_v11 = vsub.f32 1.5, %v4401_v58  ;;  %v4421_v15 = vmul.f32 0.5, %v4420_v48 }
0x18ad   : > { %v10593_v37 = vadd.f32 %v10583_v30, %v4501_v38  ;;  %v10596_v60 = vsub.f32 %v10502_v33, %v4300_v1  ;;  %v4432_v4 = vsub.f32 1.5, %v4431_v10 }
0x18ae   : > { %v4403_v34 = vmul.f32 %v7802_v42, %v4402_v11  ;;  %v4422_v51 = vsub.f32 1.5, %v4421_v15  ;;  %v7028_v15 = vld [vmem:[%s11570_s7 + $0x78] sm:$0xff] }
0x18af   : > { %v4537_v43 = vpack.c.bf16 %v10593_v37, %v10590_v16  ;;  %v4322_v18 = vmul.f32 %v10596_v60, %v10596_v60  ;;  %v4433_v21 = vmul.f32 %v7804_v5, %v4432_v4  ;;  %v4622_v63 = vpack.c.bf16 %v7028_v15, %v7027_v29 }
0x18b0   : > { %v4407_v6 = vsel %vm4406_vm12, %v7802_v42, %v4403_v34  ;;  %v4423_v49 = vmul.f32 %v7806_v31, %v4422_v51  ;;  %vm4426_vm12 = vmor %vm4424_vm11, %vm4425_vm6  ;;  %v7025_v51 = vld [vmem:[%s11570_s7 + $0x60] sm:$0xff] }
0x18b1   : > { %7029 = vmatmul.msk.bf16.vlgmr.msra.gmra.mxu0 %vm519_vm0, %v4537_v43  ;;  %v4353_v33 = vsel %vm519_vm0, %v4322_v18, 0.0  ;;  %v4490_v28 = vmul.f32 %v4407_v6, %v10486_v26  ;;  %v4437_v26 = vsel %vm4436_vm8, %v7804_v5, %v4433_v21  ;;  %4646 = vmatpush.bf16.msra.mxu2 %v4622_v63  ;;  %v7026_v21 = vld [vmem:[%s11570_s7 + $0x68] sm:$0xff] }
0x18b2   : > { %4354 = vadd.xlane.f32.xlu1 %v4353_v33  ;;  %v4427_v46 = vsel %vm4426_vm12, %v7806_v31, %v4423_v49  ;;  %v4493_v27 = vmul.f32 %v4437_v26, %v10472_v3  ;;  %v4343_v5 = vpop.xlane.xlu2 %4342 }
0x18b3   : > { %v4502_v13 = vmul.f32 %v10576_v22, %v4490_v28  ;;  %v4492_v47 = vmul.f32 %v4427_v46, %v10416_v52  ;;  %v7023_v46 = vld [vmem:[%s11570_s7 + $0x50] sm:$0xff] }
0x18b4   : > { %v4505_v55 = vmul.f32 %v10576_v22, %v4493_v27  ;;  %v7024_v27 = vld [vmem:[%s11570_s7 + $0x58] sm:$0xff] }
0x18b5   : > { %v10613_v24 = vadd.f32 %v10583_v30, %v4502_v13  ;;  %v4504_v42 = vmul.f32 %v10576_v22, %v4492_v47  ;;  %v4620_v47 = vpack.c.bf16 %v7024_v27, %v7023_v46 }
0x18b6   : > { %v10628_v32 = vadd.f32 %v10583_v30, %v4505_v55 }
0x18b7   : > { %v4538_v53 = vpack.c.bf16 %v10616_v14, %v10613_v24  ;;  %v10631_v59 = vadd.f32 %v10583_v30, %v4504_v42  ;;  %v7021_v42 = vld [vmem:[%s11570_s7 + $0x40] sm:$0xff] }
0x18b9   : > { %v4539_v8 = vpack.c.bf16 %v10628_v32, %v10631_v59 }
0x18c1   : > { %7030 = vmatmul.msk.bf16.gmra.mxu0 %vm519_vm0, %v4538_v53  ;;  %v4621_v53 = vpack.c.bf16 %v7026_v21, %v7025_v51 }
0x18c3   : > { %4647 = vmatpush.bf16.msra.mxu2 %v4621_v53 }
0x18c7   : > { %4648 = vmatpush.bf16.msra.mxu2 %v4620_v47 }
0x18d1   : > { %v5327_v62 = vpop.xlane.xlu1 %5326  ;;  %7031 = vmatmul.msk.bf16.gmra.mxu0 %vm519_vm0, %v4539_v8  ;;  %v7022_v8 = vld [vmem:[%s11570_s7 + $0x48] sm:$0xff] }
0x18d2   : > { %v5331_v3 = vmul.f32 %v5327_v62, %v11671_v45 }
0x18d4   : > { %v10638_v52 = vsub.f32 %v10515_v35, %v5331_v3  ;;  %v4362_v35 = vmul.f32 %v4343_v5, %v11671_v45  ;;  %v4619_v3 = vpack.c.bf16 %v7022_v8, %v7021_v42 }
0x18d6   : > { %v5335_v44 = vmul.f32 %v10638_v52, %v10638_v52  ;;  %v4373_v54 = vadd.f32 1e-05, %v4362_v35  ;;  %4649 = vmatpush.bf16.msra.mxu2 %v4619_v3 }
0x18d8   : > { %v5337_v23 = vsel %vm519_vm0, %v5335_v44, 0.0  ;;  %7807 = vrsqrt.f32 %v4373_v54  ;;  %vm4444_vm15 = vweird.f32 %v4373_v54 }
0x18d9   : > { %5338 = vadd.xlane.f32.xlu0 %v5337_v23  ;;  %v5330_v17 = vpop.xlane.xlu0 %5329 }
0x18da   : > { %v5332_v19 = vmul.f32 %v5330_v17, %v11671_v45 }
0x18dc   : > { %v10645_v0 = vsub.f32 %v10520_v61, %v5332_v19 }
0x18de   : > { %v5336_v9 = vmul.f32 %v10645_v0, %v10645_v0  ;;  %v7808_v12 = vpop.eup %7807 }
0x18df   : > { %v4439_v58 = vmul.f32 %v7808_v12, %v4373_v54  ;;  %vm4445_vm14 = vweird.f32 %v7808_v12 }
0x18e0   : > { %v5340_v25 = vsel %vm519_vm0, %v5336_v9, 0.0  ;;  %vm4446_vm5 = vmor %vm4444_vm15, %vm4445_vm14 }
0x18e1   : > { %5341 = vadd.xlane.f32.xlu2 %v5340_v25  ;;  %v4440_v20 = vmul.f32 %v7808_v12, %v4439_v58 }
0x18e3   : > { %v4441_v61 = vmul.f32 0.5, %v4440_v20 }
0x18e5   : > { %v4442_v56 = vsub.f32 1.5, %v4441_v61 }
0x18e7   : > { %v4443_v40 = vmul.f32 %v7808_v12, %v4442_v56 }
0x18e9   : > { %v4447_v18 = vsel %vm4446_vm5, %v7808_v12, %v4443_v40 }
0x18ea   : > { %v4494_v36 = vmul.f32 %v4447_v18, %v10506_v2 }
0x18ec   : > { %v4506_v4 = vmul.f32 %v10576_v22, %v4494_v36 }
0x18ee   : > { %v10670_v49 = vadd.f32 %v10583_v30, %v4506_v4 }
0x18f6   : > { %v4346_v31 = vpop.xlane.xlu1 %4345 }
0x18f7   : > { %v4363_v38 = vmul.f32 %v4346_v31, %v11671_v45 }
0x18f9   : > { %v4374_v1 = vadd.f32 1e-05, %v4363_v38 }
0x18fb   : > { %7809 = vrsqrt.f32 %v4374_v1  ;;  %vm4454_vm7 = vweird.f32 %v4374_v1 }
0x18fe   : > { %v4349_v43 = vpop.xlane.xlu0 %4348 }
0x18ff   : > { %v4364_v33 = vmul.f32 %v4349_v43, %v11671_v45 }
0x1901   : > { %v7810_v11 = vpop.eup %7809  ;;  %v4375_v10 = vadd.f32 1e-05, %v4364_v33  ;;  %v7065_v33 = vld [vmem:[%s11568_s5 + $0x30] sm:$0xff] }
0x1902   : > { %v4449_v41 = vmul.f32 %v7810_v11, %v4374_v1  ;;  %vm4455_vm6 = vweird.f32 %v7810_v11 }
0x1903   : > { %vm4456_vm8 = vmor %vm4454_vm7, %vm4455_vm6  ;;  %7811 = vrsqrt.f32 %v4375_v10  ;;  %vm4464_vm12 = vweird.f32 %v4375_v10 }
0x1904   : > { %v4450_v34 = vmul.f32 %v7810_v11, %v4449_v41  ;;  %v10696_v41 = vld [vmem:[%s11573_s10] sm:$0x3f] }
0x1906   : > { %v4451_v57 = vmul.f32 0.5, %v4450_v34  ;;  %v10699_v34 = vperm.slane %v10696_v41, 4 }
0x1908   : > { %v4452_v6 = vsub.f32 1.5, %v4451_v57 }
0x1909   : > { %v7812_v55 = vpop.eup %7811 }
0x190a   : > { %v4453_v48 = vmul.f32 %v7810_v11, %v4452_v6  ;;  %v4459_v62 = vmul.f32 %v7812_v55, %v4375_v10  ;;  %vm4465_vm11 = vweird.f32 %v7812_v55 }
0x190b   : > { %vm4466_vm14 = vmor %vm4464_vm12, %vm4465_vm11 }
0x190c   : > { %v4457_v28 = vsel %vm4456_vm8, %v7810_v11, %v4453_v48  ;;  %v4460_v44 = vmul.f32 %v7812_v55, %v4459_v62 }
0x190d   : > { %v4495_v13 = vmul.f32 %v4457_v28, %v10526_v39 }
0x190e   : > { %v4461_v5 = vmul.f32 0.5, %v4460_v44 }
0x190f   : > { %v4507_v2 = vmul.f32 %v10576_v22, %v4495_v13 }
0x1910   : > { %v4462_v9 = vsub.f32 1.5, %v4461_v5 }
0x1911   : > { %v10673_v39 = vadd.f32 %v10583_v30, %v4507_v2  ;;  %v7063_v2 = vld [vmem:[%s11568_s5 + $0x20] sm:$0xff] }
0x1912   : > { %v4463_v58 = vmul.f32 %v7812_v55, %v4462_v9 }
0x1913   : > { %v4540_v26 = vpack.c.bf16 %v10673_v39, %v10670_v49 }
0x1914   : > { %v4467_v38 = vsel %vm4466_vm14, %v7812_v55, %v4463_v58 }
0x1915   : > { %7032 = vmatmul.msk.bf16.gmra.mxu0 %vm519_vm0, %v4540_v26  ;;  %v4496_v40 = vmul.f32 %v4467_v38, %v10532_v7  ;;  %v7066_v7 = vld [vmem:[%s11568_s5 + $0x38] sm:$0xff] }
0x1916   : > { %v5412_v28 = vpack.c.bf16 %v7066_v7, %v7065_v33 }
0x1917   : > { %v4508_v48 = vmul.f32 %v10576_v22, %v4496_v40 }
0x1918   : > { %5420 = vmatpush.bf16.msrb.mxu0 %v5412_v28 }
0x1919   : > { %v10719_v51 = vadd.f32 %v10583_v30, %v4508_v48 }
0x191d   : > { %v4352_v23 = vpop.xlane.xlu2 %4351 }
0x191e   : > { %v4365_v17 = vmul.f32 %v4352_v23, %v11671_v45 }
0x1920   : > { %v4376_v19 = vadd.f32 1e-05, %v4365_v17 }
0x1922   : > { %7813 = vrsqrt.f32 %v4376_v19  ;;  %vm4474_vm5 = vweird.f32 %v4376_v19 }
0x1925   : > { %v4355_v25 = vpop.xlane.xlu1 %4354 }
0x1926   : > { %v4366_v35 = vmul.f32 %v4355_v25, %v11671_v45 }
0x1928   : > { %v7814_v54 = vpop.eup %7813  ;;  %v4377_v12 = vadd.f32 1e-05, %v4366_v35 }
0x1929   : > { %v4469_v20 = vmul.f32 %v7814_v54, %v4376_v19  ;;  %vm4475_vm15 = vweird.f32 %v7814_v54 }
0x192a   : > { %7815 = vrsqrt.f32 %v4377_v12  ;;  %vm4476_vm6 = vmor %vm4474_vm5, %vm4475_vm15  ;;  %vm4484_vm8 = vweird.f32 %v4377_v12 }
0x192b   : > { %v4470_v31 = vmul.f32 %v7814_v54, %v4469_v20  ;;  %v7059_v20 = vld [vmem:[%s11569_s6 + $0xc0] sm:$0xff] }
0x192d   : > { %v4471_v1 = vmul.f32 0.5, %v4470_v31  ;;  %v7060_v31 = vld [vmem:[%s11569_s6 + $0xc8] sm:$0xff] }
0x192e   : > { %v4573_v61 = vpop.f32.mrf.mxu0 }
0x192f   : > { %v4472_v56 = vsub.f32 1.5, %v4471_v1  ;;  %v4574_v29 = vadd.f32 %v4573_v61, %v10699_v34  ;;  %v5391_v1 = vpack.c.bf16 %v7060_v31, %v7059_v20 }
0x1930   : > { %v7816_v11 = vpop.eup %7815 }
0x1931   : > { %v4473_v43 = vmul.f32 %v7814_v54, %v4472_v56  ;;  %v4479_v18 = vmul.f32 %v7816_v11, %v4377_v12  ;;  %vm4485_vm7 = vweird.f32 %v7816_v11  ;;  %v4602_v46 = vmax.f32 %v4574_v29, 0.0 }
0x1932   : > { %vm4486_vm11 = vmor %vm4484_vm8, %vm4485_vm7 }
0x1933   : > { %v4477_v57 = vsel %vm4476_vm6, %v7814_v54, %v4473_v43  ;;  %v4480_v6 = vmul.f32 %v7816_v11, %v4479_v18 }
0x1934   : > { %v4497_v36 = vmul.f32 %v4477_v57, %v10574_v50  ;;  %v7064_v50 = vld [vmem:[%s11568_s5 + $0x28] sm:$0xff] }
0x1935   : > { %v4481_v10 = vmul.f32 0.5, %v4480_v6  ;;  %v5411_v53 = vpack.c.bf16 %v7064_v50, %v7063_v2  ;;  %v498_v2 = vld [vmem:[%s11571_s8 + $0xa] sm:$0x3] }
0x1936   : > { %v4575_v15 = vpop.f32.mrf.mxu0  ;;  %v4509_v13 = vmul.f32 %v10576_v22, %v4497_v36 }
0x1937   : > { %v4482_v4 = vsub.f32 1.5, %v4481_v10  ;;  %v4576_v63 = vadd.f32 %v4575_v15, %v10699_v34  ;;  %5421 = vmatpush.bf16.msrb.mxu0 %v5411_v53  ;;  %v11678_v10 = vld [vmem:[#allocation4_spill] sm:$0xff] }
0x1938   : > { %v10722_v21 = vadd.f32 %v10583_v30, %v4509_v13 }
0x1939   : > { %v4483_v26 = vmul.f32 %v7816_v11, %v4482_v4  ;;  %v4603_v27 = vmax.f32 %v4576_v63, 0.0 }
0x193a   : > { %v4541_v47 = vpack.c.bf16 %v10722_v21, %v10719_v51 }
0x193b   : > { %v4487_v55 = vsel %vm4486_vm11, %v7816_v11, %v4483_v26  ;;  %v4613_v42 = vpack.c.bf16 %v4603_v27, %v4602_v46  ;;  %v5369_v46 = vperm.slane %v498_v2, 0 }
0x193c   : > { %7033 = vmatmul.msk.bf16.gmra.mxu0 %vm519_vm0, %v4541_v47  ;;  %v4498_v8 = vmul.f32 %v4487_v55, %v10596_v60  ;;  %v7061_v60 = vld [vmem:[%s11569_s6 + $0xd0] sm:$0xff] }
0x193d   : > { %7035 = vmatmul.msk.bf16.vlgmr.msra.gmra.mxu2 %vm911_vm9, %v4613_v42  ;;  %v5372_v42 = vperm.slane %v498_v2, 1 }
0x193e   : > { %v4578_v62 = vpop.f32.mrf.mxu0  ;;  %v4510_v3 = vmul.f32 %v10576_v22, %v4498_v8  ;;  %v7062_v22 = vld [vmem:[%s11569_s6 + $0xd8] sm:$0xff] }
0x193f   : > { %v4579_v44 = vadd.f32 %v4578_v62, %v10699_v34  ;;  %v5392_v54 = vpack.c.bf16 %v7062_v22, %v7061_v60 }
0x1940   : > { %v10732_v17 = vadd.f32 %v10583_v30, %v4510_v3 }
0x1941   : > { %v4604_v5 = vmax.f32 %v4579_v44, 0.0  ;;  %5403 = vmatpush.bf16.msra.mxu3 %v5392_v54 }
0x1942   : > { %v4542_v25 = vpack.c.bf16 %v10732_v17, %v10732_v17 }
0x1945   : > { %5404 = vmatpush.bf16.msra.mxu3 %v5391_v1 }
0x1946   : > { %v4580_v23 = vpop.f32.mrf.mxu0 }
0x1947   : > { %v4581_v19 = vadd.f32 %v4580_v23, %v10699_v34 }
0x1949   : > { %v4605_v9 = vmax.f32 %v4581_v19, 0.0 }
0x194b   : > { %v4614_v35 = vpack.c.bf16 %v4605_v9, %v4604_v5 }
0x194c   : > { %7034 = vmatmul.msk.bf16.gmra.mxu0 %vm519_vm0, %v4542_v25  ;;  %v5339_v30 = vpop.xlane.xlu0 %5338 }
0x194d   : > { %v5343_v12 = vmul.f32 %v5339_v30, %v11671_v45  ;;  %7036 = vmatmul.msk.bf16.gmra.mxu2 %vm911_vm9, %v4614_v35 }
0x194e   : > { %v4583_v58 = vpop.f32.mrf.mxu0 }
0x194f   : > { %v5345_v38 = vadd.f32 1e-05, %v5343_v12  ;;  %v4584_v56 = vadd.f32 %v4583_v58, %v10699_v34 }
0x1951   : > { %7817 = vrsqrt.f32 %v5345_v38  ;;  %v4606_v33 = vmax.f32 %v4584_v56, 0.0  ;;  %vm5353_vm14 = vweird.f32 %v5345_v38 }
0x1954   : > { %v5342_v61 = vpop.xlane.xlu2 %5341 }
0x1955   : > { %v5344_v11 = vmul.f32 %v5342_v61, %v11671_v45 }
0x1956   : > { %v4585_v40 = vpop.f32.mrf.mxu0 }
0x1957   : > { %v7818_v43 = vpop.eup %7817  ;;  %v5346_v18 = vadd.f32 1e-05, %v5344_v11  ;;  %v4586_v57 = vadd.f32 %v4585_v40, %v10699_v34  ;;  %v5413_v40 = vperm.slane %v10696_v41, 1  ;;  %v10789_v41 = vld [vmem:[%s11574_s11] sm:$0xff] }
0x1958   : > { %v5348_v6 = vmul.f32 %v7818_v43, %v5345_v38  ;;  %vm5354_vm12 = vweird.f32 %v7818_v43 }
0x1959   : > { %7819 = vrsqrt.f32 %v5346_v18  ;;  %v4607_v7 = vmax.f32 %v4586_v57, 0.0  ;;  %vm5355_vm15 = vmor %vm5353_vm14, %vm5354_vm12  ;;  %vm5363_vm6 = vweird.f32 %v5346_v18 }
0x195a   : > { %v5349_v36 = vmul.f32 %v7818_v43, %v5348_v6 }
0x195b   : > { %v4615_v48 = vpack.c.bf16 %v4607_v7, %v4606_v33 }
0x195c   : > { %v5350_v28 = vmul.f32 0.5, %v5349_v36  ;;  %7072 = vmatmul.msk.bf16.vlgmr.msrb.gmra.mxu0 %vm519_vm0, %v11678_v10 }
0x195d   : > { %7037 = vmatmul.msk.bf16.gmra.mxu2 %vm911_vm9, %v4615_v48 }
0x195e   : > { %v5351_v29 = vsub.f32 1.5, %v5350_v28 }
0x195f   : > { %v7820_v15 = vpop.eup %7819 }
0x1960   : > { %v5352_v13 = vmul.f32 %v7818_v43, %v5351_v29  ;;  %v5358_v4 = vmul.f32 %v7820_v15, %v5346_v18  ;;  %vm5364_vm5 = vweird.f32 %v7820_v15 }
0x1961   : > { %vm5365_vm7 = vmor %vm5363_vm6, %vm5364_vm5 }
0x1962   : > { %v5359_v63 = vmul.f32 %v7820_v15, %v5358_v4  ;;  %v5356_v50 = vsel %vm5355_vm15, %v7818_v43, %v5352_v13 }
0x1963   : > { %v5367_v27 = vmul.f32 %v5356_v50, %v10638_v52 }
0x1964   : > { %v5360_v53 = vmul.f32 0.5, %v5359_v63 }
0x1965   : > { %v5370_v8 = vmul.f32 %v5369_v46, %v5367_v27 }
0x1966   : > { %v5361_v26 = vsub.f32 1.5, %v5360_v53 }
0x1967   : > { %v10763_v44 = vadd.f32 %v5372_v42, %v5370_v8 }
0x1968   : > { %v5362_v47 = vmul.f32 %v7820_v15, %v5361_v26 }
0x196a   : > { %v5366_v55 = vsel %vm5365_vm7, %v7820_v15, %v5362_v47 }
0x196b   : > { %v5368_v62 = vmul.f32 %v5366_v55, %v10645_v0 }
0x196d   : > { %v5371_v3 = vmul.f32 %v5369_v46, %v5368_v62 }
0x196f   : > { %v10765_v23 = vadd.f32 %v5372_v42, %v5371_v3 }
0x1971   : > { %v5390_v19 = vpack.c.bf16 %v10765_v23, %v10763_v44 }
0x1973   : > { %7071 = vmatmul.msk.bf16.vlgmr.msra.gmra.mxu3 %vm519_vm0, %v5390_v19 }
0x1992   : > { %v4588_v5 = vpop.f32.mrf.mxu0 }
0x1993   : > { %v4589_v52 = vadd.f32 %v4588_v5, %v10699_v34 }
0x1995   : > { %v4608_v60 = vmax.f32 %v4589_v52, 0.0 }
0x199a   : > { %v4590_v9 = vpop.f32.mrf.mxu0 }
0x199b   : > { %v4591_v25 = vadd.f32 %v4590_v9, %v10699_v34 }
0x199d   : > { %v4609_v22 = vmax.f32 %v4591_v25, 0.0 }
0x199f   : > { %v4616_v35 = vpack.c.bf16 %v4609_v22, %v4608_v60 }
0x19a1   : > { %7038 = vmatmul.msk.bf16.gmra.mxu2 %vm911_vm9, %v4616_v35 }
0x19b9   : > { %v4593_v0 = vpop.f32.mrf.mxu0 }
0x19ba   : > { %v4594_v54 = vadd.f32 %v4593_v0, %v10699_v34 }
0x19bc   : > { %v4610_v58 = vmax.f32 %v4594_v54, 0.0 }
0x19c0   : > { %v10792_v13 = vpop.f32.mrf.mxu2 }
0x19c1   : > { %v4595_v30 = vpop.f32.mrf.mxu0 }
0x19c2   : > { %v4596_v12 = vadd.f32 %v4595_v30, %v10699_v34 }
0x19c4   : > { %v4611_v20 = vmax.f32 %v4596_v12, 0.0 }
0x19c6   : > { %v4617_v31 = vpack.c.bf16 %v4611_v20, %v4610_v58  ;;  %v11679_v20 = vld [vmem:[#allocation6_spill] sm:$0xff] }
0x19c8   : > { %7039 = vmatmul.msk.bf16.gmra.mxu2 %vm911_vm9, %v4617_v31  ;;  %v10794_v27 = vpop.f32.mrf.mxu2 }
0x19c9   : > { %v4598_v38 = vpop.f32.mrf.mxu0 }
0x19ca   : > { %v4599_v1 = vadd.f32 %v4598_v38, %v10699_v34  ;;  %v5393_v34 = vperm.slane %v10789_v41, 6 }
0x19cc   : > { %v4612_v56 = vmax.f32 %v4599_v1, 0.0 }
0x19ce   : > { %v4618_v11 = vpack.c.bf16 %v4612_v56, %v4612_v56 }
0x19d0   : > { %v10802_v47 = vpop.f32.mrf.mxu2 }
0x19d1   : > { %v4600_v61 = vpop.f32.mrf.mxu0 }
0x19d8   : > { %7040 = vmatmul.msk.bf16.gmra.mxu2 %vm911_vm9, %v4618_v11  ;;  %v10804_v55 = vpop.f32.mrf.mxu2 }
0x19d9   : > { %v5423_v43 = vpop.f32.mrf.mxu0 }
0x19da   : > { %v5424_v18 = vadd.f32 %v5423_v43, %v5413_v40 }
0x19dc   : > { %v5431_v57 = vpack.c.bf16 %v5424_v18, %v5424_v18 }
0x19de   : > { %v5441_v6 = vsel %vm575_vm1, %v5431_v57, 0  ;;  %v5481_v33 = vunpack.c.l.b16 %v5431_v57 }
0x19df   : > { %5450 = vmatpush.bf16.xpose.msra.mxu1 %v5441_v6 }
0x19e0   : > { %v10780_v7 = vpack.c.b16 %v5481_v33, %v5481_v33  ;;  %v10806_v42 = vpop.f32.mrf.mxu2 }
0x19e1   : > { %v5425_v36 = vpop.f32.mrf.mxu0 }
0x19e2   : > { %5576 = vrot.lane.b32.xlu2 %v10780_v7, %s11657_s27  ;;  %5507 = vrot.lane.b32.xlu1 %v10780_v7, %s11655_s18 }
0x19e8   : > { %v10808_v8 = vpop.f32.mrf.mxu2 }
0x19f6   : > { %v5406_v48 = vpop.f32.mrf.mxu3 }
0x19f7   : > { %v5407_v28 = vadd.f32 %v5406_v48, %v5393_v34 }
0x19f9   : > { %v5427_v29 = vmul.f32 0.35355338, %v5407_v28 }
0x19fb   : > { %v5429_v63 = vpack.c.bf16 %v5427_v29, %v5427_v29 }
0x19fd   : > { %v5434_v53 = vunpack.c.l.b16 %v5429_v63 }
0x19fe   : > { %v5408_v15 = vpop.f32.mrf.mxu3 }
0x19ff   : > { %v5409_v4 = vadd.f32 %v5408_v15, %v5393_v34 }
0x1a01   : > { %v5428_v2 = vmul.f32 0.35355338, %v5409_v4 }
0x1a03   : > { %v5430_v50 = vpack.c.bf16 %v5428_v2, %v5428_v2 }
0x1a05   : > { %v5435_v26 = vunpack.c.l.b16 %v5430_v50 }
0x1a07   : > { %v5436_v46 = vpack.c.b16 %v5435_v26, %v5434_v53 }
0x1a09   : > { %5643 = vrot.lane.b32.xlu2 %v5436_v46, %s11656_s17  ;;  %5574 = vrot.lane.b32.xlu1 %v5436_v46, %s11657_s27 }
0x1a0a   : > { %5505 = vrot.lane.b32.xlu0 %v5436_v46, %s11655_s18  ;;  %7073 = vmatmul.msk.bf16.vlgmr.msra.gmra.mxu1 %vm575_vm1, %v5436_v46 }
0x1a12   : > { %5645 = vrot.lane.b32.xlu0 %v10780_v7, %s11656_s17 }
0x1a24   : > { %v10810_v62 = vpop.f32.mrf.mxu2 }
0x1a2c   : > { %v10813_v5 = vpop.f32.mrf.mxu2 }
0x1a3c   : > { %v5577_v3 = vpop.permute.xlu2 %5576 }
0x1a3d   : > { %v5582_v19 = vsel %vm575_vm1, %v5577_v3, 0 }
0x1a3e   : > { %5591 = vmatpush.bf16.xpose.msrb.mxu1 %v5582_v19 }
0x1a4b   : > { %v10815_v52 = vpop.f32.mrf.mxu2 }
0x1a53   : > { %v10817_v9 = vpop.f32.mrf.mxu2 }
0x1a54   : > { %v5508_v25 = vpop.permute.xlu1 %5507 }
0x1a55   : > { %v5513_v60 = vsel %vm575_vm1, %v5508_v25, 0 }
0x1a56   : > { %5522 = vmatpush.bf16.xpose.msrb.mxu3 %v5513_v60 }
0x1a5b   : > { %v10820_v22 = vpop.f32.mrf.mxu2 }
0x1a63   : > { %v4678_v35 = vpop.f32.mrf.mxu2  ;;  %v5644_v1 = vpop.permute.xlu2 %5643 }
0x1a7b   : > { %v5575_v0 = vpop.permute.xlu1 %5574 }
0x1a7c   : > { %v5506_v54 = vpop.permute.xlu0 %5505  ;;  %7077 = vmatmul.msk.bf16.vlgmr.msrb.gmra.mxu1 %vm575_vm1, %v5575_v0 }
0x1a7d   : > { %7075 = vmatmul.msk.bf16.vlgmr.msrb.gmra.mxu3 %vm575_vm1, %v5506_v54 }
0x1a84   : > { %v5646_v30 = vpop.permute.xlu0 %5645 }
0x1a85   : > { %v5651_v12 = vsel %vm575_vm1, %v5646_v30, 0 }
0x1a86   : > { %5660 = vmatpush.bf16.xpose.msra.mxu3 %v5651_v12 }
0x1a87   : > { %v5452_v58 = vpop.f32.mrf.mxu1 }
0x1a88   : > { %v5453_v31 = vadd.f32 %v5452_v58, %v11679_v20 }
0x1a8a   : > { %v5457_v38 = vsel %vm575_vm1, %v5453_v31, -inf }
0x1a8b   : > { %5458 = vmax.xlane.f32.xlu0 %v5457_v38 }
0x1a8d   : > { %7079 = vmatmul.msk.bf16.vlgmr.msra.gmra.mxu3 %vm575_vm1, %v5644_v1 }
0x1a8f   : > { %v5454_v61 = vpop.f32.mrf.mxu1 }
0x1a90   : > { %v5455_v56 = vadd.f32 %v5454_v61, %v11679_v20 }
0x1a92   : > { %v5460_v11 = vsel %vm575_vm1, %v5455_v56, -inf }
0x1a93   : > { %5461 = vmax.xlane.f32.xlu1 %v5460_v11 }
0x1af9   : > { %v5593_v40 = vpop.f32.mrf.mxu1 }
0x1afa   : > { %v5594_v43 = vadd.f32 %v5593_v40, %v11679_v20 }
0x1afc   : > { %v5598_v18 = vsel %vm575_vm1, %v5594_v43, -inf }
0x1afd   : > { %5599 = vmax.xlane.f32.xlu1 %v5598_v18 }
0x1afe   : > { %v5459_v57 = vpop.xlane.xlu0 %5458 }
0x1aff   : > { %v5463_v36 = vsub.f32 %v5453_v31, %v5459_v57 }
0x1b00   : > { %v5524_v6 = vpop.f32.mrf.mxu3 }
0x1b01   : > { %v5525_v33 = vadd.f32 %v5524_v6, %v11679_v20  ;;  %v5595_v48 = vpop.f32.mrf.mxu1  ;;  %v5465_v28 = vmul.f32 1.442695, %v5463_v36 }
0x1b02   : > { %v5596_v15 = vadd.f32 %v5595_v48, %v11679_v20 }
0x1b03   : > { %v5529_v34 = vsel %vm575_vm1, %v5525_v33, -inf  ;;  %7821 = vpow2.f32 %v5465_v28 }
0x1b04   : > { %5530 = vmax.xlane.f32.xlu2 %v5529_v34  ;;  %v5601_v53 = vsel %vm575_vm1, %v5596_v15, -inf }
0x1b06   : > { %v5462_v29 = vpop.xlane.xlu1 %5461 }
0x1b07   : > { %v5464_v4 = vsub.f32 %v5455_v56, %v5462_v29 }
0x1b08   : > { %v5526_v63 = vpop.f32.mrf.mxu3 }
0x1b09   : > { %v5467_v2 = vmul.f32 1.442695, %v5464_v4  ;;  %v5527_v50 = vadd.f32 %v5526_v63, %v11679_v20  ;;  %v10838_v46 = vpop.eup %7821 }
0x1b0a   : > { %v5469_v60 = vsel %vm575_vm1, %v10838_v46, 0.0 }
0x1b0b   : > { %7823 = vpow2.f32 %v5467_v2  ;;  %v5532_v26 = vsel %vm575_vm1, %v5527_v50, -inf }
0x1b0c   : > { %5602 = vmax.xlane.f32.xlu2 %v5601_v53  ;;  %5533 = vmax.xlane.f32.xlu0 %v5532_v26 }
0x1b10   : > { %v5662_v3 = vpop.f32.mrf.mxu3 }
0x1b11   : > { %v10840_v19 = vpop.eup %7823  ;;  %v5663_v35 = vadd.f32 %v5662_v3, %v11679_v20 }
0x1b12   : > { %v5472_v25 = vsel %vm575_vm1, %v10840_v19, 0.0 }
0x1b13   : > { %v5667_v12 = vsel %vm575_vm1, %v5663_v35, -inf }
0x1b14   : > { %5473 = vadd.xlane.f32.xlu0 %v5472_v25  ;;  %5470 = vadd.xlane.f32.xlu2 %v5469_v60 }
0x1b18   : > { %v5664_v0 = vpop.f32.mrf.mxu3 }
0x1b19   : > { %v5665_v54 = vadd.f32 %v5664_v0, %v11679_v20  ;;  %v7944_v0 = vld [vmem:[%s11574_s11 + $0x8] sm:$0xff] }
0x1b1b   : > { %v5670_v30 = vsel %vm575_vm1, %v5665_v54, -inf }
0x1b1c   : > { %5671 = vmax.xlane.f32.xlu1 %v5670_v30  ;;  %5668 = vmax.xlane.f32.xlu0 %v5667_v12  ;;  %v10872_v30 = vperm.slane %v7944_v0, 3 }
0x1b1e   : > { %v4657_v12 = vadd.f32 %v10802_v47, %v10872_v30 }
0x1b30   : > { %5483 = vrot.lane.b32.xlu0 %v10780_v7, %s11664_s21 }
0x1b35   : > { %5552 = vrot.lane.b32.xlu1 %v10780_v7, %s11665_s28 }
0x1b70   : > { %v5600_v58 = vpop.xlane.xlu1 %5599 }
0x1b71   : > { %v5604_v31 = vsub.f32 %v5594_v43, %v5600_v58 }
0x1b73   : > { %v5606_v38 = vmul.f32 1.442695, %v5604_v31 }
0x1b75   : > { %7825 = vpow2.f32 %v5606_v38 }
0x1b77   : > { %v5531_v1 = vpop.xlane.xlu2 %5530 }
0x1b78   : > { %v5535_v61 = vsub.f32 %v5525_v33, %v5531_v1  ;;  %v10885_v1 = vadd.f32 %v4657_v12, %v10613_v24 }
0x1b7a   : > { %v5537_v56 = vmul.f32 1.442695, %v5535_v61 }
0x1b7b   : > { %v10854_v20 = vpop.eup %7825 }
0x1b7c   : > { %7827 = vpow2.f32 %v5537_v56  ;;  %v5610_v11 = vsel %vm575_vm1, %v10854_v20, 0.0 }
0x1b7d   : > { %5611 = vadd.xlane.f32.xlu2 %v5610_v11 }
0x1b7f   : > { %v5603_v40 = vpop.xlane.xlu2 %5602  ;;  %v5534_v18 = vpop.xlane.xlu0 %5533 }
0x1b80   : > { %v5605_v57 = vsub.f32 %v5596_v15, %v5603_v40  ;;  %v5536_v34 = vsub.f32 %v5527_v50, %v5534_v18  ;;  %v4659_v40 = vadd.f32 %v10804_v55, %v10872_v30  ;;  %v4697_v18 = vsel %vm519_vm0, %v10885_v1, 0.0 }
0x1b82   : > { %v10858_v6 = vpop.eup %7827  ;;  %v5608_v36 = vmul.f32 1.442695, %v5605_v57  ;;  %v5539_v33 = vmul.f32 1.442695, %v5536_v34  ;;  %v10896_v24 = vadd.f32 %v4659_v40, %v10616_v14 }
0x1b83   : > { %v5541_v43 = vsel %vm575_vm1, %v10858_v6, 0.0 }
0x1b84   : > { %7829 = vpow2.f32 %v5608_v36  ;;  %5542 = vadd.xlane.f32.xlu1 %v5541_v43  ;;  %v4700_v55 = vsel %vm519_vm0, %v10896_v24, 0.0  ;;  %v4664_v43 = vadd.f32 %v10808_v8, %v10872_v30 }
0x1b85   : > { %7831 = vpow2.f32 %v5539_v33 }
0x1b86   : > { %v10913_v33 = vadd.f32 %v4664_v43, %v10628_v32 }
0x1b87   : > { %v5474_v48 = vpop.xlane.xlu0 %5473  ;;  %v5471_v25 = vpop.xlane.xlu2 %5470 }
0x1b8a   : > { %v10862_v28 = vpop.eup %7829 }
0x1b8b   : > { %v5613_v29 = vsel %vm575_vm1, %v10862_v28, 0.0  ;;  %v7832_v63 = vpop.eup %7831 }
0x1b8c   : > { %5614 = vadd.xlane.f32.xlu2 %v5613_v29  ;;  %v5544_v3 = vsel %vm575_vm1, %v7832_v63, 0.0 }
0x1b8f   : > { %v5672_v4 = vpop.xlane.xlu1 %5671  ;;  %v5669_v15 = vpop.xlane.xlu0 %5668 }
0x1b90   : > { %v5674_v2 = vsub.f32 %v5665_v54, %v5672_v4  ;;  %v5673_v53 = vsub.f32 %v5663_v35, %v5669_v15 }
0x1b92   : > { %v5677_v50 = vmul.f32 1.442695, %v5674_v2  ;;  %v5675_v26 = vmul.f32 1.442695, %v5673_v53 }
0x1b94   : > { %7833 = vpow2.f32 %v5677_v50  ;;  %5545 = vadd.xlane.f32.xlu2 %v5544_v3 }
0x1b95   : > { %7835 = vpow2.f32 %v5675_v26 }
0x1b96   : > { %7837 = vrcp.f32 %v5471_v25 }
0x1b97   : > { %7839 = vrcp.f32 %v5474_v48 }
0x1b9a   : > { %v10867_v60 = vpop.eup %7833 }
0x1b9b   : > { %v10874_v54 = vpop.eup %7835  ;;  %v5682_v35 = vsel %vm575_vm1, %v10867_v60, 0.0 }
0x1b9c   : > { %5683 = vadd.xlane.f32.xlu2 %v5682_v35  ;;  %v5679_v58 = vsel %vm575_vm1, %v10874_v54, 0.0  ;;  %v7838_v31 = vpop.eup %7837 }
0x1b9d   : > { %5680 = vadd.xlane.f32.xlu0 %v5679_v58  ;;  %5690 = vrot.lane.b32.xlu1 %v10780_v7, %s11640_s29  ;;  %v7840_v38 = vpop.eup %7839  ;;  %v5477_v61 = vmul.f32 %v7838_v31, %v10838_v46 }
0x1b9e   : > { %v5478_v56 = vmul.f32 %v7840_v38, %v10840_v19  ;;  %v4662_v19 = vadd.f32 %v10806_v42, %v10872_v30  ;;  %v4706_v42 = vsel %vm519_vm0, %v10913_v33, 0.0 }
0x1ba0   : > { %v5479_v57 = vpack.c.bf16 %v5478_v56, %v5477_v61  ;;  %v10904_v34 = vadd.f32 %v4662_v19, %v10631_v59 }
0x1ba2   : > { %v5484_v11 = vpop.permute.xlu0 %5483  ;;  %v4703_v14 = vsel %vm519_vm0, %v10904_v34, 0.0 }
0x1ba3   : > { %v5489_v47 = vsel %vm612_vm2, %v5484_v11, 0 }
0x1ba4   : > { %5498 = vmatpush.bf16.msrb.mxu2 %v5489_v47 }
0x1ba5   : > { %4698 = vadd.xlane.f32.xlu0 %v4697_v18 }
0x1ba7   : > { %v5553_v36 = vpop.permute.xlu1 %5552  ;;  %7074 = vmatmul.msk.bf16.vlgmr.msrb.gmra.mxu2 %vm575_vm1, %v5479_v57 }
0x1ba8   : > { %v5558_v46 = vsel %vm612_vm2, %v5553_v36, 0 }
0x1ba9   : > { %5567 = vmatpush.bf16.msra.mxu0 %v5558_v46 }
0x1bad   : > { %4701 = vadd.xlane.f32.xlu0 %v4700_v55 }
0x1bb4   : > { %5621 = vrot.lane.b32.xlu2 %v10780_v7, %s11639_s23 }
0x1bb5   : > { %4704 = vadd.xlane.f32.xlu0 %v4703_v14  ;;  %v4654_v14 = vadd.f32 %v10794_v27, %v10872_v30 }
0x1bbd   : > { %4707 = vadd.xlane.f32.xlu0 %v4706_v42 }
0x1bf0   : > { %v5612_v48 = vpop.xlane.xlu2 %5611 }
0x1bf7   : > { %v5543_v29 = vpop.xlane.xlu1 %5542 }
0x1bf8   : > { %7841 = vrcp.f32 %v5543_v29  ;;  %v4667_v29 = vadd.f32 %v10810_v62, %v10872_v30 }
0x1bfe   : > { %v7842_v8 = vpop.eup %7841 }
0x1bff   : > { %v5615_v59 = vpop.xlane.xlu2 %5614  ;;  %v5549_v15 = vmul.f32 %v7842_v8, %v10858_v6 }
0x1c07   : > { %v5546_v4 = vpop.xlane.xlu2 %5545 }
0x1c08   : > { %7843 = vrcp.f32 %v5546_v4 }
0x1c09   : > { %7845 = vrcp.f32 %v5615_v59 }
0x1c0a   : > { %7847 = vrcp.f32 %v5612_v48  ;;  %v4681_v48 = vadd.f32 %v4654_v14, %v10593_v37 }
0x1c0c   : > { %v4694_v8 = vsel %vm519_vm0, %v4681_v48, 0.0 }
0x1c0e   : > { %v7844_v7 = vpop.eup %7843 }
0x1c0f   : > { %v5550_v2 = vmul.f32 %v7844_v7, %v7832_v63  ;;  %v5691_v53 = vpop.permute.xlu1 %5690  ;;  %v5684_v32 = vpop.xlane.xlu2 %5683  ;;  %v4686_v7 = vadd.f32 %v4667_v29, %v10670_v49  ;;  %v4669_v29 = vadd.f32 %v10813_v5, %v10872_v30 }
0x1c10   : > { %v5696_v50 = vsel %vm612_vm2, %v5691_v53, 0  ;;  %v5681_v3 = vpop.xlane.xlu0 %5680  ;;  %v7846_v25 = vpop.eup %7845  ;;  %7849 = vrcp.f32 %v5684_v32  ;;  %v7069_v32 = vld [vmem:[%s11569_s6 + $0xf0] sm:$0xff] }
0x1c11   : > { %v5551_v26 = vpack.c.bf16 %v5550_v2, %v5549_v15  ;;  %5705 = vmatpush.bf16.msrb.mxu0 %v5696_v50  ;;  %7851 = vrcp.f32 %v5681_v3  ;;  %v7848_v0 = vpop.eup %7847  ;;  %v5619_v35 = vmul.f32 %v7846_v25, %v10862_v28  ;;  %v7070_v50 = vld [vmem:[%s11569_s6 + $0xf8] sm:$0xff]  ;;  %v7068_v3 = vld [vmem:[%s11569_s6 + $0xe8] sm:$0xff] }
0x1c12   : > { %v5618_v58 = vmul.f32 %v7848_v0, %v10854_v20 }
0x1c13   : > { %7076 = vmatmul.msk.bf16.vlgmr.msra.gmra.mxu0 %vm575_vm1, %v5551_v26  ;;  %v5744_v26 = vpack.c.bf16 %v7070_v50, %v7069_v32 }
0x1c14   : > { %v5620_v38 = vpack.c.bf16 %v5619_v35, %v5618_v58 }
0x1c15   : > { %5755 = vmatpush.bf16.msra.mxu1 %v5744_v26 }
0x1c16   : > { %v7850_v63 = vpop.eup %7849 }
0x1c17   : > { %v5622_v12 = vpop.permute.xlu2 %5621  ;;  %v7852_v31 = vpop.eup %7851  ;;  %v5688_v61 = vmul.f32 %v7850_v63, %v10867_v60 }
0x1c18   : > { %v5627_v6 = vsel %vm612_vm2, %v5622_v12, 0  ;;  %v5687_v56 = vmul.f32 %v7852_v31, %v10874_v54  ;;  %v4699_v60 = vpop.xlane.xlu0 %4698  ;;  %v4652_v54 = vadd.f32 %v10792_v13, %v10872_v30 }
0x1c19   : > { %5636 = vmatpush.bf16.msra.mxu2 %v5627_v6 }
0x1c1a   : > { %v5689_v11 = vpack.c.bf16 %v5688_v61, %v5687_v56  ;;  %v4680_v42 = vadd.f32 %v4652_v54, %v10590_v16  ;;  %v4709_v16 = vsel %vm519_vm0, %v4686_v7, 0.0 }
0x1c1c   : > { %7078 = vmatmul.msk.bf16.vlgmr.msra.gmra.mxu2 %vm575_vm1, %v5620_v38  ;;  %v4691_v4 = vsel %vm519_vm0, %v4680_v42, 0.0 }
0x1c20   : > { %v4702_v59 = vpop.xlane.xlu0 %4701 }
0x1c21   : > { %v4727_v13 = vmul.f32 %v4702_v59, %v11671_v45 }
0x1c23   : > { %7080 = vmatmul.msk.bf16.vlgmr.msrb.gmra.mxu0 %vm575_vm1, %v5689_v11  ;;  %v10943_v27 = vsub.f32 %v10896_v24, %v4727_v13  ;;  %v4687_v13 = vadd.f32 %v4669_v29, %v10673_v39 }
0x1c25   : > { %v4749_v62 = vmul.f32 %v10943_v27, %v10943_v27 }
0x1c27   : > { %v4766_v53 = vsel %vm519_vm0, %v4749_v62, 0.0  ;;  %v4674_v62 = vadd.f32 %v10817_v9, %v10872_v30 }
0x1c28   : > { %v4705_v37 = vpop.xlane.xlu0 %4704 }
0x1c29   : > { %v4728_v15 = vmul.f32 %v4705_v37, %v11671_v45 }
0x1c2a   : > { %v5500_v47 = vpop.f32.mrf.mxu2 }
0x1c2b   : > { %v10950_v2 = vsub.f32 %v10904_v34, %v4728_v15  ;;  %v7067_v34 = vld [vmem:[%s11569_s6 + $0xe0] sm:$0xff]  ;;  %v4672_v15 = vadd.f32 %v10815_v52, %v10872_v30  ;;  %v4677_v52 = vadd.f32 %v10820_v22, %v10872_v30 }
0x1c2c   : > { %v5743_v25 = vpack.c.bf16 %v7068_v3, %v7067_v34  ;;  %v7088_v34 = vld [vmem:[%s11568_s5 + $0x50] sm:$0xff] }
0x1c2d   : > { %v4750_v49 = vmul.f32 %v10950_v2, %v10950_v2 }
0x1c2e   : > { %5756 = vmatpush.bf16.msra.mxu1 %v5743_v25 }
0x1c2f   : > { %v4769_v24 = vsel %vm519_vm0, %v4750_v49, 0.0  ;;  %v11009_v49 = vadd.f32 %v4672_v15, %v10719_v51  ;;  %v11025_v51 = vadd.f32 %v4677_v52, %v10732_v17  ;;  %v7089_v17 = vld [vmem:[%s11568_s5 + $0x58] sm:$0xff] }
0x1c30   : > { %v5858_v3 = vpack.c.bf16 %v7089_v17, %v7088_v34 }
0x1c31   : > { %v4715_v50 = vsel %vm519_vm0, %v11009_v49, 0.0  ;;  %v4721_v22 = vsel %vm519_vm0, %v11025_v51, 0.0 }
0x1c32   : > { %v5502_v40 = vpop.f32.mrf.mxu2  ;;  %5884 = vmatpush.bf16.msrb.mxu3 %v5858_v3 }
0x1c90   : > { %v5569_v28 = vpop.f32.mrf.mxu0 }
0x1c98   : > { %v5571_v18 = vpop.f32.mrf.mxu0 }
0x1c99   : > { %v7337_v20 = vpack.i.bf16 %v5571_v18, %v5569_v28 }
0x1c9b   : > { %7338 = vrot.lane.b32.xlu1 %v7337_v20, %s11641_s30 }
0x1c9f   : > { %v5638_v57 = vpop.f32.mrf.mxu2 }
0x1ca0   : > { %v5707_v36 = vpop.f32.mrf.mxu0 }
0x1ca7   : > { %v5640_v46 = vpop.f32.mrf.mxu2 }
0x1ca8   : > { %v7342_v19 = vpack.i.bf16 %v5640_v46, %v5638_v57  ;;  %v5709_v55 = vpop.f32.mrf.mxu0 }
0x1ca9   : > { %v7347_v43 = vpack.i.bf16 %v5709_v55, %v5707_v36 }
0x1caa   : > { %7343 = vrot.lane.b32.xlu1 %v7342_v19, %s11642_s24 }
0x1cab   : > { %7348 = vrot.lane.b32.xlu2 %v7347_v43, %s11643_s15 }
0x1cd4   : > { %4692 = vadd.xlane.f32.xlu1 %v4691_v4  ;;  %4695 = vadd.xlane.f32.xlu2 %v4694_v8 }
0x1cdc   : > { %4710 = vadd.xlane.f32.xlu2 %v4709_v16 }
0x1ce4   : > { %4767 = vadd.xlane.f32.xlu2 %v4766_v53 }
0x1cec   : > { %4770 = vadd.xlane.f32.xlu2 %v4769_v24  ;;  %v11012_v24 = vadd.f32 %v4674_v62, %v10722_v21 }
0x1cee   : > { %v4718_v26 = vsel %vm519_vm0, %v11012_v24, 0.0 }
0x1d05   : > { %v7349_v58 = vpop.permute.xlu2 %7348 }
0x1d06   : > { %v7351_v38 = vunpack.i.h.bf16 %v7349_v58  ;;  %v7350_v61 = vunpack.i.l.bf16 %v7349_v58 }
0x1d0d   : > { %v7339_v0 = vpop.permute.xlu1 %7338 }
0x1d0e   : > { %v7341_v35 = vunpack.i.h.bf16 %v7339_v0  ;;  %v7340_v12 = vunpack.i.l.bf16 %v7339_v0  ;;  %v7086_v0 = vld [vmem:[%s11568_s5 + $0x40] sm:$0xff] }
0x1d10   : > { %v5736_v56 = vsel %vm575_vm1, %v5500_v47, %v7340_v12  ;;  %v5737_v11 = vsel %vm575_vm1, %v5502_v40, %v7341_v35  ;;  %v4726_v47 = vmul.f32 %v4699_v60, %v11671_v45  ;;  %v7087_v35 = vld [vmem:[%s11568_s5 + $0x48] sm:$0xff] }
0x1d11   : > { %v5857_v12 = vpack.c.bf16 %v7087_v35, %v7086_v0 }
0x1d12   : > { %v10989_v4 = vsub.f32 %v10885_v1, %v4726_v47  ;;  %v4712_v1 = vsel %vm519_vm0, %v4687_v13, 0.0 }
0x1d13   : > { %5885 = vmatpush.bf16.msrb.mxu3 %v5857_v12 }
0x1d14   : > { %v4748_v37 = vmul.f32 %v10989_v4, %v10989_v4 }
0x1d16   : > { %v4763_v53 = vsel %vm519_vm0, %v4748_v37, 0.0 }
0x1d1c   : > { %v7344_v6 = vpop.permute.xlu1 %7343 }
0x1d1d   : > { %v7346_v63 = vunpack.i.h.bf16 %v7344_v6  ;;  %v7345_v31 = vunpack.i.l.bf16 %v7344_v6 }
0x1d1f   : > { %v5739_v28 = vsel %vm813_vm3, %v5737_v11, %v7346_v63  ;;  %v5738_v18 = vsel %vm813_vm3, %v5736_v56, %v7345_v31 }
0x1d20   : > { %v5740_v20 = vsel %vm815_vm4, %v5738_v18, %v7350_v61  ;;  %v5741_v57 = vsel %vm815_vm4, %v5739_v28, %v7351_v38 }
0x1d21   : > { %v5742_v36 = vpack.c.bf16 %v5741_v57, %v5740_v20 }
0x1d23   : > { %7081 = vmatmul.msk.bf16.vlgmr.msra.gmra.mxu1 %vm519_vm0, %v5742_v36 }
0x1d47   : > { %v4693_v46 = vpop.xlane.xlu1 %4692  ;;  %v4696_v19 = vpop.xlane.xlu2 %4695 }
0x1d48   : > { %v4724_v55 = vmul.f32 %v4693_v46, %v11671_v45  ;;  %v4725_v43 = vmul.f32 %v4696_v19, %v11671_v45  ;;  %v5745_v19 = vperm.slane %v10789_v41, 7 }
0x1d4a   : > { %v10978_v40 = vsub.f32 %v4680_v42, %v4724_v55  ;;  %v10980_v54 = vsub.f32 %v4681_v48, %v4725_v43 }
0x1d4c   : > { %v4746_v14 = vmul.f32 %v10978_v40, %v10978_v40  ;;  %v4747_v59 = vmul.f32 %v10980_v54, %v10980_v54 }
0x1d4e   : > { %v4757_v8 = vsel %vm519_vm0, %v4746_v14, 0.0  ;;  %v4760_v60 = vsel %vm519_vm0, %v4747_v59, 0.0 }
0x1d4f   : > { %4758 = vadd.xlane.f32.xlu0 %v4757_v8  ;;  %4761 = vadd.xlane.f32.xlu1 %v4760_v60  ;;  %v4711_v42 = vpop.xlane.xlu2 %4710 }
0x1d50   : > { %v4730_v48 = vmul.f32 %v4711_v42, %v11671_v45 }
0x1d52   : > { %v10995_v16 = vsub.f32 %v4686_v7, %v4730_v48  ;;  %v4708_v7 = vpop.xlane.xlu0 %4707 }
0x1d53   : > { %v4729_v32 = vmul.f32 %v4708_v7, %v11671_v45 }
0x1d54   : > { %v4752_v5 = vmul.f32 %v10995_v16, %v10995_v16 }
0x1d55   : > { %v11018_v9 = vsub.f32 %v10913_v33, %v4729_v32 }
0x1d56   : > { %v4775_v39 = vsel %vm519_vm0, %v4752_v5, 0.0 }
0x1d57   : > { %4713 = vadd.xlane.f32.xlu0 %v4712_v1  ;;  %4764 = vadd.xlane.f32.xlu1 %v4763_v53  ;;  %v4751_v21 = vmul.f32 %v11018_v9, %v11018_v9  ;;  %v4768_v33 = vpop.xlane.xlu2 %4767 }
0x1d58   : > { %4776 = vadd.xlane.f32.xlu2 %v4775_v39  ;;  %v4793_v25 = vmul.f32 %v4768_v33, %v11671_v45 }
0x1d59   : > { %v4772_v30 = vsel %vm519_vm0, %v4751_v21, 0.0 }
0x1d5a   : > { %v11045_v58 = vadd.f32 1e-05, %v4793_v25 }
0x1d5c   : > { %7853 = vrsqrt.f32 %v11045_v58 }
0x1d5f   : > { %4716 = vadd.xlane.f32.xlu0 %v4715_v50  ;;  %4719 = vadd.xlane.f32.xlu1 %v4718_v26  ;;  %v4771_v20 = vpop.xlane.xlu2 %4770  ;;  %v497_v26 = vld [vmem:[%s11571_s8 + $0x8] sm:$0x3] }
0x1d60   : > { %v4794_v29 = vmul.f32 %v4771_v20, %v11671_v45  ;;  %v11088_v25 = vperm.slane %v497_v26, 0 }
0x1d62   : > { %v11050_v11 = vpop.eup %7853  ;;  %v11066_v1 = vadd.f32 1e-05, %v4794_v29 }
0x1d63   : > { %v4843_v46 = vmul.f32 %v11050_v11, %v11045_v58  ;;  %vm4849_vm6 = vweird.f32 %v11050_v11 }
0x1d65   : > { %v4844_v42 = vmul.f32 %v11050_v11, %v4843_v46  ;;  %v11102_v46 = vperm.slane %v497_v26, 1 }
0x1d67   : > { %4722 = vadd.xlane.f32.xlu1 %v4721_v22  ;;  %4773 = vadd.xlane.f32.xlu0 %v4772_v30  ;;  %v4845_v52 = vmul.f32 0.5, %v4844_v42 }
0x1d69   : > { %v4846_v35 = vsub.f32 1.5, %v4845_v52 }
0x1d6b   : > { %v4847_v42 = vmul.f32 %v11050_v11, %v4846_v35 }
0x1da0   : > { %v5758_v43 = vpop.f32.mrf.mxu1 }
0x1da1   : > { %v5759_v48 = vadd.f32 %v5758_v43, %v5745_v19 }
0x1da3   : > { %v11072_v50 = vadd.f32 %v5759_v48, %v10763_v44 }
0x1da8   : > { %v5760_v3 = vpop.f32.mrf.mxu1 }
0x1dc2   : > { %v4762_v6 = vpop.xlane.xlu1 %4761  ;;  %v4759_v63 = vpop.xlane.xlu0 %4758 }
0x1dc3   : > { %v4791_v31 = vmul.f32 %v4762_v6, %v11671_v45  ;;  %v4790_v38 = vmul.f32 %v4759_v63, %v11671_v45 }
0x1dc5   : > { %v4802_v61 = vadd.f32 1e-05, %v4791_v31  ;;  %v4801_v56 = vadd.f32 1e-05, %v4790_v38 }
0x1dc7   : > { %7855 = vrsqrt.f32 %v4802_v61  ;;  %vm4828_vm12 = vweird.f32 %v4802_v61  ;;  %vm4818_vm15 = vweird.f32 %v4801_v56 }
0x1dc8   : > { %7857 = vrsqrt.f32 %v4801_v56 }
0x1dca   : > { %v4765_v28 = vpop.xlane.xlu1 %4764  ;;  %v4714_v18 = vpop.xlane.xlu0 %4713 }
0x1dcb   : > { %v4792_v57 = vmul.f32 %v4765_v28, %v11671_v45  ;;  %v4731_v36 = vmul.f32 %v4714_v18, %v11671_v45 }
0x1dcd   : > { %v7856_v55 = vpop.eup %7855  ;;  %v11057_v47 = vadd.f32 1e-05, %v4792_v57  ;;  %v11059_v14 = vsub.f32 %v4687_v13, %v4731_v36 }
0x1dce   : > { %v7858_v59 = vpop.eup %7857  ;;  %v4823_v8 = vmul.f32 %v7856_v55, %v4802_v61  ;;  %vm4829_vm8 = vweird.f32 %v7856_v55  ;;  %v5765_v61 = vsel %vm519_vm0, %v11072_v50, 0.0 }
0x1dcf   : > { %v4813_v60 = vmul.f32 %v7858_v59, %v4801_v56  ;;  %7859 = vrsqrt.f32 %v11057_v47  ;;  %v4753_v41 = vmul.f32 %v11059_v14, %v11059_v14  ;;  %vm4819_vm11 = vweird.f32 %v7858_v59  ;;  %vm4830_vm14 = vmor %vm4828_vm12, %vm4829_vm8 }
0x1dd0   : > { %v4824_v37 = vmul.f32 %v7856_v55, %v4823_v8  ;;  %7861 = vrsqrt.f32 %v11066_v1  ;;  %vm4820_vm5 = vmor %vm4818_vm15, %vm4819_vm11  ;;  %v5761_v56 = vadd.f32 %v5760_v3, %v5745_v19  ;;  %vm4838_vm8 = vweird.f32 %v11057_v47 }
0x1dd1   : > { %v4814_v5 = vmul.f32 %v7858_v59, %v4813_v60  ;;  %v4778_v62 = vsel %vm519_vm0, %v4753_v41, 0.0  ;;  %vm4848_vm12 = vweird.f32 %v11045_v58 }
0x1dd2   : > { %v4825_v15 = vmul.f32 0.5, %v4824_v37  ;;  %v4720_v13 = vpop.xlane.xlu1 %4719  ;;  %v4717_v53 = vpop.xlane.xlu0 %4716  ;;  %4779 = vadd.xlane.f32.xlu0 %v4778_v62  ;;  %v11116_v48 = vadd.f32 %v5761_v56, %v10765_v23 }
0x1dd3   : > { %v4815_v39 = vmul.f32 0.5, %v4814_v5  ;;  %v4733_v7 = vmul.f32 %v4720_v13, %v11671_v45  ;;  %v4732_v32 = vmul.f32 %v4717_v53, %v11671_v45 }
0x1dd4   : > { %v4826_v21 = vsub.f32 1.5, %v4825_v15 }
0x1dd5   : > { %v11077_v22 = vpop.eup %7859  ;;  %v4816_v30 = vsub.f32 1.5, %v4815_v39  ;;  %v11080_v33 = vsub.f32 %v11012_v24, %v4733_v7  ;;  %v11083_v34 = vsub.f32 %v11009_v49, %v4732_v32 }
0x1dd6   : > { %v4827_v44 = vmul.f32 %v7856_v55, %v4826_v21  ;;  %v4833_v17 = vmul.f32 %v11077_v22, %v11057_v47  ;;  %vm4839_vm7 = vweird.f32 %v11077_v22  ;;  %v5768_v47 = vsel %vm519_vm0, %v11116_v48, 0.0 }
0x1dd7   : > { %v4817_v0 = vmul.f32 %v7858_v59, %v4816_v30  ;;  %v4755_v24 = vmul.f32 %v11080_v33, %v11080_v33  ;;  %v4754_v6 = vmul.f32 %v11083_v34, %v11083_v34  ;;  %vm4840_vm11 = vmor %vm4838_vm8, %vm4839_vm7  ;;  %vm4858_vm8 = vweird.f32 %v11066_v1 }
0x1dd8   : > { %v4831_v12 = vsel %vm4830_vm14, %v7856_v55, %v4827_v44  ;;  %v4834_v49 = vmul.f32 %v11077_v22, %v4833_v17  ;;  %vm4850_vm14 = vmor %vm4848_vm12, %vm4849_vm6 }
0x1dd9   : > { %v4923_v63 = vmul.f32 %v4831_v12, %v10980_v54  ;;  %v4821_v31 = vsel %vm4820_vm5, %v7858_v59, %v4817_v0  ;;  %v4784_v38 = vsel %vm519_vm0, %v4755_v24, 0.0  ;;  %v4781_v57 = vsel %vm519_vm0, %v4754_v6, 0.0  ;;  %v7862_v59 = vpop.eup %7861 }
0x1dda   : > { %v4922_v28 = vmul.f32 %v4821_v31, %v10978_v40  ;;  %v4835_v18 = vmul.f32 0.5, %v4834_v49  ;;  %v4723_v20 = vpop.xlane.xlu1 %4722  ;;  %4785 = vadd.xlane.f32.xlu2 %v4784_v38  ;;  %v4774_v36 = vpop.xlane.xlu0 %4773  ;;  %5766 = vadd.xlane.f32.xlu0 %v5765_v61  ;;  %v4853_v5 = vmul.f32 %v7862_v59, %v11066_v1  ;;  %v4851_v62 = vsel %vm4850_vm14, %v11050_v11, %v4847_v42 }
0x1ddb   : > { %v4935_v55 = vmul.f32 %v11088_v25, %v4923_v63  ;;  %v4734_v54 = vmul.f32 %v4723_v20, %v11671_v45  ;;  %4782 = vadd.xlane.f32.xlu1 %v4781_v57  ;;  %v4795_v43 = vmul.f32 %v4774_v36, %v11671_v45  ;;  %v4925_v7 = vmul.f32 %v4851_v62, %v10943_v27  ;;  %v4777_v1 = vpop.xlane.xlu2 %4776 }
0x1ddc   : > { %v4934_v40 = vmul.f32 %v11088_v25, %v4922_v28  ;;  %v4836_v19 = vsub.f32 1.5, %v4835_v18  ;;  %v4854_v53 = vmul.f32 %v7862_v59, %v4853_v5  ;;  %vm4859_vm5 = vweird.f32 %v7862_v59 }
0x1ddd   : > { %v4947_v29 = vadd.f32 %v11102_v46, %v4935_v55  ;;  %v11112_v8 = vsub.f32 %v11025_v51, %v4734_v54  ;;  %v4806_v60 = vadd.f32 1e-05, %v4795_v43  ;;  %v4937_v30 = vmul.f32 %v11088_v25, %v4925_v7 }
0x1dde   : > { %v4946_v37 = vadd.f32 %v11102_v46, %v4934_v40  ;;  %v4837_v41 = vmul.f32 %v11077_v22, %v4836_v19  ;;  %v4855_v52 = vmul.f32 0.5, %v4854_v53  ;;  %v4796_v56 = vmul.f32 %v4777_v1, %v11671_v45 }
0x1ddf   : > { %7863 = vrsqrt.f32 %v4806_v60  ;;  %v4756_v15 = vmul.f32 %v11112_v8, %v11112_v8  ;;  %v4949_v0 = vadd.f32 %v11102_v46, %v4937_v30  ;;  %vm4868_vm6 = vweird.f32 %v4806_v60 }
0x1de0   : > { %v5851_v51 = vpack.c.bf16 %v4947_v29, %v4946_v37  ;;  %v4841_v13 = vsel %vm4840_vm11, %v11077_v22, %v4837_v41  ;;  %v4856_v44 = vsub.f32 1.5, %v4855_v52  ;;  %vm4860_vm11 = vmor %vm4858_vm8, %vm4859_vm5  ;;  %v4807_v28 = vadd.f32 1e-05, %v4796_v56 }
0x1de1   : > { %v4787_v23 = vsel %vm519_vm0, %v4756_v15, 0.0  ;;  %v4924_v39 = vmul.f32 %v4841_v13, %v10989_v4 }
0x1de2   : > { %7095 = vmatmul.msk.bf16.vlgmr.msrb.gmra.mxu3 %vm519_vm0, %v5851_v51  ;;  %4788 = vadd.xlane.f32.xlu2 %v4787_v23  ;;  %v4857_v4 = vmul.f32 %v7862_v59, %v4856_v44  ;;  %7865 = vrsqrt.f32 %v4807_v28  ;;  %vm4878_vm14 = vweird.f32 %v4807_v28 }
0x1de3   : > { %5769 = vadd.xlane.f32.xlu1 %v5768_v47  ;;  %v4936_v21 = vmul.f32 %v11088_v25, %v4924_v39 }
0x1de4   : > { %v4861_v35 = vsel %vm4860_vm11, %v7862_v59, %v4857_v4 }
0x1de5   : > { %v7864_v58 = vpop.eup %7863  ;;  %v4948_v3 = vadd.f32 %v11102_v46, %v4936_v21  ;;  %v4926_v49 = vmul.f32 %v4861_v35, %v10950_v2 }
0x1de6   : > { %v4863_v32 = vmul.f32 %v7864_v58, %v4806_v60  ;;  %vm4869_vm15 = vweird.f32 %v7864_v58 }
0x1de7   : > { %vm4870_vm7 = vmor %vm4868_vm6, %vm4869_vm15  ;;  %v5852_v27 = vpack.c.bf16 %v4949_v0, %v4948_v3  ;;  %v4938_v63 = vmul.f32 %v11088_v25, %v4926_v49 }
0x1de8   : > { %v4864_v26 = vmul.f32 %v7864_v58, %v4863_v32  ;;  %v7866_v18 = vpop.eup %7865 }
0x1de9   : > { %v4950_v38 = vadd.f32 %v11102_v46, %v4938_v63  ;;  %vm4879_vm12 = vweird.f32 %v7866_v18 }
0x1dea   : > { %v4865_v22 = vmul.f32 0.5, %v4864_v26  ;;  %vm4880_vm15 = vmor %vm4878_vm14, %vm4879_vm12 }
0x1dec   : > { %v4866_v17 = vsub.f32 1.5, %v4865_v22 }
0x1dee   : > { %v4867_v11 = vmul.f32 %v7864_v58, %v4866_v17 }
0x1df0   : > { %v4871_v24 = vsel %vm4870_vm7, %v7864_v58, %v4867_v11 }
0x1df1   : > { %v4927_v12 = vmul.f32 %v4871_v24, %v11018_v9  ;;  %v4873_v9 = vmul.f32 %v7866_v18, %v4807_v28 }
0x1df2   : > { %7096 = vmatmul.msk.bf16.gmra.mxu3 %vm519_vm0, %v5852_v27 }
0x1df3   : > { %v4939_v6 = vmul.f32 %v11088_v25, %v4927_v12  ;;  %v4874_v20 = vmul.f32 %v7866_v18, %v4873_v9 }
0x1df5   : > { %v4951_v31 = vadd.f32 %v11102_v46, %v4939_v6  ;;  %v4875_v36 = vmul.f32 0.5, %v4874_v20 }
0x1df7   : > { %v5853_v61 = vpack.c.bf16 %v4951_v31, %v4950_v38  ;;  %v4876_v54 = vsub.f32 1.5, %v4875_v36 }
0x1df9   : > { %v4877_v41 = vmul.f32 %v7866_v18, %v4876_v54 }
0x1dfb   : > { %v4881_v47 = vsel %vm4880_vm15, %v7866_v18, %v4877_v41 }
0x1dfc   : > { %v4928_v52 = vmul.f32 %v4881_v47, %v10995_v16 }
0x1dfe   : > { %v4940_v16 = vmul.f32 %v11088_v25, %v4928_v52 }
0x1e00   : > { %v4952_v38 = vadd.f32 %v11102_v46, %v4940_v16 }
0x1e02   : > { %7097 = vmatmul.msk.bf16.gmra.mxu3 %vm519_vm0, %v5853_v61 }
0x1e45   : > { %v4780_v2 = vpop.xlane.xlu0 %4779 }
0x1e46   : > { %v4797_v57 = vmul.f32 %v4780_v2, %v11671_v45 }
0x1e48   : > { %v4808_v55 = vadd.f32 1e-05, %v4797_v57  ;;  %v7945_v57 = vld [vmem:[%s11573_s10] sm:$0x3f] }
0x1e49   : > { %v11177_v36 = vperm.slane %v7945_v57, 2 }
0x1e4a   : > { %7867 = vrsqrt.f32 %v4808_v55  ;;  %vm4888_vm6 = vweird.f32 %v4808_v55 }
0x1e4d   : > { %v4786_v43 = vpop.xlane.xlu2 %4785  ;;  %v5767_v19 = vpop.xlane.xlu0 %5766 }
0x1e4e   : > { %v4799_v59 = vmul.f32 %v4786_v43, %v11671_v45  ;;  %v4783_v40 = vpop.xlane.xlu1 %4782  ;;  %v5771_v60 = vmul.f32 %v5767_v19, %v11671_v45 }
0x1e4f   : > { %v4798_v29 = vmul.f32 %v4783_v40, %v11671_v45 }
0x1e50   : > { %v4810_v42 = vadd.f32 1e-05, %v4799_v59  ;;  %v7868_v37 = vpop.eup %7867  ;;  %v11154_v15 = vsub.f32 %v11072_v50, %v5771_v60 }
0x1e51   : > { %v4809_v5 = vadd.f32 1e-05, %v4798_v29  ;;  %v4883_v51 = vmul.f32 %v7868_v37, %v4808_v55  ;;  %vm4889_vm5 = vweird.f32 %v7868_v37 }
0x1e52   : > { %7869 = vrsqrt.f32 %v4810_v42  ;;  %v5775_v13 = vmul.f32 %v11154_v15, %v11154_v15  ;;  %vm4890_vm7 = vmor %vm4888_vm6, %vm4889_vm5  ;;  %vm4908_vm12 = vweird.f32 %v4810_v42 }
0x1e53   : > { %7871 = vrsqrt.f32 %v4809_v5  ;;  %v4884_v23 = vmul.f32 %v7868_v37, %v4883_v51  ;;  %vm4898_vm15 = vweird.f32 %v4809_v5 }
0x1e54   : > { %v5777_v53 = vsel %vm519_vm0, %v5775_v13, 0.0 }
0x1e55   : > { %v4789_v62 = vpop.xlane.xlu2 %4788  ;;  %v4885_v39 = vmul.f32 0.5, %v4884_v23  ;;  %5778 = vadd.xlane.f32.xlu0 %v5777_v53 }
0x1e56   : > { %v4800_v58 = vmul.f32 %v4789_v62, %v11671_v45  ;;  %v5770_v7 = vpop.xlane.xlu1 %5769 }
0x1e57   : > { %v5772_v50 = vmul.f32 %v5770_v7, %v11671_v45  ;;  %v4886_v26 = vsub.f32 1.5, %v4885_v39 }
0x1e58   : > { %v7870_v32 = vpop.eup %7869  ;;  %v4811_v21 = vadd.f32 1e-05, %v4800_v58 }
0x1e59   : > { %v7872_v22 = vpop.eup %7871  ;;  %v4903_v30 = vmul.f32 %v7870_v32, %v4810_v42  ;;  %v11163_v44 = vsub.f32 %v11116_v48, %v5772_v50  ;;  %v4887_v17 = vmul.f32 %v7868_v37, %v4886_v26  ;;  %vm4909_vm8 = vweird.f32 %v7870_v32 }
0x1e5a   : > { %v4893_v3 = vmul.f32 %v7872_v22, %v4809_v5  ;;  %7873 = vrsqrt.f32 %v4811_v21  ;;  %vm4899_vm11 = vweird.f32 %v7872_v22  ;;  %vm4910_vm14 = vmor %vm4908_vm12, %vm4909_vm8 }
0x1e5b   : > { %v4904_v11 = vmul.f32 %v7870_v32, %v4903_v30  ;;  %v5776_v0 = vmul.f32 %v11163_v44, %v11163_v44  ;;  %v4891_v4 = vsel %vm4890_vm7, %v7868_v37, %v4887_v17  ;;  %vm4900_vm5 = vmor %vm4898_vm15, %vm4899_vm11  ;;  %vm4918_vm7 = vweird.f32 %v4811_v21 }
0x1e5c   : > { %v4894_v27 = vmul.f32 %v7872_v22, %v4893_v3  ;;  %v4929_v24 = vmul.f32 %v4891_v4, %v11059_v14  ;;  %v7082_v4 = vld [vmem:[%s11569_s6 + $0x100] sm:$0xff] }
0x1e5d   : > { %v4905_v35 = vmul.f32 0.5, %v4904_v11  ;;  %v5780_v12 = vsel %vm519_vm0, %v5776_v0, 0.0 }
0x1e5e   : > { %v4895_v48 = vmul.f32 0.5, %v4894_v27  ;;  %5781 = vadd.xlane.f32.xlu1 %v5780_v12  ;;  %v4941_v6 = vmul.f32 %v11088_v25, %v4929_v24  ;;  %v7083_v27 = vld [vmem:[%s11569_s6 + $0x108] sm:$0xff] }
0x1e5f   : > { %v4906_v49 = vsub.f32 1.5, %v4905_v35  ;;  %v5831_v16 = vpack.c.bf16 %v7083_v27, %v7082_v4 }
0x1e60   : > { %v7874_v63 = vpop.eup %7873  ;;  %v4896_v31 = vsub.f32 1.5, %v4895_v48  ;;  %v4953_v56 = vadd.f32 %v11102_v46, %v4941_v6 }
0x1e61   : > { %v4907_v61 = vmul.f32 %v7870_v32, %v4906_v49  ;;  %v4913_v1 = vmul.f32 %v7874_v63, %v4811_v21  ;;  %vm4919_vm6 = vweird.f32 %v7874_v63 }
0x1e62   : > { %v4897_v14 = vmul.f32 %v7872_v22, %v4896_v31  ;;  %v5854_v28 = vpack.c.bf16 %v4953_v56, %v4952_v38  ;;  %vm4920_vm8 = vmor %vm4918_vm7, %vm4919_vm6 }
0x1e63   : > { %v4911_v18 = vsel %vm4910_vm14, %v7870_v32, %v4907_v61  ;;  %v4914_v20 = vmul.f32 %v7874_v63, %v4913_v1 }
0x1e64   : > { %v4901_v9 = vsel %vm4900_vm5, %v7872_v22, %v4897_v14  ;;  %7098 = vmatmul.msk.bf16.gmra.mxu3 %vm519_vm0, %v5854_v28  ;;  %v4931_v55 = vmul.f32 %v4911_v18, %v11080_v33 }
0x1e65   : > { %v5887_v2 = vpop.f32.mrf.mxu3  ;;  %v4930_v54 = vmul.f32 %v4901_v9, %v11083_v34  ;;  %v4915_v43 = vmul.f32 0.5, %v4914_v20  ;;  %v499_v9 = vld [vmem:[%s11571_s8 + $0xc] sm:$0x3] }
0x1e66   : > { %v5888_v59 = vadd.f32 %v5887_v2, %v11177_v36  ;;  %v4943_v19 = vmul.f32 %v11088_v25, %v4931_v55  ;;  %v5809_v55 = vperm.slane %v499_v9, 0 }
0x1e67   : > { %v4942_v40 = vmul.f32 %v11088_v25, %v4930_v54  ;;  %v4916_v29 = vsub.f32 1.5, %v4915_v43 }
0x1e68   : > { %v5920_v42 = vpack.c.bf16 %v5888_v59, %v5888_v59  ;;  %v4955_v5 = vadd.f32 %v11102_v46, %v4943_v19 }
0x1e69   : > { %v4954_v41 = vadd.f32 %v11102_v46, %v4942_v40  ;;  %v4917_v51 = vmul.f32 %v7874_v63, %v4916_v29  ;;  %v5812_v40 = vperm.slane %v499_v9, 1 }
0x1e6a   : > { %v5947_v34 = vunpack.c.l.b16 %v5920_v42 }
0x1e6b   : > { %v5855_v23 = vpack.c.bf16 %v4955_v5, %v4954_v41  ;;  %v4921_v47 = vsel %vm4920_vm8, %v7874_v63, %v4917_v51 }
0x1e6c   : > { %v4932_v39 = vmul.f32 %v4921_v47, %v11112_v8  ;;  %v7084_v8 = vld [vmem:[%s11569_s6 + $0x110] sm:$0xff] }
0x1e6d   : > { %v5889_v60 = vpop.f32.mrf.mxu3 }
0x1e6e   : > { %v5890_v37 = vadd.f32 %v5889_v60, %v11177_v36  ;;  %v4944_v7 = vmul.f32 %v11088_v25, %v4932_v39  ;;  %v7085_v25 = vld [vmem:[%s11569_s6 + $0x118] sm:$0xff] }
0x1e6f   : > { %v5832_v11 = vpack.c.bf16 %v7085_v25, %v7084_v8 }
0x1e70   : > { %v5921_v33 = vpack.c.bf16 %v5890_v37, %v5890_v37  ;;  %v4956_v26 = vadd.f32 %v11102_v46, %v4944_v7 }
0x1e71   : > { %5843 = vmatpush.bf16.msrb.mxu2 %v5832_v11 }
0x1e72   : > { %v5948_v13 = vunpack.c.l.b16 %v5921_v33  ;;  %v5856_v17 = vpack.c.bf16 %v4956_v26, %v4956_v26 }
0x1e74   : > { %v11187_v62 = vpack.c.b16 %v5948_v13, %v5947_v34  ;;  %7099 = vmatmul.msk.bf16.gmra.mxu3 %vm519_vm0, %v5855_v23 }
0x1e75   : > { %v5892_v53 = vpop.f32.mrf.mxu3  ;;  %5844 = vmatpush.bf16.msrb.mxu2 %v5831_v16 }
0x1e76   : > { %v5893_v58 = vadd.f32 %v5892_v53, %v11177_v36 }
0x1e78   : > { %v5922_v32 = vpack.c.bf16 %v5893_v58, %v5893_v58 }
0x1e7a   : > { %v5949_v22 = vunpack.c.l.b16 %v5922_v32 }
0x1e7d   : > { %v5894_v50 = vpop.f32.mrf.mxu3 }
0x1e7e   : > { %v5895_v52 = vadd.f32 %v5894_v50, %v11177_v36 }
0x1e80   : > { %v5923_v21 = vpack.c.bf16 %v5895_v52, %v5895_v52 }
0x1e82   : > { %v5950_v30 = vunpack.c.l.b16 %v5923_v21 }
0x1e84   : > { %v11195_v3 = vpack.c.b16 %v5950_v30, %v5949_v22  ;;  %7100 = vmatmul.msk.bf16.gmra.mxu3 %vm519_vm0, %v5856_v17 }
0x1e85   : > { %v5897_v63 = vpop.f32.mrf.mxu3 }
0x1e86   : > { %v5898_v25 = vadd.f32 %v5897_v63, %v11177_v36  ;;  %v5968_v63 = vsel %vm575_vm1, %v11187_v62, 0 }
0x1e88   : > { %v5924_v27 = vpack.c.bf16 %v5898_v25, %v5898_v25 }
0x1e8d   : > { %v5899_v18 = vpop.f32.mrf.mxu3 }
0x1e8e   : > { %v5900_v17 = vadd.f32 %v5899_v18, %v11177_v36 }
0x1ec8   : > { %v5779_v0 = vpop.xlane.xlu0 %5778 }
0x1ec9   : > { %v5783_v46 = vmul.f32 %v5779_v0, %v11671_v45  ;;  %v5925_v0 = vpack.c.bf16 %v5900_v17, %v5900_v17 }
0x1ecb   : > { %v5785_v24 = vadd.f32 1e-05, %v5783_v46 }
0x1ecd   : > { %7875 = vrsqrt.f32 %v5785_v24  ;;  %vm5793_vm12 = vweird.f32 %v5785_v24 }
0x1ed1   : > { %v5782_v35 = vpop.xlane.xlu1 %5781 }
0x1ed2   : > { %v5784_v12 = vmul.f32 %v5782_v35, %v11671_v45 }
0x1ed3   : > { %v7876_v48 = vpop.eup %7875 }
0x1ed4   : > { %v5786_v49 = vadd.f32 1e-05, %v5784_v12  ;;  %v5788_v6 = vmul.f32 %v7876_v48, %v5785_v24  ;;  %vm5794_vm11 = vweird.f32 %v7876_v48  ;;  %v5951_v24 = vunpack.c.l.b16 %v5924_v27 }
0x1ed5   : > { %vm5795_vm14 = vmor %vm5793_vm12, %vm5794_vm11 }
0x1ed6   : > { %7877 = vrsqrt.f32 %v5786_v49  ;;  %v5789_v31 = vmul.f32 %v7876_v48, %v5788_v6  ;;  %vm5803_vm5 = vweird.f32 %v5786_v49  ;;  %v5971_v6 = vsel %vm575_vm1, %v11195_v3, 0 }
0x1ed8   : > { %v5790_v38 = vmul.f32 0.5, %v5789_v31 }
0x1eda   : > { %v5791_v61 = vsub.f32 1.5, %v5790_v38 }
0x1edc   : > { %v7878_v1 = vpop.eup %7877  ;;  %v5792_v56 = vmul.f32 %v7876_v48, %v5791_v61  ;;  %v11297_v61 = vld [vmem:[%s11574_s11 + $0x8] sm:$0xff] }
0x1edd   : > { %v5798_v14 = vmul.f32 %v7878_v1, %v5786_v49  ;;  %vm5804_vm15 = vweird.f32 %v7878_v1 }
0x1ede   : > { %v5796_v20 = vsel %vm5795_vm14, %v7876_v48, %v5792_v56  ;;  %vm5805_vm6 = vmor %vm5803_vm5, %vm5804_vm15 }
0x1edf   : > { %v5799_v28 = vmul.f32 %v7878_v1, %v5798_v14  ;;  %v5807_v54 = vmul.f32 %v5796_v20, %v11154_v15 }
0x1ee1   : > { %v5800_v2 = vmul.f32 0.5, %v5799_v28  ;;  %v5810_v19 = vmul.f32 %v5809_v55, %v5807_v54 }
0x1ee3   : > { %v5801_v57 = vsub.f32 1.5, %v5800_v2  ;;  %v11217_v37 = vadd.f32 %v5812_v40, %v5810_v19 }
0x1ee5   : > { %v5802_v43 = vmul.f32 %v7878_v1, %v5801_v57 }
0x1ee7   : > { %v5806_v59 = vsel %vm5805_vm6, %v7878_v1, %v5802_v43  ;;  %v5902_v60 = vpop.f32.mrf.mxu3  ;;  %v5833_v1 = vperm.slane %v11297_v61, 0 }
0x1ee8   : > { %v5808_v29 = vmul.f32 %v5806_v59, %v11163_v44  ;;  %v5903_v5 = vadd.f32 %v5902_v60, %v11177_v36 }
0x1eea   : > { %v5811_v42 = vmul.f32 %v5809_v55, %v5808_v29  ;;  %v5926_v33 = vpack.c.bf16 %v5903_v5, %v5903_v5 }
0x1eec   : > { %v11219_v41 = vadd.f32 %v5812_v40, %v5811_v42  ;;  %v5953_v23 = vunpack.c.l.b16 %v5926_v33 }
0x1eee   : > { %v5830_v51 = vpack.c.bf16 %v11219_v41, %v11217_v37 }
0x1eef   : > { %v5904_v15 = vpop.f32.mrf.mxu3 }
0x1ef0   : > { %7094 = vmatmul.msk.bf16.vlgmr.msrb.gmra.mxu2 %vm519_vm0, %v5830_v51  ;;  %v5905_v34 = vadd.f32 %v5904_v15, %v11177_v36 }
0x1ef2   : > { %v5927_v13 = vpack.c.bf16 %v5905_v34, %v5905_v34 }
0x1ef4   : > { %v5954_v44 = vunpack.c.l.b16 %v5927_v13 }
0x1ef6   : > { %v11226_v47 = vpack.c.b16 %v5954_v44, %v5953_v23 }
0x1ef7   : > { %v5907_v53 = vpop.f32.mrf.mxu3 }
0x1ef8   : > { %6067 = vrot.lane.b32.xlu1 %v11226_v47, %s11655_s18  ;;  %v5908_v39 = vadd.f32 %v5907_v53, %v11177_v36  ;;  %v5977_v48 = vsel %vm575_vm1, %v11226_v47, 0 }
0x1efa   : > { %v5928_v7 = vpack.c.bf16 %v5908_v39, %v5908_v39 }
0x1efc   : > { %v5955_v52 = vunpack.c.l.b16 %v5928_v7 }
0x1eff   : > { %v5909_v58 = vpop.f32.mrf.mxu3 }
0x1f00   : > { %v5910_v50 = vadd.f32 %v5909_v58, %v11177_v36 }
0x1f02   : > { %v5929_v32 = vpack.c.bf16 %v5910_v50, %v5910_v50 }
0x1f04   : > { %v5956_v26 = vunpack.c.l.b16 %v5929_v32 }
0x1f06   : > { %v11232_v21 = vpack.c.b16 %v5956_v26, %v5955_v52 }
0x1f07   : > { %v5912_v22 = vpop.f32.mrf.mxu3 }
0x1f08   : > { %v5913_v30 = vadd.f32 %v5912_v22, %v11177_v36  ;;  %6178 = vrot.lane.b32.xlu1 %v11232_v21, %s11657_s27  ;;  %6069 = vrot.lane.b32.xlu0 %v11232_v21, %s11655_s18  ;;  %v5952_v36 = vunpack.c.l.b16 %v5925_v0  ;;  %v5980_v12 = vsel %vm575_vm1, %v11232_v21, 0 }
0x1f0a   : > { %v5930_v8 = vpack.c.bf16 %v5913_v30, %v5913_v30  ;;  %v11251_v35 = vpack.c.b16 %v5952_v36, %v5951_v24 }
0x1f0c   : > { %v5957_v11 = vunpack.c.l.b16 %v5930_v8  ;;  %v5974_v49 = vsel %vm575_vm1, %v11251_v35, 0 }
0x1f0e   : > { %v11241_v46 = vpack.c.b16 %v5957_v11, %v5957_v11 }
0x1f0f   : > { %v5914_v4 = vpop.f32.mrf.mxu3 }
0x1f10   : > { %6071 = vrot.lane.b32.xlu2 %v11241_v46, %s11655_s18  ;;  %6176 = vrot.lane.b32.xlu1 %v11226_v47, %s11657_s27  ;;  %v5983_v16 = vsel %vm575_vm1, %v11241_v46, 0 }
0x1f11   : > { %6180 = vrot.lane.b32.xlu0 %v11241_v46, %s11657_s27  ;;  %5987 = vmatpush.bf16.xpose.msra.mxu0 %v5983_v16 }
0x1f18   : > { %6065 = vrot.lane.b32.xlu2 %v11251_v35, %s11655_s18  ;;  %6174 = vrot.lane.b32.xlu1 %v11251_v35, %s11657_s27 }
0x1f19   : > { %6063 = vrot.lane.b32.xlu0 %v11195_v3, %s11655_s18  ;;  %5988 = vmatpush.bf16.xpose.msra.mxu0 %v5980_v12 }
0x1f20   : > { %6289 = vrot.lane.b32.xlu2 %v11241_v46, %s11656_s17  ;;  %6172 = vrot.lane.b32.xlu1 %v11195_v3, %s11657_s27 }
0x1f21   : > { %6061 = vrot.lane.b32.xlu0 %v11187_v62, %s11655_s18  ;;  %5989 = vmatpush.bf16.xpose.msra.mxu0 %v5977_v48 }
0x1f28   : > { %6287 = vrot.lane.b32.xlu2 %v11232_v21, %s11656_s17  ;;  %6281 = vrot.lane.b32.xlu1 %v11195_v3, %s11656_s17 }
0x1f29   : > { %5990 = vmatpush.bf16.xpose.msra.mxu0 %v5974_v49 }
0x1f30   : > { %6285 = vrot.lane.b32.xlu2 %v11226_v47, %s11656_s17 }
0x1f31   : > { %5991 = vmatpush.bf16.xpose.msra.mxu0 %v5971_v6 }
0x1f38   : > { %6170 = vrot.lane.b32.xlu2 %v11187_v62, %s11657_s27 }
0x1f39   : > { %5992 = vmatpush.bf16.xpose.msra.mxu0 %v5968_v63 }
0x1f40   : > { %6279 = vrot.lane.b32.xlu2 %v11187_v62, %s11656_s17 }
0x1f48   : > { %6030 = vrot.lane.b32.xlu2 %v11232_v21, %s11664_s21 }
0x1f50   : > { %6135 = vrot.lane.b32.xlu2 %v11251_v35, %s11665_s28 }
0x1f58   : > { %6250 = vrot.lane.b32.xlu2 %v11241_v46, %s11639_s23 }
0x1f60   : > { %6133 = vrot.lane.b32.xlu2 %v11195_v3, %s11665_s28 }
0x1f6a   : > { %v6072_v31 = vpop.permute.xlu2 %6071  ;;  %v6068_v28 = vpop.permute.xlu1 %6067 }
0x1f6b   : > { %v6092_v38 = vsel %vm575_vm1, %v6072_v31, 0  ;;  %v6086_v42 = vsel %vm575_vm1, %v6068_v28, 0 }
0x1f6c   : > { %6096 = vmatpush.bf16.xpose.msra.mxu2 %v6092_v38 }
0x1f72   : > { %v6066_v59 = vpop.permute.xlu2 %6065 }
0x1f73   : > { %v5846_v56 = vpop.f32.mrf.mxu2  ;;  %v6083_v33 = vsel %vm575_vm1, %v6066_v59, 0 }
0x1f74   : > { %v5847_v14 = vadd.f32 %v5846_v56, %v5833_v1  ;;  %v1050_v56 = vsel %vm519_vm0, %v11678_v10, 0 }
0x1f76   : > { %v5916_v18 = vmul.f32 0.35355338, %v5847_v14 }
0x1f78   : > { %v5918_v55 = vpack.c.bf16 %v5916_v18, %v5916_v18 }
0x1f7a   : > { %v6070_v20 = vpop.permute.xlu0 %6069  ;;  %v5933_v40 = vunpack.c.l.b16 %v5918_v55  ;;  %v6179_v29 = vpop.permute.xlu1 %6178 }
0x1f7b   : > { %v5848_v9 = vpop.f32.mrf.mxu2  ;;  %v6089_v57 = vsel %vm575_vm1, %v6070_v20, 0  ;;  %v6290_v15 = vpop.permute.xlu2 %6289  ;;  %v6198_v34 = vsel %vm575_vm1, %v6179_v29, 0 }
0x1f7c   : > { %v5849_v2 = vadd.f32 %v5848_v9, %v5833_v1  ;;  %6097 = vmatpush.bf16.xpose.msra.mxu2 %v6089_v57  ;;  %v6310_v52 = vsel %vm575_vm1, %v6290_v15, 0 }
0x1f7e   : > { %v5917_v54 = vmul.f32 0.35355338, %v5849_v2 }
0x1f80   : > { %v5919_v43 = vpack.c.bf16 %v5917_v54, %v5917_v54 }
0x1f82   : > { %v5934_v19 = vunpack.c.l.b16 %v5919_v43  ;;  %v6177_v13 = vpop.permute.xlu1 %6176 }
0x1f83   : > { %v6181_v60 = vpop.permute.xlu0 %6180  ;;  %v6195_v44 = vsel %vm575_vm1, %v6177_v13, 0  ;;  %v6288_v39 = vpop.permute.xlu2 %6287 }
0x1f84   : > { %v5935_v5 = vpack.c.b16 %v5934_v19, %v5933_v40  ;;  %v6201_v51 = vsel %vm575_vm1, %v6181_v60, 0  ;;  %6098 = vmatpush.bf16.xpose.msra.mxu2 %v6086_v42  ;;  %v6307_v17 = vsel %vm575_vm1, %v6288_v39, 0 }
0x1f85   : > { %6205 = vmatpush.bf16.xpose.msrb.mxu0 %v6201_v51 }
0x1f86   : > { %6277 = vrot.lane.b32.xlu1 %v5935_v5, %s11656_s17  ;;  %6059 = vrot.lane.b32.xlu0 %v5935_v5, %s11655_s18 }
0x1f87   : > { %7101 = vmatmul.msk.bf16.vlgmr.msra.gmra.mxu0 %vm575_vm1, %v5935_v5 }
0x1f8a   : > { %v6175_v58 = vpop.permute.xlu1 %6174 }
0x1f8b   : > { %v6064_v23 = vpop.permute.xlu0 %6063  ;;  %v6192_v50 = vsel %vm575_vm1, %v6175_v58, 0  ;;  %v6286_v26 = vpop.permute.xlu2 %6285 }
0x1f8c   : > { %6099 = vmatpush.bf16.xpose.msra.mxu2 %v6083_v33  ;;  %v6080_v53 = vsel %vm575_vm1, %v6064_v23, 0  ;;  %v6304_v11 = vsel %vm575_vm1, %v6286_v26, 0 }
0x1f8d   : > { %6206 = vmatpush.bf16.xpose.msrb.mxu0 %v6198_v34 }
0x1f8e   : > { %6141 = vrot.lane.b32.xlu1 %v11241_v46, %s11665_s28  ;;  %6283 = vrot.lane.b32.xlu0 %v11251_v35, %s11656_s17 }
0x1f92   : > { %v6173_v22 = vpop.permute.xlu1 %6172 }
0x1f93   : > { %v6062_v7 = vpop.permute.xlu0 %6061  ;;  %v6189_v30 = vsel %vm575_vm1, %v6173_v22, 0  ;;  %v6171_v8 = vpop.permute.xlu2 %6170 }
0x1f94   : > { %6100 = vmatpush.bf16.xpose.msra.mxu2 %v6080_v53  ;;  %v6077_v32 = vsel %vm575_vm1, %v6062_v7, 0  ;;  %v6186_v25 = vsel %vm575_vm1, %v6171_v8, 0 }
0x1f95   : > { %6207 = vmatpush.bf16.xpose.msrb.mxu0 %v6195_v44 }
0x1f96   : > { %6137 = vrot.lane.b32.xlu1 %v11226_v47, %s11665_s28  ;;  %6168 = vrot.lane.b32.xlu0 %v5935_v5, %s11657_s27 }
0x1f9a   : > { %v6282_v24 = vpop.permute.xlu1 %6281 }
0x1f9b   : > { %v6298_v48 = vsel %vm575_vm1, %v6282_v24, 0  ;;  %v6280_v49 = vpop.permute.xlu2 %6279 }
0x1f9c   : > { %6101 = vmatpush.bf16.xpose.msra.mxu2 %v6077_v32  ;;  %v6295_v38 = vsel %vm575_vm1, %v6280_v49, 0 }
0x1f9d   : > { %6208 = vmatpush.bf16.xpose.msrb.mxu0 %v6192_v50 }
0x1f9e   : > { %6032 = vrot.lane.b32.xlu0 %v11241_v46, %s11664_s21 }
0x1fa3   : > { %v6031_v14 = vpop.permute.xlu2 %6030 }
0x1fa4   : > { %6314 = vmatpush.bf16.xpose.msrb.mxu2 %v6310_v52 }
0x1fa5   : > { %6209 = vmatpush.bf16.xpose.msrb.mxu0 %v6189_v30 }
0x1fa6   : > { %6028 = vrot.lane.b32.xlu0 %v11226_v47, %s11664_s21 }
0x1fab   : > { %v6136_v57 = vpop.permute.xlu2 %6135 }
0x1fac   : > { %6315 = vmatpush.bf16.xpose.msrb.mxu2 %v6307_v17 }
0x1fad   : > { %6210 = vmatpush.bf16.xpose.msrb.mxu0 %v6186_v25 }
0x1fae   : > { %6026 = vrot.lane.b32.xlu0 %v11251_v35, %s11664_s21 }
0x1fb3   : > { %v11348_v43 = vpop.permute.xlu2 %6250 }
0x1fb4   : > { %6316 = vmatpush.bf16.xpose.msrb.mxu2 %v6304_v11 }
0x1fb6   : > { %6024 = vrot.lane.b32.xlu0 %v11195_v3, %s11664_s21 }
0x1fbb   : > { %v6134_v40 = vpop.permute.xlu2 %6133 }
0x1fbe   : > { %6022 = vrot.lane.b32.xlu0 %v11187_v62, %s11664_s21 }
0x1fc6   : > { %6139 = vrot.lane.b32.xlu0 %v11232_v21, %s11665_s28 }
0x1ff8   : > { %v6060_v0 = vpop.permute.xlu0 %6059  ;;  %v6278_v28 = vpop.permute.xlu1 %6277 }
0x1ff9   : > { %7103 = vmatmul.msk.bf16.vlgmr.msra.gmra.mxu2 %vm575_vm1, %v6060_v0 }
0x2000   : > { %v6284_v4 = vpop.permute.xlu0 %6283  ;;  %v6142_v2 = vpop.permute.xlu1 %6141 }
0x2001   : > { %v6301_v27 = vsel %vm575_vm1, %v6284_v4, 0  ;;  %v6152_v54 = vsel %vm612_vm2, %v6142_v2, 0 }
0x2002   : > { %6317 = vmatpush.bf16.xpose.msrb.mxu2 %v6301_v27 }
0x2004   : > { %v5994_v16 = vpop.f32.mrf.mxu0 }
0x2005   : > { %v5999_v36 = vsel %vm2909_vm10, %v5994_v16, -inf }
0x2006   : > { %6000 = vmax.xlane.f32.xlu0 %v5999_v36 }
0x2008   : > { %v6169_v12 = vpop.permute.xlu0 %6168  ;;  %v6138_v59 = vpop.permute.xlu1 %6137 }
0x2009   : > { %7105 = vmatmul.msk.bf16.vlgmr.msrb.gmra.mxu0 %vm575_vm1, %v6169_v12 }
0x200a   : > { %6318 = vmatpush.bf16.xpose.msrb.mxu2 %v6298_v48 }
0x200c   : > { %v5996_v6 = vpop.f32.mrf.mxu0 }
0x200d   : > { %v6002_v63 = vsel %vm2909_vm10, %v5996_v6, -inf }
0x200e   : > { %6003 = vmax.xlane.f32.xlu2 %v6002_v63 }
0x2010   : > { %v6033_v31 = vpop.permute.xlu0 %6032 }
0x2011   : > { %v6043_v1 = vsel %vm612_vm2, %v6033_v31, 0 }
0x2012   : > { %6047 = vmatpush.bf16.msrb.mxu1 %v6043_v1  ;;  %6319 = vmatpush.bf16.xpose.msrb.mxu2 %v6295_v38 }
0x2016   : > { %6048 = vmatpush.bf16.msrb.mxu1 %v6031_v14 }
0x2018   : > { %v6029_v18 = vpop.permute.xlu0 %6028 }
0x2019   : > { %7107 = vmatmul.msk.bf16.vlgmr.msrb.gmra.mxu2 %vm575_vm1, %v6278_v28 }
0x201a   : > { %6612 = vmatpush.bf16.xpose.msra.mxu2 %v1050_v56  ;;  %6049 = vmatpush.bf16.msrb.mxu1 %v6029_v18 }
0x2020   : > { %v6027_v9 = vpop.permute.xlu0 %6026 }
0x2021   : > { %6050 = vmatpush.bf16.msrb.mxu1 %v6027_v9 }
0x2028   : > { %v6025_v20 = vpop.permute.xlu0 %6024 }
0x2029   : > { %6051 = vmatpush.bf16.msrb.mxu1 %v6025_v20 }
0x2030   : > { %v6023_v55 = vpop.permute.xlu0 %6022 }
0x2031   : > { %6052 = vmatpush.bf16.msrb.mxu1 %v6023_v55 }
0x2035   : > { %6156 = vmatpush.bf16.msra.mxu1 %v6152_v54 }
0x2038   : > { %v6140_v10 = vpop.permute.xlu0 %6139 }
0x2039   : > { %6157 = vmatpush.bf16.msra.mxu1 %v6140_v10 }
0x203d   : > { %6158 = vmatpush.bf16.msra.mxu1 %v6138_v59 }
0x2041   : > { %6159 = vmatpush.bf16.msra.mxu1 %v6136_v57 }
0x2045   : > { %6160 = vmatpush.bf16.msra.mxu1 %v6134_v40 }
0x2079   : > { %v6001_v60 = vpop.xlane.xlu0 %6000 }
0x207a   : > { %v6005_v51 = vsub.f32 %v5994_v16, %v6001_v60 }
0x207c   : > { %v6103_v19 = vpop.f32.mrf.mxu2  ;;  %v6007_v34 = vmul.f32 1.442695, %v6005_v51 }
0x207d   : > { %v6108_v29 = vsel %vm2909_vm10, %v6103_v19, -inf }
0x207e   : > { %6109 = vmax.xlane.f32.xlu1 %v6108_v29  ;;  %7879 = vpow2.f32 %v6007_v34 }
0x2081   : > { %v6004_v39 = vpop.xlane.xlu2 %6003 }
0x2082   : > { %v6006_v58 = vsub.f32 %v5996_v6, %v6004_v39 }
0x2084   : > { %v6105_v42 = vpop.f32.mrf.mxu2  ;;  %v11354_v44 = vpop.eup %7879  ;;  %v6009_v7 = vmul.f32 1.442695, %v6006_v58 }
0x2085   : > { %v6111_v5 = vsel %vm2909_vm10, %v6105_v42, -inf  ;;  %v6011_v53 = vsel %vm2909_vm10, %v11354_v44, 0.0 }
0x2086   : > { %6112 = vmax.xlane.f32.xlu0 %v6111_v5  ;;  %v6212_v15 = vpop.f32.mrf.mxu0  ;;  %7881 = vpow2.f32 %v6009_v7 }
0x2087   : > { %v6217_v33 = vsel %vm2909_vm10, %v6212_v15, -inf }
0x2088   : > { %6218 = vmax.xlane.f32.xlu2 %v6217_v33 }
0x208c   : > { %v7882_v50 = vpop.eup %7881 }
0x208d   : > { %v6014_v32 = vsel %vm2909_vm10, %v7882_v50, 0.0 }
0x208e   : > { %v6214_v13 = vpop.f32.mrf.mxu0 }
0x208f   : > { %v6220_v23 = vsel %vm2909_vm10, %v6214_v13, -inf }
0x2090   : > { %6221 = vmax.xlane.f32.xlu1 %v6220_v23 }
0x2098   : > { %6012 = vadd.xlane.f32.xlu1 %v6011_v53 }
0x209a   : > { %6131 = vrot.lane.b32.xlu0 %v11187_v62, %s11665_s28 }
0x209c   : > { %v6321_v22 = vpop.f32.mrf.mxu2 }
0x20a0   : > { %6246 = vrot.lane.b32.xlu2 %v11226_v47, %s11639_s23 }
0x20a4   : > { %v6323_v16 = vpop.f32.mrf.mxu2 }
0x20a5   : > { %v6329_v36 = vsel %vm2909_vm10, %v6323_v16, -inf }
0x20a8   : > { %6357 = vrot.lane.b32.xlu2 %v11232_v21, %s11640_s29 }
0x20b1   : > { %6248 = vrot.lane.b32.xlu1 %v11232_v21, %s11639_s23 }
0x20b9   : > { %6244 = vrot.lane.b32.xlu1 %v11251_v35, %s11639_s23 }
0x20c1   : > { %6359 = vrot.lane.b32.xlu1 %v11241_v46, %s11640_s29  ;;  %v6326_v46 = vsel %vm2909_vm10, %v6321_v22, -inf }
0x20c9   : > { %6242 = vrot.lane.b32.xlu1 %v11195_v3, %s11639_s23 }
0x20d1   : > { %6015 = vadd.xlane.f32.xlu2 %v6014_v32  ;;  %6240 = vrot.lane.b32.xlu1 %v11187_v62, %s11639_s23 }
0x20f1   : > { %v6110_v21 = vpop.xlane.xlu1 %6109 }
0x20f2   : > { %v6114_v52 = vsub.f32 %v6103_v19, %v6110_v21 }
0x20f4   : > { %v6116_v26 = vmul.f32 1.442695, %v6114_v52 }
0x20f6   : > { %7883 = vpow2.f32 %v6116_v26 }
0x20f9   : > { %v6113_v30 = vpop.xlane.xlu0 %6112 }
0x20fa   : > { %v6115_v17 = vsub.f32 %v6105_v42, %v6113_v30 }
0x20fb   : > { %v6219_v8 = vpop.xlane.xlu2 %6218  ;;  %6327 = vmax.xlane.f32.xlu1 %v6326_v46 }
0x20fc   : > { %v11376_v25 = vpop.eup %7883  ;;  %v6223_v11 = vsub.f32 %v6212_v15, %v6219_v8  ;;  %v6118_v0 = vmul.f32 1.442695, %v6115_v17 }
0x20fd   : > { %v6120_v4 = vsel %vm2909_vm10, %v11376_v25, 0.0 }
0x20fe   : > { %v6225_v27 = vmul.f32 1.442695, %v6223_v11  ;;  %6121 = vadd.xlane.f32.xlu0 %v6120_v4 }
0x2100   : > { %7885 = vpow2.f32 %v6225_v27 }
0x2101   : > { %7887 = vpow2.f32 %v6118_v0 }
0x2103   : > { %v6222_v24 = vpop.xlane.xlu1 %6221  ;;  %6330 = vmax.xlane.f32.xlu1 %v6329_v36  ;;  %v6247_v14 = vpop.permute.xlu2 %6246 }
0x2104   : > { %v6224_v12 = vsub.f32 %v6214_v13, %v6222_v24 }
0x2106   : > { %v11381_v48 = vpop.eup %7885  ;;  %v6227_v49 = vmul.f32 1.442695, %v6224_v12 }
0x2107   : > { %v7888_v6 = vpop.eup %7887  ;;  %v6229_v63 = vsel %vm2909_vm10, %v11381_v48, 0.0 }
0x2108   : > { %7889 = vpow2.f32 %v6227_v49  ;;  %6230 = vadd.xlane.f32.xlu2 %v6229_v63  ;;  %v6123_v31 = vsel %vm2909_vm10, %v7888_v6, 0.0 }
0x210b   : > { %6124 = vadd.xlane.f32.xlu1 %v6123_v31  ;;  %v6013_v28 = vpop.xlane.xlu1 %6012  ;;  %v6358_v18 = vpop.permute.xlu2 %6357 }
0x210c   : > { %v6132_v38 = vpop.permute.xlu0 %6131  ;;  %7891 = vrcp.f32 %v6013_v28 }
0x210d   : > { %6161 = vmatpush.bf16.msra.mxu1 %v6132_v38 }
0x210e   : > { %v11386_v1 = vpop.eup %7889 }
0x210f   : > { %v6232_v56 = vsel %vm2909_vm10, %v11386_v1, 0.0 }
0x2110   : > { %6233 = vadd.xlane.f32.xlu0 %v6232_v56  ;;  %v7092_v56 = vld [vmem:[%s11569_s6 + $0x130] sm:$0xff] }
0x2112   : > { %v7892_v57 = vpop.eup %7891 }
0x2113   : > { %v6019_v54 = vmul.f32 %v7892_v57, %v11354_v44  ;;  %v7091_v57 = vld [vmem:[%s11569_s6 + $0x128] sm:$0xff] }
0x2120   : > { %6351 = vrot.lane.b32.xlu2 %v11195_v3, %s11640_s29 }
0x2123   : > { %v6249_v9 = vpop.permute.xlu1 %6248 }
0x2124   : > { %6355 = vrot.lane.b32.xlu1 %v11226_v47, %s11640_s29  ;;  %v6261_v47 = vsel %vm612_vm2, %v11348_v43, 0 }
0x2128   : > { %6349 = vrot.lane.b32.xlu2 %v11187_v62, %s11640_s29 }
0x212b   : > { %v6245_v2 = vpop.permute.xlu1 %6244 }
0x2133   : > { %v6360_v59 = vpop.permute.xlu1 %6359 }
0x2134   : > { %v6370_v32 = vsel %vm612_vm2, %v6360_v59, 0 }
0x213b   : > { %v6243_v62 = vpop.permute.xlu1 %6242 }
0x2143   : > { %v6241_v40 = vpop.permute.xlu1 %6240 }
0x2144   : > { %v6016_v20 = vpop.xlane.xlu2 %6015 }
0x2145   : > { %7893 = vrcp.f32 %v6016_v20 }
0x214b   : > { %v7894_v55 = vpop.eup %7893 }
0x214c   : > { %v6020_v10 = vmul.f32 %v7894_v55, %v7882_v50 }
0x214e   : > { %v6021_v3 = vpack.c.bf16 %v6020_v10, %v6019_v54 }
0x2150   : > { %7102 = vmatmul.msk.bf16.vlgmr.msrb.gmra.mxu1 %vm2909_vm10, %v6021_v3 }
0x2151   : > { %6265 = vmatpush.bf16.msrb.mxu1 %v6261_v47 }
0x2155   : > { %6266 = vmatpush.bf16.msrb.mxu1 %v6249_v9 }
0x2159   : > { %6267 = vmatpush.bf16.msrb.mxu1 %v6247_v14  ;;  %v7093_v14 = vld [vmem:[%s11569_s6 + $0x138] sm:$0xff] }
0x215a   : > { %v6418_v28 = vpack.c.bf16 %v7093_v14, %v7092_v56 }
0x215c   : > { %6429 = vmatpush.bf16.msra.mxu3 %v6418_v28 }
0x215d   : > { %6268 = vmatpush.bf16.msrb.mxu1 %v6245_v2  ;;  %v7090_v2 = vld [vmem:[%s11569_s6 + $0x120] sm:$0xff] }
0x215e   : > { %v6417_v55 = vpack.c.bf16 %v7091_v57, %v7090_v2 }
0x2160   : > { %6430 = vmatpush.bf16.msra.mxu3 %v6417_v55 }
0x2161   : > { %6269 = vmatpush.bf16.msrb.mxu1 %v6243_v62 }
0x2165   : > { %6270 = vmatpush.bf16.msrb.mxu1 %v6241_v40 }
0x216e   : > { %v6328_v19 = vpop.xlane.xlu1 %6327 }
0x216f   : > { %v6332_v29 = vsub.f32 %v6321_v22, %v6328_v19 }
0x2171   : > { %v6334_v60 = vmul.f32 1.442695, %v6332_v29  ;;  %v6122_v43 = vpop.xlane.xlu0 %6121 }
0x2173   : > { %7895 = vpow2.f32 %v6334_v60 }
0x2176   : > { %v6331_v42 = vpop.xlane.xlu1 %6330 }
0x2177   : > { %v6333_v5 = vsub.f32 %v6323_v16, %v6331_v42 }
0x2179   : > { %v7896_v51 = vpop.eup %7895  ;;  %v6336_v15 = vmul.f32 1.442695, %v6333_v5 }
0x217a   : > { %v6338_v33 = vsel %vm2909_vm10, %v7896_v51, 0.0 }
0x217b   : > { %7897 = vpow2.f32 %v6336_v15  ;;  %6339 = vadd.xlane.f32.xlu0 %v6338_v33  ;;  %v6231_v21 = vpop.xlane.xlu2 %6230 }
0x217c   : > { %7899 = vrcp.f32 %v6122_v43 }
0x217e   : > { %v6125_v34 = vpop.xlane.xlu1 %6124 }
0x217f   : > { %7901 = vrcp.f32 %v6125_v34  ;;  %v6419_v34 = vperm.slane %v11297_v61, 1 }
0x2181   : > { %v7898_v13 = vpop.eup %7897 }
0x2182   : > { %v6341_v23 = vsel %vm2909_vm10, %v7898_v13, 0.0  ;;  %v7900_v44 = vpop.eup %7899 }
0x2183   : > { %6342 = vadd.xlane.f32.xlu1 %v6341_v23  ;;  %v6128_v39 = vmul.f32 %v7900_v44, %v11376_v25  ;;  %v6234_v50 = vpop.xlane.xlu0 %6233  ;;  %v6352_v0 = vpop.permute.xlu2 %6351 }
0x2184   : > { %7903 = vrcp.f32 %v6234_v50 }
0x2185   : > { %v7902_v53 = vpop.eup %7901  ;;  %7905 = vrcp.f32 %v6231_v21 }
0x2186   : > { %v6129_v58 = vmul.f32 %v7902_v53, %v7888_v6 }
0x2188   : > { %v6130_v7 = vpack.c.bf16 %v6129_v58, %v6128_v39 }
0x218a   : > { %7104 = vmatmul.msk.bf16.vlgmr.msra.gmra.mxu1 %vm2909_vm10, %v6130_v7  ;;  %v7904_v52 = vpop.eup %7903 }
0x218b   : > { %6374 = vmatpush.bf16.msra.mxu1 %v6370_v32  ;;  %v7906_v26 = vpop.eup %7905  ;;  %v6238_v22 = vmul.f32 %v7904_v52, %v11386_v1  ;;  %v6350_v12 = vpop.permute.xlu2 %6349 }
0x218c   : > { %v6237_v30 = vmul.f32 %v7906_v26, %v11381_v48 }
0x218e   : > { %v6239_v46 = vpack.c.bf16 %v6238_v22, %v6237_v30 }
0x218f   : > { %6375 = vmatpush.bf16.msra.mxu1 %v6358_v18  ;;  %6353 = vrot.lane.b32.xlu0 %v11251_v35, %s11640_s29 }
0x2196   : > { %v6356_v17 = vpop.permute.xlu1 %6355 }
0x2197   : > { %6376 = vmatpush.bf16.msra.mxu1 %v6356_v17 }
0x219a   : > { %7106 = vmatmul.msk.bf16.vlgmr.msrb.gmra.mxu1 %vm2909_vm10, %v6239_v46 }
0x21cd   : > { %v6054_v8 = vpop.f32.mrf.mxu1 }
0x21d5   : > { %v6056_v4 = vpop.f32.mrf.mxu1 }
0x21ee   : > { %v6340_v25 = vpop.xlane.xlu0 %6339 }
0x21f6   : > { %v6343_v11 = vpop.xlane.xlu1 %6342 }
0x21f7   : > { %7907 = vrcp.f32 %v6343_v11 }
0x21f8   : > { %7909 = vrcp.f32 %v6340_v25  ;;  %v7113_v25 = vld [vmem:[%s11568_s5 + $0xb8] sm:$0xff] }
0x21fd   : > { %v7908_v35 = vpop.eup %7907 }
0x21fe   : > { %v7910_v16 = vpop.eup %7909  ;;  %v6347_v36 = vmul.f32 %v7908_v35, %v7898_v13  ;;  %v7111_v35 = vld [vmem:[%s11568_s5 + $0xa8] sm:$0xff] }
0x21ff   : > { %v6346_v48 = vmul.f32 %v7910_v16, %v7896_v51 }
0x2201   : > { %v6354_v27 = vpop.permute.xlu0 %6353  ;;  %v6348_v49 = vpack.c.bf16 %v6347_v36, %v6346_v48 }
0x2202   : > { %6377 = vmatpush.bf16.msra.mxu1 %v6354_v27  ;;  %v7110_v27 = vld [vmem:[%s11568_s5 + $0xa0] sm:$0xff] }
0x2203   : > { %v6504_v36 = vpack.c.bf16 %v7111_v35, %v7110_v27 }
0x2206   : > { %6378 = vmatpush.bf16.msra.mxu1 %v6352_v0 }
0x2207   : > { %v6163_v24 = vpop.f32.mrf.mxu1 }
0x220a   : > { %6379 = vmatpush.bf16.msra.mxu1 %v6350_v12 }
0x220d   : > { %7108 = vmatmul.msk.bf16.vlgmr.msra.gmra.mxu1 %vm2909_vm10, %v6348_v49 }
0x220f   : > { %v6165_v6 = vpop.f32.mrf.mxu1 }
0x2210   : > { %v7352_v63 = vpack.i.bf16 %v6165_v6, %v6163_v24 }
0x2212   : > { %7353 = vrot.lane.b32.xlu0 %v7352_v63, %s11641_s30 }
0x2217   : > { %v6272_v31 = vpop.f32.mrf.mxu1 }
0x221f   : > { %v6274_v38 = vpop.f32.mrf.mxu1 }
0x2220   : > { %v7357_v1 = vpack.i.bf16 %v6274_v38, %v6272_v31 }
0x2222   : > { %7358 = vrot.lane.b32.xlu2 %v7357_v1, %s11642_s24 }
0x227c   : > { %v7359_v47 = vpop.permute.xlu2 %7358 }
0x227d   : > { %v7361_v40 = vunpack.i.h.bf16 %v7359_v47  ;;  %v7360_v19 = vunpack.i.l.bf16 %v7359_v47 }
0x2284   : > { %v7354_v54 = vpop.permute.xlu0 %7353 }
0x2285   : > { %v7356_v10 = vunpack.i.h.bf16 %v7354_v54  ;;  %v7355_v3 = vunpack.i.l.bf16 %v7354_v54 }
0x2287   : > { %v6411_v59 = vsel %vm575_vm1, %v6056_v4, %v7356_v10  ;;  %v6410_v62 = vsel %vm575_vm1, %v6054_v8, %v7355_v3 }
0x2288   : > { %v6412_v5 = vsel %vm813_vm3, %v6410_v62, %v7360_v19  ;;  %v6413_v51 = vsel %vm813_vm3, %v6411_v59, %v7361_v40 }
0x228a   : > { %v6381_v18 = vpop.f32.mrf.mxu1 }
0x2292   : > { %v6383_v9 = vpop.f32.mrf.mxu1 }
0x2293   : > { %v7362_v20 = vpack.i.bf16 %v6383_v9, %v6381_v18  ;;  %v500_v18 = vld [vmem:[%s11571_s8 + $0xe] sm:$0x3] }
0x2294   : > { %v6483_v57 = vperm.slane %v500_v18, 0  ;;  %v6486_v3 = vperm.slane %v500_v18, 1 }
0x2295   : > { %7363 = vrot.lane.b32.xlu0 %v7362_v20, %s11643_s15 }
0x2307   : > { %v7364_v29 = vpop.permute.xlu0 %7363 }
0x2308   : > { %v7366_v60 = vunpack.i.h.bf16 %v7364_v29  ;;  %v7365_v42 = vunpack.i.l.bf16 %v7364_v29 }
0x230a   : > { %v6414_v15 = vsel %vm815_vm4, %v6412_v5, %v7365_v42  ;;  %v6415_v43 = vsel %vm815_vm4, %v6413_v51, %v7366_v60  ;;  %v7120_v60 = vld [vmem:[%s11570_s7 + $0xb0] sm:$0xff]  ;;  %v7121_v42 = vld [vmem:[%s11570_s7 + $0xb8] sm:$0xff]  ;;  %v7118_v51 = vld [vmem:[%s11570_s7 + $0xa0] sm:$0xff] }
0x230b   : > { %v6416_v33 = vpack.c.bf16 %v6415_v43, %v6414_v15  ;;  %v6530_v5 = vpack.c.bf16 %v7121_v42, %v7120_v60  ;;  %v7119_v15 = vld [vmem:[%s11570_s7 + $0xa8] sm:$0xff] }
0x230c   : > { %v6529_v43 = vpack.c.bf16 %v7119_v15, %v7118_v51 }
0x230d   : > { %7109 = vmatmul.msk.bf16.vlgmr.msra.gmra.mxu3 %vm519_vm0, %v6416_v33  ;;  %6539 = vmatpush.bf16.msrb.mxu1 %v6530_v5  ;;  %v7116_v33 = vld [vmem:[%s11570_s7 + $0x90] sm:$0xff] }
0x2311   : > { %6540 = vmatpush.bf16.msrb.mxu1 %v6529_v43 }
0x2390   : > { %v6432_v13 = vpop.f32.mrf.mxu3 }
0x2391   : > { %v6433_v23 = vadd.f32 %v6432_v13, %v6419_v34 }
0x2393   : > { %v6437_v44 = vadd.f32 %v6433_v23, %v11217_v37  ;;  %v7114_v23 = vld [vmem:[%s11570_s7 + $0x80] sm:$0xff] }
0x2395   : > { %v6439_v53 = vsel %vm519_vm0, %v6437_v44, 0.0 }
0x2396   : > { %6440 = vadd.xlane.f32.xlu2 %v6439_v53 }
0x2398   : > { %v6434_v39 = vpop.f32.mrf.mxu3 }
0x2399   : > { %v6435_v58 = vadd.f32 %v6434_v39, %v6419_v34  ;;  %v7117_v34 = vld [vmem:[%s11570_s7 + $0x98] sm:$0xff] }
0x239a   : > { %v6528_v13 = vpack.c.bf16 %v7117_v34, %v7116_v33 }
0x239b   : > { %v6438_v7 = vadd.f32 %v6435_v58, %v11219_v41  ;;  %v7112_v41 = vld [vmem:[%s11568_s5 + $0xb0] sm:$0xff]  ;;  %v7947_v58 = vld [vmem:[%s11573_s10] sm:$0x3f] }
0x239c   : > { %v6505_v11 = vpack.c.bf16 %v7113_v25, %v7112_v41  ;;  %6541 = vmatpush.bf16.msrb.mxu1 %v6528_v13 }
0x239d   : > { %v6442_v50 = vsel %vm519_vm0, %v6438_v7, 0.0 }
0x239e   : > { %6443 = vadd.xlane.f32.xlu0 %v6442_v50  ;;  %6516 = vmatpush.bf16.msra.mxu0 %v6505_v11 }
0x23a2   : > { %6517 = vmatpush.bf16.msra.mxu0 %v6504_v36 }
0x2409   : > { %v6441_v32 = vpop.xlane.xlu2 %6440 }
0x240a   : > { %v6445_v21 = vmul.f32 %v6441_v32, %v11671_v45 }
0x240c   : > { %v6447_v52 = vsub.f32 %v6437_v44, %v6445_v21  ;;  %v7115_v44 = vld [vmem:[%s11570_s7 + $0x88] sm:$0xff] }
0x240d   : > { %v6527_v53 = vpack.c.bf16 %v7115_v44, %v7114_v23 }
0x240e   : > { %v6449_v26 = vmul.f32 %v6447_v52, %v6447_v52 }
0x240f   : > { %6542 = vmatpush.bf16.msrb.mxu1 %v6527_v53 }
0x2410   : > { %v6451_v22 = vsel %vm519_vm0, %v6449_v26, 0.0 }
0x2411   : > { %v6444_v30 = vpop.xlane.xlu0 %6443  ;;  %6452 = vadd.xlane.f32.xlu1 %v6451_v22 }
0x2412   : > { %v6446_v37 = vmul.f32 %v6444_v30, %v11671_v45  ;;  %v6531_v30 = vperm.slane %v11297_v61, 4 }
0x2414   : > { %v6448_v17 = vsub.f32 %v6438_v7, %v6446_v37  ;;  %v6506_v7 = vperm.slane %v7947_v58, 5  ;;  %v7132_v58 = vld [vmem:[%s11569_s6 + $0x170] sm:$0xff] }
0x2416   : > { %v6450_v46 = vmul.f32 %v6448_v17, %v6448_v17 }
0x2418   : > { %v6454_v8 = vsel %vm519_vm0, %v6450_v46, 0.0 }
0x2419   : > { %6455 = vadd.xlane.f32.xlu1 %v6454_v8 }
0x2484   : > { %v6453_v0 = vpop.xlane.xlu1 %6452 }
0x2485   : > { %v6457_v4 = vmul.f32 %v6453_v0, %v11671_v45 }
0x2487   : > { %v6459_v16 = vadd.f32 1e-05, %v6457_v4 }
0x2489   : > { %7911 = vrsqrt.f32 %v6459_v16  ;;  %vm6467_vm3 = vweird.f32 %v6459_v16 }
0x248c   : > { %v6456_v24 = vpop.xlane.xlu1 %6455 }
0x248d   : > { %v6458_v12 = vmul.f32 %v6456_v24, %v11671_v45 }
0x248f   : > { %v7912_v48 = vpop.eup %7911  ;;  %v6460_v49 = vadd.f32 1e-05, %v6458_v12 }
0x2490   : > { %v6462_v6 = vmul.f32 %v7912_v48, %v6459_v16  ;;  %vm6468_vm2 = vweird.f32 %v7912_v48 }
0x2491   : > { %7913 = vrsqrt.f32 %v6460_v49  ;;  %vm6469_vm4 = vmor %vm6467_vm3, %vm6468_vm2  ;;  %vm6477_vm7 = vweird.f32 %v6460_v49 }
0x2492   : > { %v6463_v63 = vmul.f32 %v7912_v48, %v6462_v6 }
0x2494   : > { %v6464_v31 = vmul.f32 0.5, %v6463_v63  ;;  %v7127_v63 = vld [vmem:[%s11569_s6 + $0x150] sm:$0xff] }
0x2496   : > { %v6465_v38 = vsub.f32 1.5, %v6464_v31  ;;  %v7128_v31 = vld [vmem:[%s11569_s6 + $0x158] sm:$0xff] }
0x2497   : > { %v7914_v1 = vpop.eup %7913 }
0x2498   : > { %v6466_v56 = vmul.f32 %v7912_v48, %v6465_v38  ;;  %v6472_v14 = vmul.f32 %v7914_v1, %v6460_v49  ;;  %vm6478_vm10 = vweird.f32 %v7914_v1  ;;  %v6630_v38 = vpack.c.bf16 %v7128_v31, %v7127_v63 }
0x2499   : > { %vm6479_vm8 = vmor %vm6477_vm7, %vm6478_vm10  ;;  %v6684_v31 = vperm.slane %v11297_v61, 7 }
0x249a   : > { %v6473_v28 = vmul.f32 %v7914_v1, %v6472_v14  ;;  %v6470_v9 = vsel %vm6469_vm4, %v7912_v48, %v6466_v56  ;;  %6638 = vmatpush.bf16.msrb.mxu3 %v6630_v38  ;;  %v7125_v14 = vld [vmem:[%s11569_s6 + $0x140] sm:$0xff] }
0x249b   : > { %v6481_v55 = vmul.f32 %v6470_v9, %v6447_v52 }
0x249c   : > { %v6474_v20 = vmul.f32 0.5, %v6473_v28  ;;  %v7126_v28 = vld [vmem:[%s11569_s6 + $0x148] sm:$0xff] }
0x249d   : > { %v6484_v47 = vmul.f32 %v6483_v57, %v6481_v55  ;;  %v6629_v9 = vpack.c.bf16 %v7126_v28, %v7125_v14 }
0x249e   : > { %v6475_v2 = vsub.f32 1.5, %v6474_v20 }
0x249f   : > { %v6487_v40 = vadd.f32 %v6486_v3, %v6484_v47  ;;  %6639 = vmatpush.bf16.msrb.mxu3 %v6629_v9 }
0x24a0   : > { %v6476_v54 = vmul.f32 %v7914_v1, %v6475_v2 }
0x24a2   : > { %v6480_v10 = vsel %vm6479_vm8, %v7914_v1, %v6476_v54 }
0x24a3   : > { %v6482_v59 = vmul.f32 %v6480_v10, %v6448_v17 }
0x24a5   : > { %v6485_v62 = vmul.f32 %v6483_v57, %v6482_v59 }
0x24a7   : > { %v6488_v19 = vadd.f32 %v6486_v3, %v6485_v62 }
0x24a9   : > { %v6503_v29 = vpack.c.bf16 %v6488_v19, %v6487_v40 }
0x24ab   : > { %7122 = vmatmul.msk.bf16.vlgmr.msra.gmra.mxu0 %vm519_vm0, %v6503_v29  ;;  %v501_v29 = vld [vmem:[%s11571_s8 + $0x10] sm:$0x3] }
0x24ac   : > { %v6595_v5 = vperm.slane %v501_v29, 0  ;;  %v6598_v33 = vperm.slane %v501_v29, 1 }
0x2528   : > { %v6519_v39 = vpop.f32.mrf.mxu0 }
0x2529   : > { %v6520_v50 = vadd.f32 %v6519_v39, %v6506_v7 }
0x252b   : > { %v6524_v52 = vmax.f32 %v6520_v50, 0.0 }
0x2530   : > { %v6521_v32 = vpop.f32.mrf.mxu0 }
0x2531   : > { %v6522_v21 = vadd.f32 %v6521_v32, %v6506_v7  ;;  %v7133_v7 = vld [vmem:[%s11569_s6 + $0x178] sm:$0xff]  ;;  %v7130_v32 = vld [vmem:[%s11569_s6 + $0x160] sm:$0xff] }
0x2532   : > { %v6655_v50 = vpack.c.bf16 %v7133_v7, %v7132_v58  ;;  %v7972_v7 = vmov 0  }
0x2533   : > { %v6525_v26 = vmax.f32 %v6522_v21, 0.0  ;;  %v7131_v21 = vld [vmem:[%s11569_s6 + $0x168] sm:$0xff] }
0x2534   : > { %6666 = vmatpush.bf16.msrb.mxu0 %v6655_v50 }
0x2535   : > { %v6526_v22 = vpack.c.bf16 %v6525_v26, %v6524_v52  ;;  %v6654_v52 = vpack.c.bf16 %v7131_v21, %v7130_v32  ;;  %v6619_v32 = vsel %vm507_vm13, 1, %v7972_v7 }
0x2536   : > { %v6620_v21 = vperm.slane %v6619_v32, 0 }
0x2537   : > { %7123 = vmatmul.msk.bf16.vlgmr.msrb.gmra.mxu1 %vm911_vm9, %v6526_v22  ;;  %v6631_v22 = vperm.slane %v11297_v61, 5 }
0x2538   : > { %6667 = vmatpush.bf16.msrb.mxu0 %v6654_v52 }
0x25b4   : > { %v6544_v37 = vpop.f32.mrf.mxu1 }
0x25b5   : > { %v6545_v17 = vadd.f32 %v6544_v37, %v6531_v30 }
0x25b7   : > { %v6549_v46 = vadd.f32 %v6545_v17, %v6487_v40 }
0x25b9   : > { %v6551_v8 = vsel %vm519_vm0, %v6549_v46, 0.0 }
0x25ba   : > { %6552 = vadd.xlane.f32.xlu1 %v6551_v8 }
0x25bc   : > { %v6546_v41 = vpop.f32.mrf.mxu1 }
0x25bd   : > { %v6547_v25 = vadd.f32 %v6546_v41, %v6531_v30 }
0x25bf   : > { %v6550_v11 = vadd.f32 %v6547_v25, %v6488_v19  ;;  %v7137_v25 = vld [vmem:[%s11569_s6 + $0x190] sm:$0xff] }
0x25c1   : > { %v6554_v0 = vsel %vm519_vm0, %v6550_v11, 0.0 }
0x25c2   : > { %6555 = vadd.xlane.f32.xlu1 %v6554_v0 }
0x262d   : > { %v6553_v4 = vpop.xlane.xlu1 %6552 }
0x262e   : > { %v6557_v27 = vmul.f32 %v6553_v4, %v11671_v45  ;;  %v7135_v4 = vld [vmem:[%s11569_s6 + $0x180] sm:$0xff] }
0x2630   : > { %v6559_v35 = vsub.f32 %v6549_v46, %v6557_v27  ;;  %v7136_v27 = vld [vmem:[%s11569_s6 + $0x188] sm:$0xff] }
0x2632   : > { %v6561_v16 = vmul.f32 %v6559_v35, %v6559_v35 }
0x2634   : > { %v6563_v36 = vsel %vm519_vm0, %v6561_v16, 0.0 }
0x2635   : > { %6564 = vadd.xlane.f32.xlu1 %v6563_v36  ;;  %v6556_v24 = vpop.xlane.xlu1 %6555  ;;  %v6656_v36 = vperm.slane %v11297_v61, 6 }
0x2636   : > { %v6558_v12 = vmul.f32 %v6556_v24, %v11671_v45 }
0x2638   : > { %v6560_v48 = vsub.f32 %v6550_v11, %v6558_v12  ;;  %v7138_v11 = vld [vmem:[%s11569_s6 + $0x198] sm:$0xff] }
0x2639   : > { %v6683_v0 = vpack.c.bf16 %v7138_v11, %v7137_v25 }
0x263a   : > { %v6562_v49 = vmul.f32 %v6560_v48, %v6560_v48 }
0x263b   : > { %6694 = vmatpush.bf16.msra.mxu1 %v6683_v0 }
0x263c   : > { %v6566_v6 = vsel %vm519_vm0, %v6562_v49, 0.0 }
0x263d   : > { %6567 = vadd.xlane.f32.xlu2 %v6566_v6 }
0x26a8   : > { %v6565_v1 = vpop.xlane.xlu1 %6564 }
0x26a9   : > { %v6569_v56 = vmul.f32 %v6565_v1, %v11671_v45  ;;  %v7140_v1 = vld [vmem:[%s11575_s12 + $0x10] sm:$0xff] }
0x26ab   : > { %v6571_v18 = vadd.f32 1e-05, %v6569_v56 }
0x26ad   : > { %7915 = vrsqrt.f32 %v6571_v18  ;;  %vm6579_vm11 = vweird.f32 %v6571_v18 }
0x26b0   : > { %v6568_v20 = vpop.xlane.xlu2 %6567 }
0x26b1   : > { %v6570_v2 = vmul.f32 %v6568_v20, %v11671_v45  ;;  %v7141_v20 = vld [vmem:[%s11575_s12 + $0x18] sm:$0xff] }
0x26b3   : > { %v7916_v57 = vpop.eup %7915  ;;  %v6572_v55 = vadd.f32 1e-05, %v6570_v2 }
0x26b4   : > { %v6574_v54 = vmul.f32 %v7916_v57, %v6571_v18  ;;  %vm6580_vm9 = vweird.f32 %v7916_v57 }
0x26b5   : > { %7917 = vrsqrt.f32 %v6572_v55  ;;  %vm6581_vm12 = vmor %vm6579_vm11, %vm6580_vm9  ;;  %vm6589_vm15 = vweird.f32 %v6572_v55  ;;  %vm6621_vm9 = vcmp.eq.s32.totalorder %v6620_v21, 1  ;;  %vm6755_vm11 = vcmask 97280  }
0x26b6   : > { %v6575_v10 = vmul.f32 %v7916_v57, %v6574_v54 }
0x26b8   : > { %v6576_v3 = vmul.f32 0.5, %v6575_v10 }
0x26ba   : > { %v6577_v47 = vsub.f32 1.5, %v6576_v3 }
0x26bb   : > { %v7918_v59 = vpop.eup %7917 }
0x26bc   : > { %v6578_v62 = vmul.f32 %v7916_v57, %v6577_v47  ;;  %v6584_v40 = vmul.f32 %v7918_v59, %v6572_v55  ;;  %vm6590_vm14 = vweird.f32 %v7918_v59 }
0x26bd   : > { %vm6591_vm5 = vmor %vm6589_vm15, %vm6590_vm14 }
0x26be   : > { %v6585_v19 = vmul.f32 %v7918_v59, %v6584_v40  ;;  %v6582_v60 = vsel %vm6581_vm12, %v7916_v57, %v6578_v62 }
0x26bf   : > { %v6593_v51 = vmul.f32 %v6582_v60, %v6559_v35  ;;  %v6682_v35 = vpack.c.bf16 %v7136_v27, %v7135_v4 }
0x26c0   : > { %v6586_v45 = vmul.f32 0.5, %v6585_v19 }
0x26c1   : > { %v6596_v34 = vmul.f32 %v6595_v5, %v6593_v51  ;;  %6695 = vmatpush.bf16.msra.mxu1 %v6682_v35 }
0x26c2   : > { %v6587_v42 = vsub.f32 1.5, %v6586_v45 }
0x26c3   : > { %v6599_v44 = vadd.f32 %v6598_v33, %v6596_v34 }
0x26c4   : > { %v6588_v15 = vmul.f32 %v7918_v59, %v6587_v42 }
0x26c6   : > { %v6592_v43 = vsel %vm6591_vm5, %v7918_v59, %v6588_v15 }
0x26c7   : > { %v6594_v13 = vmul.f32 %v6592_v43, %v6560_v48 }
0x26c9   : > { %v6597_v23 = vmul.f32 %v6595_v5, %v6594_v13 }
0x26cb   : > { %v6600_v53 = vadd.f32 %v6598_v33, %v6597_v23 }
0x26cd   : > { %v6601_v39 = vpack.c.bf16 %v6600_v53, %v6599_v44 }
0x26cf   : > { %7124 = vmatmul.msk.bf16.vlgmr.msra.gmra.mxu2 %vm519_vm0, %v6601_v39  ;;  %7129 = vmatmul.msk.bf16.vlgmr.msrb.gmra.mxu3 %vm519_vm0, %v6601_v39 }
0x2752   : > { %v6641_v26 = vpop.f32.mrf.mxu3  ;;  %v6614_v52 = vpop.f32.mrf.mxu2 }
0x2753   : > { %v6642_v30 = vadd.f32 %v6641_v26, %v6631_v22  ;;  %v6622_v26 = vsel %vm6621_vm9, %v6614_v52, -inf }
0x2755   : > { %v6646_v46 = vmax.f32 %v6642_v30, 0.0 }
0x275a   : > { %v6643_v37 = vpop.f32.mrf.mxu3 }
0x275b   : > { %v6644_v17 = vadd.f32 %v6643_v37, %v6631_v22 }
0x275d   : > { %v6647_v8 = vmax.f32 %v6644_v17, 0.0  ;;  %v6616_v17 = vpop.f32.mrf.mxu2 }
0x275f   : > { %v6653_v41 = vpack.c.bf16 %v6647_v8, %v6646_v46  ;;  %v6623_v46 = vsel %vm6621_vm9, %v6616_v17, -inf }
0x2761   : > { %7134 = vmatmul.msk.bf16.vlgmr.msrb.gmra.mxu0 %vm519_vm0, %v6653_v41 }
0x27de   : > { %v6669_v16 = vpop.f32.mrf.mxu0 }
0x27df   : > { %v6670_v24 = vadd.f32 %v6669_v16, %v6656_v36 }
0x27e1   : > { %v6674_v49 = vmax.f32 %v6670_v24, 0.0 }
0x27e6   : > { %v6671_v12 = vpop.f32.mrf.mxu0 }
0x27e7   : > { %v6672_v48 = vadd.f32 %v6671_v12, %v6656_v36 }
0x27e9   : > { %v6675_v6 = vmax.f32 %v6672_v48, 0.0 }
0x27eb   : > { %v6681_v63 = vpack.c.bf16 %v6675_v6, %v6674_v49 }
0x27ed   : > { %7139 = vmatmul.msk.bf16.vlgmr.msra.gmra.mxu1 %vm519_vm0, %v6681_v63 }
0x286a   : > { %v6697_v38 = vpop.f32.mrf.mxu1 }
0x286b   : > { %v6698_v56 = vadd.f32 %v6697_v38, %v6684_v31 }
0x286d   : > { %v6705_v14 = vadd.f32 %v7140_v1, %v6698_v56 }
0x286f   : > { %v6707_v28 = vsub.f32 0.0, %v6705_v14 }
0x2871   : > { %v6709_v18 = vmul.f32 1.442695, %v6707_v28 }
0x2872   : > { %v6699_v9 = vpop.f32.mrf.mxu1 }
0x2873   : > { %7919 = vpow2.f32 %v6709_v18  ;;  %v6700_v2 = vadd.f32 %v6699_v9, %v6684_v31 }
0x2875   : > { %v6706_v57 = vadd.f32 %v7141_v20, %v6700_v2 }
0x2877   : > { %v6708_v55 = vsub.f32 0.0, %v6706_v57 }
0x2879   : > { %v7920_v54 = vpop.eup %7919  ;;  %v6711_v61 = vmul.f32 1.442695, %v6708_v55 }
0x287a   : > { %v6713_v10 = vadd.f32 1.0, %v7920_v54 }
0x287b   : > { %7921 = vpow2.f32 %v6711_v61 }
0x287c   : > { %7923 = vrcp.f32 %v6713_v10  ;;  %v6726_v19 = vand.u32 2147483648, %v6713_v10  ;;  %v6724_v60 = vand.u32 2147483647, %v6713_v10  ;;  %vm6720_vm6 = vweird.f32 %v6713_v10 }
0x287e   : > { %v6727_v5 = vor.u32 1.1754944e-38, %v6726_v19  ;;  %vm6725_vm3 = vcmp.eq.f32.partialorder %v6724_v60, 8.507059e+37 }
0x2881   : > { %v7922_v3 = vpop.eup %7921 }
0x2882   : > { %v7924_v47 = vpop.eup %7923  ;;  %v6714_v59 = vadd.f32 1.0, %v7922_v3 }
0x2883   : > { %v6716_v62 = vmul.f32 %v7924_v47, %v6713_v10  ;;  %vm6721_vm0 = vweird.f32 %v7924_v47 }
0x2884   : > { %7925 = vrcp.f32 %v6714_v59  ;;  %vm6722_vm2 = vmor %vm6720_vm6, %vm6721_vm0  ;;  %v6741_v34 = vand.u32 2147483648, %v6714_v59  ;;  %v6739_v23 = vand.u32 2147483647, %v6714_v59  ;;  %vm6735_vm10 = vweird.f32 %v6714_v59 }
0x2885   : > { %v6717_v40 = vsub.f32 1.0, %v6716_v62 }
0x2886   : > { %v6742_v53 = vor.u32 1.1754944e-38, %v6741_v34  ;;  %vm6740_vm8 = vcmp.eq.f32.partialorder %v6739_v23, 8.507059e+37 }
0x2887   : > { %v6718_v29 = vmul.f32 %v7924_v47, %v6717_v40 }
0x2889   : > { %v6719_v45 = vadd.f32 %v7924_v47, %v6718_v29 }
0x288a   : > { %v7926_v42 = vpop.eup %7925 }
0x288b   : > { %v6723_v51 = vsel %vm6722_vm2, %v7924_v47, %v6719_v45  ;;  %v6731_v15 = vmul.f32 %v7926_v42, %v6714_v59  ;;  %vm6736_vm4 = vweird.f32 %v7926_v42 }
0x288c   : > { %v6728_v43 = vsel %vm6725_vm3, %v6727_v5, %v6723_v51  ;;  %vm6737_vm7 = vmor %vm6735_vm10, %vm6736_vm4 }
0x288d   : > { %6747 = vrot.lane.b32.xlu0 %v6728_v43, %s11641_s30  ;;  %v6732_v33 = vsub.f32 1.0, %v6731_v15 }
0x288f   : > { %v6733_v13 = vmul.f32 %v7926_v42, %v6732_v33 }
0x2891   : > { %v6734_v44 = vadd.f32 %v7926_v42, %v6733_v13 }
0x2893   : > { %v6738_v39 = vsel %vm6737_vm7, %v7926_v42, %v6734_v44 }
0x2894   : > { %v6743_v58 = vsel %vm6740_vm8, %v6742_v53, %v6738_v39 }
0x2895   : > { %6749 = vrot.lane.b32.xlu1 %v6743_v58, %s11641_s30 }
0x28ff   : > { %v6748_v22 = vpop.permute.xlu0 %6747 }
0x2900   : > { %v6753_v30 = vsel %vm575_vm1, %v6622_v26, %v6748_v22 }
0x2901   : > { %v6756_v37 = vsel %vm6755_vm11, %v6753_v30, 0.0 }
0x2902   : > { %6758 = vst [vmem:[%s491_s20] sm:$0xff] %v6756_v37 }
0x2907   : > { %v6750_v8 = vpop.permute.xlu1 %6749 }
0x2908   : > { %v6754_v41 = vsel %vm575_vm1, %v6623_v46, %v6750_v8 }
0x2909   : > { %v6757_v25 = vsel %vm6755_vm11, %v6754_v41, 0.0 }
0x290a   : > { %6759 = vst [vmem:[%s491_s20 + $0x8] sm:$0xff] %v6757_v25 }
0x290b PF: > { %s11682_s30 = sld [smem:[#allocation2_spill]] }
0x2911   : > { %s23_s25 = sadd.s32 1, %s11682_s30  }
0x2912   : > { %p20_p4 = scmp.ge.s32.totalorder %s23_s25, 4  }
0x2914   :  { %22 = sbr.rel (!%p20_p4) target bundleno = 5 (0x5), region = 133 }

</bundles_post_ra>
